<compile_context>
chip_gen: v7x
topology: tpu7x:2x2x1
jax: 0.10.0
libtpu: 0.0.40
codegen_flags: <defaults>
</compile_context>

<pallas_src>
import functools

import jax
import jax.numpy as jnp
from jax.experimental import pallas as pl
from jax.experimental.pallas import tpu as pltpu

VMEM = pltpu.MemorySpace.VMEM
SMEM = pltpu.MemorySpace.SMEM

TA_K = 7     # triplet attention kernel size
TA_P = 3     # its padding


# ----------------------------------------------------------------------------- fused kernel

def _fused_kernel(x_ref, w_exp_ref, b_exp_ref, w_dw_ref, b_dw_ref,
                  w_proj_ref, b_proj_ref, sn_ref, att_ref,
                  o_ref, dwpad_ref, *, H, W, Cin, Chid, Cout):
    f32 = jnp.float32
    HW = H * W

    x2 = x_ref[0].reshape(HW, Cin)                                  # (H*W, Cin)

    # ---- 1x1 expand conv + folded BN + ReLU6 (MXU) --------------------------------------
    h = jnp.dot(x2, w_exp_ref[...], preferred_element_type=f32) + b_exp_ref[...]
    h = jnp.clip(h, 0.0, 6.0).reshape(H, W, Chid)

    # ---- 3x3 depthwise conv + folded BN + ReLU6 (halo built in VMEM scratch) ------------
    dwpad_ref[...] = jnp.zeros_like(dwpad_ref)
    dwpad_ref[1:H + 1, 1:W + 1, :] = h
    hp = dwpad_ref[...]                                             # (H+2, W+2, Chid)
    acc = jnp.zeros((H, W, Chid), f32)
    for ky in range(3):
        for kx in range(3):
            acc = acc + hp[ky:ky + H, kx:kx + W, :] * w_dw_ref[ky * 3 + kx, :]
    h = jnp.clip(acc + b_dw_ref[...], 0.0, 6.0)

    # ---- 1x1 project conv + folded BN (linear) -------------------------------------------
    out2 = jnp.dot(h.reshape(HW, Chid), w_proj_ref[...],
                   preferred_element_type=f32) + b_proj_ref[...]
    out = out2.reshape(H, W, Cout)

    # ---- TripletAttention: all three ZPools in ONE pass over `out` -----------------------
    mx_c = jnp.max(out, axis=2); mn_c = jnp.mean(out, axis=2)       # (H, W)  pool over C
    mx_h = jnp.max(out, axis=0); mn_h = jnp.mean(out, axis=0)       # (W, C)  pool over H
    mx_w = jnp.max(out, axis=1); mn_w = jnp.mean(out, axis=1)       # (H, C)  pool over W

    def emb_rows(n):   # (n+6, n): ones where i == a + 3   -> left-multiply pads rows by 3/3
        i = jax.lax.broadcasted_iota(jnp.int32, (n + 2 * TA_P, n), 0)
        a = jax.lax.broadcasted_iota(jnp.int32, (n + 2 * TA_P, n), 1)
        return jnp.where(i == a + TA_P, 1.0, 0.0).astype(f32)

    def emb_cols(n):   # (n, n+6): ones where j == b + 3   -> right-multiply pads cols by 3/3
        b = jax.lax.broadcasted_iota(jnp.int32, (n, n + 2 * TA_P), 0)
        j = jax.lax.broadcasted_iota(jnp.int32, (n, n + 2 * TA_P), 1)
        return jnp.where(j == b + TA_P, 1.0, 0.0).astype(f32)

    def gate(gidx, pmax, pmean, A, B):
        # 7x7 conv (2ch -> 1, pad=3) + folded BN + sigmoid on an (A, B) pooled map.
        Pm, Em = emb_rows(A), emb_cols(B)
        pad = lambda p: jnp.dot(Pm, jnp.dot(p, Em, preferred_element_type=f32),
                                preferred_element_type=f32)          # (A+6, B+6), zero halo
        pm, pe = pad(pmax), pad(pmean)
        acc = jnp.zeros((A, B), f32)
        for ka in range(TA_K):
            pm_r = pm[ka:ka + A, :]                                  # hoist row slice
            pe_r = pe[ka:ka + A, :]
            for kb in range(TA_K):
                base = (ka * TA_K + kb) * 2
                acc = acc + att_ref[gidx, base] * pm_r[:, kb:kb + B]
                acc = acc + att_ref[gidx, base + 1] * pe_r[:, kb:kb + B]
        return jax.nn.sigmoid(acc + att_ref[gidx, 2 * TA_K * TA_K])

    s_hw = gate(0, mx_c, mn_c, H, W)        # conv over (H, W)
    s_cw = gate(1, mx_h, mn_h, W, Cout)     # conv over (C, W), taps pre-transposed -> (W, C) layout
    s_hc = gate(2, mx_w, mn_w, H, Cout)     # conv over (H, C)

    scale = (s_hw[:, :, None] + s_cw[None, :, :] + s_hc[:, None, :]) * (1.0 / 3.0)
    y = (out * scale).reshape(HW, Cout)

    # ---- CNSN -----------------------------------------------------------------------------
    # CrossNorm is a stochastic train-time statistic exchange -> identity at inference.
    # TODO(synk): CrossNorm '2-instance' train-mode behaviour is not emulated.
    # SelfNorm (BN1d folded into the channel-wise FCs) + residual add, single-axis reductions.
    mean = jnp.mean(y, axis=0, keepdims=True)                            # (1, C)
    var = jnp.sum((y - mean) ** 2, axis=0, keepdims=True) / (HW - 1)     # unbiased, as torch.std
    std = jnp.sqrt(var)
    g = jax.nn.sigmoid(mean * sn_ref[0, :] + std * sn_ref[1, :] + sn_ref[2, :])
    f = jax.nn.sigmoid(mean * sn_ref[3, :] + std * sn_ref[4, :] + sn_ref[5, :])
    res = x2 + y * g + mean * (f - g)

    o_ref[...] = res.reshape(1, H, W, Cout)


# ----------------------------------------------------------------------------- forward wrapper

def forward(x_nchw, params):
    x = jnp.transpose(x_nchw, (0, 2, 3, 1)).astype(jnp.float32)          # NCHW -> NHWC
    N, H, W, Cin = x.shape
    Chid = params['w_exp'].shape[1]
    Cout = params['w_proj'].shape[1]

    kernel = functools.partial(_fused_kernel, H=H, W=W, Cin=Cin, Chid=Chid, Cout=Cout)
    full = lambda shape: pl.BlockSpec(shape, lambda n, _s=shape: (0,) * len(_s))

    out = pl.pallas_call(
        kernel,
        out_shape=jax.ShapeDtypeStruct((N, H, W, Cout), jnp.float32),
        grid_spec=pltpu.PrefetchScalarGridSpec(
            num_scalar_prefetch=0,
            grid=(N,),
            in_specs=[
                pl.BlockSpec((1, H, W, Cin), lambda n: (n, 0, 0, 0)),     # x: one image / step
                full((Cin, Chid)),                                        # expand weight
                full((1, Chid)),                                          # expand bias (BN folded)
                full((9, Chid)),                                          # depthwise weight (taps, C)
                full((1, Chid)),                                          # depthwise bias
                full((Chid, Cout)),                                       # project weight
                full((1, Cout)),                                          # project bias
                full((6, Cout)),                                          # selfnorm params
                pl.BlockSpec(memory_space=SMEM),                          # attention taps (scalars)
            ],
            out_specs=pl.BlockSpec((1, H, W, Cout), lambda n: (n, 0, 0, 0)),
            scratch_shapes=[pltpu.VMEM((H + 2, W + 2, Chid), jnp.float32)],
        ),
        compiler_params=pltpu.CompilerParams(
            dimension_semantics=("parallel",)),
    )(x, params['w_exp'], params['b_exp'], params['w_dw'], params['b_dw'],
      params['w_proj'], params['b_proj'], params['sn'], params['att'])

    return jnp.transpose(out, (0, 3, 1, 2))                               # NHWC -> NCHW


# ----------------------------------------------------------------------------- parameters (synthetic)

def params_init(key, cin, cout, chid):
    keys = iter(jax.random.split(key, 48))

    def nrm(shape, scale=0.1):
        return scale * jax.random.normal(next(keys), shape, jnp.float32)

    def bn_fold(c, eps=1e-5):
        gamma = 1.0 + 0.1 * jax.random.normal(next(keys), (c,), jnp.float32)
        beta = 0.1 * jax.random.normal(next(keys), (c,), jnp.float32)
        rmean = 0.1 * jax.random.normal(next(keys), (c,), jnp.float32)
        rvar = 0.5 + jax.random.uniform(next(keys), (c,), jnp.float32)
        s = gamma * jax.lax.rsqrt(rvar + eps)
        return s, beta - rmean * s

    p = {}
    # expand 1x1 conv + BN
    w = nrm((cin, chid)); s, o = bn_fold(chid)
    p['w_exp'] = w * s[None, :]; p['b_exp'] = o[None, :]
    # depthwise 3x3 conv + BN (taps flattened to the sublane axis)
    w = nrm((3, 3, chid)); s, o = bn_fold(chid)
    p['w_dw'] = (w * s).reshape(9, chid); p['b_dw'] = o[None, :]
    # project 1x1 conv + BN (linear)
    w = nrm((chid, cout)); s, o = bn_fold(cout)
    p['w_proj'] = w * s[None, :]; p['b_proj'] = o[None, :]

    # triplet attention gates: Conv2d(2,1,7,pad=3,bias=False) + BN(1), folded, flattened (+ bias)
    def att_gate(transpose):
        w = nrm((TA_K, TA_K, 2))              # [kh, kw, (max, mean)]
        s, o = bn_fold(1)
        w = w * s[0]
        if transpose:                          # cw gate is evaluated in (W, C) layout
            w = jnp.transpose(w, (1, 0, 2))
        return jnp.concatenate([w.reshape(-1), o.reshape(1)]).astype(jnp.float32)

    p['att'] = jnp.stack([att_gate(False), att_gate(True), att_gate(False)], axis=0)   # (3, 99)

    # SelfNorm: channel-wise FC (Conv1d groups=C, kernel=2) + BN1d for g and f, folded
    def cfc():
        w = nrm((cout, 2)); s, o = bn_fold(cout)
        return w[:, 0] * s, w[:, 1] * s, o

    ag, bg, cg = cfc()
    af, bf, cf = cfc()
    p['sn'] = jnp.stack([ag, bg, cg, af, bf, cf], axis=0)                 # (6, C)
    return p


# ----------------------------------------------------------------------------- main

if __name__ == "__main__":
    key = jax.random.PRNGKey(0)
    kx, kp = jax.random.split(key)

    N, C, H, W = 2, 16, 8, 8            # stride=1, inp==oup -> use_res_connect=True
    expand_ratio = 2
    x = jax.random.normal(kx, (N, C, H, W), jnp.float32)
    params = params_init(kp, cin=C, cout=C, chid=C * expand_ratio)

    out = jax.block_until_ready(jax.jit(forward)(x, params))

    assert out.shape == (N, C, H, W), out.shape
    assert bool(jnp.all(jnp.isfinite(out)))
    print("KERNEL_OK")
</pallas_src>

<mosaic_0001>
module attributes {stable_mosaic.version = 11 : i64} {
  func.func @_fused_kernel(%arg0: i32, %arg1: memref<1x8x8x16xf32, #tpu.memory_space<vmem>>, %arg2: memref<16x32xf32, #tpu.memory_space<vmem>>, %arg3: memref<1x32xf32, #tpu.memory_space<vmem>>, %arg4: memref<9x32xf32, #tpu.memory_space<vmem>>, %arg5: memref<1x32xf32, #tpu.memory_space<vmem>>, %arg6: memref<32x16xf32, #tpu.memory_space<vmem>>, %arg7: memref<1x16xf32, #tpu.memory_space<vmem>>, %arg8: memref<6x16xf32, #tpu.memory_space<vmem>>, %arg9: memref<3x99xf32, #tpu.memory_space<smem>>, %arg10: memref<1x8x8x16xf32, #tpu.memory_space<vmem>>, %arg11: memref<10x10x32xf32, #tpu.memory_space<vmem>>) attributes {dimension_semantics = [#tpu.dimension_semantics<parallel>], iteration_bounds = array<i64: 2>, scalar_prefetch = 0 : i64, scratch_operands = 1 : i64, tpu.core_type = #tpu.core_type<tc>, window_params = [{transform_indices = @transform_0, window_bounds = array<i64: 1, 8, 8, 16>}, {pipeline_mode = #tpu.pipeline_mode<synchronous>, transform_indices = @transform_1, window_bounds = array<i64: 16, 32>}, {pipeline_mode = #tpu.pipeline_mode<synchronous>, transform_indices = @transform_2, window_bounds = array<i64: 1, 32>}, {pipeline_mode = #tpu.pipeline_mode<synchronous>, transform_indices = @transform_3, window_bounds = array<i64: 9, 32>}, {pipeline_mode = #tpu.pipeline_mode<synchronous>, transform_indices = @transform_4, window_bounds = array<i64: 1, 32>}, {pipeline_mode = #tpu.pipeline_mode<synchronous>, transform_indices = @transform_5, window_bounds = array<i64: 32, 16>}, {pipeline_mode = #tpu.pipeline_mode<synchronous>, transform_indices = @transform_6, window_bounds = array<i64: 1, 16>}, {pipeline_mode = #tpu.pipeline_mode<synchronous>, transform_indices = @transform_7, window_bounds = array<i64: 6, 16>}, {transform_indices = @transform_8, window_bounds = array<i64: 3, 99>}, {transform_indices = @transform_9, window_bounds = array<i64: 1, 8, 8, 16>}]} {
    %c0 = arith.constant 0 : index
    %c0_0 = arith.constant 0 : index
    %c0_1 = arith.constant 0 : index
    %c0_2 = arith.constant 0 : index
    %0 = vector.load %arg1[%c0, %c0_0, %c0_1, %c0_2] : memref<1x8x8x16xf32, #tpu.memory_space<vmem>>, vector<1x8x8x16xf32>
    %1 = vector.shape_cast %0 : vector<1x8x8x16xf32> to vector<8x8x16xf32>
    %2 = vector.shape_cast %1 : vector<8x8x16xf32> to vector<64x16xf32>
    %c0_3 = arith.constant 0 : index
    %c0_4 = arith.constant 0 : index
    %3 = vector.load %arg2[%c0_3, %c0_4] : memref<16x32xf32, #tpu.memory_space<vmem>>, vector<16x32xf32>
    %cst = arith.constant dense<0.000000e+00> : vector<64x32xf32>
    %4 = tpu.matmul %2, %3, %cst {dimension_numbers = #tpu.dot_dimension_numbers<[1], [0], [0], [1], [0, 0, 1, 1], [], []>} : vector<64x16xf32>, vector<16x32xf32>, vector<64x32xf32> -> vector<64x32xf32>
    %c0_5 = arith.constant 0 : index
    %c0_6 = arith.constant 0 : index
    %5 = vector.load %arg3[%c0_5, %c0_6] : memref<1x32xf32, #tpu.memory_space<vmem>>, vector<1x32xf32>
    %6 = vector.broadcast %5 : vector<1x32xf32> to vector<64x32xf32>
    %7 = arith.addf %4, %6 : vector<64x32xf32>
    %cst_7 = arith.constant 0.000000e+00 : f32
    %cst_8 = arith.constant 6.000000e+00 : f32
    %8 = vector.broadcast %cst_7 : f32 to vector<64x32xf32>
    %9 = arith.maximumf %8, %7 : vector<64x32xf32>
    %10 = vector.broadcast %cst_8 : f32 to vector<64x32xf32>
    %11 = arith.minimumf %10, %9 : vector<64x32xf32>
    %12 = vector.shape_cast %11 : vector<64x32xf32> to vector<8x8x32xf32>
    %cst_9 = arith.constant 0.000000e+00 : f32
    %13 = vector.broadcast %cst_9 : f32 to vector<10x10x32xf32>
    %c0_10 = arith.constant 0 : index
    %c0_11 = arith.constant 0 : index
    %c0_12 = arith.constant 0 : index
    %14 = vector.load %arg11[%c0_10, %c0_11, %c0_12] : memref<10x10x32xf32, #tpu.memory_space<vmem>>, vector<10x10x32xf32>
    tpu.vector_store %arg11[%c0_10, %c0_11, %c0_12], %13 {strides = array<i32>} : memref<10x10x32xf32, #tpu.memory_space<vmem>>, vector<10x10x32xf32>,
    %c1 = arith.constant 1 : index
    %c1_13 = arith.constant 1 : index
    %c0_14 = arith.constant 0 : index
    %15 = vector.load %arg11[%c1, %c1_13, %c0_14] : memref<10x10x32xf32, #tpu.memory_space<vmem>>, vector<8x8x32xf32>
    tpu.vector_store %arg11[%c1, %c1_13, %c0_14], %12 {strides = array<i32>} : memref<10x10x32xf32, #tpu.memory_space<vmem>>, vector<8x8x32xf32>,
    %c0_15 = arith.constant 0 : index
    %c0_16 = arith.constant 0 : index
    %c0_17 = arith.constant 0 : index
    %16 = vector.load %arg11[%c0_15, %c0_16, %c0_17] : memref<10x10x32xf32, #tpu.memory_space<vmem>>, vector<10x10x32xf32>
    %cst_18 = arith.constant 0.000000e+00 : f32
    %17 = vector.broadcast %cst_18 : f32 to vector<8x8x32xf32>
    %18 = vector.extract_strided_slice %16 {offsets = [0, 0, 0], sizes = [8, 8, 32], strides = [1, 1, 1]} : vector<10x10x32xf32> to vector<8x8x32xf32>
    %c0_19 = arith.constant 0 : index
    %c0_20 = arith.constant 0 : index
    %19 = vector.load %arg4[%c0_19, %c0_20] : memref<9x32xf32, #tpu.memory_space<vmem>>, vector<1x32xf32>
    %20 = vector.shape_cast %19 : vector<1x32xf32> to vector<32xf32>
    %21 = vector.shape_cast %20 : vector<32xf32> to vector<1x1x32xf32>
    %22 = vector.broadcast %21 : vector<1x1x32xf32> to vector<8x8x32xf32>
    %23 = arith.mulf %18, %22 : vector<8x8x32xf32>
    %24 = arith.addf %17, %23 : vector<8x8x32xf32>
    %25 = vector.extract_strided_slice %16 {offsets = [0, 1, 0], sizes = [8, 8, 32], strides = [1, 1, 1]} : vector<10x10x32xf32> to vector<8x8x32xf32>
    %c1_21 = arith.constant 1 : index
    %c0_22 = arith.constant 0 : index
    %26 = vector.load %arg4[%c1_21, %c0_22] : memref<9x32xf32, #tpu.memory_space<vmem>>, vector<1x32xf32>
    %27 = vector.shape_cast %26 : vector<1x32xf32> to vector<32xf32>
    %28 = vector.shape_cast %27 : vector<32xf32> to vector<1x1x32xf32>
    %29 = vector.broadcast %28 : vector<1x1x32xf32> to vector<8x8x32xf32>
    %30 = arith.mulf %25, %29 : vector<8x8x32xf32>
    %31 = arith.addf %24, %30 : vector<8x8x32xf32>
    %32 = vector.extract_strided_slice %16 {offsets = [0, 2, 0], sizes = [8, 8, 32], strides = [1, 1, 1]} : vector<10x10x32xf32> to vector<8x8x32xf32>
    %c2 = arith.constant 2 : index
    %c0_23 = arith.constant 0 : index
    %33 = vector.load %arg4[%c2, %c0_23] : memref<9x32xf32, #tpu.memory_space<vmem>>, vector<1x32xf32>
    %34 = vector.shape_cast %33 : vector<1x32xf32> to vector<32xf32>
    %35 = vector.shape_cast %34 : vector<32xf32> to vector<1x1x32xf32>
    %36 = vector.broadcast %35 : vector<1x1x32xf32> to vector<8x8x32xf32>
    %37 = arith.mulf %32, %36 : vector<8x8x32xf32>
    %38 = arith.addf %31, %37 : vector<8x8x32xf32>
    %39 = vector.extract_strided_slice %16 {offsets = [1, 0, 0], sizes = [8, 8, 32], strides = [1, 1, 1]} : vector<10x10x32xf32> to vector<8x8x32xf32>
    %c3 = arith.constant 3 : index
    %c0_24 = arith.constant 0 : index
    %40 = vector.load %arg4[%c3, %c0_24] : memref<9x32xf32, #tpu.memory_space<vmem>>, vector<1x32xf32>
    %41 = vector.shape_cast %40 : vector<1x32xf32> to vector<32xf32>
    %42 = vector.shape_cast %41 : vector<32xf32> to vector<1x1x32xf32>
    %43 = vector.broadcast %42 : vector<1x1x32xf32> to vector<8x8x32xf32>
    %44 = arith.mulf %39, %43 : vector<8x8x32xf32>
    %45 = arith.addf %38, %44 : vector<8x8x32xf32>
    %46 = vector.extract_strided_slice %16 {offsets = [1, 1, 0], sizes = [8, 8, 32], strides = [1, 1, 1]} : vector<10x10x32xf32> to vector<8x8x32xf32>
    %c4 = arith.constant 4 : index
    %c0_25 = arith.constant 0 : index
    %47 = vector.load %arg4[%c4, %c0_25] : memref<9x32xf32, #tpu.memory_space<vmem>>, vector<1x32xf32>
    %48 = vector.shape_cast %47 : vector<1x32xf32> to vector<32xf32>
    %49 = vector.shape_cast %48 : vector<32xf32> to vector<1x1x32xf32>
    %50 = vector.broadcast %49 : vector<1x1x32xf32> to vector<8x8x32xf32>
    %51 = arith.mulf %46, %50 : vector<8x8x32xf32>
    %52 = arith.addf %45, %51 : vector<8x8x32xf32>
    %53 = vector.extract_strided_slice %16 {offsets = [1, 2, 0], sizes = [8, 8, 32], strides = [1, 1, 1]} : vector<10x10x32xf32> to vector<8x8x32xf32>
    %c5 = arith.constant 5 : index
    %c0_26 = arith.constant 0 : index
    %54 = vector.load %arg4[%c5, %c0_26] : memref<9x32xf32, #tpu.memory_space<vmem>>, vector<1x32xf32>
    %55 = vector.shape_cast %54 : vector<1x32xf32> to vector<32xf32>
    %56 = vector.shape_cast %55 : vector<32xf32> to vector<1x1x32xf32>
    %57 = vector.broadcast %56 : vector<1x1x32xf32> to vector<8x8x32xf32>
    %58 = arith.mulf %53, %57 : vector<8x8x32xf32>
    %59 = arith.addf %52, %58 : vector<8x8x32xf32>
    %60 = vector.extract_strided_slice %16 {offsets = [2, 0, 0], sizes = [8, 8, 32], strides = [1, 1, 1]} : vector<10x10x32xf32> to vector<8x8x32xf32>
    %c6 = arith.constant 6 : index
    %c0_27 = arith.constant 0 : index
    %61 = vector.load %arg4[%c6, %c0_27] : memref<9x32xf32, #tpu.memory_space<vmem>>, vector<1x32xf32>
    %62 = vector.shape_cast %61 : vector<1x32xf32> to vector<32xf32>
    %63 = vector.shape_cast %62 : vector<32xf32> to vector<1x1x32xf32>
    %64 = vector.broadcast %63 : vector<1x1x32xf32> to vector<8x8x32xf32>
    %65 = arith.mulf %60, %64 : vector<8x8x32xf32>
    %66 = arith.addf %59, %65 : vector<8x8x32xf32>
    %67 = vector.extract_strided_slice %16 {offsets = [2, 1, 0], sizes = [8, 8, 32], strides = [1, 1, 1]} : vector<10x10x32xf32> to vector<8x8x32xf32>
    %c7 = arith.constant 7 : index
    %c0_28 = arith.constant 0 : index
    %68 = vector.load %arg4[%c7, %c0_28] : memref<9x32xf32, #tpu.memory_space<vmem>>, vector<1x32xf32>
    %69 = vector.shape_cast %68 : vector<1x32xf32> to vector<32xf32>
    %70 = vector.shape_cast %69 : vector<32xf32> to vector<1x1x32xf32>
    %71 = vector.broadcast %70 : vector<1x1x32xf32> to vector<8x8x32xf32>
    %72 = arith.mulf %67, %71 : vector<8x8x32xf32>
    %73 = arith.addf %66, %72 : vector<8x8x32xf32>
    %74 = vector.extract_strided_slice %16 {offsets = [2, 2, 0], sizes = [8, 8, 32], strides = [1, 1, 1]} : vector<10x10x32xf32> to vector<8x8x32xf32>
    %c8 = arith.constant 8 : index
    %c0_29 = arith.constant 0 : index
    %75 = vector.load %arg4[%c8, %c0_29] : memref<9x32xf32, #tpu.memory_space<vmem>>, vector<1x32xf32>
    %76 = vector.shape_cast %75 : vector<1x32xf32> to vector<32xf32>
    %77 = vector.shape_cast %76 : vector<32xf32> to vector<1x1x32xf32>
    %78 = vector.broadcast %77 : vector<1x1x32xf32> to vector<8x8x32xf32>
    %79 = arith.mulf %74, %78 : vector<8x8x32xf32>
    %80 = arith.addf %73, %79 : vector<8x8x32xf32>
    %c0_30 = arith.constant 0 : index
    %c0_31 = arith.constant 0 : index
    %81 = vector.load %arg5[%c0_30, %c0_31] : memref<1x32xf32, #tpu.memory_space<vmem>>, vector<1x32xf32>
    %82 = vector.shape_cast %81 : vector<1x32xf32> to vector<1x1x32xf32>
    %83 = vector.broadcast %82 : vector<1x1x32xf32> to vector<8x8x32xf32>
    %84 = arith.addf %80, %83 : vector<8x8x32xf32>
    %cst_32 = arith.constant 0.000000e+00 : f32
    %cst_33 = arith.constant 6.000000e+00 : f32
    %85 = vector.broadcast %cst_32 : f32 to vector<8x8x32xf32>
    %86 = arith.maximumf %85, %84 : vector<8x8x32xf32>
    %87 = vector.broadcast %cst_33 : f32 to vector<8x8x32xf32>
    %88 = arith.minimumf %87, %86 : vector<8x8x32xf32>
    %89 = vector.shape_cast %88 : vector<8x8x32xf32> to vector<64x32xf32>
    %c0_34 = arith.constant 0 : index
    %c0_35 = arith.constant 0 : index
    %90 = vector.load %arg6[%c0_34, %c0_35] : memref<32x16xf32, #tpu.memory_space<vmem>>, vector<32x16xf32>
    %cst_36 = arith.constant dense<0.000000e+00> : vector<64x16xf32>
    %91 = tpu.matmul %89, %90, %cst_36 {dimension_numbers = #tpu.dot_dimension_numbers<[1], [0], [0], [1], [0, 0, 1, 1], [], []>} : vector<64x32xf32>, vector<32x16xf32>, vector<64x16xf32> -> vector<64x16xf32>
    %c0_37 = arith.constant 0 : index
    %c0_38 = arith.constant 0 : index
    %92 = vector.load %arg7[%c0_37, %c0_38] : memref<1x16xf32, #tpu.memory_space<vmem>>, vector<1x16xf32>
    %93 = vector.broadcast %92 : vector<1x16xf32> to vector<64x16xf32>
    %94 = arith.addf %91, %93 : vector<64x16xf32>
    %95 = vector.shape_cast %94 : vector<64x16xf32> to vector<8x8x16xf32>
    %cst_39 = arith.constant dense<0xFF800000> : vector<8x8xf32>
    %96 = vector.multi_reduction <maximumf>, %95, %cst_39 [2] : vector<8x8x16xf32> to vector<8x8xf32>
    %cst_40 = arith.constant dense<0.000000e+00> : vector<8x8xf32>
    %97 = vector.multi_reduction <add>, %95, %cst_40 [2] : vector<8x8x16xf32> to vector<8x8xf32>
    %cst_41 = arith.constant 1.600000e+01 : f32
    %98 = vector.broadcast %cst_41 : f32 to vector<8x8xf32>
    %99 = arith.divf %97, %98 : vector<8x8xf32>
    %cst_42 = arith.constant dense<0xFF800000> : vector<8x16xf32>
    %100 = vector.multi_reduction <maximumf>, %95, %cst_42 [0] : vector<8x8x16xf32> to vector<8x16xf32>
    %cst_43 = arith.constant dense<0.000000e+00> : vector<8x16xf32>
    %101 = vector.multi_reduction <add>, %95, %cst_43 [0] : vector<8x8x16xf32> to vector<8x16xf32>
    %cst_44 = arith.constant 8.000000e+00 : f32
    %102 = vector.broadcast %cst_44 : f32 to vector<8x16xf32>
    %103 = arith.divf %101, %102 : vector<8x16xf32>
    %cst_45 = arith.constant dense<0xFF800000> : vector<8x16xf32>
    %104 = vector.multi_reduction <maximumf>, %95, %cst_45 [1] : vector<8x8x16xf32> to vector<8x16xf32>
    %cst_46 = arith.constant dense<0.000000e+00> : vector<8x16xf32>
    %105 = vector.multi_reduction <add>, %95, %cst_46 [1] : vector<8x8x16xf32> to vector<8x16xf32>
    %cst_47 = arith.constant 8.000000e+00 : f32
    %106 = vector.broadcast %cst_47 : f32 to vector<8x16xf32>
    %107 = arith.divf %105, %106 : vector<8x16xf32>
    %108 = tpu.iota {dimensions = array<i32: 0>} : vector<14x8xi32>
    %109 = tpu.iota {dimensions = array<i32: 1>} : vector<14x8xi32>
    %c3_i32 = arith.constant 3 : i32
    %110 = vector.broadcast %c3_i32 : i32 to vector<14x8xi32>
    %111 = arith.addi %109, %110 : vector<14x8xi32>
    %112 = arith.cmpi eq, %108, %111 : vector<14x8xi32>
    %cst_48 = arith.constant 1.000000e+00 : f32
    %cst_49 = arith.constant 0.000000e+00 : f32
    %113 = vector.broadcast %cst_48 : f32 to vector<14x8xf32>
    %114 = vector.broadcast %cst_49 : f32 to vector<14x8xf32>
    %115 = arith.select %112, %113, %114 : vector<14x8xi1>, vector<14x8xf32>
    %116 = tpu.iota {dimensions = array<i32: 0>} : vector<8x14xi32>
    %117 = tpu.iota {dimensions = array<i32: 1>} : vector<8x14xi32>
    %c3_i32_50 = arith.constant 3 : i32
    %118 = vector.broadcast %c3_i32_50 : i32 to vector<8x14xi32>
    %119 = arith.addi %116, %118 : vector<8x14xi32>
    %120 = arith.cmpi eq, %117, %119 : vector<8x14xi32>
    %cst_51 = arith.constant 1.000000e+00 : f32
    %cst_52 = arith.constant 0.000000e+00 : f32
    %121 = vector.broadcast %cst_51 : f32 to vector<8x14xf32>
    %122 = vector.broadcast %cst_52 : f32 to vector<8x14xf32>
    %123 = arith.select %120, %121, %122 : vector<8x14xi1>, vector<8x14xf32>
    %cst_53 = arith.constant dense<0.000000e+00> : vector<8x14xf32>
    %124 = tpu.matmul %96, %123, %cst_53 {dimension_numbers = #tpu.dot_dimension_numbers<[1], [0], [0], [1], [0, 0, 1, 1], [], []>} : vector<8x8xf32>, vector<8x14xf32>, vector<8x14xf32> -> vector<8x14xf32>
    %cst_54 = arith.constant dense<0.000000e+00> : vector<14x14xf32>
    %125 = tpu.matmul %115, %124, %cst_54 {dimension_numbers = #tpu.dot_dimension_numbers<[1], [0], [0], [1], [0, 0, 1, 1], [], []>} : vector<14x8xf32>, vector<8x14xf32>, vector<14x14xf32> -> vector<14x14xf32>
    %cst_55 = arith.constant dense<0.000000e+00> : vector<8x14xf32>
    %126 = tpu.matmul %99, %123, %cst_55 {dimension_numbers = #tpu.dot_dimension_numbers<[1], [0], [0], [1], [0, 0, 1, 1], [], []>} : vector<8x8xf32>, vector<8x14xf32>, vector<8x14xf32> -> vector<8x14xf32>
    %cst_56 = arith.constant dense<0.000000e+00> : vector<14x14xf32>
    %127 = tpu.matmul %115, %126, %cst_56 {dimension_numbers = #tpu.dot_dimension_numbers<[1], [0], [0], [1], [0, 0, 1, 1], [], []>} : vector<14x8xf32>, vector<8x14xf32>, vector<14x14xf32> -> vector<14x14xf32>
    %cst_57 = arith.constant 0.000000e+00 : f32
    %128 = vector.broadcast %cst_57 : f32 to vector<8x8xf32>
    %129 = vector.extract_strided_slice %125 {offsets = [0, 0], sizes = [8, 14], strides = [1, 1]} : vector<14x14xf32> to vector<8x14xf32>
    %130 = vector.extract_strided_slice %127 {offsets = [0, 0], sizes = [8, 14], strides = [1, 1]} : vector<14x14xf32> to vector<8x14xf32>
    %c0_58 = arith.constant 0 : index
    %c0_59 = arith.constant 0 : index
    %131 = memref.load %arg9[%c0_58, %c0_59] : memref<3x99xf32, #tpu.memory_space<smem>>
    %132 = vector.extract_strided_slice %129 {offsets = [0, 0], sizes = [8, 8], strides = [1, 1]} : vector<8x14xf32> to vector<8x8xf32>
    %133 = vector.broadcast %131 : f32 to vector<8x8xf32>
    %134 = arith.mulf %133, %132 : vector<8x8xf32>
    %135 = arith.addf %128, %134 : vector<8x8xf32>
    %c0_60 = arith.constant 0 : index
    %c1_61 = arith.constant 1 : index
    %136 = memref.load %arg9[%c0_60, %c1_61] : memref<3x99xf32, #tpu.memory_space<smem>>
    %137 = vector.extract_strided_slice %130 {offsets = [0, 0], sizes = [8, 8], strides = [1, 1]} : vector<8x14xf32> to vector<8x8xf32>
    %138 = vector.broadcast %136 : f32 to vector<8x8xf32>
    %139 = arith.mulf %138, %137 : vector<8x8xf32>
    %140 = arith.addf %135, %139 : vector<8x8xf32>
    %c0_62 = arith.constant 0 : index
    %c2_63 = arith.constant 2 : index
    %141 = memref.load %arg9[%c0_62, %c2_63] : memref<3x99xf32, #tpu.memory_space<smem>>
    %142 = vector.extract_strided_slice %129 {offsets = [0, 1], sizes = [8, 8], strides = [1, 1]} : vector<8x14xf32> to vector<8x8xf32>
    %143 = vector.broadcast %141 : f32 to vector<8x8xf32>
    %144 = arith.mulf %143, %142 : vector<8x8xf32>
    %145 = arith.addf %140, %144 : vector<8x8xf32>
    %c0_64 = arith.constant 0 : index
    %c3_65 = arith.constant 3 : index
    %146 = memref.load %arg9[%c0_64, %c3_65] : memref<3x99xf32, #tpu.memory_space<smem>>
    %147 = vector.extract_strided_slice %130 {offsets = [0, 1], sizes = [8, 8], strides = [1, 1]} : vector<8x14xf32> to vector<8x8xf32>
    %148 = vector.broadcast %146 : f32 to vector<8x8xf32>
    %149 = arith.mulf %148, %147 : vector<8x8xf32>
    %150 = arith.addf %145, %149 : vector<8x8xf32>
    %c0_66 = arith.constant 0 : index
    %c4_67 = arith.constant 4 : index
    %151 = memref.load %arg9[%c0_66, %c4_67] : memref<3x99xf32, #tpu.memory_space<smem>>
    %152 = vector.extract_strided_slice %129 {offsets = [0, 2], sizes = [8, 8], strides = [1, 1]} : vector<8x14xf32> to vector<8x8xf32>
    %153 = vector.broadcast %151 : f32 to vector<8x8xf32>
    %154 = arith.mulf %153, %152 : vector<8x8xf32>
    %155 = arith.addf %150, %154 : vector<8x8xf32>
    %c0_68 = arith.constant 0 : index
    %c5_69 = arith.constant 5 : index
    %156 = memref.load %arg9[%c0_68, %c5_69] : memref<3x99xf32, #tpu.memory_space<smem>>
    %157 = vector.extract_strided_slice %130 {offsets = [0, 2], sizes = [8, 8], strides = [1, 1]} : vector<8x14xf32> to vector<8x8xf32>
    %158 = vector.broadcast %156 : f32 to vector<8x8xf32>
    %159 = arith.mulf %158, %157 : vector<8x8xf32>
    %160 = arith.addf %155, %159 : vector<8x8xf32>
    %c0_70 = arith.constant 0 : index
    %c6_71 = arith.constant 6 : index
    %161 = memref.load %arg9[%c0_70, %c6_71] : memref<3x99xf32, #tpu.memory_space<smem>>
    %162 = vector.extract_strided_slice %129 {offsets = [0, 3], sizes = [8, 8], strides = [1, 1]} : vector<8x14xf32> to vector<8x8xf32>
    %163 = vector.broadcast %161 : f32 to vector<8x8xf32>
    %164 = arith.mulf %163, %162 : vector<8x8xf32>
    %165 = arith.addf %160, %164 : vector<8x8xf32>
    %c0_72 = arith.constant 0 : index
    %c7_73 = arith.constant 7 : index
    %166 = memref.load %arg9[%c0_72, %c7_73] : memref<3x99xf32, #tpu.memory_space<smem>>
    %167 = vector.extract_strided_slice %130 {offsets = [0, 3], sizes = [8, 8], strides = [1, 1]} : vector<8x14xf32> to vector<8x8xf32>
    %168 = vector.broadcast %166 : f32 to vector<8x8xf32>
    %169 = arith.mulf %168, %167 : vector<8x8xf32>
    %170 = arith.addf %165, %169 : vector<8x8xf32>
    %c0_74 = arith.constant 0 : index
    %c8_75 = arith.constant 8 : index
    %171 = memref.load %arg9[%c0_74, %c8_75] : memref<3x99xf32, #tpu.memory_space<smem>>
    %172 = vector.extract_strided_slice %129 {offsets = [0, 4], sizes = [8, 8], strides = [1, 1]} : vector<8x14xf32> to vector<8x8xf32>
    %173 = vector.broadcast %171 : f32 to vector<8x8xf32>
    %174 = arith.mulf %173, %172 : vector<8x8xf32>
    %175 = arith.addf %170, %174 : vector<8x8xf32>
    %c0_76 = arith.constant 0 : index
    %c9 = arith.constant 9 : index
    %176 = memref.load %arg9[%c0_76, %c9] : memref<3x99xf32, #tpu.memory_space<smem>>
    %177 = vector.extract_strided_slice %130 {offsets = [0, 4], sizes = [8, 8], strides = [1, 1]} : vector<8x14xf32> to vector<8x8xf32>
    %178 = vector.broadcast %176 : f32 to vector<8x8xf32>
    %179 = arith.mulf %178, %177 : vector<8x8xf32>
    %180 = arith.addf %175, %179 : vector<8x8xf32>
    %c0_77 = arith.constant 0 : index
    %c10 = arith.constant 10 : index
    %181 = memref.load %arg9[%c0_77, %c10] : memref<3x99xf32, #tpu.memory_space<smem>>
    %182 = vector.extract_strided_slice %129 {offsets = [0, 5], sizes = [8, 8], strides = [1, 1]} : vector<8x14xf32> to vector<8x8xf32>
    %183 = vector.broadcast %181 : f32 to vector<8x8xf32>
    %184 = arith.mulf %183, %182 : vector<8x8xf32>
    %185 = arith.addf %180, %184 : vector<8x8xf32>
    %c0_78 = arith.constant 0 : index
    %c11 = arith.constant 11 : index
    %186 = memref.load %arg9[%c0_78, %c11] : memref<3x99xf32, #tpu.memory_space<smem>>
    %187 = vector.extract_strided_slice %130 {offsets = [0, 5], sizes = [8, 8], strides = [1, 1]} : vector<8x14xf32> to vector<8x8xf32>
    %188 = vector.broadcast %186 : f32 to vector<8x8xf32>
    %189 = arith.mulf %188, %187 : vector<8x8xf32>
    %190 = arith.addf %185, %189 : vector<8x8xf32>
    %c0_79 = arith.constant 0 : index
    %c12 = arith.constant 12 : index
    %191 = memref.load %arg9[%c0_79, %c12] : memref<3x99xf32, #tpu.memory_space<smem>>
    %192 = vector.extract_strided_slice %129 {offsets = [0, 6], sizes = [8, 8], strides = [1, 1]} : vector<8x14xf32> to vector<8x8xf32>
    %193 = vector.broadcast %191 : f32 to vector<8x8xf32>
    %194 = arith.mulf %193, %192 : vector<8x8xf32>
    %195 = arith.addf %190, %194 : vector<8x8xf32>
    %c0_80 = arith.constant 0 : index
    %c13 = arith.constant 13 : index
    %196 = memref.load %arg9[%c0_80, %c13] : memref<3x99xf32, #tpu.memory_space<smem>>
    %197 = vector.extract_strided_slice %130 {offsets = [0, 6], sizes = [8, 8], strides = [1, 1]} : vector<8x14xf32> to vector<8x8xf32>
    %198 = vector.broadcast %196 : f32 to vector<8x8xf32>
    %199 = arith.mulf %198, %197 : vector<8x8xf32>
    %200 = arith.addf %195, %199 : vector<8x8xf32>
    %201 = vector.extract_strided_slice %125 {offsets = [1, 0], sizes = [8, 14], strides = [1, 1]} : vector<14x14xf32> to vector<8x14xf32>
    %202 = vector.extract_strided_slice %127 {offsets = [1, 0], sizes = [8, 14], strides = [1, 1]} : vector<14x14xf32> to vector<8x14xf32>
    %c0_81 = arith.constant 0 : index
    %c14 = arith.constant 14 : index
    %203 = memref.load %arg9[%c0_81, %c14] : memref<3x99xf32, #tpu.memory_space<smem>>
    %204 = vector.extract_strided_slice %201 {offsets = [0, 0], sizes = [8, 8], strides = [1, 1]} : vector<8x14xf32> to vector<8x8xf32>
    %205 = vector.broadcast %203 : f32 to vector<8x8xf32>
    %206 = arith.mulf %205, %204 : vector<8x8xf32>
    %207 = arith.addf %200, %206 : vector<8x8xf32>
    %c0_82 = arith.constant 0 : index
    %c15 = arith.constant 15 : index
    %208 = memref.load %arg9[%c0_82, %c15] : memref<3x99xf32, #tpu.memory_space<smem>>
    %209 = vector.extract_strided_slice %202 {offsets = [0, 0], sizes = [8, 8], strides = [1, 1]} : vector<8x14xf32> to vector<8x8xf32>
    %210 = vector.broadcast %208 : f32 to vector<8x8xf32>
    %211 = arith.mulf %210, %209 : vector<8x8xf32>
    %212 = arith.addf %207, %211 : vector<8x8xf32>
    %c0_83 = arith.constant 0 : index
    %c16 = arith.constant 16 : index
    %213 = memref.load %arg9[%c0_83, %c16] : memref<3x99xf32, #tpu.memory_space<smem>>
    %214 = vector.extract_strided_slice %201 {offsets = [0, 1], sizes = [8, 8], strides = [1, 1]} : vector<8x14xf32> to vector<8x8xf32>
    %215 = vector.broadcast %213 : f32 to vector<8x8xf32>
    %216 = arith.mulf %215, %214 : vector<8x8xf32>
    %217 = arith.addf %212, %216 : vector<8x8xf32>
    %c0_84 = arith.constant 0 : index
    %c17 = arith.constant 17 : index
    %218 = memref.load %arg9[%c0_84, %c17] : memref<3x99xf32, #tpu.memory_space<smem>>
    %219 = vector.extract_strided_slice %202 {offsets = [0, 1], sizes = [8, 8], strides = [1, 1]} : vector<8x14xf32> to vector<8x8xf32>
    %220 = vector.broadcast %218 : f32 to vector<8x8xf32>
    %221 = arith.mulf %220, %219 : vector<8x8xf32>
    %222 = arith.addf %217, %221 : vector<8x8xf32>
    %c0_85 = arith.constant 0 : index
    %c18 = arith.constant 18 : index
    %223 = memref.load %arg9[%c0_85, %c18] : memref<3x99xf32, #tpu.memory_space<smem>>
    %224 = vector.extract_strided_slice %201 {offsets = [0, 2], sizes = [8, 8], strides = [1, 1]} : vector<8x14xf32> to vector<8x8xf32>
    %225 = vector.broadcast %223 : f32 to vector<8x8xf32>
    %226 = arith.mulf %225, %224 : vector<8x8xf32>
    %227 = arith.addf %222, %226 : vector<8x8xf32>
    %c0_86 = arith.constant 0 : index
    %c19 = arith.constant 19 : index
    %228 = memref.load %arg9[%c0_86, %c19] : memref<3x99xf32, #tpu.memory_space<smem>>
    %229 = vector.extract_strided_slice %202 {offsets = [0, 2], sizes = [8, 8], strides = [1, 1]} : vector<8x14xf32> to vector<8x8xf32>
    %230 = vector.broadcast %228 : f32 to vector<8x8xf32>
    %231 = arith.mulf %230, %229 : vector<8x8xf32>
    %232 = arith.addf %227, %231 : vector<8x8xf32>
    %c0_87 = arith.constant 0 : index
    %c20 = arith.constant 20 : index
    %233 = memref.load %arg9[%c0_87, %c20] : memref<3x99xf32, #tpu.memory_space<smem>>
    %234 = vector.extract_strided_slice %201 {offsets = [0, 3], sizes = [8, 8], strides = [1, 1]} : vector<8x14xf32> to vector<8x8xf32>
    %235 = vector.broadcast %233 : f32 to vector<8x8xf32>
    %236 = arith.mulf %235, %234 : vector<8x8xf32>
    %237 = arith.addf %232, %236 : vector<8x8xf32>
    %c0_88 = arith.constant 0 : index
    %c21 = arith.constant 21 : index
    %238 = memref.load %arg9[%c0_88, %c21] : memref<3x99xf32, #tpu.memory_space<smem>>
    %239 = vector.extract_strided_slice %202 {offsets = [0, 3], sizes = [8, 8], strides = [1, 1]} : vector<8x14xf32> to vector<8x8xf32>
    %240 = vector.broadcast %238 : f32 to vector<8x8xf32>
    %241 = arith.mulf %240, %239 : vector<8x8xf32>
    %242 = arith.addf %237, %241 : vector<8x8xf32>
    %c0_89 = arith.constant 0 : index
    %c22 = arith.constant 22 : index
    %243 = memref.load %arg9[%c0_89, %c22] : memref<3x99xf32, #tpu.memory_space<smem>>
    %244 = vector.extract_strided_slice %201 {offsets = [0, 4], sizes = [8, 8], strides = [1, 1]} : vector<8x14xf32> to vector<8x8xf32>
    %245 = vector.broadcast %243 : f32 to vector<8x8xf32>
    %246 = arith.mulf %245, %244 : vector<8x8xf32>
    %247 = arith.addf %242, %246 : vector<8x8xf32>
    %c0_90 = arith.constant 0 : index
    %c23 = arith.constant 23 : index
    %248 = memref.load %arg9[%c0_90, %c23] : memref<3x99xf32, #tpu.memory_space<smem>>
    %249 = vector.extract_strided_slice %202 {offsets = [0, 4], sizes = [8, 8], strides = [1, 1]} : vector<8x14xf32> to vector<8x8xf32>
    %250 = vector.broadcast %248 : f32 to vector<8x8xf32>
    %251 = arith.mulf %250, %249 : vector<8x8xf32>
    %252 = arith.addf %247, %251 : vector<8x8xf32>
    %c0_91 = arith.constant 0 : index
    %c24 = arith.constant 24 : index
    %253 = memref.load %arg9[%c0_91, %c24] : memref<3x99xf32, #tpu.memory_space<smem>>
    %254 = vector.extract_strided_slice %201 {offsets = [0, 5], sizes = [8, 8], strides = [1, 1]} : vector<8x14xf32> to vector<8x8xf32>
    %255 = vector.broadcast %253 : f32 to vector<8x8xf32>
    %256 = arith.mulf %255, %254 : vector<8x8xf32>
    %257 = arith.addf %252, %256 : vector<8x8xf32>
    %c0_92 = arith.constant 0 : index
    %c25 = arith.constant 25 : index
    %258 = memref.load %arg9[%c0_92, %c25] : memref<3x99xf32, #tpu.memory_space<smem>>
    %259 = vector.extract_strided_slice %202 {offsets = [0, 5], sizes = [8, 8], strides = [1, 1]} : vector<8x14xf32> to vector<8x8xf32>
    %260 = vector.broadcast %258 : f32 to vector<8x8xf32>
    %261 = arith.mulf %260, %259 : vector<8x8xf32>
    %262 = arith.addf %257, %261 : vector<8x8xf32>
    %c0_93 = arith.constant 0 : index
    %c26 = arith.constant 26 : index
    %263 = memref.load %arg9[%c0_93, %c26] : memref<3x99xf32, #tpu.memory_space<smem>>
    %264 = vector.extract_strided_slice %201 {offsets = [0, 6], sizes = [8, 8], strides = [1, 1]} : vector<8x14xf32> to vector<8x8xf32>
    %265 = vector.broadcast %263 : f32 to vector<8x8xf32>
    %266 = arith.mulf %265, %264 : vector<8x8xf32>
    %267 = arith.addf %262, %266 : vector<8x8xf32>
    %c0_94 = arith.constant 0 : index
    %c27 = arith.constant 27 : index
    %268 = memref.load %arg9[%c0_94, %c27] : memref<3x99xf32, #tpu.memory_space<smem>>
    %269 = vector.extract_strided_slice %202 {offsets = [0, 6], sizes = [8, 8], strides = [1, 1]} : vector<8x14xf32> to vector<8x8xf32>
    %270 = vector.broadcast %268 : f32 to vector<8x8xf32>
    %271 = arith.mulf %270, %269 : vector<8x8xf32>
    %272 = arith.addf %267, %271 : vector<8x8xf32>
    %273 = vector.extract_strided_slice %125 {offsets = [2, 0], sizes = [8, 14], strides = [1, 1]} : vector<14x14xf32> to vector<8x14xf32>
    %274 = vector.extract_strided_slice %127 {offsets = [2, 0], sizes = [8, 14], strides = [1, 1]} : vector<14x14xf32> to vector<8x14xf32>
    %c0_95 = arith.constant 0 : index
    %c28 = arith.constant 28 : index
    %275 = memref.load %arg9[%c0_95, %c28] : memref<3x99xf32, #tpu.memory_space<smem>>
    %276 = vector.extract_strided_slice %273 {offsets = [0, 0], sizes = [8, 8], strides = [1, 1]} : vector<8x14xf32> to vector<8x8xf32>
    %277 = vector.broadcast %275 : f32 to vector<8x8xf32>
    %278 = arith.mulf %277, %276 : vector<8x8xf32>
    %279 = arith.addf %272, %278 : vector<8x8xf32>
    %c0_96 = arith.constant 0 : index
    %c29 = arith.constant 29 : index
    %280 = memref.load %arg9[%c0_96, %c29] : memref<3x99xf32, #tpu.memory_space<smem>>
    %281 = vector.extract_strided_slice %274 {offsets = [0, 0], sizes = [8, 8], strides = [1, 1]} : vector<8x14xf32> to vector<8x8xf32>
    %282 = vector.broadcast %280 : f32 to vector<8x8xf32>
    %283 = arith.mulf %282, %281 : vector<8x8xf32>
    %284 = arith.addf %279, %283 : vector<8x8xf32>
    %c0_97 = arith.constant 0 : index
    %c30 = arith.constant 30 : index
    %285 = memref.load %arg9[%c0_97, %c30] : memref<3x99xf32, #tpu.memory_space<smem>>
    %286 = vector.extract_strided_slice %273 {offsets = [0, 1], sizes = [8, 8], strides = [1, 1]} : vector<8x14xf32> to vector<8x8xf32>
    %287 = vector.broadcast %285 : f32 to vector<8x8xf32>
    %288 = arith.mulf %287, %286 : vector<8x8xf32>
    %289 = arith.addf %284, %288 : vector<8x8xf32>
    %c0_98 = arith.constant 0 : index
    %c31 = arith.constant 31 : index
    %290 = memref.load %arg9[%c0_98, %c31] : memref<3x99xf32, #tpu.memory_space<smem>>
    %291 = vector.extract_strided_slice %274 {offsets = [0, 1], sizes = [8, 8], strides = [1, 1]} : vector<8x14xf32> to vector<8x8xf32>
    %292 = vector.broadcast %290 : f32 to vector<8x8xf32>
    %293 = arith.mulf %292, %291 : vector<8x8xf32>
    %294 = arith.addf %289, %293 : vector<8x8xf32>
    %c0_99 = arith.constant 0 : index
    %c32 = arith.constant 32 : index
    %295 = memref.load %arg9[%c0_99, %c32] : memref<3x99xf32, #tpu.memory_space<smem>>
    %296 = vector.extract_strided_slice %273 {offsets = [0, 2], sizes = [8, 8], strides = [1, 1]} : vector<8x14xf32> to vector<8x8xf32>
    %297 = vector.broadcast %295 : f32 to vector<8x8xf32>
    %298 = arith.mulf %297, %296 : vector<8x8xf32>
    %299 = arith.addf %294, %298 : vector<8x8xf32>
    %c0_100 = arith.constant 0 : index
    %c33 = arith.constant 33 : index
    %300 = memref.load %arg9[%c0_100, %c33] : memref<3x99xf32, #tpu.memory_space<smem>>
    %301 = vector.extract_strided_slice %274 {offsets = [0, 2], sizes = [8, 8], strides = [1, 1]} : vector<8x14xf32> to vector<8x8xf32>
    %302 = vector.broadcast %300 : f32 to vector<8x8xf32>
    %303 = arith.mulf %302, %301 : vector<8x8xf32>
    %304 = arith.addf %299, %303 : vector<8x8xf32>
    %c0_101 = arith.constant 0 : index
    %c34 = arith.constant 34 : index
    %305 = memref.load %arg9[%c0_101, %c34] : memref<3x99xf32, #tpu.memory_space<smem>>
    %306 = vector.extract_strided_slice %273 {offsets = [0, 3], sizes = [8, 8], strides = [1, 1]} : vector<8x14xf32> to vector<8x8xf32>
    %307 = vector.broadcast %305 : f32 to vector<8x8xf32>
    %308 = arith.mulf %307, %306 : vector<8x8xf32>
    %309 = arith.addf %304, %308 : vector<8x8xf32>
    %c0_102 = arith.constant 0 : index
    %c35 = arith.constant 35 : index
    %310 = memref.load %arg9[%c0_102, %c35] : memref<3x99xf32, #tpu.memory_space<smem>>
    %311 = vector.extract_strided_slice %274 {offsets = [0, 3], sizes = [8, 8], strides = [1, 1]} : vector<8x14xf32> to vector<8x8xf32>
    %312 = vector.broadcast %310 : f32 to vector<8x8xf32>
    %313 = arith.mulf %312, %311 : vector<8x8xf32>
    %314 = arith.addf %309, %313 : vector<8x8xf32>
    %c0_103 = arith.constant 0 : index
    %c36 = arith.constant 36 : index
    %315 = memref.load %arg9[%c0_103, %c36] : memref<3x99xf32, #tpu.memory_space<smem>>
    %316 = vector.extract_strided_slice %273 {offsets = [0, 4], sizes = [8, 8], strides = [1, 1]} : vector<8x14xf32> to vector<8x8xf32>
    %317 = vector.broadcast %315 : f32 to vector<8x8xf32>
    %318 = arith.mulf %317, %316 : vector<8x8xf32>
    %319 = arith.addf %314, %318 : vector<8x8xf32>
    %c0_104 = arith.constant 0 : index
    %c37 = arith.constant 37 : index
    %320 = memref.load %arg9[%c0_104, %c37] : memref<3x99xf32, #tpu.memory_space<smem>>
    %321 = vector.extract_strided_slice %274 {offsets = [0, 4], sizes = [8, 8], strides = [1, 1]} : vector<8x14xf32> to vector<8x8xf32>
    %322 = vector.broadcast %320 : f32 to vector<8x8xf32>
    %323 = arith.mulf %322, %321 : vector<8x8xf32>
    %324 = arith.addf %319, %323 : vector<8x8xf32>
    %c0_105 = arith.constant 0 : index
    %c38 = arith.constant 38 : index
    %325 = memref.load %arg9[%c0_105, %c38] : memref<3x99xf32, #tpu.memory_space<smem>>
    %326 = vector.extract_strided_slice %273 {offsets = [0, 5], sizes = [8, 8], strides = [1, 1]} : vector<8x14xf32> to vector<8x8xf32>
    %327 = vector.broadcast %325 : f32 to vector<8x8xf32>
    %328 = arith.mulf %327, %326 : vector<8x8xf32>
    %329 = arith.addf %324, %328 : vector<8x8xf32>
    %c0_106 = arith.constant 0 : index
    %c39 = arith.constant 39 : index
    %330 = memref.load %arg9[%c0_106, %c39] : memref<3x99xf32, #tpu.memory_space<smem>>
    %331 = vector.extract_strided_slice %274 {offsets = [0, 5], sizes = [8, 8], strides = [1, 1]} : vector<8x14xf32> to vector<8x8xf32>
    %332 = vector.broadcast %330 : f32 to vector<8x8xf32>
    %333 = arith.mulf %332, %331 : vector<8x8xf32>
    %334 = arith.addf %329, %333 : vector<8x8xf32>
    %c0_107 = arith.constant 0 : index
    %c40 = arith.constant 40 : index
    %335 = memref.load %arg9[%c0_107, %c40] : memref<3x99xf32, #tpu.memory_space<smem>>
    %336 = vector.extract_strided_slice %273 {offsets = [0, 6], sizes = [8, 8], strides = [1, 1]} : vector<8x14xf32> to vector<8x8xf32>
    %337 = vector.broadcast %335 : f32 to vector<8x8xf32>
    %338 = arith.mulf %337, %336 : vector<8x8xf32>
    %339 = arith.addf %334, %338 : vector<8x8xf32>
    %c0_108 = arith.constant 0 : index
    %c41 = arith.constant 41 : index
    %340 = memref.load %arg9[%c0_108, %c41] : memref<3x99xf32, #tpu.memory_space<smem>>
    %341 = vector.extract_strided_slice %274 {offsets = [0, 6], sizes = [8, 8], strides = [1, 1]} : vector<8x14xf32> to vector<8x8xf32>
    %342 = vector.broadcast %340 : f32 to vector<8x8xf32>
    %343 = arith.mulf %342, %341 : vector<8x8xf32>
    %344 = arith.addf %339, %343 : vector<8x8xf32>
    %345 = vector.extract_strided_slice %125 {offsets = [3, 0], sizes = [8, 14], strides = [1, 1]} : vector<14x14xf32> to vector<8x14xf32>
    %346 = vector.extract_strided_slice %127 {offsets = [3, 0], sizes = [8, 14], strides = [1, 1]} : vector<14x14xf32> to vector<8x14xf32>
    %c0_109 = arith.constant 0 : index
    %c42 = arith.constant 42 : index
    %347 = memref.load %arg9[%c0_109, %c42] : memref<3x99xf32, #tpu.memory_space<smem>>
    %348 = vector.extract_strided_slice %345 {offsets = [0, 0], sizes = [8, 8], strides = [1, 1]} : vector<8x14xf32> to vector<8x8xf32>
    %349 = vector.broadcast %347 : f32 to vector<8x8xf32>
    %350 = arith.mulf %349, %348 : vector<8x8xf32>
    %351 = arith.addf %344, %350 : vector<8x8xf32>
    %c0_110 = arith.constant 0 : index
    %c43 = arith.constant 43 : index
    %352 = memref.load %arg9[%c0_110, %c43] : memref<3x99xf32, #tpu.memory_space<smem>>
    %353 = vector.extract_strided_slice %346 {offsets = [0, 0], sizes = [8, 8], strides = [1, 1]} : vector<8x14xf32> to vector<8x8xf32>
    %354 = vector.broadcast %352 : f32 to vector<8x8xf32>
    %355 = arith.mulf %354, %353 : vector<8x8xf32>
    %356 = arith.addf %351, %355 : vector<8x8xf32>
    %c0_111 = arith.constant 0 : index
    %c44 = arith.constant 44 : index
    %357 = memref.load %arg9[%c0_111, %c44] : memref<3x99xf32, #tpu.memory_space<smem>>
    %358 = vector.extract_strided_slice %345 {offsets = [0, 1], sizes = [8, 8], strides = [1, 1]} : vector<8x14xf32> to vector<8x8xf32>
    %359 = vector.broadcast %357 : f32 to vector<8x8xf32>
    %360 = arith.mulf %359, %358 : vector<8x8xf32>
    %361 = arith.addf %356, %360 : vector<8x8xf32>
    %c0_112 = arith.constant 0 : index
    %c45 = arith.constant 45 : index
    %362 = memref.load %arg9[%c0_112, %c45] : memref<3x99xf32, #tpu.memory_space<smem>>
    %363 = vector.extract_strided_slice %346 {offsets = [0, 1], sizes = [8, 8], strides = [1, 1]} : vector<8x14xf32> to vector<8x8xf32>
    %364 = vector.broadcast %362 : f32 to vector<8x8xf32>
    %365 = arith.mulf %364, %363 : vector<8x8xf32>
    %366 = arith.addf %361, %365 : vector<8x8xf32>
    %c0_113 = arith.constant 0 : index
    %c46 = arith.constant 46 : index
    %367 = memref.load %arg9[%c0_113, %c46] : memref<3x99xf32, #tpu.memory_space<smem>>
    %368 = vector.extract_strided_slice %345 {offsets = [0, 2], sizes = [8, 8], strides = [1, 1]} : vector<8x14xf32> to vector<8x8xf32>
    %369 = vector.broadcast %367 : f32 to vector<8x8xf32>
    %370 = arith.mulf %369, %368 : vector<8x8xf32>
    %371 = arith.addf %366, %370 : vector<8x8xf32>
    %c0_114 = arith.constant 0 : index
    %c47 = arith.constant 47 : index
    %372 = memref.load %arg9[%c0_114, %c47] : memref<3x99xf32, #tpu.memory_space<smem>>
    %373 = vector.extract_strided_slice %346 {offsets = [0, 2], sizes = [8, 8], strides = [1, 1]} : vector<8x14xf32> to vector<8x8xf32>
    %374 = vector.broadcast %372 : f32 to vector<8x8xf32>
    %375 = arith.mulf %374, %373 : vector<8x8xf32>
    %376 = arith.addf %371, %375 : vector<8x8xf32>
    %c0_115 = arith.constant 0 : index
    %c48 = arith.constant 48 : index
    %377 = memref.load %arg9[%c0_115, %c48] : memref<3x99xf32, #tpu.memory_space<smem>>
    %378 = vector.extract_strided_slice %345 {offsets = [0, 3], sizes = [8, 8], strides = [1, 1]} : vector<8x14xf32> to vector<8x8xf32>
    %379 = vector.broadcast %377 : f32 to vector<8x8xf32>
    %380 = arith.mulf %379, %378 : vector<8x8xf32>
    %381 = arith.addf %376, %380 : vector<8x8xf32>
    %c0_116 = arith.constant 0 : index
    %c49 = arith.constant 49 : index
    %382 = memref.load %arg9[%c0_116, %c49] : memref<3x99xf32, #tpu.memory_space<smem>>
    %383 = vector.extract_strided_slice %346 {offsets = [0, 3], sizes = [8, 8], strides = [1, 1]} : vector<8x14xf32> to vector<8x8xf32>
    %384 = vector.broadcast %382 : f32 to vector<8x8xf32>
    %385 = arith.mulf %384, %383 : vector<8x8xf32>
    %386 = arith.addf %381, %385 : vector<8x8xf32>
    %c0_117 = arith.constant 0 : index
    %c50 = arith.constant 50 : index
    %387 = memref.load %arg9[%c0_117, %c50] : memref<3x99xf32, #tpu.memory_space<smem>>
    %388 = vector.extract_strided_slice %345 {offsets = [0, 4], sizes = [8, 8], strides = [1, 1]} : vector<8x14xf32> to vector<8x8xf32>
    %389 = vector.broadcast %387 : f32 to vector<8x8xf32>
    %390 = arith.mulf %389, %388 : vector<8x8xf32>
    %391 = arith.addf %386, %390 : vector<8x8xf32>
    %c0_118 = arith.constant 0 : index
    %c51 = arith.constant 51 : index
    %392 = memref.load %arg9[%c0_118, %c51] : memref<3x99xf32, #tpu.memory_space<smem>>
    %393 = vector.extract_strided_slice %346 {offsets = [0, 4], sizes = [8, 8], strides = [1, 1]} : vector<8x14xf32> to vector<8x8xf32>
    %394 = vector.broadcast %392 : f32 to vector<8x8xf32>
    %395 = arith.mulf %394, %393 : vector<8x8xf32>
    %396 = arith.addf %391, %395 : vector<8x8xf32>
    %c0_119 = arith.constant 0 : index
    %c52 = arith.constant 52 : index
    %397 = memref.load %arg9[%c0_119, %c52] : memref<3x99xf32, #tpu.memory_space<smem>>
    %398 = vector.extract_strided_slice %345 {offsets = [0, 5], sizes = [8, 8], strides = [1, 1]} : vector<8x14xf32> to vector<8x8xf32>
    %399 = vector.broadcast %397 : f32 to vector<8x8xf32>
    %400 = arith.mulf %399, %398 : vector<8x8xf32>
    %401 = arith.addf %396, %400 : vector<8x8xf32>
    %c0_120 = arith.constant 0 : index
    %c53 = arith.constant 53 : index
    %402 = memref.load %arg9[%c0_120, %c53] : memref<3x99xf32, #tpu.memory_space<smem>>
    %403 = vector.extract_strided_slice %346 {offsets = [0, 5], sizes = [8, 8], strides = [1, 1]} : vector<8x14xf32> to vector<8x8xf32>
    %404 = vector.broadcast %402 : f32 to vector<8x8xf32>
    %405 = arith.mulf %404, %403 : vector<8x8xf32>
    %406 = arith.addf %401, %405 : vector<8x8xf32>
    %c0_121 = arith.constant 0 : index
    %c54 = arith.constant 54 : index
    %407 = memref.load %arg9[%c0_121, %c54] : memref<3x99xf32, #tpu.memory_space<smem>>
    %408 = vector.extract_strided_slice %345 {offsets = [0, 6], sizes = [8, 8], strides = [1, 1]} : vector<8x14xf32> to vector<8x8xf32>
    %409 = vector.broadcast %407 : f32 to vector<8x8xf32>
    %410 = arith.mulf %409, %408 : vector<8x8xf32>
    %411 = arith.addf %406, %410 : vector<8x8xf32>
    %c0_122 = arith.constant 0 : index
    %c55 = arith.constant 55 : index
    %412 = memref.load %arg9[%c0_122, %c55] : memref<3x99xf32, #tpu.memory_space<smem>>
    %413 = vector.extract_strided_slice %346 {offsets = [0, 6], sizes = [8, 8], strides = [1, 1]} : vector<8x14xf32> to vector<8x8xf32>
    %414 = vector.broadcast %412 : f32 to vector<8x8xf32>
    %415 = arith.mulf %414, %413 : vector<8x8xf32>
    %416 = arith.addf %411, %415 : vector<8x8xf32>
    %417 = vector.extract_strided_slice %125 {offsets = [4, 0], sizes = [8, 14], strides = [1, 1]} : vector<14x14xf32> to vector<8x14xf32>
    %418 = vector.extract_strided_slice %127 {offsets = [4, 0], sizes = [8, 14], strides = [1, 1]} : vector<14x14xf32> to vector<8x14xf32>
    %c0_123 = arith.constant 0 : index
    %c56 = arith.constant 56 : index
    %419 = memref.load %arg9[%c0_123, %c56] : memref<3x99xf32, #tpu.memory_space<smem>>
    %420 = vector.extract_strided_slice %417 {offsets = [0, 0], sizes = [8, 8], strides = [1, 1]} : vector<8x14xf32> to vector<8x8xf32>
    %421 = vector.broadcast %419 : f32 to vector<8x8xf32>
    %422 = arith.mulf %421, %420 : vector<8x8xf32>
    %423 = arith.addf %416, %422 : vector<8x8xf32>
    %c0_124 = arith.constant 0 : index
    %c57 = arith.constant 57 : index
    %424 = memref.load %arg9[%c0_124, %c57] : memref<3x99xf32, #tpu.memory_space<smem>>
    %425 = vector.extract_strided_slice %418 {offsets = [0, 0], sizes = [8, 8], strides = [1, 1]} : vector<8x14xf32> to vector<8x8xf32>
    %426 = vector.broadcast %424 : f32 to vector<8x8xf32>
    %427 = arith.mulf %426, %425 : vector<8x8xf32>
    %428 = arith.addf %423, %427 : vector<8x8xf32>
    %c0_125 = arith.constant 0 : index
    %c58 = arith.constant 58 : index
    %429 = memref.load %arg9[%c0_125, %c58] : memref<3x99xf32, #tpu.memory_space<smem>>
    %430 = vector.extract_strided_slice %417 {offsets = [0, 1], sizes = [8, 8], strides = [1, 1]} : vector<8x14xf32> to vector<8x8xf32>
    %431 = vector.broadcast %429 : f32 to vector<8x8xf32>
    %432 = arith.mulf %431, %430 : vector<8x8xf32>
    %433 = arith.addf %428, %432 : vector<8x8xf32>
    %c0_126 = arith.constant 0 : index
    %c59 = arith.constant 59 : index
    %434 = memref.load %arg9[%c0_126, %c59] : memref<3x99xf32, #tpu.memory_space<smem>>
    %435 = vector.extract_strided_slice %418 {offsets = [0, 1], sizes = [8, 8], strides = [1, 1]} : vector<8x14xf32> to vector<8x8xf32>
    %436 = vector.broadcast %434 : f32 to vector<8x8xf32>
    %437 = arith.mulf %436, %435 : vector<8x8xf32>
    %438 = arith.addf %433, %437 : vector<8x8xf32>
    %c0_127 = arith.constant 0 : index
    %c60 = arith.constant 60 : index
    %439 = memref.load %arg9[%c0_127, %c60] : memref<3x99xf32, #tpu.memory_space<smem>>
    %440 = vector.extract_strided_slice %417 {offsets = [0, 2], sizes = [8, 8], strides = [1, 1]} : vector<8x14xf32> to vector<8x8xf32>
    %441 = vector.broadcast %439 : f32 to vector<8x8xf32>
    %442 = arith.mulf %441, %440 : vector<8x8xf32>
    %443 = arith.addf %438, %442 : vector<8x8xf32>
    %c0_128 = arith.constant 0 : index
    %c61 = arith.constant 61 : index
    %444 = memref.load %arg9[%c0_128, %c61] : memref<3x99xf32, #tpu.memory_space<smem>>
    %445 = vector.extract_strided_slice %418 {offsets = [0, 2], sizes = [8, 8], strides = [1, 1]} : vector<8x14xf32> to vector<8x8xf32>
    %446 = vector.broadcast %444 : f32 to vector<8x8xf32>
    %447 = arith.mulf %446, %445 : vector<8x8xf32>
    %448 = arith.addf %443, %447 : vector<8x8xf32>
    %c0_129 = arith.constant 0 : index
    %c62 = arith.constant 62 : index
    %449 = memref.load %arg9[%c0_129, %c62] : memref<3x99xf32, #tpu.memory_space<smem>>
    %450 = vector.extract_strided_slice %417 {offsets = [0, 3], sizes = [8, 8], strides = [1, 1]} : vector<8x14xf32> to vector<8x8xf32>
    %451 = vector.broadcast %449 : f32 to vector<8x8xf32>
    %452 = arith.mulf %451, %450 : vector<8x8xf32>
    %453 = arith.addf %448, %452 : vector<8x8xf32>
    %c0_130 = arith.constant 0 : index
    %c63 = arith.constant 63 : index
    %454 = memref.load %arg9[%c0_130, %c63] : memref<3x99xf32, #tpu.memory_space<smem>>
    %455 = vector.extract_strided_slice %418 {offsets = [0, 3], sizes = [8, 8], strides = [1, 1]} : vector<8x14xf32> to vector<8x8xf32>
    %456 = vector.broadcast %454 : f32 to vector<8x8xf32>
    %457 = arith.mulf %456, %455 : vector<8x8xf32>
    %458 = arith.addf %453, %457 : vector<8x8xf32>
    %c0_131 = arith.constant 0 : index
    %c64 = arith.constant 64 : index
    %459 = memref.load %arg9[%c0_131, %c64] : memref<3x99xf32, #tpu.memory_space<smem>>
    %460 = vector.extract_strided_slice %417 {offsets = [0, 4], sizes = [8, 8], strides = [1, 1]} : vector<8x14xf32> to vector<8x8xf32>
    %461 = vector.broadcast %459 : f32 to vector<8x8xf32>
    %462 = arith.mulf %461, %460 : vector<8x8xf32>
    %463 = arith.addf %458, %462 : vector<8x8xf32>
    %c0_132 = arith.constant 0 : index
    %c65 = arith.constant 65 : index
    %464 = memref.load %arg9[%c0_132, %c65] : memref<3x99xf32, #tpu.memory_space<smem>>
    %465 = vector.extract_strided_slice %418 {offsets = [0, 4], sizes = [8, 8], strides = [1, 1]} : vector<8x14xf32> to vector<8x8xf32>
    %466 = vector.broadcast %464 : f32 to vector<8x8xf32>
    %467 = arith.mulf %466, %465 : vector<8x8xf32>
    %468 = arith.addf %463, %467 : vector<8x8xf32>
    %c0_133 = arith.constant 0 : index
    %c66 = arith.constant 66 : index
    %469 = memref.load %arg9[%c0_133, %c66] : memref<3x99xf32, #tpu.memory_space<smem>>
    %470 = vector.extract_strided_slice %417 {offsets = [0, 5], sizes = [8, 8], strides = [1, 1]} : vector<8x14xf32> to vector<8x8xf32>
    %471 = vector.broadcast %469 : f32 to vector<8x8xf32>
    %472 = arith.mulf %471, %470 : vector<8x8xf32>
    %473 = arith.addf %468, %472 : vector<8x8xf32>
    %c0_134 = arith.constant 0 : index
    %c67 = arith.constant 67 : index
    %474 = memref.load %arg9[%c0_134, %c67] : memref<3x99xf32, #tpu.memory_space<smem>>
    %475 = vector.extract_strided_slice %418 {offsets = [0, 5], sizes = [8, 8], strides = [1, 1]} : vector<8x14xf32> to vector<8x8xf32>
    %476 = vector.broadcast %474 : f32 to vector<8x8xf32>
    %477 = arith.mulf %476, %475 : vector<8x8xf32>
    %478 = arith.addf %473, %477 : vector<8x8xf32>
    %c0_135 = arith.constant 0 : index
    %c68 = arith.constant 68 : index
    %479 = memref.load %arg9[%c0_135, %c68] : memref<3x99xf32, #tpu.memory_space<smem>>
    %480 = vector.extract_strided_slice %417 {offsets = [0, 6], sizes = [8, 8], strides = [1, 1]} : vector<8x14xf32> to vector<8x8xf32>
    %481 = vector.broadcast %479 : f32 to vector<8x8xf32>
    %482 = arith.mulf %481, %480 : vector<8x8xf32>
    %483 = arith.addf %478, %482 : vector<8x8xf32>
    %c0_136 = arith.constant 0 : index
    %c69 = arith.constant 69 : index
    %484 = memref.load %arg9[%c0_136, %c69] : memref<3x99xf32, #tpu.memory_space<smem>>
    %485 = vector.extract_strided_slice %418 {offsets = [0, 6], sizes = [8, 8], strides = [1, 1]} : vector<8x14xf32> to vector<8x8xf32>
    %486 = vector.broadcast %484 : f32 to vector<8x8xf32>
    %487 = arith.mulf %486, %485 : vector<8x8xf32>
    %488 = arith.addf %483, %487 : vector<8x8xf32>
    %489 = vector.extract_strided_slice %125 {offsets = [5, 0], sizes = [8, 14], strides = [1, 1]} : vector<14x14xf32> to vector<8x14xf32>
    %490 = vector.extract_strided_slice %127 {offsets = [5, 0], sizes = [8, 14], strides = [1, 1]} : vector<14x14xf32> to vector<8x14xf32>
    %c0_137 = arith.constant 0 : index
    %c70 = arith.constant 70 : index
    %491 = memref.load %arg9[%c0_137, %c70] : memref<3x99xf32, #tpu.memory_space<smem>>
    %492 = vector.extract_strided_slice %489 {offsets = [0, 0], sizes = [8, 8], strides = [1, 1]} : vector<8x14xf32> to vector<8x8xf32>
    %493 = vector.broadcast %491 : f32 to vector<8x8xf32>
    %494 = arith.mulf %493, %492 : vector<8x8xf32>
    %495 = arith.addf %488, %494 : vector<8x8xf32>
    %c0_138 = arith.constant 0 : index
    %c71 = arith.constant 71 : index
    %496 = memref.load %arg9[%c0_138, %c71] : memref<3x99xf32, #tpu.memory_space<smem>>
    %497 = vector.extract_strided_slice %490 {offsets = [0, 0], sizes = [8, 8], strides = [1, 1]} : vector<8x14xf32> to vector<8x8xf32>
    %498 = vector.broadcast %496 : f32 to vector<8x8xf32>
    %499 = arith.mulf %498, %497 : vector<8x8xf32>
    %500 = arith.addf %495, %499 : vector<8x8xf32>
    %c0_139 = arith.constant 0 : index
    %c72 = arith.constant 72 : index
    %501 = memref.load %arg9[%c0_139, %c72] : memref<3x99xf32, #tpu.memory_space<smem>>
    %502 = vector.extract_strided_slice %489 {offsets = [0, 1], sizes = [8, 8], strides = [1, 1]} : vector<8x14xf32> to vector<8x8xf32>
    %503 = vector.broadcast %501 : f32 to vector<8x8xf32>
    %504 = arith.mulf %503, %502 : vector<8x8xf32>
    %505 = arith.addf %500, %504 : vector<8x8xf32>
    %c0_140 = arith.constant 0 : index
    %c73 = arith.constant 73 : index
    %506 = memref.load %arg9[%c0_140, %c73] : memref<3x99xf32, #tpu.memory_space<smem>>
    %507 = vector.extract_strided_slice %490 {offsets = [0, 1], sizes = [8, 8], strides = [1, 1]} : vector<8x14xf32> to vector<8x8xf32>
    %508 = vector.broadcast %506 : f32 to vector<8x8xf32>
    %509 = arith.mulf %508, %507 : vector<8x8xf32>
    %510 = arith.addf %505, %509 : vector<8x8xf32>
    %c0_141 = arith.constant 0 : index
    %c74 = arith.constant 74 : index
    %511 = memref.load %arg9[%c0_141, %c74] : memref<3x99xf32, #tpu.memory_space<smem>>
    %512 = vector.extract_strided_slice %489 {offsets = [0, 2], sizes = [8, 8], strides = [1, 1]} : vector<8x14xf32> to vector<8x8xf32>
    %513 = vector.broadcast %511 : f32 to vector<8x8xf32>
    %514 = arith.mulf %513, %512 : vector<8x8xf32>
    %515 = arith.addf %510, %514 : vector<8x8xf32>
    %c0_142 = arith.constant 0 : index
    %c75 = arith.constant 75 : index
    %516 = memref.load %arg9[%c0_142, %c75] : memref<3x99xf32, #tpu.memory_space<smem>>
    %517 = vector.extract_strided_slice %490 {offsets = [0, 2], sizes = [8, 8], strides = [1, 1]} : vector<8x14xf32> to vector<8x8xf32>
    %518 = vector.broadcast %516 : f32 to vector<8x8xf32>
    %519 = arith.mulf %518, %517 : vector<8x8xf32>
    %520 = arith.addf %515, %519 : vector<8x8xf32>
    %c0_143 = arith.constant 0 : index
    %c76 = arith.constant 76 : index
    %521 = memref.load %arg9[%c0_143, %c76] : memref<3x99xf32, #tpu.memory_space<smem>>
    %522 = vector.extract_strided_slice %489 {offsets = [0, 3], sizes = [8, 8], strides = [1, 1]} : vector<8x14xf32> to vector<8x8xf32>
    %523 = vector.broadcast %521 : f32 to vector<8x8xf32>
    %524 = arith.mulf %523, %522 : vector<8x8xf32>
    %525 = arith.addf %520, %524 : vector<8x8xf32>
    %c0_144 = arith.constant 0 : index
    %c77 = arith.constant 77 : index
    %526 = memref.load %arg9[%c0_144, %c77] : memref<3x99xf32, #tpu.memory_space<smem>>
    %527 = vector.extract_strided_slice %490 {offsets = [0, 3], sizes = [8, 8], strides = [1, 1]} : vector<8x14xf32> to vector<8x8xf32>
    %528 = vector.broadcast %526 : f32 to vector<8x8xf32>
    %529 = arith.mulf %528, %527 : vector<8x8xf32>
    %530 = arith.addf %525, %529 : vector<8x8xf32>
    %c0_145 = arith.constant 0 : index
    %c78 = arith.constant 78 : index
    %531 = memref.load %arg9[%c0_145, %c78] : memref<3x99xf32, #tpu.memory_space<smem>>
    %532 = vector.extract_strided_slice %489 {offsets = [0, 4], sizes = [8, 8], strides = [1, 1]} : vector<8x14xf32> to vector<8x8xf32>
    %533 = vector.broadcast %531 : f32 to vector<8x8xf32>
    %534 = arith.mulf %533, %532 : vector<8x8xf32>
    %535 = arith.addf %530, %534 : vector<8x8xf32>
    %c0_146 = arith.constant 0 : index
    %c79 = arith.constant 79 : index
    %536 = memref.load %arg9[%c0_146, %c79] : memref<3x99xf32, #tpu.memory_space<smem>>
    %537 = vector.extract_strided_slice %490 {offsets = [0, 4], sizes = [8, 8], strides = [1, 1]} : vector<8x14xf32> to vector<8x8xf32>
    %538 = vector.broadcast %536 : f32 to vector<8x8xf32>
    %539 = arith.mulf %538, %537 : vector<8x8xf32>
    %540 = arith.addf %535, %539 : vector<8x8xf32>
    %c0_147 = arith.constant 0 : index
    %c80 = arith.constant 80 : index
    %541 = memref.load %arg9[%c0_147, %c80] : memref<3x99xf32, #tpu.memory_space<smem>>
    %542 = vector.extract_strided_slice %489 {offsets = [0, 5], sizes = [8, 8], strides = [1, 1]} : vector<8x14xf32> to vector<8x8xf32>
    %543 = vector.broadcast %541 : f32 to vector<8x8xf32>
    %544 = arith.mulf %543, %542 : vector<8x8xf32>
    %545 = arith.addf %540, %544 : vector<8x8xf32>
    %c0_148 = arith.constant 0 : index
    %c81 = arith.constant 81 : index
    %546 = memref.load %arg9[%c0_148, %c81] : memref<3x99xf32, #tpu.memory_space<smem>>
    %547 = vector.extract_strided_slice %490 {offsets = [0, 5], sizes = [8, 8], strides = [1, 1]} : vector<8x14xf32> to vector<8x8xf32>
    %548 = vector.broadcast %546 : f32 to vector<8x8xf32>
    %549 = arith.mulf %548, %547 : vector<8x8xf32>
    %550 = arith.addf %545, %549 : vector<8x8xf32>
    %c0_149 = arith.constant 0 : index
    %c82 = arith.constant 82 : index
    %551 = memref.load %arg9[%c0_149, %c82] : memref<3x99xf32, #tpu.memory_space<smem>>
    %552 = vector.extract_strided_slice %489 {offsets = [0, 6], sizes = [8, 8], strides = [1, 1]} : vector<8x14xf32> to vector<8x8xf32>
    %553 = vector.broadcast %551 : f32 to vector<8x8xf32>
    %554 = arith.mulf %553, %552 : vector<8x8xf32>
    %555 = arith.addf %550, %554 : vector<8x8xf32>
    %c0_150 = arith.constant 0 : index
    %c83 = arith.constant 83 : index
    %556 = memref.load %arg9[%c0_150, %c83] : memref<3x99xf32, #tpu.memory_space<smem>>
    %557 = vector.extract_strided_slice %490 {offsets = [0, 6], sizes = [8, 8], strides = [1, 1]} : vector<8x14xf32> to vector<8x8xf32>
    %558 = vector.broadcast %556 : f32 to vector<8x8xf32>
    %559 = arith.mulf %558, %557 : vector<8x8xf32>
    %560 = arith.addf %555, %559 : vector<8x8xf32>
    %561 = vector.extract_strided_slice %125 {offsets = [6, 0], sizes = [8, 14], strides = [1, 1]} : vector<14x14xf32> to vector<8x14xf32>
    %562 = vector.extract_strided_slice %127 {offsets = [6, 0], sizes = [8, 14], strides = [1, 1]} : vector<14x14xf32> to vector<8x14xf32>
    %c0_151 = arith.constant 0 : index
    %c84 = arith.constant 84 : index
    %563 = memref.load %arg9[%c0_151, %c84] : memref<3x99xf32, #tpu.memory_space<smem>>
    %564 = vector.extract_strided_slice %561 {offsets = [0, 0], sizes = [8, 8], strides = [1, 1]} : vector<8x14xf32> to vector<8x8xf32>
    %565 = vector.broadcast %563 : f32 to vector<8x8xf32>
    %566 = arith.mulf %565, %564 : vector<8x8xf32>
    %567 = arith.addf %560, %566 : vector<8x8xf32>
    %c0_152 = arith.constant 0 : index
    %c85 = arith.constant 85 : index
    %568 = memref.load %arg9[%c0_152, %c85] : memref<3x99xf32, #tpu.memory_space<smem>>
    %569 = vector.extract_strided_slice %562 {offsets = [0, 0], sizes = [8, 8], strides = [1, 1]} : vector<8x14xf32> to vector<8x8xf32>
    %570 = vector.broadcast %568 : f32 to vector<8x8xf32>
    %571 = arith.mulf %570, %569 : vector<8x8xf32>
    %572 = arith.addf %567, %571 : vector<8x8xf32>
    %c0_153 = arith.constant 0 : index
    %c86 = arith.constant 86 : index
    %573 = memref.load %arg9[%c0_153, %c86] : memref<3x99xf32, #tpu.memory_space<smem>>
    %574 = vector.extract_strided_slice %561 {offsets = [0, 1], sizes = [8, 8], strides = [1, 1]} : vector<8x14xf32> to vector<8x8xf32>
    %575 = vector.broadcast %573 : f32 to vector<8x8xf32>
    %576 = arith.mulf %575, %574 : vector<8x8xf32>
    %577 = arith.addf %572, %576 : vector<8x8xf32>
    %c0_154 = arith.constant 0 : index
    %c87 = arith.constant 87 : index
    %578 = memref.load %arg9[%c0_154, %c87] : memref<3x99xf32, #tpu.memory_space<smem>>
    %579 = vector.extract_strided_slice %562 {offsets = [0, 1], sizes = [8, 8], strides = [1, 1]} : vector<8x14xf32> to vector<8x8xf32>
    %580 = vector.broadcast %578 : f32 to vector<8x8xf32>
    %581 = arith.mulf %580, %579 : vector<8x8xf32>
    %582 = arith.addf %577, %581 : vector<8x8xf32>
    %c0_155 = arith.constant 0 : index
    %c88 = arith.constant 88 : index
    %583 = memref.load %arg9[%c0_155, %c88] : memref<3x99xf32, #tpu.memory_space<smem>>
    %584 = vector.extract_strided_slice %561 {offsets = [0, 2], sizes = [8, 8], strides = [1, 1]} : vector<8x14xf32> to vector<8x8xf32>
    %585 = vector.broadcast %583 : f32 to vector<8x8xf32>
    %586 = arith.mulf %585, %584 : vector<8x8xf32>
    %587 = arith.addf %582, %586 : vector<8x8xf32>
    %c0_156 = arith.constant 0 : index
    %c89 = arith.constant 89 : index
    %588 = memref.load %arg9[%c0_156, %c89] : memref<3x99xf32, #tpu.memory_space<smem>>
    %589 = vector.extract_strided_slice %562 {offsets = [0, 2], sizes = [8, 8], strides = [1, 1]} : vector<8x14xf32> to vector<8x8xf32>
    %590 = vector.broadcast %588 : f32 to vector<8x8xf32>
    %591 = arith.mulf %590, %589 : vector<8x8xf32>
    %592 = arith.addf %587, %591 : vector<8x8xf32>
    %c0_157 = arith.constant 0 : index
    %c90 = arith.constant 90 : index
    %593 = memref.load %arg9[%c0_157, %c90] : memref<3x99xf32, #tpu.memory_space<smem>>
    %594 = vector.extract_strided_slice %561 {offsets = [0, 3], sizes = [8, 8], strides = [1, 1]} : vector<8x14xf32> to vector<8x8xf32>
    %595 = vector.broadcast %593 : f32 to vector<8x8xf32>
    %596 = arith.mulf %595, %594 : vector<8x8xf32>
    %597 = arith.addf %592, %596 : vector<8x8xf32>
    %c0_158 = arith.constant 0 : index
    %c91 = arith.constant 91 : index
    %598 = memref.load %arg9[%c0_158, %c91] : memref<3x99xf32, #tpu.memory_space<smem>>
    %599 = vector.extract_strided_slice %562 {offsets = [0, 3], sizes = [8, 8], strides = [1, 1]} : vector<8x14xf32> to vector<8x8xf32>
    %600 = vector.broadcast %598 : f32 to vector<8x8xf32>
    %601 = arith.mulf %600, %599 : vector<8x8xf32>
    %602 = arith.addf %597, %601 : vector<8x8xf32>
    %c0_159 = arith.constant 0 : index
    %c92 = arith.constant 92 : index
    %603 = memref.load %arg9[%c0_159, %c92] : memref<3x99xf32, #tpu.memory_space<smem>>
    %604 = vector.extract_strided_slice %561 {offsets = [0, 4], sizes = [8, 8], strides = [1, 1]} : vector<8x14xf32> to vector<8x8xf32>
    %605 = vector.broadcast %603 : f32 to vector<8x8xf32>
    %606 = arith.mulf %605, %604 : vector<8x8xf32>
    %607 = arith.addf %602, %606 : vector<8x8xf32>
    %c0_160 = arith.constant 0 : index
    %c93 = arith.constant 93 : index
    %608 = memref.load %arg9[%c0_160, %c93] : memref<3x99xf32, #tpu.memory_space<smem>>
    %609 = vector.extract_strided_slice %562 {offsets = [0, 4], sizes = [8, 8], strides = [1, 1]} : vector<8x14xf32> to vector<8x8xf32>
    %610 = vector.broadcast %608 : f32 to vector<8x8xf32>
    %611 = arith.mulf %610, %609 : vector<8x8xf32>
    %612 = arith.addf %607, %611 : vector<8x8xf32>
    %c0_161 = arith.constant 0 : index
    %c94 = arith.constant 94 : index
    %613 = memref.load %arg9[%c0_161, %c94] : memref<3x99xf32, #tpu.memory_space<smem>>
    %614 = vector.extract_strided_slice %561 {offsets = [0, 5], sizes = [8, 8], strides = [1, 1]} : vector<8x14xf32> to vector<8x8xf32>
    %615 = vector.broadcast %613 : f32 to vector<8x8xf32>
    %616 = arith.mulf %615, %614 : vector<8x8xf32>
    %617 = arith.addf %612, %616 : vector<8x8xf32>
    %c0_162 = arith.constant 0 : index
    %c95 = arith.constant 95 : index
    %618 = memref.load %arg9[%c0_162, %c95] : memref<3x99xf32, #tpu.memory_space<smem>>
    %619 = vector.extract_strided_slice %562 {offsets = [0, 5], sizes = [8, 8], strides = [1, 1]} : vector<8x14xf32> to vector<8x8xf32>
    %620 = vector.broadcast %618 : f32 to vector<8x8xf32>
    %621 = arith.mulf %620, %619 : vector<8x8xf32>
    %622 = arith.addf %617, %621 : vector<8x8xf32>
    %c0_163 = arith.constant 0 : index
    %c96 = arith.constant 96 : index
    %623 = memref.load %arg9[%c0_163, %c96] : memref<3x99xf32, #tpu.memory_space<smem>>
    %624 = vector.extract_strided_slice %561 {offsets = [0, 6], sizes = [8, 8], strides = [1, 1]} : vector<8x14xf32> to vector<8x8xf32>
    %625 = vector.broadcast %623 : f32 to vector<8x8xf32>
    %626 = arith.mulf %625, %624 : vector<8x8xf32>
    %627 = arith.addf %622, %626 : vector<8x8xf32>
    %c0_164 = arith.constant 0 : index
    %c97 = arith.constant 97 : index
    %628 = memref.load %arg9[%c0_164, %c97] : memref<3x99xf32, #tpu.memory_space<smem>>
    %629 = vector.extract_strided_slice %562 {offsets = [0, 6], sizes = [8, 8], strides = [1, 1]} : vector<8x14xf32> to vector<8x8xf32>
    %630 = vector.broadcast %628 : f32 to vector<8x8xf32>
    %631 = arith.mulf %630, %629 : vector<8x8xf32>
    %632 = arith.addf %627, %631 : vector<8x8xf32>
    %c0_165 = arith.constant 0 : index
    %c98 = arith.constant 98 : index
    %633 = memref.load %arg9[%c0_165, %c98] : memref<3x99xf32, #tpu.memory_space<smem>>
    %634 = vector.broadcast %633 : f32 to vector<8x8xf32>
    %635 = arith.addf %632, %634 : vector<8x8xf32>
    %636 = arith.negf %635 : vector<8x8xf32>
    %637 = math.exp %636 : vector<8x8xf32>
    %cst_166 = arith.constant 1.000000e+00 : f32
    %638 = vector.broadcast %cst_166 : f32 to vector<8x8xf32>
    %639 = arith.addf %638, %637 : vector<8x8xf32>
    %640 = arith.divf %638, %639 : vector<8x8xf32>
    %641 = tpu.iota {dimensions = array<i32: 0>} : vector<14x8xi32>
    %642 = tpu.iota {dimensions = array<i32: 1>} : vector<14x8xi32>
    %c3_i32_167 = arith.constant 3 : i32
    %643 = vector.broadcast %c3_i32_167 : i32 to vector<14x8xi32>
    %644 = arith.addi %642, %643 : vector<14x8xi32>
    %645 = arith.cmpi eq, %641, %644 : vector<14x8xi32>
    %cst_168 = arith.constant 1.000000e+00 : f32
    %cst_169 = arith.constant 0.000000e+00 : f32
    %646 = vector.broadcast %cst_168 : f32 to vector<14x8xf32>
    %647 = vector.broadcast %cst_169 : f32 to vector<14x8xf32>
    %648 = arith.select %645, %646, %647 : vector<14x8xi1>, vector<14x8xf32>
    %649 = tpu.iota {dimensions = array<i32: 0>} : vector<16x22xi32>
    %650 = tpu.iota {dimensions = array<i32: 1>} : vector<16x22xi32>
    %c3_i32_170 = arith.constant 3 : i32
    %651 = vector.broadcast %c3_i32_170 : i32 to vector<16x22xi32>
    %652 = arith.addi %649, %651 : vector<16x22xi32>
    %653 = arith.cmpi eq, %650, %652 : vector<16x22xi32>
    %cst_171 = arith.constant 1.000000e+00 : f32
    %cst_172 = arith.constant 0.000000e+00 : f32
    %654 = vector.broadcast %cst_171 : f32 to vector<16x22xf32>
    %655 = vector.broadcast %cst_172 : f32 to vector<16x22xf32>
    %656 = arith.select %653, %654, %655 : vector<16x22xi1>, vector<16x22xf32>
    %cst_173 = arith.constant dense<0.000000e+00> : vector<8x22xf32>
    %657 = tpu.matmul %100, %656, %cst_173 {dimension_numbers = #tpu.dot_dimension_numbers<[1], [0], [0], [1], [0, 0, 1, 1], [], []>} : vector<8x16xf32>, vector<16x22xf32>, vector<8x22xf32> -> vector<8x22xf32>
    %cst_174 = arith.constant dense<0.000000e+00> : vector<14x22xf32>
    %658 = tpu.matmul %648, %657, %cst_174 {dimension_numbers = #tpu.dot_dimension_numbers<[1], [0], [0], [1], [0, 0, 1, 1], [], []>} : vector<14x8xf32>, vector<8x22xf32>, vector<14x22xf32> -> vector<14x22xf32>
    %cst_175 = arith.constant dense<0.000000e+00> : vector<8x22xf32>
    %659 = tpu.matmul %103, %656, %cst_175 {dimension_numbers = #tpu.dot_dimension_numbers<[1], [0], [0], [1], [0, 0, 1, 1], [], []>} : vector<8x16xf32>, vector<16x22xf32>, vector<8x22xf32> -> vector<8x22xf32>
    %cst_176 = arith.constant dense<0.000000e+00> : vector<14x22xf32>
    %660 = tpu.matmul %648, %659, %cst_176 {dimension_numbers = #tpu.dot_dimension_numbers<[1], [0], [0], [1], [0, 0, 1, 1], [], []>} : vector<14x8xf32>, vector<8x22xf32>, vector<14x22xf32> -> vector<14x22xf32>
    %cst_177 = arith.constant 0.000000e+00 : f32
    %661 = vector.broadcast %cst_177 : f32 to vector<8x16xf32>
    %662 = vector.extract_strided_slice %658 {offsets = [0, 0], sizes = [8, 22], strides = [1, 1]} : vector<14x22xf32> to vector<8x22xf32>
    %663 = vector.extract_strided_slice %660 {offsets = [0, 0], sizes = [8, 22], strides = [1, 1]} : vector<14x22xf32> to vector<8x22xf32>
    %c1_178 = arith.constant 1 : index
    %c0_179 = arith.constant 0 : index
    %664 = memref.load %arg9[%c1_178, %c0_179] : memref<3x99xf32, #tpu.memory_space<smem>>
    %665 = vector.extract_strided_slice %662 {offsets = [0, 0], sizes = [8, 16], strides = [1, 1]} : vector<8x22xf32> to vector<8x16xf32>
    %666 = vector.broadcast %664 : f32 to vector<8x16xf32>
    %667 = arith.mulf %666, %665 : vector<8x16xf32>
    %668 = arith.addf %661, %667 : vector<8x16xf32>
    %c1_180 = arith.constant 1 : index
    %c1_181 = arith.constant 1 : index
    %669 = memref.load %arg9[%c1_180, %c1_181] : memref<3x99xf32, #tpu.memory_space<smem>>
    %670 = vector.extract_strided_slice %663 {offsets = [0, 0], sizes = [8, 16], strides = [1, 1]} : vector<8x22xf32> to vector<8x16xf32>
    %671 = vector.broadcast %669 : f32 to vector<8x16xf32>
    %672 = arith.mulf %671, %670 : vector<8x16xf32>
    %673 = arith.addf %668, %672 : vector<8x16xf32>
    %c1_182 = arith.constant 1 : index
    %c2_183 = arith.constant 2 : index
    %674 = memref.load %arg9[%c1_182, %c2_183] : memref<3x99xf32, #tpu.memory_space<smem>>
    %675 = vector.extract_strided_slice %662 {offsets = [0, 1], sizes = [8, 16], strides = [1, 1]} : vector<8x22xf32> to vector<8x16xf32>
    %676 = vector.broadcast %674 : f32 to vector<8x16xf32>
    %677 = arith.mulf %676, %675 : vector<8x16xf32>
    %678 = arith.addf %673, %677 : vector<8x16xf32>
    %c1_184 = arith.constant 1 : index
    %c3_185 = arith.constant 3 : index
    %679 = memref.load %arg9[%c1_184, %c3_185] : memref<3x99xf32, #tpu.memory_space<smem>>
    %680 = vector.extract_strided_slice %663 {offsets = [0, 1], sizes = [8, 16], strides = [1, 1]} : vector<8x22xf32> to vector<8x16xf32>
    %681 = vector.broadcast %679 : f32 to vector<8x16xf32>
    %682 = arith.mulf %681, %680 : vector<8x16xf32>
    %683 = arith.addf %678, %682 : vector<8x16xf32>
    %c1_186 = arith.constant 1 : index
    %c4_187 = arith.constant 4 : index
    %684 = memref.load %arg9[%c1_186, %c4_187] : memref<3x99xf32, #tpu.memory_space<smem>>
    %685 = vector.extract_strided_slice %662 {offsets = [0, 2], sizes = [8, 16], strides = [1, 1]} : vector<8x22xf32> to vector<8x16xf32>
    %686 = vector.broadcast %684 : f32 to vector<8x16xf32>
    %687 = arith.mulf %686, %685 : vector<8x16xf32>
    %688 = arith.addf %683, %687 : vector<8x16xf32>
    %c1_188 = arith.constant 1 : index
    %c5_189 = arith.constant 5 : index
    %689 = memref.load %arg9[%c1_188, %c5_189] : memref<3x99xf32, #tpu.memory_space<smem>>
    %690 = vector.extract_strided_slice %663 {offsets = [0, 2], sizes = [8, 16], strides = [1, 1]} : vector<8x22xf32> to vector<8x16xf32>
    %691 = vector.broadcast %689 : f32 to vector<8x16xf32>
    %692 = arith.mulf %691, %690 : vector<8x16xf32>
    %693 = arith.addf %688, %692 : vector<8x16xf32>
    %c1_190 = arith.constant 1 : index
    %c6_191 = arith.constant 6 : index
    %694 = memref.load %arg9[%c1_190, %c6_191] : memref<3x99xf32, #tpu.memory_space<smem>>
    %695 = vector.extract_strided_slice %662 {offsets = [0, 3], sizes = [8, 16], strides = [1, 1]} : vector<8x22xf32> to vector<8x16xf32>
    %696 = vector.broadcast %694 : f32 to vector<8x16xf32>
    %697 = arith.mulf %696, %695 : vector<8x16xf32>
    %698 = arith.addf %693, %697 : vector<8x16xf32>
    %c1_192 = arith.constant 1 : index
    %c7_193 = arith.constant 7 : index
    %699 = memref.load %arg9[%c1_192, %c7_193] : memref<3x99xf32, #tpu.memory_space<smem>>
    %700 = vector.extract_strided_slice %663 {offsets = [0, 3], sizes = [8, 16], strides = [1, 1]} : vector<8x22xf32> to vector<8x16xf32>
    %701 = vector.broadcast %699 : f32 to vector<8x16xf32>
    %702 = arith.mulf %701, %700 : vector<8x16xf32>
    %703 = arith.addf %698, %702 : vector<8x16xf32>
    %c1_194 = arith.constant 1 : index
    %c8_195 = arith.constant 8 : index
    %704 = memref.load %arg9[%c1_194, %c8_195] : memref<3x99xf32, #tpu.memory_space<smem>>
    %705 = vector.extract_strided_slice %662 {offsets = [0, 4], sizes = [8, 16], strides = [1, 1]} : vector<8x22xf32> to vector<8x16xf32>
    %706 = vector.broadcast %704 : f32 to vector<8x16xf32>
    %707 = arith.mulf %706, %705 : vector<8x16xf32>
    %708 = arith.addf %703, %707 : vector<8x16xf32>
    %c1_196 = arith.constant 1 : index
    %c9_197 = arith.constant 9 : index
    %709 = memref.load %arg9[%c1_196, %c9_197] : memref<3x99xf32, #tpu.memory_space<smem>>
    %710 = vector.extract_strided_slice %663 {offsets = [0, 4], sizes = [8, 16], strides = [1, 1]} : vector<8x22xf32> to vector<8x16xf32>
    %711 = vector.broadcast %709 : f32 to vector<8x16xf32>
    %712 = arith.mulf %711, %710 : vector<8x16xf32>
    %713 = arith.addf %708, %712 : vector<8x16xf32>
    %c1_198 = arith.constant 1 : index
    %c10_199 = arith.constant 10 : index
    %714 = memref.load %arg9[%c1_198, %c10_199] : memref<3x99xf32, #tpu.memory_space<smem>>
    %715 = vector.extract_strided_slice %662 {offsets = [0, 5], sizes = [8, 16], strides = [1, 1]} : vector<8x22xf32> to vector<8x16xf32>
    %716 = vector.broadcast %714 : f32 to vector<8x16xf32>
    %717 = arith.mulf %716, %715 : vector<8x16xf32>
    %718 = arith.addf %713, %717 : vector<8x16xf32>
    %c1_200 = arith.constant 1 : index
    %c11_201 = arith.constant 11 : index
    %719 = memref.load %arg9[%c1_200, %c11_201] : memref<3x99xf32, #tpu.memory_space<smem>>
    %720 = vector.extract_strided_slice %663 {offsets = [0, 5], sizes = [8, 16], strides = [1, 1]} : vector<8x22xf32> to vector<8x16xf32>
    %721 = vector.broadcast %719 : f32 to vector<8x16xf32>
    %722 = arith.mulf %721, %720 : vector<8x16xf32>
    %723 = arith.addf %718, %722 : vector<8x16xf32>
    %c1_202 = arith.constant 1 : index
    %c12_203 = arith.constant 12 : index
    %724 = memref.load %arg9[%c1_202, %c12_203] : memref<3x99xf32, #tpu.memory_space<smem>>
    %725 = vector.extract_strided_slice %662 {offsets = [0, 6], sizes = [8, 16], strides = [1, 1]} : vector<8x22xf32> to vector<8x16xf32>
    %726 = vector.broadcast %724 : f32 to vector<8x16xf32>
    %727 = arith.mulf %726, %725 : vector<8x16xf32>
    %728 = arith.addf %723, %727 : vector<8x16xf32>
    %c1_204 = arith.constant 1 : index
    %c13_205 = arith.constant 13 : index
    %729 = memref.load %arg9[%c1_204, %c13_205] : memref<3x99xf32, #tpu.memory_space<smem>>
    %730 = vector.extract_strided_slice %663 {offsets = [0, 6], sizes = [8, 16], strides = [1, 1]} : vector<8x22xf32> to vector<8x16xf32>
    %731 = vector.broadcast %729 : f32 to vector<8x16xf32>
    %732 = arith.mulf %731, %730 : vector<8x16xf32>
    %733 = arith.addf %728, %732 : vector<8x16xf32>
    %734 = vector.extract_strided_slice %658 {offsets = [1, 0], sizes = [8, 22], strides = [1, 1]} : vector<14x22xf32> to vector<8x22xf32>
    %735 = vector.extract_strided_slice %660 {offsets = [1, 0], sizes = [8, 22], strides = [1, 1]} : vector<14x22xf32> to vector<8x22xf32>
    %c1_206 = arith.constant 1 : index
    %c14_207 = arith.constant 14 : index
    %736 = memref.load %arg9[%c1_206, %c14_207] : memref<3x99xf32, #tpu.memory_space<smem>>
    %737 = vector.extract_strided_slice %734 {offsets = [0, 0], sizes = [8, 16], strides = [1, 1]} : vector<8x22xf32> to vector<8x16xf32>
    %738 = vector.broadcast %736 : f32 to vector<8x16xf32>
    %739 = arith.mulf %738, %737 : vector<8x16xf32>
    %740 = arith.addf %733, %739 : vector<8x16xf32>
    %c1_208 = arith.constant 1 : index
    %c15_209 = arith.constant 15 : index
    %741 = memref.load %arg9[%c1_208, %c15_209] : memref<3x99xf32, #tpu.memory_space<smem>>
    %742 = vector.extract_strided_slice %735 {offsets = [0, 0], sizes = [8, 16], strides = [1, 1]} : vector<8x22xf32> to vector<8x16xf32>
    %743 = vector.broadcast %741 : f32 to vector<8x16xf32>
    %744 = arith.mulf %743, %742 : vector<8x16xf32>
    %745 = arith.addf %740, %744 : vector<8x16xf32>
    %c1_210 = arith.constant 1 : index
    %c16_211 = arith.constant 16 : index
    %746 = memref.load %arg9[%c1_210, %c16_211] : memref<3x99xf32, #tpu.memory_space<smem>>
    %747 = vector.extract_strided_slice %734 {offsets = [0, 1], sizes = [8, 16], strides = [1, 1]} : vector<8x22xf32> to vector<8x16xf32>
    %748 = vector.broadcast %746 : f32 to vector<8x16xf32>
    %749 = arith.mulf %748, %747 : vector<8x16xf32>
    %750 = arith.addf %745, %749 : vector<8x16xf32>
    %c1_212 = arith.constant 1 : index
    %c17_213 = arith.constant 17 : index
    %751 = memref.load %arg9[%c1_212, %c17_213] : memref<3x99xf32, #tpu.memory_space<smem>>
    %752 = vector.extract_strided_slice %735 {offsets = [0, 1], sizes = [8, 16], strides = [1, 1]} : vector<8x22xf32> to vector<8x16xf32>
    %753 = vector.broadcast %751 : f32 to vector<8x16xf32>
    %754 = arith.mulf %753, %752 : vector<8x16xf32>
    %755 = arith.addf %750, %754 : vector<8x16xf32>
    %c1_214 = arith.constant 1 : index
    %c18_215 = arith.constant 18 : index
    %756 = memref.load %arg9[%c1_214, %c18_215] : memref<3x99xf32, #tpu.memory_space<smem>>
    %757 = vector.extract_strided_slice %734 {offsets = [0, 2], sizes = [8, 16], strides = [1, 1]} : vector<8x22xf32> to vector<8x16xf32>
    %758 = vector.broadcast %756 : f32 to vector<8x16xf32>
    %759 = arith.mulf %758, %757 : vector<8x16xf32>
    %760 = arith.addf %755, %759 : vector<8x16xf32>
    %c1_216 = arith.constant 1 : index
    %c19_217 = arith.constant 19 : index
    %761 = memref.load %arg9[%c1_216, %c19_217] : memref<3x99xf32, #tpu.memory_space<smem>>
    %762 = vector.extract_strided_slice %735 {offsets = [0, 2], sizes = [8, 16], strides = [1, 1]} : vector<8x22xf32> to vector<8x16xf32>
    %763 = vector.broadcast %761 : f32 to vector<8x16xf32>
    %764 = arith.mulf %763, %762 : vector<8x16xf32>
    %765 = arith.addf %760, %764 : vector<8x16xf32>
    %c1_218 = arith.constant 1 : index
    %c20_219 = arith.constant 20 : index
    %766 = memref.load %arg9[%c1_218, %c20_219] : memref<3x99xf32, #tpu.memory_space<smem>>
    %767 = vector.extract_strided_slice %734 {offsets = [0, 3], sizes = [8, 16], strides = [1, 1]} : vector<8x22xf32> to vector<8x16xf32>
    %768 = vector.broadcast %766 : f32 to vector<8x16xf32>
    %769 = arith.mulf %768, %767 : vector<8x16xf32>
    %770 = arith.addf %765, %769 : vector<8x16xf32>
    %c1_220 = arith.constant 1 : index
    %c21_221 = arith.constant 21 : index
    %771 = memref.load %arg9[%c1_220, %c21_221] : memref<3x99xf32, #tpu.memory_space<smem>>
    %772 = vector.extract_strided_slice %735 {offsets = [0, 3], sizes = [8, 16], strides = [1, 1]} : vector<8x22xf32> to vector<8x16xf32>
    %773 = vector.broadcast %771 : f32 to vector<8x16xf32>
    %774 = arith.mulf %773, %772 : vector<8x16xf32>
    %775 = arith.addf %770, %774 : vector<8x16xf32>
    %c1_222 = arith.constant 1 : index
    %c22_223 = arith.constant 22 : index
    %776 = memref.load %arg9[%c1_222, %c22_223] : memref<3x99xf32, #tpu.memory_space<smem>>
    %777 = vector.extract_strided_slice %734 {offsets = [0, 4], sizes = [8, 16], strides = [1, 1]} : vector<8x22xf32> to vector<8x16xf32>
    %778 = vector.broadcast %776 : f32 to vector<8x16xf32>
    %779 = arith.mulf %778, %777 : vector<8x16xf32>
    %780 = arith.addf %775, %779 : vector<8x16xf32>
    %c1_224 = arith.constant 1 : index
    %c23_225 = arith.constant 23 : index
    %781 = memref.load %arg9[%c1_224, %c23_225] : memref<3x99xf32, #tpu.memory_space<smem>>
    %782 = vector.extract_strided_slice %735 {offsets = [0, 4], sizes = [8, 16], strides = [1, 1]} : vector<8x22xf32> to vector<8x16xf32>
    %783 = vector.broadcast %781 : f32 to vector<8x16xf32>
    %784 = arith.mulf %783, %782 : vector<8x16xf32>
    %785 = arith.addf %780, %784 : vector<8x16xf32>
    %c1_226 = arith.constant 1 : index
    %c24_227 = arith.constant 24 : index
    %786 = memref.load %arg9[%c1_226, %c24_227] : memref<3x99xf32, #tpu.memory_space<smem>>
    %787 = vector.extract_strided_slice %734 {offsets = [0, 5], sizes = [8, 16], strides = [1, 1]} : vector<8x22xf32> to vector<8x16xf32>
    %788 = vector.broadcast %786 : f32 to vector<8x16xf32>
    %789 = arith.mulf %788, %787 : vector<8x16xf32>
    %790 = arith.addf %785, %789 : vector<8x16xf32>
    %c1_228 = arith.constant 1 : index
    %c25_229 = arith.constant 25 : index
    %791 = memref.load %arg9[%c1_228, %c25_229] : memref<3x99xf32, #tpu.memory_space<smem>>
    %792 = vector.extract_strided_slice %735 {offsets = [0, 5], sizes = [8, 16], strides = [1, 1]} : vector<8x22xf32> to vector<8x16xf32>
    %793 = vector.broadcast %791 : f32 to vector<8x16xf32>
    %794 = arith.mulf %793, %792 : vector<8x16xf32>
    %795 = arith.addf %790, %794 : vector<8x16xf32>
    %c1_230 = arith.constant 1 : index
    %c26_231 = arith.constant 26 : index
    %796 = memref.load %arg9[%c1_230, %c26_231] : memref<3x99xf32, #tpu.memory_space<smem>>
    %797 = vector.extract_strided_slice %734 {offsets = [0, 6], sizes = [8, 16], strides = [1, 1]} : vector<8x22xf32> to vector<8x16xf32>
    %798 = vector.broadcast %796 : f32 to vector<8x16xf32>
    %799 = arith.mulf %798, %797 : vector<8x16xf32>
    %800 = arith.addf %795, %799 : vector<8x16xf32>
    %c1_232 = arith.constant 1 : index
    %c27_233 = arith.constant 27 : index
    %801 = memref.load %arg9[%c1_232, %c27_233] : memref<3x99xf32, #tpu.memory_space<smem>>
    %802 = vector.extract_strided_slice %735 {offsets = [0, 6], sizes = [8, 16], strides = [1, 1]} : vector<8x22xf32> to vector<8x16xf32>
    %803 = vector.broadcast %801 : f32 to vector<8x16xf32>
    %804 = arith.mulf %803, %802 : vector<8x16xf32>
    %805 = arith.addf %800, %804 : vector<8x16xf32>
    %806 = vector.extract_strided_slice %658 {offsets = [2, 0], sizes = [8, 22], strides = [1, 1]} : vector<14x22xf32> to vector<8x22xf32>
    %807 = vector.extract_strided_slice %660 {offsets = [2, 0], sizes = [8, 22], strides = [1, 1]} : vector<14x22xf32> to vector<8x22xf32>
    %c1_234 = arith.constant 1 : index
    %c28_235 = arith.constant 28 : index
    %808 = memref.load %arg9[%c1_234, %c28_235] : memref<3x99xf32, #tpu.memory_space<smem>>
    %809 = vector.extract_strided_slice %806 {offsets = [0, 0], sizes = [8, 16], strides = [1, 1]} : vector<8x22xf32> to vector<8x16xf32>
    %810 = vector.broadcast %808 : f32 to vector<8x16xf32>
    %811 = arith.mulf %810, %809 : vector<8x16xf32>
    %812 = arith.addf %805, %811 : vector<8x16xf32>
    %c1_236 = arith.constant 1 : index
    %c29_237 = arith.constant 29 : index
    %813 = memref.load %arg9[%c1_236, %c29_237] : memref<3x99xf32, #tpu.memory_space<smem>>
    %814 = vector.extract_strided_slice %807 {offsets = [0, 0], sizes = [8, 16], strides = [1, 1]} : vector<8x22xf32> to vector<8x16xf32>
    %815 = vector.broadcast %813 : f32 to vector<8x16xf32>
    %816 = arith.mulf %815, %814 : vector<8x16xf32>
    %817 = arith.addf %812, %816 : vector<8x16xf32>
    %c1_238 = arith.constant 1 : index
    %c30_239 = arith.constant 30 : index
    %818 = memref.load %arg9[%c1_238, %c30_239] : memref<3x99xf32, #tpu.memory_space<smem>>
    %819 = vector.extract_strided_slice %806 {offsets = [0, 1], sizes = [8, 16], strides = [1, 1]} : vector<8x22xf32> to vector<8x16xf32>
    %820 = vector.broadcast %818 : f32 to vector<8x16xf32>
    %821 = arith.mulf %820, %819 : vector<8x16xf32>
    %822 = arith.addf %817, %821 : vector<8x16xf32>
    %c1_240 = arith.constant 1 : index
    %c31_241 = arith.constant 31 : index
    %823 = memref.load %arg9[%c1_240, %c31_241] : memref<3x99xf32, #tpu.memory_space<smem>>
    %824 = vector.extract_strided_slice %807 {offsets = [0, 1], sizes = [8, 16], strides = [1, 1]} : vector<8x22xf32> to vector<8x16xf32>
    %825 = vector.broadcast %823 : f32 to vector<8x16xf32>
    %826 = arith.mulf %825, %824 : vector<8x16xf32>
    %827 = arith.addf %822, %826 : vector<8x16xf32>
    %c1_242 = arith.constant 1 : index
    %c32_243 = arith.constant 32 : index
    %828 = memref.load %arg9[%c1_242, %c32_243] : memref<3x99xf32, #tpu.memory_space<smem>>
    %829 = vector.extract_strided_slice %806 {offsets = [0, 2], sizes = [8, 16], strides = [1, 1]} : vector<8x22xf32> to vector<8x16xf32>
    %830 = vector.broadcast %828 : f32 to vector<8x16xf32>
    %831 = arith.mulf %830, %829 : vector<8x16xf32>
    %832 = arith.addf %827, %831 : vector<8x16xf32>
    %c1_244 = arith.constant 1 : index
    %c33_245 = arith.constant 33 : index
    %833 = memref.load %arg9[%c1_244, %c33_245] : memref<3x99xf32, #tpu.memory_space<smem>>
    %834 = vector.extract_strided_slice %807 {offsets = [0, 2], sizes = [8, 16], strides = [1, 1]} : vector<8x22xf32> to vector<8x16xf32>
    %835 = vector.broadcast %833 : f32 to vector<8x16xf32>
    %836 = arith.mulf %835, %834 : vector<8x16xf32>
    %837 = arith.addf %832, %836 : vector<8x16xf32>
    %c1_246 = arith.constant 1 : index
    %c34_247 = arith.constant 34 : index
    %838 = memref.load %arg9[%c1_246, %c34_247] : memref<3x99xf32, #tpu.memory_space<smem>>
    %839 = vector.extract_strided_slice %806 {offsets = [0, 3], sizes = [8, 16], strides = [1, 1]} : vector<8x22xf32> to vector<8x16xf32>
    %840 = vector.broadcast %838 : f32 to vector<8x16xf32>
    %841 = arith.mulf %840, %839 : vector<8x16xf32>
    %842 = arith.addf %837, %841 : vector<8x16xf32>
    %c1_248 = arith.constant 1 : index
    %c35_249 = arith.constant 35 : index
    %843 = memref.load %arg9[%c1_248, %c35_249] : memref<3x99xf32, #tpu.memory_space<smem>>
    %844 = vector.extract_strided_slice %807 {offsets = [0, 3], sizes = [8, 16], strides = [1, 1]} : vector<8x22xf32> to vector<8x16xf32>
    %845 = vector.broadcast %843 : f32 to vector<8x16xf32>
    %846 = arith.mulf %845, %844 : vector<8x16xf32>
    %847 = arith.addf %842, %846 : vector<8x16xf32>
    %c1_250 = arith.constant 1 : index
    %c36_251 = arith.constant 36 : index
    %848 = memref.load %arg9[%c1_250, %c36_251] : memref<3x99xf32, #tpu.memory_space<smem>>
    %849 = vector.extract_strided_slice %806 {offsets = [0, 4], sizes = [8, 16], strides = [1, 1]} : vector<8x22xf32> to vector<8x16xf32>
    %850 = vector.broadcast %848 : f32 to vector<8x16xf32>
    %851 = arith.mulf %850, %849 : vector<8x16xf32>
    %852 = arith.addf %847, %851 : vector<8x16xf32>
    %c1_252 = arith.constant 1 : index
    %c37_253 = arith.constant 37 : index
    %853 = memref.load %arg9[%c1_252, %c37_253] : memref<3x99xf32, #tpu.memory_space<smem>>
    %854 = vector.extract_strided_slice %807 {offsets = [0, 4], sizes = [8, 16], strides = [1, 1]} : vector<8x22xf32> to vector<8x16xf32>
    %855 = vector.broadcast %853 : f32 to vector<8x16xf32>
    %856 = arith.mulf %855, %854 : vector<8x16xf32>
    %857 = arith.addf %852, %856 : vector<8x16xf32>
    %c1_254 = arith.constant 1 : index
    %c38_255 = arith.constant 38 : index
    %858 = memref.load %arg9[%c1_254, %c38_255] : memref<3x99xf32, #tpu.memory_space<smem>>
    %859 = vector.extract_strided_slice %806 {offsets = [0, 5], sizes = [8, 16], strides = [1, 1]} : vector<8x22xf32> to vector<8x16xf32>
    %860 = vector.broadcast %858 : f32 to vector<8x16xf32>
    %861 = arith.mulf %860, %859 : vector<8x16xf32>
    %862 = arith.addf %857, %861 : vector<8x16xf32>
    %c1_256 = arith.constant 1 : index
    %c39_257 = arith.constant 39 : index
    %863 = memref.load %arg9[%c1_256, %c39_257] : memref<3x99xf32, #tpu.memory_space<smem>>
    %864 = vector.extract_strided_slice %807 {offsets = [0, 5], sizes = [8, 16], strides = [1, 1]} : vector<8x22xf32> to vector<8x16xf32>
    %865 = vector.broadcast %863 : f32 to vector<8x16xf32>
    %866 = arith.mulf %865, %864 : vector<8x16xf32>
    %867 = arith.addf %862, %866 : vector<8x16xf32>
    %c1_258 = arith.constant 1 : index
    %c40_259 = arith.constant 40 : index
    %868 = memref.load %arg9[%c1_258, %c40_259] : memref<3x99xf32, #tpu.memory_space<smem>>
    %869 = vector.extract_strided_slice %806 {offsets = [0, 6], sizes = [8, 16], strides = [1, 1]} : vector<8x22xf32> to vector<8x16xf32>
    %870 = vector.broadcast %868 : f32 to vector<8x16xf32>
    %871 = arith.mulf %870, %869 : vector<8x16xf32>
    %872 = arith.addf %867, %871 : vector<8x16xf32>
    %c1_260 = arith.constant 1 : index
    %c41_261 = arith.constant 41 : index
    %873 = memref.load %arg9[%c1_260, %c41_261] : memref<3x99xf32, #tpu.memory_space<smem>>
    %874 = vector.extract_strided_slice %807 {offsets = [0, 6], sizes = [8, 16], strides = [1, 1]} : vector<8x22xf32> to vector<8x16xf32>
    %875 = vector.broadcast %873 : f32 to vector<8x16xf32>
    %876 = arith.mulf %875, %874 : vector<8x16xf32>
    %877 = arith.addf %872, %876 : vector<8x16xf32>
    %878 = vector.extract_strided_slice %658 {offsets = [3, 0], sizes = [8, 22], strides = [1, 1]} : vector<14x22xf32> to vector<8x22xf32>
    %879 = vector.extract_strided_slice %660 {offsets = [3, 0], sizes = [8, 22], strides = [1, 1]} : vector<14x22xf32> to vector<8x22xf32>
    %c1_262 = arith.constant 1 : index
    %c42_263 = arith.constant 42 : index
    %880 = memref.load %arg9[%c1_262, %c42_263] : memref<3x99xf32, #tpu.memory_space<smem>>
    %881 = vector.extract_strided_slice %878 {offsets = [0, 0], sizes = [8, 16], strides = [1, 1]} : vector<8x22xf32> to vector<8x16xf32>
    %882 = vector.broadcast %880 : f32 to vector<8x16xf32>
    %883 = arith.mulf %882, %881 : vector<8x16xf32>
    %884 = arith.addf %877, %883 : vector<8x16xf32>
    %c1_264 = arith.constant 1 : index
    %c43_265 = arith.constant 43 : index
    %885 = memref.load %arg9[%c1_264, %c43_265] : memref<3x99xf32, #tpu.memory_space<smem>>
    %886 = vector.extract_strided_slice %879 {offsets = [0, 0], sizes = [8, 16], strides = [1, 1]} : vector<8x22xf32> to vector<8x16xf32>
    %887 = vector.broadcast %885 : f32 to vector<8x16xf32>
    %888 = arith.mulf %887, %886 : vector<8x16xf32>
    %889 = arith.addf %884, %888 : vector<8x16xf32>
    %c1_266 = arith.constant 1 : index
    %c44_267 = arith.constant 44 : index
    %890 = memref.load %arg9[%c1_266, %c44_267] : memref<3x99xf32, #tpu.memory_space<smem>>
    %891 = vector.extract_strided_slice %878 {offsets = [0, 1], sizes = [8, 16], strides = [1, 1]} : vector<8x22xf32> to vector<8x16xf32>
    %892 = vector.broadcast %890 : f32 to vector<8x16xf32>
    %893 = arith.mulf %892, %891 : vector<8x16xf32>
    %894 = arith.addf %889, %893 : vector<8x16xf32>
    %c1_268 = arith.constant 1 : index
    %c45_269 = arith.constant 45 : index
    %895 = memref.load %arg9[%c1_268, %c45_269] : memref<3x99xf32, #tpu.memory_space<smem>>
    %896 = vector.extract_strided_slice %879 {offsets = [0, 1], sizes = [8, 16], strides = [1, 1]} : vector<8x22xf32> to vector<8x16xf32>
    %897 = vector.broadcast %895 : f32 to vector<8x16xf32>
    %898 = arith.mulf %897, %896 : vector<8x16xf32>
    %899 = arith.addf %894, %898 : vector<8x16xf32>
    %c1_270 = arith.constant 1 : index
    %c46_271 = arith.constant 46 : index
    %900 = memref.load %arg9[%c1_270, %c46_271] : memref<3x99xf32, #tpu.memory_space<smem>>
    %901 = vector.extract_strided_slice %878 {offsets = [0, 2], sizes = [8, 16], strides = [1, 1]} : vector<8x22xf32> to vector<8x16xf32>
    %902 = vector.broadcast %900 : f32 to vector<8x16xf32>
    %903 = arith.mulf %902, %901 : vector<8x16xf32>
    %904 = arith.addf %899, %903 : vector<8x16xf32>
    %c1_272 = arith.constant 1 : index
    %c47_273 = arith.constant 47 : index
    %905 = memref.load %arg9[%c1_272, %c47_273] : memref<3x99xf32, #tpu.memory_space<smem>>
    %906 = vector.extract_strided_slice %879 {offsets = [0, 2], sizes = [8, 16], strides = [1, 1]} : vector<8x22xf32> to vector<8x16xf32>
    %907 = vector.broadcast %905 : f32 to vector<8x16xf32>
    %908 = arith.mulf %907, %906 : vector<8x16xf32>
    %909 = arith.addf %904, %908 : vector<8x16xf32>
    %c1_274 = arith.constant 1 : index
    %c48_275 = arith.constant 48 : index
    %910 = memref.load %arg9[%c1_274, %c48_275] : memref<3x99xf32, #tpu.memory_space<smem>>
    %911 = vector.extract_strided_slice %878 {offsets = [0, 3], sizes = [8, 16], strides = [1, 1]} : vector<8x22xf32> to vector<8x16xf32>
    %912 = vector.broadcast %910 : f32 to vector<8x16xf32>
    %913 = arith.mulf %912, %911 : vector<8x16xf32>
    %914 = arith.addf %909, %913 : vector<8x16xf32>
    %c1_276 = arith.constant 1 : index
    %c49_277 = arith.constant 49 : index
    %915 = memref.load %arg9[%c1_276, %c49_277] : memref<3x99xf32, #tpu.memory_space<smem>>
    %916 = vector.extract_strided_slice %879 {offsets = [0, 3], sizes = [8, 16], strides = [1, 1]} : vector<8x22xf32> to vector<8x16xf32>
    %917 = vector.broadcast %915 : f32 to vector<8x16xf32>
    %918 = arith.mulf %917, %916 : vector<8x16xf32>
    %919 = arith.addf %914, %918 : vector<8x16xf32>
    %c1_278 = arith.constant 1 : index
    %c50_279 = arith.constant 50 : index
    %920 = memref.load %arg9[%c1_278, %c50_279] : memref<3x99xf32, #tpu.memory_space<smem>>
    %921 = vector.extract_strided_slice %878 {offsets = [0, 4], sizes = [8, 16], strides = [1, 1]} : vector<8x22xf32> to vector<8x16xf32>
    %922 = vector.broadcast %920 : f32 to vector<8x16xf32>
    %923 = arith.mulf %922, %921 : vector<8x16xf32>
    %924 = arith.addf %919, %923 : vector<8x16xf32>
    %c1_280 = arith.constant 1 : index
    %c51_281 = arith.constant 51 : index
    %925 = memref.load %arg9[%c1_280, %c51_281] : memref<3x99xf32, #tpu.memory_space<smem>>
    %926 = vector.extract_strided_slice %879 {offsets = [0, 4], sizes = [8, 16], strides = [1, 1]} : vector<8x22xf32> to vector<8x16xf32>
    %927 = vector.broadcast %925 : f32 to vector<8x16xf32>
    %928 = arith.mulf %927, %926 : vector<8x16xf32>
    %929 = arith.addf %924, %928 : vector<8x16xf32>
    %c1_282 = arith.constant 1 : index
    %c52_283 = arith.constant 52 : index
    %930 = memref.load %arg9[%c1_282, %c52_283] : memref<3x99xf32, #tpu.memory_space<smem>>
    %931 = vector.extract_strided_slice %878 {offsets = [0, 5], sizes = [8, 16], strides = [1, 1]} : vector<8x22xf32> to vector<8x16xf32>
    %932 = vector.broadcast %930 : f32 to vector<8x16xf32>
    %933 = arith.mulf %932, %931 : vector<8x16xf32>
    %934 = arith.addf %929, %933 : vector<8x16xf32>
    %c1_284 = arith.constant 1 : index
    %c53_285 = arith.constant 53 : index
    %935 = memref.load %arg9[%c1_284, %c53_285] : memref<3x99xf32, #tpu.memory_space<smem>>
    %936 = vector.extract_strided_slice %879 {offsets = [0, 5], sizes = [8, 16], strides = [1, 1]} : vector<8x22xf32> to vector<8x16xf32>
    %937 = vector.broadcast %935 : f32 to vector<8x16xf32>
    %938 = arith.mulf %937, %936 : vector<8x16xf32>
    %939 = arith.addf %934, %938 : vector<8x16xf32>
    %c1_286 = arith.constant 1 : index
    %c54_287 = arith.constant 54 : index
    %940 = memref.load %arg9[%c1_286, %c54_287] : memref<3x99xf32, #tpu.memory_space<smem>>
    %941 = vector.extract_strided_slice %878 {offsets = [0, 6], sizes = [8, 16], strides = [1, 1]} : vector<8x22xf32> to vector<8x16xf32>
    %942 = vector.broadcast %940 : f32 to vector<8x16xf32>
    %943 = arith.mulf %942, %941 : vector<8x16xf32>
    %944 = arith.addf %939, %943 : vector<8x16xf32>
    %c1_288 = arith.constant 1 : index
    %c55_289 = arith.constant 55 : index
    %945 = memref.load %arg9[%c1_288, %c55_289] : memref<3x99xf32, #tpu.memory_space<smem>>
    %946 = vector.extract_strided_slice %879 {offsets = [0, 6], sizes = [8, 16], strides = [1, 1]} : vector<8x22xf32> to vector<8x16xf32>
    %947 = vector.broadcast %945 : f32 to vector<8x16xf32>
    %948 = arith.mulf %947, %946 : vector<8x16xf32>
    %949 = arith.addf %944, %948 : vector<8x16xf32>
    %950 = vector.extract_strided_slice %658 {offsets = [4, 0], sizes = [8, 22], strides = [1, 1]} : vector<14x22xf32> to vector<8x22xf32>
    %951 = vector.extract_strided_slice %660 {offsets = [4, 0], sizes = [8, 22], strides = [1, 1]} : vector<14x22xf32> to vector<8x22xf32>
    %c1_290 = arith.constant 1 : index
    %c56_291 = arith.constant 56 : index
    %952 = memref.load %arg9[%c1_290, %c56_291] : memref<3x99xf32, #tpu.memory_space<smem>>
    %953 = vector.extract_strided_slice %950 {offsets = [0, 0], sizes = [8, 16], strides = [1, 1]} : vector<8x22xf32> to vector<8x16xf32>
    %954 = vector.broadcast %952 : f32 to vector<8x16xf32>
    %955 = arith.mulf %954, %953 : vector<8x16xf32>
    %956 = arith.addf %949, %955 : vector<8x16xf32>
    %c1_292 = arith.constant 1 : index
    %c57_293 = arith.constant 57 : index
    %957 = memref.load %arg9[%c1_292, %c57_293] : memref<3x99xf32, #tpu.memory_space<smem>>
    %958 = vector.extract_strided_slice %951 {offsets = [0, 0], sizes = [8, 16], strides = [1, 1]} : vector<8x22xf32> to vector<8x16xf32>
    %959 = vector.broadcast %957 : f32 to vector<8x16xf32>
    %960 = arith.mulf %959, %958 : vector<8x16xf32>
    %961 = arith.addf %956, %960 : vector<8x16xf32>
    %c1_294 = arith.constant 1 : index
    %c58_295 = arith.constant 58 : index
    %962 = memref.load %arg9[%c1_294, %c58_295] : memref<3x99xf32, #tpu.memory_space<smem>>
    %963 = vector.extract_strided_slice %950 {offsets = [0, 1], sizes = [8, 16], strides = [1, 1]} : vector<8x22xf32> to vector<8x16xf32>
    %964 = vector.broadcast %962 : f32 to vector<8x16xf32>
    %965 = arith.mulf %964, %963 : vector<8x16xf32>
    %966 = arith.addf %961, %965 : vector<8x16xf32>
    %c1_296 = arith.constant 1 : index
    %c59_297 = arith.constant 59 : index
    %967 = memref.load %arg9[%c1_296, %c59_297] : memref<3x99xf32, #tpu.memory_space<smem>>
    %968 = vector.extract_strided_slice %951 {offsets = [0, 1], sizes = [8, 16], strides = [1, 1]} : vector<8x22xf32> to vector<8x16xf32>
    %969 = vector.broadcast %967 : f32 to vector<8x16xf32>
    %970 = arith.mulf %969, %968 : vector<8x16xf32>
    %971 = arith.addf %966, %970 : vector<8x16xf32>
    %c1_298 = arith.constant 1 : index
    %c60_299 = arith.constant 60 : index
    %972 = memref.load %arg9[%c1_298, %c60_299] : memref<3x99xf32, #tpu.memory_space<smem>>
    %973 = vector.extract_strided_slice %950 {offsets = [0, 2], sizes = [8, 16], strides = [1, 1]} : vector<8x22xf32> to vector<8x16xf32>
    %974 = vector.broadcast %972 : f32 to vector<8x16xf32>
    %975 = arith.mulf %974, %973 : vector<8x16xf32>
    %976 = arith.addf %971, %975 : vector<8x16xf32>
    %c1_300 = arith.constant 1 : index
    %c61_301 = arith.constant 61 : index
    %977 = memref.load %arg9[%c1_300, %c61_301] : memref<3x99xf32, #tpu.memory_space<smem>>
    %978 = vector.extract_strided_slice %951 {offsets = [0, 2], sizes = [8, 16], strides = [1, 1]} : vector<8x22xf32> to vector<8x16xf32>
    %979 = vector.broadcast %977 : f32 to vector<8x16xf32>
    %980 = arith.mulf %979, %978 : vector<8x16xf32>
    %981 = arith.addf %976, %980 : vector<8x16xf32>
    %c1_302 = arith.constant 1 : index
    %c62_303 = arith.constant 62 : index
    %982 = memref.load %arg9[%c1_302, %c62_303] : memref<3x99xf32, #tpu.memory_space<smem>>
    %983 = vector.extract_strided_slice %950 {offsets = [0, 3], sizes = [8, 16], strides = [1, 1]} : vector<8x22xf32> to vector<8x16xf32>
    %984 = vector.broadcast %982 : f32 to vector<8x16xf32>
    %985 = arith.mulf %984, %983 : vector<8x16xf32>
    %986 = arith.addf %981, %985 : vector<8x16xf32>
    %c1_304 = arith.constant 1 : index
    %c63_305 = arith.constant 63 : index
    %987 = memref.load %arg9[%c1_304, %c63_305] : memref<3x99xf32, #tpu.memory_space<smem>>
    %988 = vector.extract_strided_slice %951 {offsets = [0, 3], sizes = [8, 16], strides = [1, 1]} : vector<8x22xf32> to vector<8x16xf32>
    %989 = vector.broadcast %987 : f32 to vector<8x16xf32>
    %990 = arith.mulf %989, %988 : vector<8x16xf32>
    %991 = arith.addf %986, %990 : vector<8x16xf32>
    %c1_306 = arith.constant 1 : index
    %c64_307 = arith.constant 64 : index
    %992 = memref.load %arg9[%c1_306, %c64_307] : memref<3x99xf32, #tpu.memory_space<smem>>
    %993 = vector.extract_strided_slice %950 {offsets = [0, 4], sizes = [8, 16], strides = [1, 1]} : vector<8x22xf32> to vector<8x16xf32>
    %994 = vector.broadcast %992 : f32 to vector<8x16xf32>
    %995 = arith.mulf %994, %993 : vector<8x16xf32>
    %996 = arith.addf %991, %995 : vector<8x16xf32>
    %c1_308 = arith.constant 1 : index
    %c65_309 = arith.constant 65 : index
    %997 = memref.load %arg9[%c1_308, %c65_309] : memref<3x99xf32, #tpu.memory_space<smem>>
    %998 = vector.extract_strided_slice %951 {offsets = [0, 4], sizes = [8, 16], strides = [1, 1]} : vector<8x22xf32> to vector<8x16xf32>
    %999 = vector.broadcast %997 : f32 to vector<8x16xf32>
    %1000 = arith.mulf %999, %998 : vector<8x16xf32>
    %1001 = arith.addf %996, %1000 : vector<8x16xf32>
    %c1_310 = arith.constant 1 : index
    %c66_311 = arith.constant 66 : index
    %1002 = memref.load %arg9[%c1_310, %c66_311] : memref<3x99xf32, #tpu.memory_space<smem>>
    %1003 = vector.extract_strided_slice %950 {offsets = [0, 5], sizes = [8, 16], strides = [1, 1]} : vector<8x22xf32> to vector<8x16xf32>
    %1004 = vector.broadcast %1002 : f32 to vector<8x16xf32>
    %1005 = arith.mulf %1004, %1003 : vector<8x16xf32>
    %1006 = arith.addf %1001, %1005 : vector<8x16xf32>
    %c1_312 = arith.constant 1 : index
    %c67_313 = arith.constant 67 : index
    %1007 = memref.load %arg9[%c1_312, %c67_313] : memref<3x99xf32, #tpu.memory_space<smem>>
    %1008 = vector.extract_strided_slice %951 {offsets = [0, 5], sizes = [8, 16], strides = [1, 1]} : vector<8x22xf32> to vector<8x16xf32>
    %1009 = vector.broadcast %1007 : f32 to vector<8x16xf32>
    %1010 = arith.mulf %1009, %1008 : vector<8x16xf32>
    %1011 = arith.addf %1006, %1010 : vector<8x16xf32>
    %c1_314 = arith.constant 1 : index
    %c68_315 = arith.constant 68 : index
    %1012 = memref.load %arg9[%c1_314, %c68_315] : memref<3x99xf32, #tpu.memory_space<smem>>
    %1013 = vector.extract_strided_slice %950 {offsets = [0, 6], sizes = [8, 16], strides = [1, 1]} : vector<8x22xf32> to vector<8x16xf32>
    %1014 = vector.broadcast %1012 : f32 to vector<8x16xf32>
    %1015 = arith.mulf %1014, %1013 : vector<8x16xf32>
    %1016 = arith.addf %1011, %1015 : vector<8x16xf32>
    %c1_316 = arith.constant 1 : index
    %c69_317 = arith.constant 69 : index
    %1017 = memref.load %arg9[%c1_316, %c69_317] : memref<3x99xf32, #tpu.memory_space<smem>>
    %1018 = vector.extract_strided_slice %951 {offsets = [0, 6], sizes = [8, 16], strides = [1, 1]} : vector<8x22xf32> to vector<8x16xf32>
    %1019 = vector.broadcast %1017 : f32 to vector<8x16xf32>
    %1020 = arith.mulf %1019, %1018 : vector<8x16xf32>
    %1021 = arith.addf %1016, %1020 : vector<8x16xf32>
    %1022 = vector.extract_strided_slice %658 {offsets = [5, 0], sizes = [8, 22], strides = [1, 1]} : vector<14x22xf32> to vector<8x22xf32>
    %1023 = vector.extract_strided_slice %660 {offsets = [5, 0], sizes = [8, 22], strides = [1, 1]} : vector<14x22xf32> to vector<8x22xf32>
    %c1_318 = arith.constant 1 : index
    %c70_319 = arith.constant 70 : index
    %1024 = memref.load %arg9[%c1_318, %c70_319] : memref<3x99xf32, #tpu.memory_space<smem>>
    %1025 = vector.extract_strided_slice %1022 {offsets = [0, 0], sizes = [8, 16], strides = [1, 1]} : vector<8x22xf32> to vector<8x16xf32>
    %1026 = vector.broadcast %1024 : f32 to vector<8x16xf32>
    %1027 = arith.mulf %1026, %1025 : vector<8x16xf32>
    %1028 = arith.addf %1021, %1027 : vector<8x16xf32>
    %c1_320 = arith.constant 1 : index
    %c71_321 = arith.constant 71 : index
    %1029 = memref.load %arg9[%c1_320, %c71_321] : memref<3x99xf32, #tpu.memory_space<smem>>
    %1030 = vector.extract_strided_slice %1023 {offsets = [0, 0], sizes = [8, 16], strides = [1, 1]} : vector<8x22xf32> to vector<8x16xf32>
    %1031 = vector.broadcast %1029 : f32 to vector<8x16xf32>
    %1032 = arith.mulf %1031, %1030 : vector<8x16xf32>
    %1033 = arith.addf %1028, %1032 : vector<8x16xf32>
    %c1_322 = arith.constant 1 : index
    %c72_323 = arith.constant 72 : index
    %1034 = memref.load %arg9[%c1_322, %c72_323] : memref<3x99xf32, #tpu.memory_space<smem>>
    %1035 = vector.extract_strided_slice %1022 {offsets = [0, 1], sizes = [8, 16], strides = [1, 1]} : vector<8x22xf32> to vector<8x16xf32>
    %1036 = vector.broadcast %1034 : f32 to vector<8x16xf32>
    %1037 = arith.mulf %1036, %1035 : vector<8x16xf32>
    %1038 = arith.addf %1033, %1037 : vector<8x16xf32>
    %c1_324 = arith.constant 1 : index
    %c73_325 = arith.constant 73 : index
    %1039 = memref.load %arg9[%c1_324, %c73_325] : memref<3x99xf32, #tpu.memory_space<smem>>
    %1040 = vector.extract_strided_slice %1023 {offsets = [0, 1], sizes = [8, 16], strides = [1, 1]} : vector<8x22xf32> to vector<8x16xf32>
    %1041 = vector.broadcast %1039 : f32 to vector<8x16xf32>
    %1042 = arith.mulf %1041, %1040 : vector<8x16xf32>
    %1043 = arith.addf %1038, %1042 : vector<8x16xf32>
    %c1_326 = arith.constant 1 : index
    %c74_327 = arith.constant 74 : index
    %1044 = memref.load %arg9[%c1_326, %c74_327] : memref<3x99xf32, #tpu.memory_space<smem>>
    %1045 = vector.extract_strided_slice %1022 {offsets = [0, 2], sizes = [8, 16], strides = [1, 1]} : vector<8x22xf32> to vector<8x16xf32>
    %1046 = vector.broadcast %1044 : f32 to vector<8x16xf32>
    %1047 = arith.mulf %1046, %1045 : vector<8x16xf32>
    %1048 = arith.addf %1043, %1047 : vector<8x16xf32>
    %c1_328 = arith.constant 1 : index
    %c75_329 = arith.constant 75 : index
    %1049 = memref.load %arg9[%c1_328, %c75_329] : memref<3x99xf32, #tpu.memory_space<smem>>
    %1050 = vector.extract_strided_slice %1023 {offsets = [0, 2], sizes = [8, 16], strides = [1, 1]} : vector<8x22xf32> to vector<8x16xf32>
    %1051 = vector.broadcast %1049 : f32 to vector<8x16xf32>
    %1052 = arith.mulf %1051, %1050 : vector<8x16xf32>
    %1053 = arith.addf %1048, %1052 : vector<8x16xf32>
    %c1_330 = arith.constant 1 : index
    %c76_331 = arith.constant 76 : index
    %1054 = memref.load %arg9[%c1_330, %c76_331] : memref<3x99xf32, #tpu.memory_space<smem>>
    %1055 = vector.extract_strided_slice %1022 {offsets = [0, 3], sizes = [8, 16], strides = [1, 1]} : vector<8x22xf32> to vector<8x16xf32>
    %1056 = vector.broadcast %1054 : f32 to vector<8x16xf32>
    %1057 = arith.mulf %1056, %1055 : vector<8x16xf32>
    %1058 = arith.addf %1053, %1057 : vector<8x16xf32>
    %c1_332 = arith.constant 1 : index
    %c77_333 = arith.constant 77 : index
    %1059 = memref.load %arg9[%c1_332, %c77_333] : memref<3x99xf32, #tpu.memory_space<smem>>
    %1060 = vector.extract_strided_slice %1023 {offsets = [0, 3], sizes = [8, 16], strides = [1, 1]} : vector<8x22xf32> to vector<8x16xf32>
    %1061 = vector.broadcast %1059 : f32 to vector<8x16xf32>
    %1062 = arith.mulf %1061, %1060 : vector<8x16xf32>
    %1063 = arith.addf %1058, %1062 : vector<8x16xf32>
    %c1_334 = arith.constant 1 : index
    %c78_335 = arith.constant 78 : index
    %1064 = memref.load %arg9[%c1_334, %c78_335] : memref<3x99xf32, #tpu.memory_space<smem>>
    %1065 = vector.extract_strided_slice %1022 {offsets = [0, 4], sizes = [8, 16], strides = [1, 1]} : vector<8x22xf32> to vector<8x16xf32>
    %1066 = vector.broadcast %1064 : f32 to vector<8x16xf32>
    %1067 = arith.mulf %1066, %1065 : vector<8x16xf32>
    %1068 = arith.addf %1063, %1067 : vector<8x16xf32>
    %c1_336 = arith.constant 1 : index
    %c79_337 = arith.constant 79 : index
    %1069 = memref.load %arg9[%c1_336, %c79_337] : memref<3x99xf32, #tpu.memory_space<smem>>
    %1070 = vector.extract_strided_slice %1023 {offsets = [0, 4], sizes = [8, 16], strides = [1, 1]} : vector<8x22xf32> to vector<8x16xf32>
    %1071 = vector.broadcast %1069 : f32 to vector<8x16xf32>
    %1072 = arith.mulf %1071, %1070 : vector<8x16xf32>
    %1073 = arith.addf %1068, %1072 : vector<8x16xf32>
    %c1_338 = arith.constant 1 : index
    %c80_339 = arith.constant 80 : index
    %1074 = memref.load %arg9[%c1_338, %c80_339] : memref<3x99xf32, #tpu.memory_space<smem>>
    %1075 = vector.extract_strided_slice %1022 {offsets = [0, 5], sizes = [8, 16], strides = [1, 1]} : vector<8x22xf32> to vector<8x16xf32>
    %1076 = vector.broadcast %1074 : f32 to vector<8x16xf32>
    %1077 = arith.mulf %1076, %1075 : vector<8x16xf32>
    %1078 = arith.addf %1073, %1077 : vector<8x16xf32>
    %c1_340 = arith.constant 1 : index
    %c81_341 = arith.constant 81 : index
    %1079 = memref.load %arg9[%c1_340, %c81_341] : memref<3x99xf32, #tpu.memory_space<smem>>
    %1080 = vector.extract_strided_slice %1023 {offsets = [0, 5], sizes = [8, 16], strides = [1, 1]} : vector<8x22xf32> to vector<8x16xf32>
    %1081 = vector.broadcast %1079 : f32 to vector<8x16xf32>
    %1082 = arith.mulf %1081, %1080 : vector<8x16xf32>
    %1083 = arith.addf %1078, %1082 : vector<8x16xf32>
    %c1_342 = arith.constant 1 : index
    %c82_343 = arith.constant 82 : index
    %1084 = memref.load %arg9[%c1_342, %c82_343] : memref<3x99xf32, #tpu.memory_space<smem>>
    %1085 = vector.extract_strided_slice %1022 {offsets = [0, 6], sizes = [8, 16], strides = [1, 1]} : vector<8x22xf32> to vector<8x16xf32>
    %1086 = vector.broadcast %1084 : f32 to vector<8x16xf32>
    %1087 = arith.mulf %1086, %1085 : vector<8x16xf32>
    %1088 = arith.addf %1083, %1087 : vector<8x16xf32>
    %c1_344 = arith.constant 1 : index
    %c83_345 = arith.constant 83 : index
    %1089 = memref.load %arg9[%c1_344, %c83_345] : memref<3x99xf32, #tpu.memory_space<smem>>
    %1090 = vector.extract_strided_slice %1023 {offsets = [0, 6], sizes = [8, 16], strides = [1, 1]} : vector<8x22xf32> to vector<8x16xf32>
    %1091 = vector.broadcast %1089 : f32 to vector<8x16xf32>
    %1092 = arith.mulf %1091, %1090 : vector<8x16xf32>
    %1093 = arith.addf %1088, %1092 : vector<8x16xf32>
    %1094 = vector.extract_strided_slice %658 {offsets = [6, 0], sizes = [8, 22], strides = [1, 1]} : vector<14x22xf32> to vector<8x22xf32>
    %1095 = vector.extract_strided_slice %660 {offsets = [6, 0], sizes = [8, 22], strides = [1, 1]} : vector<14x22xf32> to vector<8x22xf32>
    %c1_346 = arith.constant 1 : index
    %c84_347 = arith.constant 84 : index
    %1096 = memref.load %arg9[%c1_346, %c84_347] : memref<3x99xf32, #tpu.memory_space<smem>>
    %1097 = vector.extract_strided_slice %1094 {offsets = [0, 0], sizes = [8, 16], strides = [1, 1]} : vector<8x22xf32> to vector<8x16xf32>
    %1098 = vector.broadcast %1096 : f32 to vector<8x16xf32>
    %1099 = arith.mulf %1098, %1097 : vector<8x16xf32>
    %1100 = arith.addf %1093, %1099 : vector<8x16xf32>
    %c1_348 = arith.constant 1 : index
    %c85_349 = arith.constant 85 : index
    %1101 = memref.load %arg9[%c1_348, %c85_349] : memref<3x99xf32, #tpu.memory_space<smem>>
    %1102 = vector.extract_strided_slice %1095 {offsets = [0, 0], sizes = [8, 16], strides = [1, 1]} : vector<8x22xf32> to vector<8x16xf32>
    %1103 = vector.broadcast %1101 : f32 to vector<8x16xf32>
    %1104 = arith.mulf %1103, %1102 : vector<8x16xf32>
    %1105 = arith.addf %1100, %1104 : vector<8x16xf32>
    %c1_350 = arith.constant 1 : index
    %c86_351 = arith.constant 86 : index
    %1106 = memref.load %arg9[%c1_350, %c86_351] : memref<3x99xf32, #tpu.memory_space<smem>>
    %1107 = vector.extract_strided_slice %1094 {offsets = [0, 1], sizes = [8, 16], strides = [1, 1]} : vector<8x22xf32> to vector<8x16xf32>
    %1108 = vector.broadcast %1106 : f32 to vector<8x16xf32>
    %1109 = arith.mulf %1108, %1107 : vector<8x16xf32>
    %1110 = arith.addf %1105, %1109 : vector<8x16xf32>
    %c1_352 = arith.constant 1 : index
    %c87_353 = arith.constant 87 : index
    %1111 = memref.load %arg9[%c1_352, %c87_353] : memref<3x99xf32, #tpu.memory_space<smem>>
    %1112 = vector.extract_strided_slice %1095 {offsets = [0, 1], sizes = [8, 16], strides = [1, 1]} : vector<8x22xf32> to vector<8x16xf32>
    %1113 = vector.broadcast %1111 : f32 to vector<8x16xf32>
    %1114 = arith.mulf %1113, %1112 : vector<8x16xf32>
    %1115 = arith.addf %1110, %1114 : vector<8x16xf32>
    %c1_354 = arith.constant 1 : index
    %c88_355 = arith.constant 88 : index
    %1116 = memref.load %arg9[%c1_354, %c88_355] : memref<3x99xf32, #tpu.memory_space<smem>>
    %1117 = vector.extract_strided_slice %1094 {offsets = [0, 2], sizes = [8, 16], strides = [1, 1]} : vector<8x22xf32> to vector<8x16xf32>
    %1118 = vector.broadcast %1116 : f32 to vector<8x16xf32>
    %1119 = arith.mulf %1118, %1117 : vector<8x16xf32>
    %1120 = arith.addf %1115, %1119 : vector<8x16xf32>
    %c1_356 = arith.constant 1 : index
    %c89_357 = arith.constant 89 : index
    %1121 = memref.load %arg9[%c1_356, %c89_357] : memref<3x99xf32, #tpu.memory_space<smem>>
    %1122 = vector.extract_strided_slice %1095 {offsets = [0, 2], sizes = [8, 16], strides = [1, 1]} : vector<8x22xf32> to vector<8x16xf32>
    %1123 = vector.broadcast %1121 : f32 to vector<8x16xf32>
    %1124 = arith.mulf %1123, %1122 : vector<8x16xf32>
    %1125 = arith.addf %1120, %1124 : vector<8x16xf32>
    %c1_358 = arith.constant 1 : index
    %c90_359 = arith.constant 90 : index
    %1126 = memref.load %arg9[%c1_358, %c90_359] : memref<3x99xf32, #tpu.memory_space<smem>>
    %1127 = vector.extract_strided_slice %1094 {offsets = [0, 3], sizes = [8, 16], strides = [1, 1]} : vector<8x22xf32> to vector<8x16xf32>
    %1128 = vector.broadcast %1126 : f32 to vector<8x16xf32>
    %1129 = arith.mulf %1128, %1127 : vector<8x16xf32>
    %1130 = arith.addf %1125, %1129 : vector<8x16xf32>
    %c1_360 = arith.constant 1 : index
    %c91_361 = arith.constant 91 : index
    %1131 = memref.load %arg9[%c1_360, %c91_361] : memref<3x99xf32, #tpu.memory_space<smem>>
    %1132 = vector.extract_strided_slice %1095 {offsets = [0, 3], sizes = [8, 16], strides = [1, 1]} : vector<8x22xf32> to vector<8x16xf32>
    %1133 = vector.broadcast %1131 : f32 to vector<8x16xf32>
    %1134 = arith.mulf %1133, %1132 : vector<8x16xf32>
    %1135 = arith.addf %1130, %1134 : vector<8x16xf32>
    %c1_362 = arith.constant 1 : index
    %c92_363 = arith.constant 92 : index
    %1136 = memref.load %arg9[%c1_362, %c92_363] : memref<3x99xf32, #tpu.memory_space<smem>>
    %1137 = vector.extract_strided_slice %1094 {offsets = [0, 4], sizes = [8, 16], strides = [1, 1]} : vector<8x22xf32> to vector<8x16xf32>
    %1138 = vector.broadcast %1136 : f32 to vector<8x16xf32>
    %1139 = arith.mulf %1138, %1137 : vector<8x16xf32>
    %1140 = arith.addf %1135, %1139 : vector<8x16xf32>
    %c1_364 = arith.constant 1 : index
    %c93_365 = arith.constant 93 : index
    %1141 = memref.load %arg9[%c1_364, %c93_365] : memref<3x99xf32, #tpu.memory_space<smem>>
    %1142 = vector.extract_strided_slice %1095 {offsets = [0, 4], sizes = [8, 16], strides = [1, 1]} : vector<8x22xf32> to vector<8x16xf32>
    %1143 = vector.broadcast %1141 : f32 to vector<8x16xf32>
    %1144 = arith.mulf %1143, %1142 : vector<8x16xf32>
    %1145 = arith.addf %1140, %1144 : vector<8x16xf32>
    %c1_366 = arith.constant 1 : index
    %c94_367 = arith.constant 94 : index
    %1146 = memref.load %arg9[%c1_366, %c94_367] : memref<3x99xf32, #tpu.memory_space<smem>>
    %1147 = vector.extract_strided_slice %1094 {offsets = [0, 5], sizes = [8, 16], strides = [1, 1]} : vector<8x22xf32> to vector<8x16xf32>
    %1148 = vector.broadcast %1146 : f32 to vector<8x16xf32>
    %1149 = arith.mulf %1148, %1147 : vector<8x16xf32>
    %1150 = arith.addf %1145, %1149 : vector<8x16xf32>
    %c1_368 = arith.constant 1 : index
    %c95_369 = arith.constant 95 : index
    %1151 = memref.load %arg9[%c1_368, %c95_369] : memref<3x99xf32, #tpu.memory_space<smem>>
    %1152 = vector.extract_strided_slice %1095 {offsets = [0, 5], sizes = [8, 16], strides = [1, 1]} : vector<8x22xf32> to vector<8x16xf32>
    %1153 = vector.broadcast %1151 : f32 to vector<8x16xf32>
    %1154 = arith.mulf %1153, %1152 : vector<8x16xf32>
    %1155 = arith.addf %1150, %1154 : vector<8x16xf32>
    %c1_370 = arith.constant 1 : index
    %c96_371 = arith.constant 96 : index
    %1156 = memref.load %arg9[%c1_370, %c96_371] : memref<3x99xf32, #tpu.memory_space<smem>>
    %1157 = vector.extract_strided_slice %1094 {offsets = [0, 6], sizes = [8, 16], strides = [1, 1]} : vector<8x22xf32> to vector<8x16xf32>
    %1158 = vector.broadcast %1156 : f32 to vector<8x16xf32>
    %1159 = arith.mulf %1158, %1157 : vector<8x16xf32>
    %1160 = arith.addf %1155, %1159 : vector<8x16xf32>
    %c1_372 = arith.constant 1 : index
    %c97_373 = arith.constant 97 : index
    %1161 = memref.load %arg9[%c1_372, %c97_373] : memref<3x99xf32, #tpu.memory_space<smem>>
    %1162 = vector.extract_strided_slice %1095 {offsets = [0, 6], sizes = [8, 16], strides = [1, 1]} : vector<8x22xf32> to vector<8x16xf32>
    %1163 = vector.broadcast %1161 : f32 to vector<8x16xf32>
    %1164 = arith.mulf %1163, %1162 : vector<8x16xf32>
    %1165 = arith.addf %1160, %1164 : vector<8x16xf32>
    %c1_374 = arith.constant 1 : index
    %c98_375 = arith.constant 98 : index
    %1166 = memref.load %arg9[%c1_374, %c98_375] : memref<3x99xf32, #tpu.memory_space<smem>>
    %1167 = vector.broadcast %1166 : f32 to vector<8x16xf32>
    %1168 = arith.addf %1165, %1167 : vector<8x16xf32>
    %1169 = arith.negf %1168 : vector<8x16xf32>
    %1170 = math.exp %1169 : vector<8x16xf32>
    %cst_376 = arith.constant 1.000000e+00 : f32
    %1171 = vector.broadcast %cst_376 : f32 to vector<8x16xf32>
    %1172 = arith.addf %1171, %1170 : vector<8x16xf32>
    %1173 = arith.divf %1171, %1172 : vector<8x16xf32>
    %1174 = tpu.iota {dimensions = array<i32: 0>} : vector<14x8xi32>
    %1175 = tpu.iota {dimensions = array<i32: 1>} : vector<14x8xi32>
    %c3_i32_377 = arith.constant 3 : i32
    %1176 = vector.broadcast %c3_i32_377 : i32 to vector<14x8xi32>
    %1177 = arith.addi %1175, %1176 : vector<14x8xi32>
    %1178 = arith.cmpi eq, %1174, %1177 : vector<14x8xi32>
    %cst_378 = arith.constant 1.000000e+00 : f32
    %cst_379 = arith.constant 0.000000e+00 : f32
    %1179 = vector.broadcast %cst_378 : f32 to vector<14x8xf32>
    %1180 = vector.broadcast %cst_379 : f32 to vector<14x8xf32>
    %1181 = arith.select %1178, %1179, %1180 : vector<14x8xi1>, vector<14x8xf32>
    %1182 = tpu.iota {dimensions = array<i32: 0>} : vector<16x22xi32>
    %1183 = tpu.iota {dimensions = array<i32: 1>} : vector<16x22xi32>
    %c3_i32_380 = arith.constant 3 : i32
    %1184 = vector.broadcast %c3_i32_380 : i32 to vector<16x22xi32>
    %1185 = arith.addi %1182, %1184 : vector<16x22xi32>
    %1186 = arith.cmpi eq, %1183, %1185 : vector<16x22xi32>
    %cst_381 = arith.constant 1.000000e+00 : f32
    %cst_382 = arith.constant 0.000000e+00 : f32
    %1187 = vector.broadcast %cst_381 : f32 to vector<16x22xf32>
    %1188 = vector.broadcast %cst_382 : f32 to vector<16x22xf32>
    %1189 = arith.select %1186, %1187, %1188 : vector<16x22xi1>, vector<16x22xf32>
    %cst_383 = arith.constant dense<0.000000e+00> : vector<8x22xf32>
    %1190 = tpu.matmul %104, %1189, %cst_383 {dimension_numbers = #tpu.dot_dimension_numbers<[1], [0], [0], [1], [0, 0, 1, 1], [], []>} : vector<8x16xf32>, vector<16x22xf32>, vector<8x22xf32> -> vector<8x22xf32>
    %cst_384 = arith.constant dense<0.000000e+00> : vector<14x22xf32>
    %1191 = tpu.matmul %1181, %1190, %cst_384 {dimension_numbers = #tpu.dot_dimension_numbers<[1], [0], [0], [1], [0, 0, 1, 1], [], []>} : vector<14x8xf32>, vector<8x22xf32>, vector<14x22xf32> -> vector<14x22xf32>
    %cst_385 = arith.constant dense<0.000000e+00> : vector<8x22xf32>
    %1192 = tpu.matmul %107, %1189, %cst_385 {dimension_numbers = #tpu.dot_dimension_numbers<[1], [0], [0], [1], [0, 0, 1, 1], [], []>} : vector<8x16xf32>, vector<16x22xf32>, vector<8x22xf32> -> vector<8x22xf32>
    %cst_386 = arith.constant dense<0.000000e+00> : vector<14x22xf32>
    %1193 = tpu.matmul %1181, %1192, %cst_386 {dimension_numbers = #tpu.dot_dimension_numbers<[1], [0], [0], [1], [0, 0, 1, 1], [], []>} : vector<14x8xf32>, vector<8x22xf32>, vector<14x22xf32> -> vector<14x22xf32>
    %cst_387 = arith.constant 0.000000e+00 : f32
    %1194 = vector.broadcast %cst_387 : f32 to vector<8x16xf32>
    %1195 = vector.extract_strided_slice %1191 {offsets = [0, 0], sizes = [8, 22], strides = [1, 1]} : vector<14x22xf32> to vector<8x22xf32>
    %1196 = vector.extract_strided_slice %1193 {offsets = [0, 0], sizes = [8, 22], strides = [1, 1]} : vector<14x22xf32> to vector<8x22xf32>
    %c2_388 = arith.constant 2 : index
    %c0_389 = arith.constant 0 : index
    %1197 = memref.load %arg9[%c2_388, %c0_389] : memref<3x99xf32, #tpu.memory_space<smem>>
    %1198 = vector.extract_strided_slice %1195 {offsets = [0, 0], sizes = [8, 16], strides = [1, 1]} : vector<8x22xf32> to vector<8x16xf32>
    %1199 = vector.broadcast %1197 : f32 to vector<8x16xf32>
    %1200 = arith.mulf %1199, %1198 : vector<8x16xf32>
    %1201 = arith.addf %1194, %1200 : vector<8x16xf32>
    %c2_390 = arith.constant 2 : index
    %c1_391 = arith.constant 1 : index
    %1202 = memref.load %arg9[%c2_390, %c1_391] : memref<3x99xf32, #tpu.memory_space<smem>>
    %1203 = vector.extract_strided_slice %1196 {offsets = [0, 0], sizes = [8, 16], strides = [1, 1]} : vector<8x22xf32> to vector<8x16xf32>
    %1204 = vector.broadcast %1202 : f32 to vector<8x16xf32>
    %1205 = arith.mulf %1204, %1203 : vector<8x16xf32>
    %1206 = arith.addf %1201, %1205 : vector<8x16xf32>
    %c2_392 = arith.constant 2 : index
    %c2_393 = arith.constant 2 : index
    %1207 = memref.load %arg9[%c2_392, %c2_393] : memref<3x99xf32, #tpu.memory_space<smem>>
    %1208 = vector.extract_strided_slice %1195 {offsets = [0, 1], sizes = [8, 16], strides = [1, 1]} : vector<8x22xf32> to vector<8x16xf32>
    %1209 = vector.broadcast %1207 : f32 to vector<8x16xf32>
    %1210 = arith.mulf %1209, %1208 : vector<8x16xf32>
    %1211 = arith.addf %1206, %1210 : vector<8x16xf32>
    %c2_394 = arith.constant 2 : index
    %c3_395 = arith.constant 3 : index
    %1212 = memref.load %arg9[%c2_394, %c3_395] : memref<3x99xf32, #tpu.memory_space<smem>>
    %1213 = vector.extract_strided_slice %1196 {offsets = [0, 1], sizes = [8, 16], strides = [1, 1]} : vector<8x22xf32> to vector<8x16xf32>
    %1214 = vector.broadcast %1212 : f32 to vector<8x16xf32>
    %1215 = arith.mulf %1214, %1213 : vector<8x16xf32>
    %1216 = arith.addf %1211, %1215 : vector<8x16xf32>
    %c2_396 = arith.constant 2 : index
    %c4_397 = arith.constant 4 : index
    %1217 = memref.load %arg9[%c2_396, %c4_397] : memref<3x99xf32, #tpu.memory_space<smem>>
    %1218 = vector.extract_strided_slice %1195 {offsets = [0, 2], sizes = [8, 16], strides = [1, 1]} : vector<8x22xf32> to vector<8x16xf32>
    %1219 = vector.broadcast %1217 : f32 to vector<8x16xf32>
    %1220 = arith.mulf %1219, %1218 : vector<8x16xf32>
    %1221 = arith.addf %1216, %1220 : vector<8x16xf32>
    %c2_398 = arith.constant 2 : index
    %c5_399 = arith.constant 5 : index
    %1222 = memref.load %arg9[%c2_398, %c5_399] : memref<3x99xf32, #tpu.memory_space<smem>>
    %1223 = vector.extract_strided_slice %1196 {offsets = [0, 2], sizes = [8, 16], strides = [1, 1]} : vector<8x22xf32> to vector<8x16xf32>
    %1224 = vector.broadcast %1222 : f32 to vector<8x16xf32>
    %1225 = arith.mulf %1224, %1223 : vector<8x16xf32>
    %1226 = arith.addf %1221, %1225 : vector<8x16xf32>
    %c2_400 = arith.constant 2 : index
    %c6_401 = arith.constant 6 : index
    %1227 = memref.load %arg9[%c2_400, %c6_401] : memref<3x99xf32, #tpu.memory_space<smem>>
    %1228 = vector.extract_strided_slice %1195 {offsets = [0, 3], sizes = [8, 16], strides = [1, 1]} : vector<8x22xf32> to vector<8x16xf32>
    %1229 = vector.broadcast %1227 : f32 to vector<8x16xf32>
    %1230 = arith.mulf %1229, %1228 : vector<8x16xf32>
    %1231 = arith.addf %1226, %1230 : vector<8x16xf32>
    %c2_402 = arith.constant 2 : index
    %c7_403 = arith.constant 7 : index
    %1232 = memref.load %arg9[%c2_402, %c7_403] : memref<3x99xf32, #tpu.memory_space<smem>>
    %1233 = vector.extract_strided_slice %1196 {offsets = [0, 3], sizes = [8, 16], strides = [1, 1]} : vector<8x22xf32> to vector<8x16xf32>
    %1234 = vector.broadcast %1232 : f32 to vector<8x16xf32>
    %1235 = arith.mulf %1234, %1233 : vector<8x16xf32>
    %1236 = arith.addf %1231, %1235 : vector<8x16xf32>
    %c2_404 = arith.constant 2 : index
    %c8_405 = arith.constant 8 : index
    %1237 = memref.load %arg9[%c2_404, %c8_405] : memref<3x99xf32, #tpu.memory_space<smem>>
    %1238 = vector.extract_strided_slice %1195 {offsets = [0, 4], sizes = [8, 16], strides = [1, 1]} : vector<8x22xf32> to vector<8x16xf32>
    %1239 = vector.broadcast %1237 : f32 to vector<8x16xf32>
    %1240 = arith.mulf %1239, %1238 : vector<8x16xf32>
    %1241 = arith.addf %1236, %1240 : vector<8x16xf32>
    %c2_406 = arith.constant 2 : index
    %c9_407 = arith.constant 9 : index
    %1242 = memref.load %arg9[%c2_406, %c9_407] : memref<3x99xf32, #tpu.memory_space<smem>>
    %1243 = vector.extract_strided_slice %1196 {offsets = [0, 4], sizes = [8, 16], strides = [1, 1]} : vector<8x22xf32> to vector<8x16xf32>
    %1244 = vector.broadcast %1242 : f32 to vector<8x16xf32>
    %1245 = arith.mulf %1244, %1243 : vector<8x16xf32>
    %1246 = arith.addf %1241, %1245 : vector<8x16xf32>
    %c2_408 = arith.constant 2 : index
    %c10_409 = arith.constant 10 : index
    %1247 = memref.load %arg9[%c2_408, %c10_409] : memref<3x99xf32, #tpu.memory_space<smem>>
    %1248 = vector.extract_strided_slice %1195 {offsets = [0, 5], sizes = [8, 16], strides = [1, 1]} : vector<8x22xf32> to vector<8x16xf32>
    %1249 = vector.broadcast %1247 : f32 to vector<8x16xf32>
    %1250 = arith.mulf %1249, %1248 : vector<8x16xf32>
    %1251 = arith.addf %1246, %1250 : vector<8x16xf32>
    %c2_410 = arith.constant 2 : index
    %c11_411 = arith.constant 11 : index
    %1252 = memref.load %arg9[%c2_410, %c11_411] : memref<3x99xf32, #tpu.memory_space<smem>>
    %1253 = vector.extract_strided_slice %1196 {offsets = [0, 5], sizes = [8, 16], strides = [1, 1]} : vector<8x22xf32> to vector<8x16xf32>
    %1254 = vector.broadcast %1252 : f32 to vector<8x16xf32>
    %1255 = arith.mulf %1254, %1253 : vector<8x16xf32>
    %1256 = arith.addf %1251, %1255 : vector<8x16xf32>
    %c2_412 = arith.constant 2 : index
    %c12_413 = arith.constant 12 : index
    %1257 = memref.load %arg9[%c2_412, %c12_413] : memref<3x99xf32, #tpu.memory_space<smem>>
    %1258 = vector.extract_strided_slice %1195 {offsets = [0, 6], sizes = [8, 16], strides = [1, 1]} : vector<8x22xf32> to vector<8x16xf32>
    %1259 = vector.broadcast %1257 : f32 to vector<8x16xf32>
    %1260 = arith.mulf %1259, %1258 : vector<8x16xf32>
    %1261 = arith.addf %1256, %1260 : vector<8x16xf32>
    %c2_414 = arith.constant 2 : index
    %c13_415 = arith.constant 13 : index
    %1262 = memref.load %arg9[%c2_414, %c13_415] : memref<3x99xf32, #tpu.memory_space<smem>>
    %1263 = vector.extract_strided_slice %1196 {offsets = [0, 6], sizes = [8, 16], strides = [1, 1]} : vector<8x22xf32> to vector<8x16xf32>
    %1264 = vector.broadcast %1262 : f32 to vector<8x16xf32>
    %1265 = arith.mulf %1264, %1263 : vector<8x16xf32>
    %1266 = arith.addf %1261, %1265 : vector<8x16xf32>
    %1267 = vector.extract_strided_slice %1191 {offsets = [1, 0], sizes = [8, 22], strides = [1, 1]} : vector<14x22xf32> to vector<8x22xf32>
    %1268 = vector.extract_strided_slice %1193 {offsets = [1, 0], sizes = [8, 22], strides = [1, 1]} : vector<14x22xf32> to vector<8x22xf32>
    %c2_416 = arith.constant 2 : index
    %c14_417 = arith.constant 14 : index
    %1269 = memref.load %arg9[%c2_416, %c14_417] : memref<3x99xf32, #tpu.memory_space<smem>>
    %1270 = vector.extract_strided_slice %1267 {offsets = [0, 0], sizes = [8, 16], strides = [1, 1]} : vector<8x22xf32> to vector<8x16xf32>
    %1271 = vector.broadcast %1269 : f32 to vector<8x16xf32>
    %1272 = arith.mulf %1271, %1270 : vector<8x16xf32>
    %1273 = arith.addf %1266, %1272 : vector<8x16xf32>
    %c2_418 = arith.constant 2 : index
    %c15_419 = arith.constant 15 : index
    %1274 = memref.load %arg9[%c2_418, %c15_419] : memref<3x99xf32, #tpu.memory_space<smem>>
    %1275 = vector.extract_strided_slice %1268 {offsets = [0, 0], sizes = [8, 16], strides = [1, 1]} : vector<8x22xf32> to vector<8x16xf32>
    %1276 = vector.broadcast %1274 : f32 to vector<8x16xf32>
    %1277 = arith.mulf %1276, %1275 : vector<8x16xf32>
    %1278 = arith.addf %1273, %1277 : vector<8x16xf32>
    %c2_420 = arith.constant 2 : index
    %c16_421 = arith.constant 16 : index
    %1279 = memref.load %arg9[%c2_420, %c16_421] : memref<3x99xf32, #tpu.memory_space<smem>>
    %1280 = vector.extract_strided_slice %1267 {offsets = [0, 1], sizes = [8, 16], strides = [1, 1]} : vector<8x22xf32> to vector<8x16xf32>
    %1281 = vector.broadcast %1279 : f32 to vector<8x16xf32>
    %1282 = arith.mulf %1281, %1280 : vector<8x16xf32>
    %1283 = arith.addf %1278, %1282 : vector<8x16xf32>
    %c2_422 = arith.constant 2 : index
    %c17_423 = arith.constant 17 : index
    %1284 = memref.load %arg9[%c2_422, %c17_423] : memref<3x99xf32, #tpu.memory_space<smem>>
    %1285 = vector.extract_strided_slice %1268 {offsets = [0, 1], sizes = [8, 16], strides = [1, 1]} : vector<8x22xf32> to vector<8x16xf32>
    %1286 = vector.broadcast %1284 : f32 to vector<8x16xf32>
    %1287 = arith.mulf %1286, %1285 : vector<8x16xf32>
    %1288 = arith.addf %1283, %1287 : vector<8x16xf32>
    %c2_424 = arith.constant 2 : index
    %c18_425 = arith.constant 18 : index
    %1289 = memref.load %arg9[%c2_424, %c18_425] : memref<3x99xf32, #tpu.memory_space<smem>>
    %1290 = vector.extract_strided_slice %1267 {offsets = [0, 2], sizes = [8, 16], strides = [1, 1]} : vector<8x22xf32> to vector<8x16xf32>
    %1291 = vector.broadcast %1289 : f32 to vector<8x16xf32>
    %1292 = arith.mulf %1291, %1290 : vector<8x16xf32>
    %1293 = arith.addf %1288, %1292 : vector<8x16xf32>
    %c2_426 = arith.constant 2 : index
    %c19_427 = arith.constant 19 : index
    %1294 = memref.load %arg9[%c2_426, %c19_427] : memref<3x99xf32, #tpu.memory_space<smem>>
    %1295 = vector.extract_strided_slice %1268 {offsets = [0, 2], sizes = [8, 16], strides = [1, 1]} : vector<8x22xf32> to vector<8x16xf32>
    %1296 = vector.broadcast %1294 : f32 to vector<8x16xf32>
    %1297 = arith.mulf %1296, %1295 : vector<8x16xf32>
    %1298 = arith.addf %1293, %1297 : vector<8x16xf32>
    %c2_428 = arith.constant 2 : index
    %c20_429 = arith.constant 20 : index
    %1299 = memref.load %arg9[%c2_428, %c20_429] : memref<3x99xf32, #tpu.memory_space<smem>>
    %1300 = vector.extract_strided_slice %1267 {offsets = [0, 3], sizes = [8, 16], strides = [1, 1]} : vector<8x22xf32> to vector<8x16xf32>
    %1301 = vector.broadcast %1299 : f32 to vector<8x16xf32>
    %1302 = arith.mulf %1301, %1300 : vector<8x16xf32>
    %1303 = arith.addf %1298, %1302 : vector<8x16xf32>
    %c2_430 = arith.constant 2 : index
    %c21_431 = arith.constant 21 : index
    %1304 = memref.load %arg9[%c2_430, %c21_431] : memref<3x99xf32, #tpu.memory_space<smem>>
    %1305 = vector.extract_strided_slice %1268 {offsets = [0, 3], sizes = [8, 16], strides = [1, 1]} : vector<8x22xf32> to vector<8x16xf32>
    %1306 = vector.broadcast %1304 : f32 to vector<8x16xf32>
    %1307 = arith.mulf %1306, %1305 : vector<8x16xf32>
    %1308 = arith.addf %1303, %1307 : vector<8x16xf32>
    %c2_432 = arith.constant 2 : index
    %c22_433 = arith.constant 22 : index
    %1309 = memref.load %arg9[%c2_432, %c22_433] : memref<3x99xf32, #tpu.memory_space<smem>>
    %1310 = vector.extract_strided_slice %1267 {offsets = [0, 4], sizes = [8, 16], strides = [1, 1]} : vector<8x22xf32> to vector<8x16xf32>
    %1311 = vector.broadcast %1309 : f32 to vector<8x16xf32>
    %1312 = arith.mulf %1311, %1310 : vector<8x16xf32>
    %1313 = arith.addf %1308, %1312 : vector<8x16xf32>
    %c2_434 = arith.constant 2 : index
    %c23_435 = arith.constant 23 : index
    %1314 = memref.load %arg9[%c2_434, %c23_435] : memref<3x99xf32, #tpu.memory_space<smem>>
    %1315 = vector.extract_strided_slice %1268 {offsets = [0, 4], sizes = [8, 16], strides = [1, 1]} : vector<8x22xf32> to vector<8x16xf32>
    %1316 = vector.broadcast %1314 : f32 to vector<8x16xf32>
    %1317 = arith.mulf %1316, %1315 : vector<8x16xf32>
    %1318 = arith.addf %1313, %1317 : vector<8x16xf32>
    %c2_436 = arith.constant 2 : index
    %c24_437 = arith.constant 24 : index
    %1319 = memref.load %arg9[%c2_436, %c24_437] : memref<3x99xf32, #tpu.memory_space<smem>>
    %1320 = vector.extract_strided_slice %1267 {offsets = [0, 5], sizes = [8, 16], strides = [1, 1]} : vector<8x22xf32> to vector<8x16xf32>
    %1321 = vector.broadcast %1319 : f32 to vector<8x16xf32>
    %1322 = arith.mulf %1321, %1320 : vector<8x16xf32>
    %1323 = arith.addf %1318, %1322 : vector<8x16xf32>
    %c2_438 = arith.constant 2 : index
    %c25_439 = arith.constant 25 : index
    %1324 = memref.load %arg9[%c2_438, %c25_439] : memref<3x99xf32, #tpu.memory_space<smem>>
    %1325 = vector.extract_strided_slice %1268 {offsets = [0, 5], sizes = [8, 16], strides = [1, 1]} : vector<8x22xf32> to vector<8x16xf32>
    %1326 = vector.broadcast %1324 : f32 to vector<8x16xf32>
    %1327 = arith.mulf %1326, %1325 : vector<8x16xf32>
    %1328 = arith.addf %1323, %1327 : vector<8x16xf32>
    %c2_440 = arith.constant 2 : index
    %c26_441 = arith.constant 26 : index
    %1329 = memref.load %arg9[%c2_440, %c26_441] : memref<3x99xf32, #tpu.memory_space<smem>>
    %1330 = vector.extract_strided_slice %1267 {offsets = [0, 6], sizes = [8, 16], strides = [1, 1]} : vector<8x22xf32> to vector<8x16xf32>
    %1331 = vector.broadcast %1329 : f32 to vector<8x16xf32>
    %1332 = arith.mulf %1331, %1330 : vector<8x16xf32>
    %1333 = arith.addf %1328, %1332 : vector<8x16xf32>
    %c2_442 = arith.constant 2 : index
    %c27_443 = arith.constant 27 : index
    %1334 = memref.load %arg9[%c2_442, %c27_443] : memref<3x99xf32, #tpu.memory_space<smem>>
    %1335 = vector.extract_strided_slice %1268 {offsets = [0, 6], sizes = [8, 16], strides = [1, 1]} : vector<8x22xf32> to vector<8x16xf32>
    %1336 = vector.broadcast %1334 : f32 to vector<8x16xf32>
    %1337 = arith.mulf %1336, %1335 : vector<8x16xf32>
    %1338 = arith.addf %1333, %1337 : vector<8x16xf32>
    %1339 = vector.extract_strided_slice %1191 {offsets = [2, 0], sizes = [8, 22], strides = [1, 1]} : vector<14x22xf32> to vector<8x22xf32>
    %1340 = vector.extract_strided_slice %1193 {offsets = [2, 0], sizes = [8, 22], strides = [1, 1]} : vector<14x22xf32> to vector<8x22xf32>
    %c2_444 = arith.constant 2 : index
    %c28_445 = arith.constant 28 : index
    %1341 = memref.load %arg9[%c2_444, %c28_445] : memref<3x99xf32, #tpu.memory_space<smem>>
    %1342 = vector.extract_strided_slice %1339 {offsets = [0, 0], sizes = [8, 16], strides = [1, 1]} : vector<8x22xf32> to vector<8x16xf32>
    %1343 = vector.broadcast %1341 : f32 to vector<8x16xf32>
    %1344 = arith.mulf %1343, %1342 : vector<8x16xf32>
    %1345 = arith.addf %1338, %1344 : vector<8x16xf32>
    %c2_446 = arith.constant 2 : index
    %c29_447 = arith.constant 29 : index
    %1346 = memref.load %arg9[%c2_446, %c29_447] : memref<3x99xf32, #tpu.memory_space<smem>>
    %1347 = vector.extract_strided_slice %1340 {offsets = [0, 0], sizes = [8, 16], strides = [1, 1]} : vector<8x22xf32> to vector<8x16xf32>
    %1348 = vector.broadcast %1346 : f32 to vector<8x16xf32>
    %1349 = arith.mulf %1348, %1347 : vector<8x16xf32>
    %1350 = arith.addf %1345, %1349 : vector<8x16xf32>
    %c2_448 = arith.constant 2 : index
    %c30_449 = arith.constant 30 : index
    %1351 = memref.load %arg9[%c2_448, %c30_449] : memref<3x99xf32, #tpu.memory_space<smem>>
    %1352 = vector.extract_strided_slice %1339 {offsets = [0, 1], sizes = [8, 16], strides = [1, 1]} : vector<8x22xf32> to vector<8x16xf32>
    %1353 = vector.broadcast %1351 : f32 to vector<8x16xf32>
    %1354 = arith.mulf %1353, %1352 : vector<8x16xf32>
    %1355 = arith.addf %1350, %1354 : vector<8x16xf32>
    %c2_450 = arith.constant 2 : index
    %c31_451 = arith.constant 31 : index
    %1356 = memref.load %arg9[%c2_450, %c31_451] : memref<3x99xf32, #tpu.memory_space<smem>>
    %1357 = vector.extract_strided_slice %1340 {offsets = [0, 1], sizes = [8, 16], strides = [1, 1]} : vector<8x22xf32> to vector<8x16xf32>
    %1358 = vector.broadcast %1356 : f32 to vector<8x16xf32>
    %1359 = arith.mulf %1358, %1357 : vector<8x16xf32>
    %1360 = arith.addf %1355, %1359 : vector<8x16xf32>
    %c2_452 = arith.constant 2 : index
    %c32_453 = arith.constant 32 : index
    %1361 = memref.load %arg9[%c2_452, %c32_453] : memref<3x99xf32, #tpu.memory_space<smem>>
    %1362 = vector.extract_strided_slice %1339 {offsets = [0, 2], sizes = [8, 16], strides = [1, 1]} : vector<8x22xf32> to vector<8x16xf32>
    %1363 = vector.broadcast %1361 : f32 to vector<8x16xf32>
    %1364 = arith.mulf %1363, %1362 : vector<8x16xf32>
    %1365 = arith.addf %1360, %1364 : vector<8x16xf32>
    %c2_454 = arith.constant 2 : index
    %c33_455 = arith.constant 33 : index
    %1366 = memref.load %arg9[%c2_454, %c33_455] : memref<3x99xf32, #tpu.memory_space<smem>>
    %1367 = vector.extract_strided_slice %1340 {offsets = [0, 2], sizes = [8, 16], strides = [1, 1]} : vector<8x22xf32> to vector<8x16xf32>
    %1368 = vector.broadcast %1366 : f32 to vector<8x16xf32>
    %1369 = arith.mulf %1368, %1367 : vector<8x16xf32>
    %1370 = arith.addf %1365, %1369 : vector<8x16xf32>
    %c2_456 = arith.constant 2 : index
    %c34_457 = arith.constant 34 : index
    %1371 = memref.load %arg9[%c2_456, %c34_457] : memref<3x99xf32, #tpu.memory_space<smem>>
    %1372 = vector.extract_strided_slice %1339 {offsets = [0, 3], sizes = [8, 16], strides = [1, 1]} : vector<8x22xf32> to vector<8x16xf32>
    %1373 = vector.broadcast %1371 : f32 to vector<8x16xf32>
    %1374 = arith.mulf %1373, %1372 : vector<8x16xf32>
    %1375 = arith.addf %1370, %1374 : vector<8x16xf32>
    %c2_458 = arith.constant 2 : index
    %c35_459 = arith.constant 35 : index
    %1376 = memref.load %arg9[%c2_458, %c35_459] : memref<3x99xf32, #tpu.memory_space<smem>>
    %1377 = vector.extract_strided_slice %1340 {offsets = [0, 3], sizes = [8, 16], strides = [1, 1]} : vector<8x22xf32> to vector<8x16xf32>
    %1378 = vector.broadcast %1376 : f32 to vector<8x16xf32>
    %1379 = arith.mulf %1378, %1377 : vector<8x16xf32>
    %1380 = arith.addf %1375, %1379 : vector<8x16xf32>
    %c2_460 = arith.constant 2 : index
    %c36_461 = arith.constant 36 : index
    %1381 = memref.load %arg9[%c2_460, %c36_461] : memref<3x99xf32, #tpu.memory_space<smem>>
    %1382 = vector.extract_strided_slice %1339 {offsets = [0, 4], sizes = [8, 16], strides = [1, 1]} : vector<8x22xf32> to vector<8x16xf32>
    %1383 = vector.broadcast %1381 : f32 to vector<8x16xf32>
    %1384 = arith.mulf %1383, %1382 : vector<8x16xf32>
    %1385 = arith.addf %1380, %1384 : vector<8x16xf32>
    %c2_462 = arith.constant 2 : index
    %c37_463 = arith.constant 37 : index
    %1386 = memref.load %arg9[%c2_462, %c37_463] : memref<3x99xf32, #tpu.memory_space<smem>>
    %1387 = vector.extract_strided_slice %1340 {offsets = [0, 4], sizes = [8, 16], strides = [1, 1]} : vector<8x22xf32> to vector<8x16xf32>
    %1388 = vector.broadcast %1386 : f32 to vector<8x16xf32>
    %1389 = arith.mulf %1388, %1387 : vector<8x16xf32>
    %1390 = arith.addf %1385, %1389 : vector<8x16xf32>
    %c2_464 = arith.constant 2 : index
    %c38_465 = arith.constant 38 : index
    %1391 = memref.load %arg9[%c2_464, %c38_465] : memref<3x99xf32, #tpu.memory_space<smem>>
    %1392 = vector.extract_strided_slice %1339 {offsets = [0, 5], sizes = [8, 16], strides = [1, 1]} : vector<8x22xf32> to vector<8x16xf32>
    %1393 = vector.broadcast %1391 : f32 to vector<8x16xf32>
    %1394 = arith.mulf %1393, %1392 : vector<8x16xf32>
    %1395 = arith.addf %1390, %1394 : vector<8x16xf32>
    %c2_466 = arith.constant 2 : index
    %c39_467 = arith.constant 39 : index
    %1396 = memref.load %arg9[%c2_466, %c39_467] : memref<3x99xf32, #tpu.memory_space<smem>>
    %1397 = vector.extract_strided_slice %1340 {offsets = [0, 5], sizes = [8, 16], strides = [1, 1]} : vector<8x22xf32> to vector<8x16xf32>
    %1398 = vector.broadcast %1396 : f32 to vector<8x16xf32>
    %1399 = arith.mulf %1398, %1397 : vector<8x16xf32>
    %1400 = arith.addf %1395, %1399 : vector<8x16xf32>
    %c2_468 = arith.constant 2 : index
    %c40_469 = arith.constant 40 : index
    %1401 = memref.load %arg9[%c2_468, %c40_469] : memref<3x99xf32, #tpu.memory_space<smem>>
    %1402 = vector.extract_strided_slice %1339 {offsets = [0, 6], sizes = [8, 16], strides = [1, 1]} : vector<8x22xf32> to vector<8x16xf32>
    %1403 = vector.broadcast %1401 : f32 to vector<8x16xf32>
    %1404 = arith.mulf %1403, %1402 : vector<8x16xf32>
    %1405 = arith.addf %1400, %1404 : vector<8x16xf32>
    %c2_470 = arith.constant 2 : index
    %c41_471 = arith.constant 41 : index
    %1406 = memref.load %arg9[%c2_470, %c41_471] : memref<3x99xf32, #tpu.memory_space<smem>>
    %1407 = vector.extract_strided_slice %1340 {offsets = [0, 6], sizes = [8, 16], strides = [1, 1]} : vector<8x22xf32> to vector<8x16xf32>
    %1408 = vector.broadcast %1406 : f32 to vector<8x16xf32>
    %1409 = arith.mulf %1408, %1407 : vector<8x16xf32>
    %1410 = arith.addf %1405, %1409 : vector<8x16xf32>
    %1411 = vector.extract_strided_slice %1191 {offsets = [3, 0], sizes = [8, 22], strides = [1, 1]} : vector<14x22xf32> to vector<8x22xf32>
    %1412 = vector.extract_strided_slice %1193 {offsets = [3, 0], sizes = [8, 22], strides = [1, 1]} : vector<14x22xf32> to vector<8x22xf32>
    %c2_472 = arith.constant 2 : index
    %c42_473 = arith.constant 42 : index
    %1413 = memref.load %arg9[%c2_472, %c42_473] : memref<3x99xf32, #tpu.memory_space<smem>>
    %1414 = vector.extract_strided_slice %1411 {offsets = [0, 0], sizes = [8, 16], strides = [1, 1]} : vector<8x22xf32> to vector<8x16xf32>
    %1415 = vector.broadcast %1413 : f32 to vector<8x16xf32>
    %1416 = arith.mulf %1415, %1414 : vector<8x16xf32>
    %1417 = arith.addf %1410, %1416 : vector<8x16xf32>
    %c2_474 = arith.constant 2 : index
    %c43_475 = arith.constant 43 : index
    %1418 = memref.load %arg9[%c2_474, %c43_475] : memref<3x99xf32, #tpu.memory_space<smem>>
    %1419 = vector.extract_strided_slice %1412 {offsets = [0, 0], sizes = [8, 16], strides = [1, 1]} : vector<8x22xf32> to vector<8x16xf32>
    %1420 = vector.broadcast %1418 : f32 to vector<8x16xf32>
    %1421 = arith.mulf %1420, %1419 : vector<8x16xf32>
    %1422 = arith.addf %1417, %1421 : vector<8x16xf32>
    %c2_476 = arith.constant 2 : index
    %c44_477 = arith.constant 44 : index
    %1423 = memref.load %arg9[%c2_476, %c44_477] : memref<3x99xf32, #tpu.memory_space<smem>>
    %1424 = vector.extract_strided_slice %1411 {offsets = [0, 1], sizes = [8, 16], strides = [1, 1]} : vector<8x22xf32> to vector<8x16xf32>
    %1425 = vector.broadcast %1423 : f32 to vector<8x16xf32>
    %1426 = arith.mulf %1425, %1424 : vector<8x16xf32>
    %1427 = arith.addf %1422, %1426 : vector<8x16xf32>
    %c2_478 = arith.constant 2 : index
    %c45_479 = arith.constant 45 : index
    %1428 = memref.load %arg9[%c2_478, %c45_479] : memref<3x99xf32, #tpu.memory_space<smem>>
    %1429 = vector.extract_strided_slice %1412 {offsets = [0, 1], sizes = [8, 16], strides = [1, 1]} : vector<8x22xf32> to vector<8x16xf32>
    %1430 = vector.broadcast %1428 : f32 to vector<8x16xf32>
    %1431 = arith.mulf %1430, %1429 : vector<8x16xf32>
    %1432 = arith.addf %1427, %1431 : vector<8x16xf32>
    %c2_480 = arith.constant 2 : index
    %c46_481 = arith.constant 46 : index
    %1433 = memref.load %arg9[%c2_480, %c46_481] : memref<3x99xf32, #tpu.memory_space<smem>>
    %1434 = vector.extract_strided_slice %1411 {offsets = [0, 2], sizes = [8, 16], strides = [1, 1]} : vector<8x22xf32> to vector<8x16xf32>
    %1435 = vector.broadcast %1433 : f32 to vector<8x16xf32>
    %1436 = arith.mulf %1435, %1434 : vector<8x16xf32>
    %1437 = arith.addf %1432, %1436 : vector<8x16xf32>
    %c2_482 = arith.constant 2 : index
    %c47_483 = arith.constant 47 : index
    %1438 = memref.load %arg9[%c2_482, %c47_483] : memref<3x99xf32, #tpu.memory_space<smem>>
    %1439 = vector.extract_strided_slice %1412 {offsets = [0, 2], sizes = [8, 16], strides = [1, 1]} : vector<8x22xf32> to vector<8x16xf32>
    %1440 = vector.broadcast %1438 : f32 to vector<8x16xf32>
    %1441 = arith.mulf %1440, %1439 : vector<8x16xf32>
    %1442 = arith.addf %1437, %1441 : vector<8x16xf32>
    %c2_484 = arith.constant 2 : index
    %c48_485 = arith.constant 48 : index
    %1443 = memref.load %arg9[%c2_484, %c48_485] : memref<3x99xf32, #tpu.memory_space<smem>>
    %1444 = vector.extract_strided_slice %1411 {offsets = [0, 3], sizes = [8, 16], strides = [1, 1]} : vector<8x22xf32> to vector<8x16xf32>
    %1445 = vector.broadcast %1443 : f32 to vector<8x16xf32>
    %1446 = arith.mulf %1445, %1444 : vector<8x16xf32>
    %1447 = arith.addf %1442, %1446 : vector<8x16xf32>
    %c2_486 = arith.constant 2 : index
    %c49_487 = arith.constant 49 : index
    %1448 = memref.load %arg9[%c2_486, %c49_487] : memref<3x99xf32, #tpu.memory_space<smem>>
    %1449 = vector.extract_strided_slice %1412 {offsets = [0, 3], sizes = [8, 16], strides = [1, 1]} : vector<8x22xf32> to vector<8x16xf32>
    %1450 = vector.broadcast %1448 : f32 to vector<8x16xf32>
    %1451 = arith.mulf %1450, %1449 : vector<8x16xf32>
    %1452 = arith.addf %1447, %1451 : vector<8x16xf32>
    %c2_488 = arith.constant 2 : index
    %c50_489 = arith.constant 50 : index
    %1453 = memref.load %arg9[%c2_488, %c50_489] : memref<3x99xf32, #tpu.memory_space<smem>>
    %1454 = vector.extract_strided_slice %1411 {offsets = [0, 4], sizes = [8, 16], strides = [1, 1]} : vector<8x22xf32> to vector<8x16xf32>
    %1455 = vector.broadcast %1453 : f32 to vector<8x16xf32>
    %1456 = arith.mulf %1455, %1454 : vector<8x16xf32>
    %1457 = arith.addf %1452, %1456 : vector<8x16xf32>
    %c2_490 = arith.constant 2 : index
    %c51_491 = arith.constant 51 : index
    %1458 = memref.load %arg9[%c2_490, %c51_491] : memref<3x99xf32, #tpu.memory_space<smem>>
    %1459 = vector.extract_strided_slice %1412 {offsets = [0, 4], sizes = [8, 16], strides = [1, 1]} : vector<8x22xf32> to vector<8x16xf32>
    %1460 = vector.broadcast %1458 : f32 to vector<8x16xf32>
    %1461 = arith.mulf %1460, %1459 : vector<8x16xf32>
    %1462 = arith.addf %1457, %1461 : vector<8x16xf32>
    %c2_492 = arith.constant 2 : index
    %c52_493 = arith.constant 52 : index
    %1463 = memref.load %arg9[%c2_492, %c52_493] : memref<3x99xf32, #tpu.memory_space<smem>>
    %1464 = vector.extract_strided_slice %1411 {offsets = [0, 5], sizes = [8, 16], strides = [1, 1]} : vector<8x22xf32> to vector<8x16xf32>
    %1465 = vector.broadcast %1463 : f32 to vector<8x16xf32>
    %1466 = arith.mulf %1465, %1464 : vector<8x16xf32>
    %1467 = arith.addf %1462, %1466 : vector<8x16xf32>
    %c2_494 = arith.constant 2 : index
    %c53_495 = arith.constant 53 : index
    %1468 = memref.load %arg9[%c2_494, %c53_495] : memref<3x99xf32, #tpu.memory_space<smem>>
    %1469 = vector.extract_strided_slice %1412 {offsets = [0, 5], sizes = [8, 16], strides = [1, 1]} : vector<8x22xf32> to vector<8x16xf32>
    %1470 = vector.broadcast %1468 : f32 to vector<8x16xf32>
    %1471 = arith.mulf %1470, %1469 : vector<8x16xf32>
    %1472 = arith.addf %1467, %1471 : vector<8x16xf32>
    %c2_496 = arith.constant 2 : index
    %c54_497 = arith.constant 54 : index
    %1473 = memref.load %arg9[%c2_496, %c54_497] : memref<3x99xf32, #tpu.memory_space<smem>>
    %1474 = vector.extract_strided_slice %1411 {offsets = [0, 6], sizes = [8, 16], strides = [1, 1]} : vector<8x22xf32> to vector<8x16xf32>
    %1475 = vector.broadcast %1473 : f32 to vector<8x16xf32>
    %1476 = arith.mulf %1475, %1474 : vector<8x16xf32>
    %1477 = arith.addf %1472, %1476 : vector<8x16xf32>
    %c2_498 = arith.constant 2 : index
    %c55_499 = arith.constant 55 : index
    %1478 = memref.load %arg9[%c2_498, %c55_499] : memref<3x99xf32, #tpu.memory_space<smem>>
    %1479 = vector.extract_strided_slice %1412 {offsets = [0, 6], sizes = [8, 16], strides = [1, 1]} : vector<8x22xf32> to vector<8x16xf32>
    %1480 = vector.broadcast %1478 : f32 to vector<8x16xf32>
    %1481 = arith.mulf %1480, %1479 : vector<8x16xf32>
    %1482 = arith.addf %1477, %1481 : vector<8x16xf32>
    %1483 = vector.extract_strided_slice %1191 {offsets = [4, 0], sizes = [8, 22], strides = [1, 1]} : vector<14x22xf32> to vector<8x22xf32>
    %1484 = vector.extract_strided_slice %1193 {offsets = [4, 0], sizes = [8, 22], strides = [1, 1]} : vector<14x22xf32> to vector<8x22xf32>
    %c2_500 = arith.constant 2 : index
    %c56_501 = arith.constant 56 : index
    %1485 = memref.load %arg9[%c2_500, %c56_501] : memref<3x99xf32, #tpu.memory_space<smem>>
    %1486 = vector.extract_strided_slice %1483 {offsets = [0, 0], sizes = [8, 16], strides = [1, 1]} : vector<8x22xf32> to vector<8x16xf32>
    %1487 = vector.broadcast %1485 : f32 to vector<8x16xf32>
    %1488 = arith.mulf %1487, %1486 : vector<8x16xf32>
    %1489 = arith.addf %1482, %1488 : vector<8x16xf32>
    %c2_502 = arith.constant 2 : index
    %c57_503 = arith.constant 57 : index
    %1490 = memref.load %arg9[%c2_502, %c57_503] : memref<3x99xf32, #tpu.memory_space<smem>>
    %1491 = vector.extract_strided_slice %1484 {offsets = [0, 0], sizes = [8, 16], strides = [1, 1]} : vector<8x22xf32> to vector<8x16xf32>
    %1492 = vector.broadcast %1490 : f32 to vector<8x16xf32>
    %1493 = arith.mulf %1492, %1491 : vector<8x16xf32>
    %1494 = arith.addf %1489, %1493 : vector<8x16xf32>
    %c2_504 = arith.constant 2 : index
    %c58_505 = arith.constant 58 : index
    %1495 = memref.load %arg9[%c2_504, %c58_505] : memref<3x99xf32, #tpu.memory_space<smem>>
    %1496 = vector.extract_strided_slice %1483 {offsets = [0, 1], sizes = [8, 16], strides = [1, 1]} : vector<8x22xf32> to vector<8x16xf32>
    %1497 = vector.broadcast %1495 : f32 to vector<8x16xf32>
    %1498 = arith.mulf %1497, %1496 : vector<8x16xf32>
    %1499 = arith.addf %1494, %1498 : vector<8x16xf32>
    %c2_506 = arith.constant 2 : index
    %c59_507 = arith.constant 59 : index
    %1500 = memref.load %arg9[%c2_506, %c59_507] : memref<3x99xf32, #tpu.memory_space<smem>>
    %1501 = vector.extract_strided_slice %1484 {offsets = [0, 1], sizes = [8, 16], strides = [1, 1]} : vector<8x22xf32> to vector<8x16xf32>
    %1502 = vector.broadcast %1500 : f32 to vector<8x16xf32>
    %1503 = arith.mulf %1502, %1501 : vector<8x16xf32>
    %1504 = arith.addf %1499, %1503 : vector<8x16xf32>
    %c2_508 = arith.constant 2 : index
    %c60_509 = arith.constant 60 : index
    %1505 = memref.load %arg9[%c2_508, %c60_509] : memref<3x99xf32, #tpu.memory_space<smem>>
    %1506 = vector.extract_strided_slice %1483 {offsets = [0, 2], sizes = [8, 16], strides = [1, 1]} : vector<8x22xf32> to vector<8x16xf32>
    %1507 = vector.broadcast %1505 : f32 to vector<8x16xf32>
    %1508 = arith.mulf %1507, %1506 : vector<8x16xf32>
    %1509 = arith.addf %1504, %1508 : vector<8x16xf32>
    %c2_510 = arith.constant 2 : index
    %c61_511 = arith.constant 61 : index
    %1510 = memref.load %arg9[%c2_510, %c61_511] : memref<3x99xf32, #tpu.memory_space<smem>>
    %1511 = vector.extract_strided_slice %1484 {offsets = [0, 2], sizes = [8, 16], strides = [1, 1]} : vector<8x22xf32> to vector<8x16xf32>
    %1512 = vector.broadcast %1510 : f32 to vector<8x16xf32>
    %1513 = arith.mulf %1512, %1511 : vector<8x16xf32>
    %1514 = arith.addf %1509, %1513 : vector<8x16xf32>
    %c2_512 = arith.constant 2 : index
    %c62_513 = arith.constant 62 : index
    %1515 = memref.load %arg9[%c2_512, %c62_513] : memref<3x99xf32, #tpu.memory_space<smem>>
    %1516 = vector.extract_strided_slice %1483 {offsets = [0, 3], sizes = [8, 16], strides = [1, 1]} : vector<8x22xf32> to vector<8x16xf32>
    %1517 = vector.broadcast %1515 : f32 to vector<8x16xf32>
    %1518 = arith.mulf %1517, %1516 : vector<8x16xf32>
    %1519 = arith.addf %1514, %1518 : vector<8x16xf32>
    %c2_514 = arith.constant 2 : index
    %c63_515 = arith.constant 63 : index
    %1520 = memref.load %arg9[%c2_514, %c63_515] : memref<3x99xf32, #tpu.memory_space<smem>>
    %1521 = vector.extract_strided_slice %1484 {offsets = [0, 3], sizes = [8, 16], strides = [1, 1]} : vector<8x22xf32> to vector<8x16xf32>
    %1522 = vector.broadcast %1520 : f32 to vector<8x16xf32>
    %1523 = arith.mulf %1522, %1521 : vector<8x16xf32>
    %1524 = arith.addf %1519, %1523 : vector<8x16xf32>
    %c2_516 = arith.constant 2 : index
    %c64_517 = arith.constant 64 : index
    %1525 = memref.load %arg9[%c2_516, %c64_517] : memref<3x99xf32, #tpu.memory_space<smem>>
    %1526 = vector.extract_strided_slice %1483 {offsets = [0, 4], sizes = [8, 16], strides = [1, 1]} : vector<8x22xf32> to vector<8x16xf32>
    %1527 = vector.broadcast %1525 : f32 to vector<8x16xf32>
    %1528 = arith.mulf %1527, %1526 : vector<8x16xf32>
    %1529 = arith.addf %1524, %1528 : vector<8x16xf32>
    %c2_518 = arith.constant 2 : index
    %c65_519 = arith.constant 65 : index
    %1530 = memref.load %arg9[%c2_518, %c65_519] : memref<3x99xf32, #tpu.memory_space<smem>>
    %1531 = vector.extract_strided_slice %1484 {offsets = [0, 4], sizes = [8, 16], strides = [1, 1]} : vector<8x22xf32> to vector<8x16xf32>
    %1532 = vector.broadcast %1530 : f32 to vector<8x16xf32>
    %1533 = arith.mulf %1532, %1531 : vector<8x16xf32>
    %1534 = arith.addf %1529, %1533 : vector<8x16xf32>
    %c2_520 = arith.constant 2 : index
    %c66_521 = arith.constant 66 : index
    %1535 = memref.load %arg9[%c2_520, %c66_521] : memref<3x99xf32, #tpu.memory_space<smem>>
    %1536 = vector.extract_strided_slice %1483 {offsets = [0, 5], sizes = [8, 16], strides = [1, 1]} : vector<8x22xf32> to vector<8x16xf32>
    %1537 = vector.broadcast %1535 : f32 to vector<8x16xf32>
    %1538 = arith.mulf %1537, %1536 : vector<8x16xf32>
    %1539 = arith.addf %1534, %1538 : vector<8x16xf32>
    %c2_522 = arith.constant 2 : index
    %c67_523 = arith.constant 67 : index
    %1540 = memref.load %arg9[%c2_522, %c67_523] : memref<3x99xf32, #tpu.memory_space<smem>>
    %1541 = vector.extract_strided_slice %1484 {offsets = [0, 5], sizes = [8, 16], strides = [1, 1]} : vector<8x22xf32> to vector<8x16xf32>
    %1542 = vector.broadcast %1540 : f32 to vector<8x16xf32>
    %1543 = arith.mulf %1542, %1541 : vector<8x16xf32>
    %1544 = arith.addf %1539, %1543 : vector<8x16xf32>
    %c2_524 = arith.constant 2 : index
    %c68_525 = arith.constant 68 : index
    %1545 = memref.load %arg9[%c2_524, %c68_525] : memref<3x99xf32, #tpu.memory_space<smem>>
    %1546 = vector.extract_strided_slice %1483 {offsets = [0, 6], sizes = [8, 16], strides = [1, 1]} : vector<8x22xf32> to vector<8x16xf32>
    %1547 = vector.broadcast %1545 : f32 to vector<8x16xf32>
    %1548 = arith.mulf %1547, %1546 : vector<8x16xf32>
    %1549 = arith.addf %1544, %1548 : vector<8x16xf32>
    %c2_526 = arith.constant 2 : index
    %c69_527 = arith.constant 69 : index
    %1550 = memref.load %arg9[%c2_526, %c69_527] : memref<3x99xf32, #tpu.memory_space<smem>>
    %1551 = vector.extract_strided_slice %1484 {offsets = [0, 6], sizes = [8, 16], strides = [1, 1]} : vector<8x22xf32> to vector<8x16xf32>
    %1552 = vector.broadcast %1550 : f32 to vector<8x16xf32>
    %1553 = arith.mulf %1552, %1551 : vector<8x16xf32>
    %1554 = arith.addf %1549, %1553 : vector<8x16xf32>
    %1555 = vector.extract_strided_slice %1191 {offsets = [5, 0], sizes = [8, 22], strides = [1, 1]} : vector<14x22xf32> to vector<8x22xf32>
    %1556 = vector.extract_strided_slice %1193 {offsets = [5, 0], sizes = [8, 22], strides = [1, 1]} : vector<14x22xf32> to vector<8x22xf32>
    %c2_528 = arith.constant 2 : index
    %c70_529 = arith.constant 70 : index
    %1557 = memref.load %arg9[%c2_528, %c70_529] : memref<3x99xf32, #tpu.memory_space<smem>>
    %1558 = vector.extract_strided_slice %1555 {offsets = [0, 0], sizes = [8, 16], strides = [1, 1]} : vector<8x22xf32> to vector<8x16xf32>
    %1559 = vector.broadcast %1557 : f32 to vector<8x16xf32>
    %1560 = arith.mulf %1559, %1558 : vector<8x16xf32>
    %1561 = arith.addf %1554, %1560 : vector<8x16xf32>
    %c2_530 = arith.constant 2 : index
    %c71_531 = arith.constant 71 : index
    %1562 = memref.load %arg9[%c2_530, %c71_531] : memref<3x99xf32, #tpu.memory_space<smem>>
    %1563 = vector.extract_strided_slice %1556 {offsets = [0, 0], sizes = [8, 16], strides = [1, 1]} : vector<8x22xf32> to vector<8x16xf32>
    %1564 = vector.broadcast %1562 : f32 to vector<8x16xf32>
    %1565 = arith.mulf %1564, %1563 : vector<8x16xf32>
    %1566 = arith.addf %1561, %1565 : vector<8x16xf32>
    %c2_532 = arith.constant 2 : index
    %c72_533 = arith.constant 72 : index
    %1567 = memref.load %arg9[%c2_532, %c72_533] : memref<3x99xf32, #tpu.memory_space<smem>>
    %1568 = vector.extract_strided_slice %1555 {offsets = [0, 1], sizes = [8, 16], strides = [1, 1]} : vector<8x22xf32> to vector<8x16xf32>
    %1569 = vector.broadcast %1567 : f32 to vector<8x16xf32>
    %1570 = arith.mulf %1569, %1568 : vector<8x16xf32>
    %1571 = arith.addf %1566, %1570 : vector<8x16xf32>
    %c2_534 = arith.constant 2 : index
    %c73_535 = arith.constant 73 : index
    %1572 = memref.load %arg9[%c2_534, %c73_535] : memref<3x99xf32, #tpu.memory_space<smem>>
    %1573 = vector.extract_strided_slice %1556 {offsets = [0, 1], sizes = [8, 16], strides = [1, 1]} : vector<8x22xf32> to vector<8x16xf32>
    %1574 = vector.broadcast %1572 : f32 to vector<8x16xf32>
    %1575 = arith.mulf %1574, %1573 : vector<8x16xf32>
    %1576 = arith.addf %1571, %1575 : vector<8x16xf32>
    %c2_536 = arith.constant 2 : index
    %c74_537 = arith.constant 74 : index
    %1577 = memref.load %arg9[%c2_536, %c74_537] : memref<3x99xf32, #tpu.memory_space<smem>>
    %1578 = vector.extract_strided_slice %1555 {offsets = [0, 2], sizes = [8, 16], strides = [1, 1]} : vector<8x22xf32> to vector<8x16xf32>
    %1579 = vector.broadcast %1577 : f32 to vector<8x16xf32>
    %1580 = arith.mulf %1579, %1578 : vector<8x16xf32>
    %1581 = arith.addf %1576, %1580 : vector<8x16xf32>
    %c2_538 = arith.constant 2 : index
    %c75_539 = arith.constant 75 : index
    %1582 = memref.load %arg9[%c2_538, %c75_539] : memref<3x99xf32, #tpu.memory_space<smem>>
    %1583 = vector.extract_strided_slice %1556 {offsets = [0, 2], sizes = [8, 16], strides = [1, 1]} : vector<8x22xf32> to vector<8x16xf32>
    %1584 = vector.broadcast %1582 : f32 to vector<8x16xf32>
    %1585 = arith.mulf %1584, %1583 : vector<8x16xf32>
    %1586 = arith.addf %1581, %1585 : vector<8x16xf32>
    %c2_540 = arith.constant 2 : index
    %c76_541 = arith.constant 76 : index
    %1587 = memref.load %arg9[%c2_540, %c76_541] : memref<3x99xf32, #tpu.memory_space<smem>>
    %1588 = vector.extract_strided_slice %1555 {offsets = [0, 3], sizes = [8, 16], strides = [1, 1]} : vector<8x22xf32> to vector<8x16xf32>
    %1589 = vector.broadcast %1587 : f32 to vector<8x16xf32>
    %1590 = arith.mulf %1589, %1588 : vector<8x16xf32>
    %1591 = arith.addf %1586, %1590 : vector<8x16xf32>
    %c2_542 = arith.constant 2 : index
    %c77_543 = arith.constant 77 : index
    %1592 = memref.load %arg9[%c2_542, %c77_543] : memref<3x99xf32, #tpu.memory_space<smem>>
    %1593 = vector.extract_strided_slice %1556 {offsets = [0, 3], sizes = [8, 16], strides = [1, 1]} : vector<8x22xf32> to vector<8x16xf32>
    %1594 = vector.broadcast %1592 : f32 to vector<8x16xf32>
    %1595 = arith.mulf %1594, %1593 : vector<8x16xf32>
    %1596 = arith.addf %1591, %1595 : vector<8x16xf32>
    %c2_544 = arith.constant 2 : index
    %c78_545 = arith.constant 78 : index
    %1597 = memref.load %arg9[%c2_544, %c78_545] : memref<3x99xf32, #tpu.memory_space<smem>>
    %1598 = vector.extract_strided_slice %1555 {offsets = [0, 4], sizes = [8, 16], strides = [1, 1]} : vector<8x22xf32> to vector<8x16xf32>
    %1599 = vector.broadcast %1597 : f32 to vector<8x16xf32>
    %1600 = arith.mulf %1599, %1598 : vector<8x16xf32>
    %1601 = arith.addf %1596, %1600 : vector<8x16xf32>
    %c2_546 = arith.constant 2 : index
    %c79_547 = arith.constant 79 : index
    %1602 = memref.load %arg9[%c2_546, %c79_547] : memref<3x99xf32, #tpu.memory_space<smem>>
    %1603 = vector.extract_strided_slice %1556 {offsets = [0, 4], sizes = [8, 16], strides = [1, 1]} : vector<8x22xf32> to vector<8x16xf32>
    %1604 = vector.broadcast %1602 : f32 to vector<8x16xf32>
    %1605 = arith.mulf %1604, %1603 : vector<8x16xf32>
    %1606 = arith.addf %1601, %1605 : vector<8x16xf32>
    %c2_548 = arith.constant 2 : index
    %c80_549 = arith.constant 80 : index
    %1607 = memref.load %arg9[%c2_548, %c80_549] : memref<3x99xf32, #tpu.memory_space<smem>>
    %1608 = vector.extract_strided_slice %1555 {offsets = [0, 5], sizes = [8, 16], strides = [1, 1]} : vector<8x22xf32> to vector<8x16xf32>
    %1609 = vector.broadcast %1607 : f32 to vector<8x16xf32>
    %1610 = arith.mulf %1609, %1608 : vector<8x16xf32>
    %1611 = arith.addf %1606, %1610 : vector<8x16xf32>
    %c2_550 = arith.constant 2 : index
    %c81_551 = arith.constant 81 : index
    %1612 = memref.load %arg9[%c2_550, %c81_551] : memref<3x99xf32, #tpu.memory_space<smem>>
    %1613 = vector.extract_strided_slice %1556 {offsets = [0, 5], sizes = [8, 16], strides = [1, 1]} : vector<8x22xf32> to vector<8x16xf32>
    %1614 = vector.broadcast %1612 : f32 to vector<8x16xf32>
    %1615 = arith.mulf %1614, %1613 : vector<8x16xf32>
    %1616 = arith.addf %1611, %1615 : vector<8x16xf32>
    %c2_552 = arith.constant 2 : index
    %c82_553 = arith.constant 82 : index
    %1617 = memref.load %arg9[%c2_552, %c82_553] : memref<3x99xf32, #tpu.memory_space<smem>>
    %1618 = vector.extract_strided_slice %1555 {offsets = [0, 6], sizes = [8, 16], strides = [1, 1]} : vector<8x22xf32> to vector<8x16xf32>
    %1619 = vector.broadcast %1617 : f32 to vector<8x16xf32>
    %1620 = arith.mulf %1619, %1618 : vector<8x16xf32>
    %1621 = arith.addf %1616, %1620 : vector<8x16xf32>
    %c2_554 = arith.constant 2 : index
    %c83_555 = arith.constant 83 : index
    %1622 = memref.load %arg9[%c2_554, %c83_555] : memref<3x99xf32, #tpu.memory_space<smem>>
    %1623 = vector.extract_strided_slice %1556 {offsets = [0, 6], sizes = [8, 16], strides = [1, 1]} : vector<8x22xf32> to vector<8x16xf32>
    %1624 = vector.broadcast %1622 : f32 to vector<8x16xf32>
    %1625 = arith.mulf %1624, %1623 : vector<8x16xf32>
    %1626 = arith.addf %1621, %1625 : vector<8x16xf32>
    %1627 = vector.extract_strided_slice %1191 {offsets = [6, 0], sizes = [8, 22], strides = [1, 1]} : vector<14x22xf32> to vector<8x22xf32>
    %1628 = vector.extract_strided_slice %1193 {offsets = [6, 0], sizes = [8, 22], strides = [1, 1]} : vector<14x22xf32> to vector<8x22xf32>
    %c2_556 = arith.constant 2 : index
    %c84_557 = arith.constant 84 : index
    %1629 = memref.load %arg9[%c2_556, %c84_557] : memref<3x99xf32, #tpu.memory_space<smem>>
    %1630 = vector.extract_strided_slice %1627 {offsets = [0, 0], sizes = [8, 16], strides = [1, 1]} : vector<8x22xf32> to vector<8x16xf32>
    %1631 = vector.broadcast %1629 : f32 to vector<8x16xf32>
    %1632 = arith.mulf %1631, %1630 : vector<8x16xf32>
    %1633 = arith.addf %1626, %1632 : vector<8x16xf32>
    %c2_558 = arith.constant 2 : index
    %c85_559 = arith.constant 85 : index
    %1634 = memref.load %arg9[%c2_558, %c85_559] : memref<3x99xf32, #tpu.memory_space<smem>>
    %1635 = vector.extract_strided_slice %1628 {offsets = [0, 0], sizes = [8, 16], strides = [1, 1]} : vector<8x22xf32> to vector<8x16xf32>
    %1636 = vector.broadcast %1634 : f32 to vector<8x16xf32>
    %1637 = arith.mulf %1636, %1635 : vector<8x16xf32>
    %1638 = arith.addf %1633, %1637 : vector<8x16xf32>
    %c2_560 = arith.constant 2 : index
    %c86_561 = arith.constant 86 : index
    %1639 = memref.load %arg9[%c2_560, %c86_561] : memref<3x99xf32, #tpu.memory_space<smem>>
    %1640 = vector.extract_strided_slice %1627 {offsets = [0, 1], sizes = [8, 16], strides = [1, 1]} : vector<8x22xf32> to vector<8x16xf32>
    %1641 = vector.broadcast %1639 : f32 to vector<8x16xf32>
    %1642 = arith.mulf %1641, %1640 : vector<8x16xf32>
    %1643 = arith.addf %1638, %1642 : vector<8x16xf32>
    %c2_562 = arith.constant 2 : index
    %c87_563 = arith.constant 87 : index
    %1644 = memref.load %arg9[%c2_562, %c87_563] : memref<3x99xf32, #tpu.memory_space<smem>>
    %1645 = vector.extract_strided_slice %1628 {offsets = [0, 1], sizes = [8, 16], strides = [1, 1]} : vector<8x22xf32> to vector<8x16xf32>
    %1646 = vector.broadcast %1644 : f32 to vector<8x16xf32>
    %1647 = arith.mulf %1646, %1645 : vector<8x16xf32>
    %1648 = arith.addf %1643, %1647 : vector<8x16xf32>
    %c2_564 = arith.constant 2 : index
    %c88_565 = arith.constant 88 : index
    %1649 = memref.load %arg9[%c2_564, %c88_565] : memref<3x99xf32, #tpu.memory_space<smem>>
    %1650 = vector.extract_strided_slice %1627 {offsets = [0, 2], sizes = [8, 16], strides = [1, 1]} : vector<8x22xf32> to vector<8x16xf32>
    %1651 = vector.broadcast %1649 : f32 to vector<8x16xf32>
    %1652 = arith.mulf %1651, %1650 : vector<8x16xf32>
    %1653 = arith.addf %1648, %1652 : vector<8x16xf32>
    %c2_566 = arith.constant 2 : index
    %c89_567 = arith.constant 89 : index
    %1654 = memref.load %arg9[%c2_566, %c89_567] : memref<3x99xf32, #tpu.memory_space<smem>>
    %1655 = vector.extract_strided_slice %1628 {offsets = [0, 2], sizes = [8, 16], strides = [1, 1]} : vector<8x22xf32> to vector<8x16xf32>
    %1656 = vector.broadcast %1654 : f32 to vector<8x16xf32>
    %1657 = arith.mulf %1656, %1655 : vector<8x16xf32>
    %1658 = arith.addf %1653, %1657 : vector<8x16xf32>
    %c2_568 = arith.constant 2 : index
    %c90_569 = arith.constant 90 : index
    %1659 = memref.load %arg9[%c2_568, %c90_569] : memref<3x99xf32, #tpu.memory_space<smem>>
    %1660 = vector.extract_strided_slice %1627 {offsets = [0, 3], sizes = [8, 16], strides = [1, 1]} : vector<8x22xf32> to vector<8x16xf32>
    %1661 = vector.broadcast %1659 : f32 to vector<8x16xf32>
    %1662 = arith.mulf %1661, %1660 : vector<8x16xf32>
    %1663 = arith.addf %1658, %1662 : vector<8x16xf32>
    %c2_570 = arith.constant 2 : index
    %c91_571 = arith.constant 91 : index
    %1664 = memref.load %arg9[%c2_570, %c91_571] : memref<3x99xf32, #tpu.memory_space<smem>>
    %1665 = vector.extract_strided_slice %1628 {offsets = [0, 3], sizes = [8, 16], strides = [1, 1]} : vector<8x22xf32> to vector<8x16xf32>
    %1666 = vector.broadcast %1664 : f32 to vector<8x16xf32>
    %1667 = arith.mulf %1666, %1665 : vector<8x16xf32>
    %1668 = arith.addf %1663, %1667 : vector<8x16xf32>
    %c2_572 = arith.constant 2 : index
    %c92_573 = arith.constant 92 : index
    %1669 = memref.load %arg9[%c2_572, %c92_573] : memref<3x99xf32, #tpu.memory_space<smem>>
    %1670 = vector.extract_strided_slice %1627 {offsets = [0, 4], sizes = [8, 16], strides = [1, 1]} : vector<8x22xf32> to vector<8x16xf32>
    %1671 = vector.broadcast %1669 : f32 to vector<8x16xf32>
    %1672 = arith.mulf %1671, %1670 : vector<8x16xf32>
    %1673 = arith.addf %1668, %1672 : vector<8x16xf32>
    %c2_574 = arith.constant 2 : index
    %c93_575 = arith.constant 93 : index
    %1674 = memref.load %arg9[%c2_574, %c93_575] : memref<3x99xf32, #tpu.memory_space<smem>>
    %1675 = vector.extract_strided_slice %1628 {offsets = [0, 4], sizes = [8, 16], strides = [1, 1]} : vector<8x22xf32> to vector<8x16xf32>
    %1676 = vector.broadcast %1674 : f32 to vector<8x16xf32>
    %1677 = arith.mulf %1676, %1675 : vector<8x16xf32>
    %1678 = arith.addf %1673, %1677 : vector<8x16xf32>
    %c2_576 = arith.constant 2 : index
    %c94_577 = arith.constant 94 : index
    %1679 = memref.load %arg9[%c2_576, %c94_577] : memref<3x99xf32, #tpu.memory_space<smem>>
    %1680 = vector.extract_strided_slice %1627 {offsets = [0, 5], sizes = [8, 16], strides = [1, 1]} : vector<8x22xf32> to vector<8x16xf32>
    %1681 = vector.broadcast %1679 : f32 to vector<8x16xf32>
    %1682 = arith.mulf %1681, %1680 : vector<8x16xf32>
    %1683 = arith.addf %1678, %1682 : vector<8x16xf32>
    %c2_578 = arith.constant 2 : index
    %c95_579 = arith.constant 95 : index
    %1684 = memref.load %arg9[%c2_578, %c95_579] : memref<3x99xf32, #tpu.memory_space<smem>>
    %1685 = vector.extract_strided_slice %1628 {offsets = [0, 5], sizes = [8, 16], strides = [1, 1]} : vector<8x22xf32> to vector<8x16xf32>
    %1686 = vector.broadcast %1684 : f32 to vector<8x16xf32>
    %1687 = arith.mulf %1686, %1685 : vector<8x16xf32>
    %1688 = arith.addf %1683, %1687 : vector<8x16xf32>
    %c2_580 = arith.constant 2 : index
    %c96_581 = arith.constant 96 : index
    %1689 = memref.load %arg9[%c2_580, %c96_581] : memref<3x99xf32, #tpu.memory_space<smem>>
    %1690 = vector.extract_strided_slice %1627 {offsets = [0, 6], sizes = [8, 16], strides = [1, 1]} : vector<8x22xf32> to vector<8x16xf32>
    %1691 = vector.broadcast %1689 : f32 to vector<8x16xf32>
    %1692 = arith.mulf %1691, %1690 : vector<8x16xf32>
    %1693 = arith.addf %1688, %1692 : vector<8x16xf32>
    %c2_582 = arith.constant 2 : index
    %c97_583 = arith.constant 97 : index
    %1694 = memref.load %arg9[%c2_582, %c97_583] : memref<3x99xf32, #tpu.memory_space<smem>>
    %1695 = vector.extract_strided_slice %1628 {offsets = [0, 6], sizes = [8, 16], strides = [1, 1]} : vector<8x22xf32> to vector<8x16xf32>
    %1696 = vector.broadcast %1694 : f32 to vector<8x16xf32>
    %1697 = arith.mulf %1696, %1695 : vector<8x16xf32>
    %1698 = arith.addf %1693, %1697 : vector<8x16xf32>
    %c2_584 = arith.constant 2 : index
    %c98_585 = arith.constant 98 : index
    %1699 = memref.load %arg9[%c2_584, %c98_585] : memref<3x99xf32, #tpu.memory_space<smem>>
    %1700 = vector.broadcast %1699 : f32 to vector<8x16xf32>
    %1701 = arith.addf %1698, %1700 : vector<8x16xf32>
    %1702 = arith.negf %1701 : vector<8x16xf32>
    %1703 = math.exp %1702 : vector<8x16xf32>
    %cst_586 = arith.constant 1.000000e+00 : f32
    %1704 = vector.broadcast %cst_586 : f32 to vector<8x16xf32>
    %1705 = arith.addf %1704, %1703 : vector<8x16xf32>
    %1706 = arith.divf %1704, %1705 : vector<8x16xf32>
    %1707 = vector.shape_cast %640 : vector<8x8xf32> to vector<8x8x1xf32>
    %1708 = vector.shape_cast %1173 : vector<8x16xf32> to vector<1x8x16xf32>
    %1709 = vector.broadcast %1707 : vector<8x8x1xf32> to vector<8x8x16xf32>
    %1710 = vector.broadcast %1708 : vector<1x8x16xf32> to vector<8x8x16xf32>
    %1711 = arith.addf %1709, %1710 : vector<8x8x16xf32>
    %1712 = vector.shape_cast %1706 : vector<8x16xf32> to vector<8x1x16xf32>
    %1713 = vector.broadcast %1712 : vector<8x1x16xf32> to vector<8x8x16xf32>
    %1714 = arith.addf %1711, %1713 : vector<8x8x16xf32>
    %cst_587 = arith.constant 0.333333343 : f32
    %1715 = vector.broadcast %cst_587 : f32 to vector<8x8x16xf32>
    %1716 = arith.mulf %1714, %1715 : vector<8x8x16xf32>
    %1717 = arith.mulf %95, %1716 : vector<8x8x16xf32>
    %1718 = vector.shape_cast %1717 : vector<8x8x16xf32> to vector<64x16xf32>
    %cst_588 = arith.constant dense<0.000000e+00> : vector<16xf32>
    %1719 = vector.multi_reduction <add>, %1718, %cst_588 [0] : vector<64x16xf32> to vector<16xf32>
    %1720 = vector.shape_cast %1719 : vector<16xf32> to vector<1x16xf32>
    %cst_589 = arith.constant 6.400000e+01 : f32
    %1721 = vector.broadcast %cst_589 : f32 to vector<1x16xf32>
    %1722 = arith.divf %1720, %1721 : vector<1x16xf32>
    %1723 = vector.broadcast %1722 : vector<1x16xf32> to vector<64x16xf32>
    %1724 = arith.subf %1718, %1723 : vector<64x16xf32>
    %1725 = arith.mulf %1724, %1724 : vector<64x16xf32>
    %cst_590 = arith.constant dense<0.000000e+00> : vector<16xf32>
    %1726 = vector.multi_reduction <add>, %1725, %cst_590 [0] : vector<64x16xf32> to vector<16xf32>
    %1727 = vector.shape_cast %1726 : vector<16xf32> to vector<1x16xf32>
    %cst_591 = arith.constant 6.300000e+01 : f32
    %1728 = vector.broadcast %cst_591 : f32 to vector<1x16xf32>
    %1729 = arith.divf %1727, %1728 : vector<1x16xf32>
    %1730 = math.sqrt %1729 : vector<1x16xf32>
    %c0_592 = arith.constant 0 : index
    %c0_593 = arith.constant 0 : index
    %1731 = vector.load %arg8[%c0_592, %c0_593] : memref<6x16xf32, #tpu.memory_space<vmem>>, vector<1x16xf32>
    %1732 = vector.shape_cast %1731 : vector<1x16xf32> to vector<16xf32>
    %1733 = vector.shape_cast %1732 : vector<16xf32> to vector<1x16xf32>
    %1734 = arith.mulf %1722, %1733 : vector<1x16xf32>
    %c1_594 = arith.constant 1 : index
    %c0_595 = arith.constant 0 : index
    %1735 = vector.load %arg8[%c1_594, %c0_595] : memref<6x16xf32, #tpu.memory_space<vmem>>, vector<1x16xf32>
    %1736 = vector.shape_cast %1735 : vector<1x16xf32> to vector<16xf32>
    %1737 = vector.shape_cast %1736 : vector<16xf32> to vector<1x16xf32>
    %1738 = arith.mulf %1730, %1737 : vector<1x16xf32>
    %1739 = arith.addf %1734, %1738 : vector<1x16xf32>
    %c2_596 = arith.constant 2 : index
    %c0_597 = arith.constant 0 : index
    %1740 = vector.load %arg8[%c2_596, %c0_597] : memref<6x16xf32, #tpu.memory_space<vmem>>, vector<1x16xf32>
    %1741 = vector.shape_cast %1740 : vector<1x16xf32> to vector<16xf32>
    %1742 = vector.shape_cast %1741 : vector<16xf32> to vector<1x16xf32>
    %1743 = arith.addf %1739, %1742 : vector<1x16xf32>
    %1744 = arith.negf %1743 : vector<1x16xf32>
    %1745 = math.exp %1744 : vector<1x16xf32>
    %cst_598 = arith.constant 1.000000e+00 : f32
    %1746 = vector.broadcast %cst_598 : f32 to vector<1x16xf32>
    %1747 = arith.addf %1746, %1745 : vector<1x16xf32>
    %1748 = arith.divf %1746, %1747 : vector<1x16xf32>
    %c3_599 = arith.constant 3 : index
    %c0_600 = arith.constant 0 : index
    %1749 = vector.load %arg8[%c3_599, %c0_600] : memref<6x16xf32, #tpu.memory_space<vmem>>, vector<1x16xf32>
    %1750 = vector.shape_cast %1749 : vector<1x16xf32> to vector<16xf32>
    %1751 = vector.shape_cast %1750 : vector<16xf32> to vector<1x16xf32>
    %1752 = arith.mulf %1722, %1751 : vector<1x16xf32>
    %c4_601 = arith.constant 4 : index
    %c0_602 = arith.constant 0 : index
    %1753 = vector.load %arg8[%c4_601, %c0_602] : memref<6x16xf32, #tpu.memory_space<vmem>>, vector<1x16xf32>
    %1754 = vector.shape_cast %1753 : vector<1x16xf32> to vector<16xf32>
    %1755 = vector.shape_cast %1754 : vector<16xf32> to vector<1x16xf32>
    %1756 = arith.mulf %1730, %1755 : vector<1x16xf32>
    %1757 = arith.addf %1752, %1756 : vector<1x16xf32>
    %c5_603 = arith.constant 5 : index
    %c0_604 = arith.constant 0 : index
    %1758 = vector.load %arg8[%c5_603, %c0_604] : memref<6x16xf32, #tpu.memory_space<vmem>>, vector<1x16xf32>
    %1759 = vector.shape_cast %1758 : vector<1x16xf32> to vector<16xf32>
    %1760 = vector.shape_cast %1759 : vector<16xf32> to vector<1x16xf32>
    %1761 = arith.addf %1757, %1760 : vector<1x16xf32>
    %1762 = arith.negf %1761 : vector<1x16xf32>
    %1763 = math.exp %1762 : vector<1x16xf32>
    %cst_605 = arith.constant 1.000000e+00 : f32
    %1764 = vector.broadcast %cst_605 : f32 to vector<1x16xf32>
    %1765 = arith.addf %1764, %1763 : vector<1x16xf32>
    %1766 = arith.divf %1764, %1765 : vector<1x16xf32>
    %1767 = vector.broadcast %1748 : vector<1x16xf32> to vector<64x16xf32>
    %1768 = arith.mulf %1718, %1767 : vector<64x16xf32>
    %1769 = arith.addf %2, %1768 : vector<64x16xf32>
    %1770 = arith.subf %1766, %1748 : vector<1x16xf32>
    %1771 = arith.mulf %1722, %1770 : vector<1x16xf32>
    %1772 = vector.broadcast %1771 : vector<1x16xf32> to vector<64x16xf32>
    %1773 = arith.addf %1769, %1772 : vector<64x16xf32>
    %1774 = vector.shape_cast %1773 : vector<64x16xf32> to vector<1x8x8x16xf32>
    %c0_606 = arith.constant 0 : index
    %c0_607 = arith.constant 0 : index
    %c0_608 = arith.constant 0 : index
    %c0_609 = arith.constant 0 : index
    %1775 = vector.load %arg10[%c0_606, %c0_607, %c0_608, %c0_609] : memref<1x8x8x16xf32, #tpu.memory_space<vmem>>, vector<1x8x8x16xf32>
    tpu.vector_store %arg10[%c0_606, %c0_607, %c0_608, %c0_609], %1774 {strides = array<i32>} : memref<1x8x8x16xf32, #tpu.memory_space<vmem>>, vector<1x8x8x16xf32>,
    return
  }
  func.func @transform_0(%arg0: i32) -> (i32, i32, i32, i32) {
    %c0_i32 = arith.constant 0 : i32
    %c0_i32_0 = arith.constant 0 : i32
    %c0_i32_1 = arith.constant 0 : i32
    %c0_i32_2 = arith.constant 0 : i32
    return %arg0, %c0_i32, %c0_i32_0, %c0_i32_1 : i32, i32, i32, i32
  }
  func.func @transform_1(%arg0: i32) -> (i32, i32) {
    %c0_i32 = arith.constant 0 : i32
    %c0_i32_0 = arith.constant 0 : i32
    %c0_i32_1 = arith.constant 0 : i32
    return %c0_i32, %c0_i32_0 : i32, i32
  }
  func.func @transform_2(%arg0: i32) -> (i32, i32) {
    %c0_i32 = arith.constant 0 : i32
    %c0_i32_0 = arith.constant 0 : i32
    %c0_i32_1 = arith.constant 0 : i32
    return %c0_i32, %c0_i32_0 : i32, i32
  }
  func.func @transform_3(%arg0: i32) -> (i32, i32) {
    %c0_i32 = arith.constant 0 : i32
    %c0_i32_0 = arith.constant 0 : i32
    %c0_i32_1 = arith.constant 0 : i32
    return %c0_i32, %c0_i32_0 : i32, i32
  }
  func.func @transform_4(%arg0: i32) -> (i32, i32) {
    %c0_i32 = arith.constant 0 : i32
    %c0_i32_0 = arith.constant 0 : i32
    %c0_i32_1 = arith.constant 0 : i32
    return %c0_i32, %c0_i32_0 : i32, i32
  }
  func.func @transform_5(%arg0: i32) -> (i32, i32) {
    %c0_i32 = arith.constant 0 : i32
    %c0_i32_0 = arith.constant 0 : i32
    %c0_i32_1 = arith.constant 0 : i32
    return %c0_i32, %c0_i32_0 : i32, i32
  }
  func.func @transform_6(%arg0: i32) -> (i32, i32) {
    %c0_i32 = arith.constant 0 : i32
    %c0_i32_0 = arith.constant 0 : i32
    %c0_i32_1 = arith.constant 0 : i32
    return %c0_i32, %c0_i32_0 : i32, i32
  }
  func.func @transform_7(%arg0: i32) -> (i32, i32) {
    %c0_i32 = arith.constant 0 : i32
    %c0_i32_0 = arith.constant 0 : i32
    %c0_i32_1 = arith.constant 0 : i32
    return %c0_i32, %c0_i32_0 : i32, i32
  }
  func.func @transform_8(%arg0: i32) -> (i32, i32) {
    %c0_i32 = arith.constant 0 : i32
    %c0_i32_0 = arith.constant 0 : i32
    %c0_i32_1 = arith.constant 0 : i32
    return %c0_i32, %c0_i32_0 : i32, i32
  }
  func.func @transform_9(%arg0: i32) -> (i32, i32, i32, i32) {
    %c0_i32 = arith.constant 0 : i32
    %c0_i32_0 = arith.constant 0 : i32
    %c0_i32_1 = arith.constant 0 : i32
    %c0_i32_2 = arith.constant 0 : i32
    return %arg0, %c0_i32, %c0_i32_0, %c0_i32_1 : i32, i32, i32, i32
  }
}

</mosaic_0001>

<bundles_post_ra>
// kernel: forward.1
= control target key start
LH: loop header
LB: loop body
LE: loop exit
PB: predicated region body
PF: predicated region fallthrough
CT: control target
= control target key end

     0   :  { %s11871_s0 = inlined_call_operand.hbm [shape: f32[2,8,8,16], index: 0, kind: input, shape index: {}]   ;;  %s11872_s1 = inlined_call_operand.vmem [shape: f32[16,32], index: 1, kind: input, shape index: {}]   ;;  %s11873_s2 = inlined_call_operand.vmem [shape: f32[1,32], index: 2, kind: input, shape index: {}]   ;;  %s11874_s3 = inlined_call_operand.vmem [shape: f32[9,32], index: 3, kind: input, shape index: {}]   ;;  %s11875_s4 = inlined_call_operand.vmem [shape: f32[1,32], index: 4, kind: input, shape index: {}]   ;;  %s11876_s5 = inlined_call_operand.vmem [shape: f32[32,16], index: 5, kind: input, shape index: {}]   ;;  %s11877_s6 = inlined_call_operand.vmem [shape: f32[1,16], index: 6, kind: input, shape index: {}]   ;;  %s11878_s7 = inlined_call_operand.vmem [shape: f32[6,16], index: 7, kind: input, shape index: {}]   ;;  %s11879_s8 = inlined_call_operand.vmem [shape: f32[3,99], index: 8, kind: input, shape index: {}]   ;;  %s11880_s9 = inlined_call_operand.hbm [shape: f32[2,8,8,16], index: 9, kind: output, shape index: {}]  }
   0x1   :  { %12005 = sst [smem:[#allocation172_spill]] %s11871_s0 }
   0x2   :  { %12006 = sst [smem:[#allocation173_spill]] %s11872_s1 }
   0x3   :  { %12007 = sst [smem:[#allocation174_spill]] %s11873_s2 }
   0x4   :  { %12008 = sst [smem:[#allocation175_spill]] %s11874_s3 }
   0x5   :  { %12009 = sst [smem:[#allocation176_spill]] %s11875_s4 }
   0x6   :  { %12010 = sst [smem:[#allocation177_spill]] %s11876_s5 }
   0x7   :  { %12011 = sst [smem:[#allocation178_spill]] %s11877_s6 }
   0x8   :  { %12012 = sst [smem:[#allocation179_spill]] %s11878_s7 }
   0x9   :  { %12013 = sst [smem:[#allocation180_spill]] %s11879_s8 }
   0xa   :  { %12014 = sst [smem:[#allocation181_spill]] %s11880_s9 }
   0xb   :  { %14 = vsyncpa [#allocation4], 0 }
   0xc   :  { %16 = vsyncpa [#allocation4 + $0x1], 0 }
   0xd   :  { %17 = vsyncpa [#allocation6], 0 }
   0xe   :  { %18 = vsyncpa [#allocation5], 0 }
   0xf   :  { %20 = vsyncpa [#allocation5 + $0x1], 0  ;;  %s7301_s30 = smov 0   ;;  %s7303_s10 = smov 0  }
  0x10   :  { %s7305_s11 = smov 0   ;;  %s7307_s12 = smov 0  }
  0x11 LB: > { %12015 = sst [smem:[#allocation12_spill]] %s7218_s30  ;;  %s7322_s13 = sadd.s32 4294967295, %s7230_s12   ;;  %s7230_s12 = sphi %s7307_s12, %s12673_s12   ;;  %s7226_s11 = sphi %s7305_s11, %s12676_s11   ;;  %s7222_s10 = sphi %s7303_s10, %s12675_s10   ;;  %s7218_s30 = sphi %s7301_s30, %s12674_s30  }
  0x12   : > { %12016 = sst [smem:[#allocation13_spill]] %s7222_s10  ;;  %s6453_s14 = sadd.s32 4294967294, %s7230_s12  }
  0x13   : > { %12017 = sst [smem:[#allocation14_spill]] %s7226_s11  ;;  %s7326_s15 = sadd.s32 1, %s7230_s12  }
  0x14   : > { %12018 = sst [smem:[#allocation15_spill]] %s7230_s12  ;;  %s33_s16 = sadd.s32 1, %s7226_s11 }
  0x15   : > { %12019 = sst [smem:[#allocation16_spill]] %s7322_s13  ;;  %s30_s17 = ssub.s32 %s7230_s12, %s7326_s15 }
  0x16   : > { %12020 = sst [smem:[#allocation17_spill]] %s7326_s15  ;;  %p40_p0 = scmp.ne.s32.totalorder %s7226_s11, %s7222_s10 }
  0x17   : > { %p31_p1 = scmp.eq.s32.totalorder %s30_s17, 0  ;;  %p41_p2 = scmp.eq.s32.totalorder %s7230_s12, 0 }
  0x18   : > { %p46_p3 = scmp.ne.s32.totalorder %s7222_s10, %s7218_s30  ;;  %p11882_p4 = scmp.eq.s32.totalorder %s7322_s13, 0 }
  0x19   : > { %s7338_s18 = scalar_select %p31_p1, %s7226_s11, %s33_s16  }
  0x1a   : > { %p7340_p5 = por %p41_p2, %p40_p0  ;;  %p7346_p6 = por %p11882_p4, %p46_p3 }
  0x1b   : > { %12021 = sst [smem:[#allocation18_spill]] %s7338_s18  ;;  %p238_p7 = scmp.eq.s32.totalorder %s7322_s13, 1 }
  0x1c   : > { %s12023_s20 = scalar_select %p7346_p6, 1, 0 }
  0x1d   : > { %p244_p8 = scmp.eq.s32.totalorder %s6453_s14, 1  ;;  %p6454_p9 = scmp.ge.s32.totalorder %s7230_s12, 1 }
  0x1e   : > { %p251_p10 = scmp.lt.s32.totalorder %s7230_s12, 3  ;;  %p7353_p11 = por %p238_p7, %p40_p0 }
  0x1f   : > { %p7357_p12 = por %p244_p8, %p46_p3  ;;  %s12029_s8 = sld [smem:[#allocation180_spill]] }
  0x20   : > { %s12024_s21 = scalar_select %p7353_p11, 1, 0 }
  0x21   : > { %s12026_s22 = scalar_select %p7357_p12, 1, 0 }
  0x22   : > { %12025 = sst [smem:[#allocation19_spill]] %s12024_s21  ;;  %p7361_p13 = pnand %p6454_p9, %p251_p10 }
  0x23   : > { %12027 = sst [smem:[#allocation20_spill]] %s12026_s22  ;;  %p7033_p2 = scmp.lt.s32.totalorder %s7230_s12, 2 }
  0x24   : > { %p7020_p1 = pneg %p7361_p13  ;;  %s296_s28 = sand.u32 1, %s7226_s11  }
  0x25   : > { %s285_s26 = sshll.u32 %s12029_s8, 4  ;;  %p7381_p3 = pnand %p7033_p2, %p7340_p5  ;;  %s286_s26 = int_to_ptr.vmem [resolvable:$true] %s285_s26 }
  0x26   : > { %p7374_p7 = pnand %p7020_p1, %p11882_p4  ;;  %s6457_s14 = sshll.u32 %s296_s28, 6 }
  0x27   : > { %s7115_s16 = scalar_lea.vmem %s286_s26, 64  ;;  %p7123_p12 = scmp.lt.s32.totalorder %s286_s26, %s286_s26 }
  0x28   : > { %p7116_p8 = scmp.ne.s32.totalorder %s286_s26, %s7115_s16  ;;  %p7117_p9 = pneg %p7374_p7 }
  0x29   : > { %p7124_p11 = scmp.lt.s32.totalorder %s7115_s16, %s7115_s16 }
  0x2a   : > { %p7118_p10 = pnand %p7117_p9, %p7116_p8 }
  0x2b   : > { %p7125_p1 = por %p7124_p11, %p7123_p12 }
  0x2c   : > { %p7119_p0 = pneg %p7118_p10 }
  0x2e   : > { %p7126_p4 = pnand %p7125_p1, %p7119_p0 }
  0x30   : > { %7129 = shalt.err (!%p7126_p4)
}
  0x31   : > { %s7232_s17 = smov [#allocation7]   ;;  %s6826_s19 = sshll.u32 %s7230_s12, 10 }
  0x32   : > { %7023 = dma.vmem_to_smem (!%p7374_p7), %s286_s26, 64, %s7232_s17, [#allocation6]  }
  0x33   : > { %s300_s24 = scalar_lea.vmem [#allocation3], %s6457_s14  ;;  %s12032_s0 = sld [smem:[#allocation172_spill]] }
  0x34   : > { %s307_s25 = sshll.u32 %s300_s24, 4  ;;  %s7397_s16 = scalar_lea.sflag [#allocation4], %s296_s28  ;;  %s7395_s25 = int_to_ptr.vmem [resolvable:$true] %s307_s25 }
  0x35   : > { %p7132_p5 = pneg %p7381_p3 }
  0x39   : > { %s7393_s11 = scalar_lea.hbm %s12032_s0, %s6826_s19  ;;  %s7135_s18 = scalar_lea.hbm %s12032_s0, 2048 }
  0x3a   : > { %s7130_s27 = scalar_lea.hbm %s7393_s11, 1024  ;;  %p7136_p0 = scmp.lt.u32.totalorder %s7393_s11, %s12032_s0 }
  0x3b   : > { %p7131_p4 = scmp.ne.s32.totalorder %s7393_s11, %s7130_s27  ;;  %p7137_p2 = scmp.lt.u32.totalorder %s7135_s18, %s7130_s27 }
  0x3c   : > { %p7139_p8 = scmp.lt.u32.totalorder %s7130_s27, %s7393_s11 }
  0x3d   : > { %p7133_p11 = pnand %p7132_p5, %p7131_p4  ;;  %p7138_p7 = por %p7137_p2, %p7136_p0 }
  0x3f   : > { %p7134_p12 = pneg %p7133_p11  ;;  %p7140_p9 = por %p7139_p8, %p7138_p7 }
  0x41   : > { %p7141_p10 = pnand %p7140_p9, %p7134_p12 }
  0x43   : > { %7144 = shalt.err (!%p7141_p10)
}
  0x44   : > { %s7145_s28 = scalar_lea.vmem %s7395_s25, 1024  ;;  %s7233_s19 = smov [#allocation3]  }
  0x45   : > { %p7146_p1 = scmp.ne.s32.totalorder %s7395_s25, %s7145_s28  ;;  %s7150_s24 = sshll.u32 %s7233_s19, 4  ;;  %s7151_s24 = int_to_ptr.vmem [resolvable:$false] %s7150_s24 }
  0x46   : > { %s7152_s26 = scalar_lea.vmem %s7151_s24, 2048  ;;  %p7153_p6 = scmp.lt.s32.totalorder %s7395_s25, %s7151_s24 }
  0x47   : > { %p7148_p4 = pnand %p7146_p1, %p7132_p5  ;;  %p7154_p0 = scmp.lt.s32.totalorder %s7152_s26, %s7145_s28 }
  0x49   : > { %p7149_p11 = pneg %p7148_p4  ;;  %p7155_p2 = por %p7154_p0, %p7153_p6 }
  0x4b   : > { %p7156_p7 = pnand %p7155_p2, %p7149_p11 }
  0x4d   : > { %7159 = shalt.err (!%p7156_p7)
}
  0x4e   : > { %s7234_s27 = smov 128   ;;  %s7235_s8 = smov 8  }
  0x4f   : > { %7027 = dma.hbm_to_vmem [thread:$0]  (!%p7381_p3), %s7393_s11, 1024, %s7395_s25, %s7397_s16, %s7234_s27, %s7234_s27, %s7235_s8  }
  0x50   : > { %319 = sbr.rel (%p7361_p13) target bundleno = 2048 (0x800), region = 56 }
  0x57   : > { %s7428_s18 = sand.u32 1, %s7222_s10   ;;  %p12035_p6 = scmp.ne.s32.totalorder %s12023_s20, 0 }
  0x58   : > { %12033 = sst [smem:[#allocation21_spill]] %s7428_s18  ;;  %s11885_s14 = sshll.u32 %s7428_s18, 6 }
  0x59   : > { %s322_s17 = scalar_lea.sflag [#allocation4], %s7428_s18  ;;  %s7434_s28 = scalar_lea.vmem [#allocation3], %s11885_s14 }
  0x5a   : > { %12034 = sst [smem:[#allocation22_spill]] %s7434_s28 }
  0x5b   : > { %7205 = dma.done.wait (%p12035_p6), %s322_s17, 1024  }
  0x5c   : > { %7207 = vsyncadd (%p12035_p6), %s322_s17, 4294966272  ;;  %p12036_p3 = scmp.eq.s32.totalorder %s7322_s13, 0 }
  0x5e   : > { %7209 = dma.done.wait (%p12036_p3), [#allocation6], 64   ;;  %p12037_p13 = pmov %p12036_p3 }
  0x60   : > { %7211 = vsyncadd (%p12037_p13), [#allocation6], 4294967232 }
  0x61   : > { %334 = sfence }
  0x62   : > { %s12038_s1 = sld [smem:[#allocation173_spill]]  ;;  %v365_v2 = vld [vmem:[%s7434_s28] sm:$0xff]  ;;  %vm382_vm0 = vcmask 130048   ;;  %v366_v4 = vld [vmem:[%s7434_s28 + $0x8] sm:$0xff]  ;;  %v367_v5 = vld [vmem:[%s7434_s28 + $0x10] sm:$0xff]  ;;  %vm528_vm1 = vcmask 261120  }
  0x63   : > { %6888 = vmatprep.mubr.msk.f32.mxu0 %vm382_vm0, %v365_v2  ;;  %v368_v6 = vld [vmem:[%s7434_s28 + $0x18] sm:$0xff]  ;;  %v369_v7 = vld [vmem:[%s7434_s28 + $0x20] sm:$0xff]  ;;  %v370_v8 = vld [vmem:[%s7434_s28 + $0x28] sm:$0xff]  ;;  %vm530_vm2 = vcmask 254976   ;;  %v7236_v11 = vmov 0.0   ;;  %s12039_s5 = sld [smem:[#allocation177_spill]] }
  0x64   : > { %v371_v9 = vld [vmem:[%s7434_s28 + $0x30] sm:$0xff]  ;;  %v372_v10 = vld [vmem:[%s7434_s28 + $0x38] sm:$0xff]  ;;  %534 = vst.msk [vmem:[#allocation2 + $0x20] sm:$0xff] %vm528_vm1, %v7236_v11  ;;  %529 = vst.msk [vmem:[#allocation2] sm:$0xff] %vm528_vm1, %v7236_v11  ;;  %s12040_s3 = sld [smem:[#allocation175_spill]]  ;;  %s12041_s2 = sld [smem:[#allocation174_spill]] }
  0x65   : > { %535 = vst.msk [vmem:[#allocation2 + $0x28] sm:$0x3] %vm530_vm2, %v7236_v11  ;;  %531 = vst.msk [vmem:[#allocation2 + $0x8] sm:$0x3] %vm530_vm2, %v7236_v11  ;;  %vm637_vm3 = vcmask 1046528   ;;  %vm715_vm4 = vcmask 1045504  }
  0x66   : > { %532 = vst.msk [vmem:[#allocation2 + $0x10] sm:$0xff] %vm528_vm1, %v7236_v11  ;;  %536 = vst.msk [vmem:[#allocation2 + $0x30] sm:$0xff] %vm528_vm1, %v7236_v11  ;;  %s12042_s4 = sld [smem:[#allocation176_spill]]  ;;  %s12043_s6 = sld [smem:[#allocation178_spill]]  ;;  %vm1507_vm5 = vcmask 1041409   ;;  %vm1509_vm6 = vcmask 1042434  }
  0x67   : > { %533 = vst.msk [vmem:[#allocation2 + $0x18] sm:$0x3] %vm530_vm2, %v7236_v11  ;;  %537 = vst.msk [vmem:[#allocation2 + $0x38] sm:$0x3] %vm530_vm2, %v7236_v11  ;;  %vm1511_vm7 = vcmask 1043459   ;;  %vm1513_vm8 = vcmask 1044484  }
  0x68   : > { %v373_v0 = vld [vmem:[%s12038_s1] sm:$0xff]  ;;  %v374_v1 = vld [vmem:[%s12038_s1 + $0x8] sm:$0xff]  ;;  %538 = vst.msk [vmem:[#allocation2 + $0x40] sm:$0xff] %vm528_vm1, %v7236_v11  ;;  %540 = vst.msk [vmem:[#allocation2 + $0x50] sm:$0xff] %vm528_vm1, %v7236_v11  ;;  %vm1515_vm9 = vcmask 1045509   ;;  %vm1517_vm11 = vcmask 1046534  }
  0x69   : > { %v6988_v3 = vpack.c.bf16 %v374_v1, %v373_v0  ;;  %539 = vst.msk [vmem:[#allocation2 + $0x48] sm:$0x3] %vm530_vm2, %v7236_v11  ;;  %541 = vst.msk [vmem:[#allocation2 + $0x58] sm:$0x3] %vm530_vm2, %v7236_v11  ;;  %v1137_v12 = vld [vmem:[%s12039_s5] sm:$0xff]  ;;  %v1138_v13 = vld [vmem:[%s12039_s5 + $0x8] sm:$0xff] }
  0x6a   : > { %542 = vst.msk [vmem:[#allocation2 + $0x60] sm:$0xff] %vm528_vm1, %v7236_v11  ;;  %544 = vst.msk [vmem:[#allocation2 + $0x70] sm:$0xff] %vm528_vm1, %v7236_v11  ;;  %v6992_v14 = vpack.c.bf16 %v1138_v13, %v1137_v12  ;;  %v1139_v15 = vld [vmem:[%s12039_s5 + $0x10] sm:$0xff]  ;;  %v1140_v16 = vld [vmem:[%s12039_s5 + $0x18] sm:$0xff]  ;;  %vm1519_vm12 = vcmask 1047559   ;;  %vm7238_vm13 = vmmov 0  }
  0x6b   : > { %6989 = vmatprep.subr.bf16.mxu0 %v6988_v3  ;;  %543 = vst.msk [vmem:[#allocation2 + $0x68] sm:$0x3] %vm530_vm2, %v7236_v11  ;;  %545 = vst.msk [vmem:[#allocation2 + $0x78] sm:$0x3] %vm530_vm2, %v7236_v11  ;;  %v6996_v17 = vpack.c.bf16 %v1140_v16, %v1139_v15  ;;  %v559_v18 = vld [vmem:[#allocation2] sm:$0xff]  ;;  %vm1521_vm14 = vcmask 64512  }
  0x6c   : > { %6991 = vmatpush3.bf16.msra.mxu0 %v6988_v3  ;;  %546 = vst.msk [vmem:[#allocation2 + $0x80] sm:$0xff] %vm528_vm1, %v7236_v11  ;;  %548 = vst.msk [vmem:[#allocation2 + $0x90] sm:$0xff] %vm528_vm1, %v7236_v11  ;;  %6993 = vmatprep.subr.bf16.mxu1 %v6992_v14  ;;  %v7523_v19 = vld [vmem:[%s12040_s3 + $0x1] ss:$0 sm:$0xff]  ;;  %v560_v20 = vld [vmem:[#allocation2 + $0x8] sm:$0x3] }
  0x6d   : > { %547 = vst.msk [vmem:[#allocation2 + $0x88] sm:$0x3] %vm530_vm2, %v7236_v11  ;;  %549 = vst.msk [vmem:[#allocation2 + $0x98] sm:$0x3] %vm530_vm2, %v7236_v11  ;;  %6920 = vmatprep.subr.mxu0 %v7236_v11  ;;  %6995 = vmatpush3.bf16.msra.mxu1 %v6992_v14  ;;  %v6464_v21 = vld [vmem:[%s12041_s2] ss:$0 sm:$0xff]  ;;  %v605_v22 = vmul.f32 %v7523_v19, %v559_v18  ;;  %v606_v23 = vmul.f32 %v7523_v19, %v560_v20 }
  0x6e   : > { %6997 = vmatprep.subr.bf16.mxu1 %v6996_v17  ;;  %v7533_v25 = vld [vmem:[%s12040_s3 + $0x2] ss:$0 sm:$0xff]  ;;  %v7538_v31 = vld [vmem:[%s12040_s3] ss:$0 sm:$0xff]  ;;  %v7552_v59 = vld [vmem:[%s12040_s3 + $0x6] ss:$0 sm:$0xff] }
  0x6f   : > { %6889 = vmatmul.mubr.msk.f32.vlgmr.msra.gmra.mrb[0].mxu0 %vm382_vm0, %v366_v4  ;;  %v638_v29 = vrot.slane %v605_v22, 1  ;;  %v639_v32 = vrot.slane %v606_v23, 1  ;;  %v683_v33 = vmul.f32 %v7533_v25, %v559_v18  ;;  %v684_v34 = vmul.f32 %v7533_v25, %v560_v20  ;;  %v7559_v0 = vld [vmem:[%s12040_s3 + $0x3] ss:$0 sm:$0xff]  ;;  %v7564_v1 = vld [vmem:[%s12040_s3 + $0x7] ss:$0 sm:$0xff] }
  0x70   : > { %6891 = vmatprep.mubr.msk.f32.mxu0 %vm382_vm0, %v367_v5  ;;  %v584_v42 = vmul.f32 %v7538_v31, %v559_v18  ;;  %v7592_v18 = vld [vmem:[%s12040_s3 + $0x5] ss:$0 sm:$0xff]  ;;  %s8095_s11 = sld [smem:[#allocation7 + $0x4]]  ;;  %s8097_s23 = sld [smem:[#allocation7 + $0x42]] }
  0x71   : > { %6999 = vmatpush3.bf16.msra.mxu1 %v6996_v17  ;;  %v640_v44 = vsel %vm637_vm3, %v638_v29, %v639_v32  ;;  %v716_v45 = vrot.slane %v683_v33, 2  ;;  %v717_v46 = vrot.slane %v684_v34, 2  ;;  %s8099_s29 = sld [smem:[#allocation7 + $0x2]]  ;;  %s8101_s25 = sld [smem:[#allocation7 + $0x44]] }
  0x72   : > { %6930 = vmatprep.subr.mxu1 %v7236_v11  ;;  %v670_v54 = vadd.f32 %v640_v44, %v584_v42  ;;  %s8103_s20 = sld [smem:[#allocation7 + $0x6]]  ;;  %s8105_s16 = sld [smem:[#allocation7 + $0x8]] }
  0x73   : > { %6892 = vmatmul.mubr.msk.f32.gmra.mrb[2].mxu0 %vm382_vm0, %v368_v6  ;;  %v718_v56 = vsel %vm715_vm4, %v716_v45, %v717_v46  ;;  %v7554_v60 = vld [vmem:[#allocation2 + $0x90] sm:$0xff]  ;;  %s8107_s19 = sld [smem:[#allocation7 + $0x48]]  ;;  %s8109_s24 = sld [smem:[#allocation7 + $0xa]] }
  0x74   : > { %6894 = vmatprep.mubr.msk.f32.mxu0 %vm382_vm0, %v369_v7  ;;  %v748_v6 = vadd.f32 %v718_v56, %v670_v54  ;;  %v7573_v7 = vld [vmem:[%s12040_s3 + $0x4] ss:$0 sm:$0xff]  ;;  %v7584_v14 = vmul.f32 %v7564_v1, %v7554_v60  ;;  %s8111_s26 = sld [smem:[#allocation7 + $0x4a]]  ;;  %s8113_s27 = sld [smem:[#allocation7 + $0xc]] }
  0x75   : > { %s8115_s8 = sld [smem:[#allocation7 + $0x4c]]  ;;  %s8117_s17 = sld [smem:[#allocation7 + $0x10]] }
  0x76   : > { %12055 = sst [smem:[#allocation32_spill]] %s8095_s11  ;;  %s8119_s14 = sld [smem:[#allocation7 + $0x4e]] }
  0x77   : > { %6895 = vmatmul.mubr.msk.f32.gmra.mrb[4].mxu0 %vm382_vm0, %v370_v8  ;;  %12056 = sst [smem:[#allocation33_spill]] %s8097_s23  ;;  %s8121_s0 = sld [smem:[#allocation7 + $0x12]] }
  0x78   : > { %6897 = vmatprep.mubr.msk.f32.mxu0 %vm382_vm0, %v371_v9  ;;  %12057 = sst [smem:[#allocation34_spill]] %s8099_s29  ;;  %s8123_s1 = sld [smem:[#allocation7 + $0x50]] }
  0x79   : > { %12058 = sst [smem:[#allocation35_spill]] %s8101_s25  ;;  %s8125_s2 = sld [smem:[#allocation7 + $0x14]] }
  0x7a   : > { %12059 = sst [smem:[#allocation36_spill]] %s8103_s20  ;;  %s8131_s5 = sld [smem:[#allocation7 + $0x18]] }
  0x7b   : > { %6898 = vmatmul.mubr.msk.f32.gmra.mrb[6].mxu0 %vm382_vm0, %v372_v10  ;;  %12060 = sst [smem:[#allocation37_spill]] %s8105_s16  ;;  %s8135_s10 = sld [smem:[#allocation7 + $0x1e]] }
  0x7c   : > { %6922 = vmatprep.mubr.msk.f32.mxu0 %vm7238_vm13, %v7236_v11  ;;  %12061 = sst [smem:[#allocation38_spill]] %s8107_s19  ;;  %s8137_s15 = sld [smem:[#allocation7 + $0x20]] }
  0x7d   : > { %12062 = sst [smem:[#allocation39_spill]] %s8109_s24  ;;  %s8141_s22 = sld [smem:[#allocation7 + $0x24]] }
  0x7e   : > { %12063 = sst [smem:[#allocation40_spill]] %s8111_s26  ;;  %s8139_s12 = sld [smem:[#allocation7 + $0x22]] }
  0x7f   : > { %12064 = sst [smem:[#allocation41_spill]] %s8113_s27  ;;  %s8143_s30 = sld [smem:[#allocation7 + $0x26]] }
  0x80   : > { %12065 = sst [smem:[#allocation42_spill]] %s8115_s8  ;;  %s8145_s21 = sld [smem:[#allocation7 + $0x28]] }
  0x81   : > { %12066 = sst [smem:[#allocation43_spill]] %s8117_s17  ;;  %s8147_s9 = sld [smem:[#allocation7 + $0x2c]] }
  0x82   : > { %12067 = sst [smem:[#allocation44_spill]] %s8119_s14  ;;  %s8149_s18 = sld [smem:[#allocation7 + $0x2e]] }
  0x83   : > { %12068 = sst [smem:[#allocation45_spill]] %s8121_s0  ;;  %s8153_s28 = sld [smem:[#allocation7 + $0x32]] }
  0x84   : > { %12069 = sst [smem:[#allocation46_spill]] %s8123_s1  ;;  %s8151_s13 = sld [smem:[#allocation7 + $0x30]] }
  0x85   : > { %12070 = sst [smem:[#allocation47_spill]] %s8125_s2  ;;  %s8155_s7 = sld [smem:[#allocation7 + $0x34]] }
  0x86   : > { %12073 = sst [smem:[#allocation50_spill]] %s8131_s5 }
  0x87   : > { %12075 = sst [smem:[#allocation52_spill]] %s8135_s10  ;;  %s8157_s10 = sld [smem:[#allocation7 + $0x36]] }
  0x88   : > { %12076 = sst [smem:[#allocation53_spill]] %s8137_s15  ;;  %s8159_s15 = sld [smem:[#allocation7 + $0x3a]] }
  0x89   : > { %12077 = sst [smem:[#allocation54_spill]] %s8139_s12  ;;  %s8161_s12 = sld [smem:[#allocation7 + $0x3c]] }
  0x8a   : > { %12078 = sst [smem:[#allocation55_spill]] %s8141_s22  ;;  %s8163_s22 = sld [smem:[#allocation7 + $0x3]] }
  0x8b   : > { %12079 = sst [smem:[#allocation56_spill]] %s8143_s30  ;;  %s8165_s30 = sld [smem:[#allocation7 + $0x3e]] }
  0x8c   : > { %12080 = sst [smem:[#allocation57_spill]] %s8145_s21  ;;  %s8167_s21 = sld [smem:[#allocation7 + $0x5]] }
  0x8d   : > { %12081 = sst [smem:[#allocation58_spill]] %s8147_s9 }
  0x8e   : > { %12082 = sst [smem:[#allocation59_spill]] %s8149_s18  ;;  %s8169_s18 = sld [smem:[#allocation7 + $0x40]] }
  0x8f   : > { %12083 = sst [smem:[#allocation60_spill]] %s8151_s13 }
  0x90   : > { %12084 = sst [smem:[#allocation61_spill]] %s8153_s28  ;;  %s8171_s13 = sld [smem:[#allocation7 + $0x7]] }
  0x91   : > { %12085 = sst [smem:[#allocation62_spill]] %s8155_s7  ;;  %s8173_s28 = sld [smem:[#allocation7]] }
  0x92   : > { %12086 = sst [smem:[#allocation63_spill]] %s8157_s10  ;;  %s8175_s7 = sld [smem:[#allocation7 + $0x9]] }
  0x93   : > { %12087 = sst [smem:[#allocation64_spill]] %s8159_s15  ;;  %s8177_s15 = sld [smem:[#allocation7 + $0xe]] }
  0x94   : > { %12088 = sst [smem:[#allocation65_spill]] %s8161_s12  ;;  %s8179_s12 = sld [smem:[#allocation7 + $0xb]] }
  0x95   : > { %12089 = sst [smem:[#allocation66_spill]] %s8163_s22  ;;  %s8187_s22 = sld [smem:[#allocation7 + $0x13]] }
  0x96   : > { %12090 = sst [smem:[#allocation67_spill]] %s8165_s30  ;;  %s8181_s30 = sld [smem:[#allocation7 + $0x1]] }
  0x97   : > { %12091 = sst [smem:[#allocation68_spill]] %s8167_s21  ;;  %s8183_s21 = sld [smem:[#allocation7 + $0xd]] }
  0x98   : > { %12092 = sst [smem:[#allocation69_spill]] %s8169_s18  ;;  %s8185_s18 = sld [smem:[#allocation7 + $0x11]] }
  0x99   : > { %12093 = sst [smem:[#allocation70_spill]] %s8171_s13 }
  0x9a   : > { %12094 = sst [smem:[#allocation71_spill]] %s8173_s28  ;;  %s8189_s28 = sld [smem:[#allocation7 + $0x15]] }
  0x9b   : > { %12095 = sst [smem:[#allocation72_spill]] %s8175_s7  ;;  %s8191_s7 = sld [smem:[#allocation7 + $0x17]] }
  0x9c   : > { %12096 = sst [smem:[#allocation73_spill]] %s8177_s15  ;;  %s8193_s15 = sld [smem:[#allocation7 + $0x19]] }
  0x9d   : > { %12097 = sst [smem:[#allocation74_spill]] %s8179_s12  ;;  %s8195_s12 = sld [smem:[#allocation7 + $0x1b]] }
  0x9e   : > { %12098 = sst [smem:[#allocation75_spill]] %s8181_s30  ;;  %s8197_s30 = sld [smem:[#allocation7 + $0x1f]] }
  0x9f   : > { %12099 = sst [smem:[#allocation76_spill]] %s8185_s18  ;;  %s8201_s18 = sld [smem:[#allocation7 + $0x21]] }
  0xa0   : > { %12100 = sst [smem:[#allocation77_spill]] %s8187_s22  ;;  %s8203_s22 = sld [smem:[#allocation7 + $0x23]] }
  0xa1   : > { %s8273_s10 = sld [smem:[#allocation7 + $0x51]] }
  0xa2   : > { %12101 = sst [smem:[#allocation78_spill]] %s8193_s15  ;;  %s8209_s15 = sld [smem:[#allocation7 + $0x25]] }
  0xa3   : > { %12102 = sst [smem:[#allocation79_spill]] %s8195_s12  ;;  %s7242_s12 = smov 127  }
  0xa4   : > { %12103 = sst [smem:[#allocation80_spill]] %s8197_s30  ;;  %s8211_s30 = sld [smem:[#allocation7 + $0x1c]] }
  0xa5   : > { %12104 = sst [smem:[#allocation81_spill]] %s8201_s18  ;;  %s7244_s18 = smov 125  }
  0xa6   : > { %12105 = sst [smem:[#allocation82_spill]] %s8203_s22  ;;  %s11989_s22 = smov 123  }
  0xa8   : > { %12106 = sst [smem:[#allocation83_spill]] %s8209_s15  ;;  %s7245_s15 = smov 122  }
  0xaa   : > { %12107 = sst [smem:[#allocation84_spill]] %s8211_s30  ;;  %s8225_s30 = sld [smem:[#allocation7 + $0x41]] }
 0x142   : > { %v6890_v24 = vpop.f32.mrb[0].mxu0 }
 0x143   : > { %v479_v26 = vadd.f32 %v6890_v24, %v6464_v21  ;;  %v473_v27 = vpop.f32.mrb[1].mxu0 }
 0x144   : > { %v474_v28 = vadd.f32 %v6464_v21, %v473_v27 }
 0x145   : > { %v513_v30 = vmax.f32 %v479_v26, 0.0  ;;  %v7602_v26 = vld [vmem:[%s12040_s3 + $0x8] ss:$0 sm:$0xff]  ;;  %s8127_s3 = sld [smem:[#allocation7 + $0x52]] }
 0x146   : > { %v512_v35 = vmax.f32 %v474_v28, 0.0  ;;  %v6893_v36 = vpop.f32.mrb[2].mxu0 }
 0x147   : > { %v521_v37 = vmin.f32 %v513_v30, 6.0  ;;  %v489_v38 = vadd.f32 %v6893_v36, %v6464_v21  ;;  %v483_v39 = vpop.f32.mrb[3].mxu0 }
 0x148   : > { %v520_v40 = vmin.f32 %v512_v35, 6.0  ;;  %v484_v41 = vadd.f32 %v6464_v21, %v483_v39 }
 0x149   : > { %552 = vst.msk [vmem:[#allocation2 + $0x21] sm:$0xff] %vm528_vm1, %v521_v37  ;;  %v515_v43 = vmax.f32 %v489_v38, 0.0 }
 0x14a   : > { %551 = vst.msk [vmem:[#allocation2 + $0x11] sm:$0xff] %vm528_vm1, %v520_v40  ;;  %v514_v47 = vmax.f32 %v484_v41, 0.0  ;;  %v6896_v48 = vpop.f32.mrb[4].mxu0 }
 0x14b   : > { %v523_v49 = vmin.f32 %v515_v43, 6.0  ;;  %v499_v50 = vadd.f32 %v6896_v48, %v6464_v21  ;;  %v493_v51 = vpop.f32.mrb[5].mxu0  ;;  %12071 = sst [smem:[#allocation48_spill]] %s8127_s3 }
 0x14c   : > { %v522_v52 = vmin.f32 %v514_v47, 6.0  ;;  %v494_v53 = vadd.f32 %v6464_v21, %v493_v51 }
 0x14d   : > { %554 = vst.msk [vmem:[#allocation2 + $0x41] sm:$0xff] %vm528_vm1, %v523_v49  ;;  %v517_v55 = vmax.f32 %v499_v50, 0.0 }
 0x14e   : > { %553 = vst.msk [vmem:[#allocation2 + $0x31] sm:$0xff] %vm528_vm1, %v522_v52  ;;  %v516_v57 = vmax.f32 %v494_v53, 0.0  ;;  %v6899_v58 = vpop.f32.mrb[6].mxu0 }
 0x14f   : > { %v525_v61 = vmin.f32 %v517_v55, 6.0  ;;  %v509_v62 = vadd.f32 %v6899_v58, %v6464_v21  ;;  %v503_v63 = vpop.f32.mrb[7].mxu0 }
 0x150   : > { %v524_v2 = vmin.f32 %v516_v57, 6.0  ;;  %v504_v3 = vadd.f32 %v6464_v21, %v503_v63  ;;  %v7566_v4 = vld [vmem:[#allocation2 + $0x20] sm:$0xff]  ;;  %v7568_v5 = vld [vmem:[#allocation2 + $0x28] sm:$0x3] }
 0x151   : > { %556 = vst.msk [vmem:[#allocation2 + $0x61] sm:$0xff] %vm528_vm1, %v525_v61  ;;  %v519_v8 = vmax.f32 %v509_v62, 0.0  ;;  %v561_v9 = vld [vmem:[#allocation2 + $0x10] sm:$0xff]  ;;  %v562_v10 = vld [vmem:[#allocation2 + $0x18] sm:$0x3]  ;;  %v7578_v12 = vmul.f32 %v7523_v19, %v7568_v5  ;;  %v936_v13 = vmul.f32 %v7552_v59, %v7566_v4  ;;  %v957_v20 = vmul.f32 %v7564_v1, %v7566_v4 }
 0x152   : > { %555 = vst.msk [vmem:[#allocation2 + $0x51] sm:$0xff] %vm528_vm1, %v524_v2  ;;  %v518_v15 = vmax.f32 %v504_v3, 0.0  ;;  %v608_v16 = vmul.f32 %v7523_v19, %v562_v10  ;;  %v761_v17 = vmul.f32 %v7559_v0, %v561_v9  ;;  %v686_v22 = vmul.f32 %v7533_v25, %v562_v10 }
 0x153   : > { %v527_v21 = vmin.f32 %v519_v8, 6.0  ;;  %v782_v23 = vmul.f32 %v7573_v7, %v561_v9  ;;  %v783_v24 = vmul.f32 %v7573_v7, %v562_v10  ;;  %v645_v29 = vrot.slane %v7578_v12, 1 }
 0x154   : > { %v526_v27 = vmin.f32 %v518_v15, 6.0  ;;  %v642_v28 = vrot.slane %v608_v16, 1  ;;  %v769_v30 = vadd.f32 %v761_v17, %v748_v6  ;;  %v859_v34 = vmul.f32 %v7592_v18, %v561_v9 }
 0x155   : > { %558 = vst.msk [vmem:[#allocation2 + $0x81] sm:$0xff] %vm528_vm1, %v527_v21  ;;  %v814_v32 = vrot.slane %v782_v23, 1  ;;  %v815_v33 = vrot.slane %v783_v24, 1  ;;  %v860_v35 = vmul.f32 %v7592_v18, %v562_v10  ;;  %v958_v36 = vmul.f32 %v7564_v1, %v7568_v5  ;;  %v7630_v2 = vld [vmem:[#allocation2 + $0x30] sm:$0xff]  ;;  %v7637_v17 = vld [vmem:[#allocation2 + $0x38] sm:$0x3] }
 0x156   : > { %557 = vst.msk [vmem:[#allocation2 + $0x71] sm:$0xff] %vm528_vm1, %v526_v27  ;;  %v989_v37 = vrot.slane %v957_v20, 1  ;;  %v1034_v38 = vmul.f32 %v7602_v26, %v7566_v4  ;;  %v1035_v39 = vmul.f32 %v7602_v26, %v7568_v5  ;;  %v720_v40 = vrot.slane %v686_v22, 2  ;;  %v7644_v22 = vld [vmem:[%s12042_s4] ss:$0 sm:$0xff]  ;;  %s8129_s4 = sld [smem:[#allocation7 + $0x16]] }
 0x157   : > { %v816_v41 = vsel %vm637_vm3, %v814_v32, %v815_v33  ;;  %v891_v42 = vrot.slane %v859_v34, 2  ;;  %v892_v43 = vrot.slane %v860_v35, 2  ;;  %v990_v45 = vrot.slane %v958_v36, 1 }
 0x158   : > { %v846_v44 = vadd.f32 %v816_v41, %v769_v30  ;;  %v1066_v46 = vrot.slane %v1034_v38, 2  ;;  %v1067_v47 = vrot.slane %v1035_v39, 2  ;;  %v585_v49 = vmul.f32 %v7538_v31, %v561_v9 }
 0x159   : > { %v893_v48 = vsel %vm715_vm4, %v891_v42, %v892_v43  ;;  %v607_v50 = vmul.f32 %v7523_v19, %v561_v9  ;;  %v685_v51 = vmul.f32 %v7533_v25, %v561_v9  ;;  %v991_v53 = vsel %vm637_vm3, %v989_v37, %v990_v45 }
 0x15a   : > { %v923_v52 = vadd.f32 %v893_v48, %v846_v44  ;;  %v762_v54 = vmul.f32 %v7559_v0, %v7566_v4  ;;  %v784_v55 = vmul.f32 %v7573_v7, %v7566_v4  ;;  %v785_v58 = vmul.f32 %v7573_v7, %v7568_v5 }
 0x15b   : > { %v641_v56 = vrot.slane %v607_v50, 1  ;;  %v719_v57 = vrot.slane %v685_v51, 2  ;;  %v861_v61 = vmul.f32 %v7592_v18, %v7566_v4  ;;  %v1068_v63 = vsel %vm715_vm4, %v1066_v46, %v1067_v47 }
 0x15c   : > { %v944_v62 = vadd.f32 %v936_v13, %v923_v52  ;;  %v817_v3 = vrot.slane %v784_v55, 1  ;;  %v862_v6 = vmul.f32 %v7592_v18, %v7568_v5  ;;  %v818_v9 = vrot.slane %v785_v58, 1  ;;  %12072 = sst [smem:[#allocation49_spill]] %s8129_s4 }
 0x15d   : > { %v643_v8 = vsel %vm637_vm3, %v641_v56, %v642_v28  ;;  %v894_v10 = vrot.slane %v861_v61, 2  ;;  %v937_v15 = vmul.f32 %v7552_v59, %v7630_v2  ;;  %v959_v21 = vmul.f32 %v7564_v1, %v7630_v2 }
 0x15e   : > { %v1021_v16 = vadd.f32 %v991_v53, %v944_v62  ;;  %v671_v20 = vadd.f32 %v643_v8, %v585_v49  ;;  %v895_v13 = vrot.slane %v862_v6, 2  ;;  %v721_v23 = vsel %vm715_vm4, %v719_v57, %v720_v40  ;;  %v7682_v6 = vld [vmem:[#allocation2 + $0x48] sm:$0x3] }
 0x15f   : > { %v960_v24 = vmul.f32 %v7564_v1, %v7637_v17  ;;  %v1036_v27 = vmul.f32 %v7602_v26, %v7630_v2  ;;  %v1037_v28 = vmul.f32 %v7602_v26, %v7637_v17  ;;  %v819_v33 = vsel %vm637_vm3, %v817_v3, %v818_v9  ;;  %v7680_v3 = vld [vmem:[#allocation2 + $0x40] sm:$0xff] }
 0x160   : > { %v1098_v30 = vadd.f32 %v1068_v63, %v1021_v16  ;;  %v749_v32 = vadd.f32 %v721_v23, %v671_v20  ;;  %v992_v34 = vrot.slane %v959_v21, 1  ;;  %v896_v35 = vsel %vm715_vm4, %v894_v10, %v895_v13 }
 0x161   : > { %v993_v36 = vrot.slane %v960_v24, 1  ;;  %v1069_v37 = vrot.slane %v1036_v27, 2  ;;  %v1070_v38 = vrot.slane %v1037_v28, 2  ;;  %v609_v41 = vmul.f32 %v7523_v19, %v7566_v4 }
 0x162   : > { %v1113_v39 = vadd.f32 %v7644_v22, %v1098_v30  ;;  %v770_v40 = vadd.f32 %v762_v54, %v749_v32  ;;  %v687_v42 = vmul.f32 %v7533_v25, %v7566_v4  ;;  %v586_v45 = vmul.f32 %v7538_v31, %v7566_v4 }
 0x163   : > { %v994_v43 = vsel %vm637_vm3, %v992_v34, %v993_v36  ;;  %v1071_v44 = vsel %vm715_vm4, %v1069_v37, %v1070_v38  ;;  %v688_v46 = vmul.f32 %v7533_v25, %v7568_v5  ;;  %v644_v49 = vrot.slane %v609_v41, 1 }
 0x164   : > { %v1121_v47 = vmax.f32 %v1113_v39, 0.0  ;;  %v847_v48 = vadd.f32 %v819_v33, %v770_v40  ;;  %v722_v50 = vrot.slane %v687_v42, 2  ;;  %v786_v52 = vmul.f32 %v7573_v7, %v7630_v2 }
 0x165   : > { %v723_v51 = vrot.slane %v688_v46, 2  ;;  %v787_v53 = vmul.f32 %v7573_v7, %v7637_v17  ;;  %v863_v54 = vmul.f32 %v7592_v18, %v7630_v2  ;;  %v646_v4 = vsel %vm637_vm3, %v644_v49, %v645_v29 }
 0x166   : > { %v1129_v55 = vmin.f32 %v1121_v47, 6.0  ;;  %v924_v56 = vadd.f32 %v896_v35, %v847_v48  ;;  %v864_v5 = vmul.f32 %v7592_v18, %v7637_v17  ;;  %v672_v57 = vadd.f32 %v646_v4, %v586_v45 }
 0x167   : > { %v763_v58 = vmul.f32 %v7559_v0, %v7630_v2  ;;  %v820_v61 = vrot.slane %v786_v52, 1  ;;  %v821_v62 = vrot.slane %v787_v53, 1  ;;  %v724_v12 = vsel %vm715_vm4, %v722_v50, %v723_v51 }
 0x168   : > { %6908 = vmatprep.mubr.msk.f32.mxu1 %vm528_vm1, %v1129_v55  ;;  %v945_v63 = vadd.f32 %v937_v15, %v924_v56  ;;  %v897_v8 = vrot.slane %v863_v54, 2  ;;  %v898_v29 = vrot.slane %v864_v5, 2  ;;  %v750_v9 = vadd.f32 %v724_v12, %v672_v57  ;;  %v7720_v57 = vld [vmem:[#allocation2 + $0x50] sm:$0xff] }
 0x169   : > { %v938_v10 = vmul.f32 %v7552_v59, %v7680_v3  ;;  %v961_v16 = vmul.f32 %v7564_v1, %v7680_v3  ;;  %v962_v20 = vmul.f32 %v7564_v1, %v7682_v6  ;;  %v822_v15 = vsel %vm637_vm3, %v820_v61, %v821_v62 }
 0x16a   : > { %v1022_v13 = vadd.f32 %v994_v43, %v945_v63  ;;  %v1038_v21 = vmul.f32 %v7602_v26, %v7680_v3  ;;  %v1039_v23 = vmul.f32 %v7602_v26, %v7682_v6  ;;  %v771_v24 = vadd.f32 %v763_v58, %v750_v9  ;;  %v7722_v58 = vld [vmem:[#allocation2 + $0x58] sm:$0x3] }
 0x16b   : > { %v899_v27 = vsel %vm715_vm4, %v897_v8, %v898_v29  ;;  %v995_v28 = vrot.slane %v961_v16, 1  ;;  %v996_v30 = vrot.slane %v962_v20, 1  ;;  %v611_v35 = vmul.f32 %v7523_v19, %v7630_v2 }
 0x16c   : > { %v1099_v32 = vadd.f32 %v1071_v44, %v1022_v13  ;;  %v1072_v33 = vrot.slane %v1038_v21, 2  ;;  %v1073_v34 = vrot.slane %v1039_v23, 2  ;;  %v848_v36 = vadd.f32 %v822_v15, %v771_v24 }
 0x16d   : > { %v587_v37 = vmul.f32 %v7538_v31, %v7630_v2  ;;  %v612_v38 = vmul.f32 %v7523_v19, %v7637_v17  ;;  %v689_v39 = vmul.f32 %v7533_v25, %v7630_v2  ;;  %v997_v41 = vsel %vm637_vm3, %v995_v28, %v996_v30 }
 0x16e   : > { %v1114_v40 = vadd.f32 %v7644_v22, %v1099_v32  ;;  %v647_v42 = vrot.slane %v611_v35, 1  ;;  %v690_v43 = vmul.f32 %v7533_v25, %v7637_v17  ;;  %v925_v44 = vadd.f32 %v899_v27, %v848_v36 }
 0x16f   : > { %v1074_v45 = vsel %vm715_vm4, %v1072_v33, %v1073_v34  ;;  %v648_v46 = vrot.slane %v612_v38, 1  ;;  %v725_v47 = vrot.slane %v689_v39, 2  ;;  %v788_v50 = vmul.f32 %v7573_v7, %v7680_v3 }
 0x170   : > { %v1122_v48 = vmax.f32 %v1114_v40, 0.0  ;;  %v726_v49 = vrot.slane %v690_v43, 2  ;;  %v789_v2 = vmul.f32 %v7573_v7, %v7682_v6  ;;  %v946_v51 = vadd.f32 %v938_v10, %v925_v44 }
 0x171   : > { %v649_v52 = vsel %vm637_vm3, %v647_v42, %v648_v46  ;;  %v865_v53 = vmul.f32 %v7592_v18, %v7680_v3  ;;  %v866_v17 = vmul.f32 %v7592_v18, %v7682_v6  ;;  %v823_v4 = vrot.slane %v788_v50, 1 }
 0x172   : > { %v1130_v54 = vmin.f32 %v1122_v48, 6.0  ;;  %v673_v55 = vadd.f32 %v649_v52, %v587_v37  ;;  %v727_v56 = vsel %vm715_vm4, %v725_v47, %v726_v49  ;;  %v1023_v5 = vadd.f32 %v997_v41, %v946_v51 }
 0x173   : > { %v824_v61 = vrot.slane %v789_v2, 1  ;;  %v900_v62 = vrot.slane %v865_v53, 2  ;;  %v901_v63 = vrot.slane %v866_v17, 2  ;;  %v764_v8 = vmul.f32 %v7559_v0, %v7680_v3 }
 0x174   : > { %6909 = vmatmul.mubr.msk.f32.vlgmr.msra.gmra.mrb[0].mxu1 %vm528_vm1, %v1130_v54  ;;  %v751_v12 = vadd.f32 %v727_v56, %v673_v55  ;;  %v963_v29 = vmul.f32 %v7564_v1, %v7720_v57  ;;  %v964_v9 = vmul.f32 %v7564_v1, %v7722_v58  ;;  %v1100_v10 = vadd.f32 %v1074_v45, %v1023_v5  ;;  %v7765_v55 = vld [vmem:[#allocation2 + $0x60] sm:$0xff]  ;;  %v7767_v56 = vld [vmem:[#allocation2 + $0x68] sm:$0x3] }
 0x175   : > { %v825_v16 = vsel %vm637_vm3, %v823_v4, %v824_v61  ;;  %v939_v20 = vmul.f32 %v7552_v59, %v7720_v57  ;;  %v1040_v13 = vmul.f32 %v7602_v26, %v7720_v57  ;;  %v1041_v24 = vmul.f32 %v7602_v26, %v7722_v58 }
 0x176   : > { %v772_v15 = vadd.f32 %v764_v8, %v751_v12  ;;  %v998_v21 = vrot.slane %v963_v29, 1  ;;  %v999_v23 = vrot.slane %v964_v9, 1  ;;  %v1115_v27 = vadd.f32 %v7644_v22, %v1100_v10 }
 0x177   : > { %v902_v28 = vsel %vm715_vm4, %v900_v62, %v901_v63  ;;  %v1075_v30 = vrot.slane %v1040_v13, 2  ;;  %v613_v32 = vmul.f32 %v7523_v19, %v7680_v3  ;;  %v588_v35 = vmul.f32 %v7538_v31, %v7680_v3 }
 0x178   : > { %v849_v33 = vadd.f32 %v825_v16, %v772_v15  ;;  %v1000_v34 = vsel %vm637_vm3, %v998_v21, %v999_v23  ;;  %v614_v36 = vmul.f32 %v7523_v19, %v7682_v6  ;;  %v1123_v37 = vmax.f32 %v1115_v27, 0.0 }
 0x179   : > { %v650_v38 = vrot.slane %v613_v32, 1  ;;  %v691_v39 = vmul.f32 %v7533_v25, %v7680_v3  ;;  %v692_v40 = vmul.f32 %v7533_v25, %v7682_v6  ;;  %v1076_v42 = vrot.slane %v1041_v24, 2 }
 0x17a   : > { %v926_v41 = vadd.f32 %v902_v28, %v849_v33  ;;  %v651_v43 = vrot.slane %v614_v36, 1  ;;  %v765_v44 = vmul.f32 %v7559_v0, %v7720_v57  ;;  %v1131_v45 = vmin.f32 %v1123_v37, 6.0 }
 0x17b   : > { %v728_v46 = vrot.slane %v691_v39, 2  ;;  %v729_v47 = vrot.slane %v692_v40, 2  ;;  %v790_v48 = vmul.f32 %v7573_v7, %v7720_v57  ;;  %v791_v3 = vmul.f32 %v7573_v7, %v7722_v58 }
 0x17c   : > { %v947_v49 = vadd.f32 %v939_v20, %v926_v41  ;;  %v652_v50 = vsel %vm637_vm3, %v650_v38, %v651_v43  ;;  %v867_v6 = vmul.f32 %v7592_v18, %v7720_v57  ;;  %6911 = vmatprep.mubr.msk.f32.mxu1 %vm528_vm1, %v1131_v45  ;;  %v868_v53 = vmul.f32 %v7592_v18, %v7722_v58 }
 0x17d   : > { %v674_v2 = vadd.f32 %v652_v50, %v588_v35  ;;  %v730_v51 = vsel %vm715_vm4, %v728_v46, %v729_v47  ;;  %v826_v52 = vrot.slane %v790_v48, 1  ;;  %v1077_v54 = vsel %vm715_vm4, %v1075_v30, %v1076_v42 }
 0x17e   : > { %v1024_v17 = vadd.f32 %v1000_v34, %v947_v49  ;;  %v827_v4 = vrot.slane %v791_v3, 1  ;;  %v903_v5 = vrot.slane %v867_v6, 2  ;;  %v904_v62 = vrot.slane %v868_v53, 2 }
 0x17f   : > { %v752_v61 = vadd.f32 %v730_v51, %v674_v2  ;;  %v965_v63 = vmul.f32 %v7564_v1, %v7765_v55  ;;  %v966_v12 = vmul.f32 %v7564_v1, %v7767_v56  ;;  %v1042_v9 = vmul.f32 %v7602_v26, %v7765_v55  ;;  %v7805_v2 = vld [vmem:[#allocation2 + $0x70] sm:$0xff]  ;;  %v7807_v51 = vld [vmem:[#allocation2 + $0x78] sm:$0x3] }
 0x180   : > { %v1101_v8 = vadd.f32 %v1077_v54, %v1024_v17  ;;  %v828_v29 = vsel %vm637_vm3, %v826_v52, %v827_v4  ;;  %v1043_v10 = vmul.f32 %v7602_v26, %v7767_v56  ;;  %v940_v20 = vmul.f32 %v7552_v59, %v7765_v55 }
 0x181   : > { %v773_v16 = vadd.f32 %v765_v44, %v752_v61  ;;  %v1001_v13 = vrot.slane %v965_v63, 1  ;;  %v1002_v15 = vrot.slane %v966_v12, 1  ;;  %v905_v23 = vsel %vm715_vm4, %v903_v5, %v904_v62 }
 0x182   : > { %v1116_v21 = vadd.f32 %v7644_v22, %v1101_v8  ;;  %v1078_v24 = vrot.slane %v1042_v9, 2  ;;  %v1079_v27 = vrot.slane %v1043_v10, 2  ;;  %v589_v30 = vmul.f32 %v7538_v31, %v7720_v57 }
 0x183   : > { %v850_v28 = vadd.f32 %v828_v29, %v773_v16  ;;  %v615_v32 = vmul.f32 %v7523_v19, %v7720_v57  ;;  %v616_v33 = vmul.f32 %v7523_v19, %v7722_v58  ;;  %v1003_v35 = vsel %vm637_vm3, %v1001_v13, %v1002_v15 }
 0x184   : > { %v1124_v34 = vmax.f32 %v1116_v21, 0.0  ;;  %v693_v36 = vmul.f32 %v7533_v25, %v7720_v57  ;;  %v694_v37 = vmul.f32 %v7533_v25, %v7722_v58  ;;  %v1080_v39 = vsel %vm715_vm4, %v1078_v24, %v1079_v27 }
 0x185   : > { %v927_v38 = vadd.f32 %v905_v23, %v850_v28  ;;  %v653_v40 = vrot.slane %v615_v32, 1  ;;  %v654_v41 = vrot.slane %v616_v33, 1  ;;  %v792_v45 = vmul.f32 %v7573_v7, %v7765_v55 }
 0x186   : > { %v1132_v42 = vmin.f32 %v1124_v34, 6.0  ;;  %v731_v43 = vrot.slane %v693_v36, 2  ;;  %v732_v44 = vrot.slane %v694_v37, 2  ;;  %v793_v57 = vmul.f32 %v7573_v7, %v7767_v56 }
 0x187   : > { %v948_v46 = vadd.f32 %v940_v20, %v927_v38  ;;  %v655_v47 = vsel %vm637_vm3, %v653_v40, %v654_v41  ;;  %v869_v58 = vmul.f32 %v7592_v18, %v7765_v55  ;;  %v829_v50 = vrot.slane %v792_v45, 1  ;;  %v576_v45 = vld [vmem:[#allocation2 + $0x88] sm:$0x3] }
 0x188   : > { %6912 = vmatmul.mubr.msk.f32.gmra.mrb[2].mxu1 %vm528_vm1, %v1132_v42  ;;  %v675_v48 = vadd.f32 %v655_v47, %v589_v30  ;;  %v733_v49 = vsel %vm715_vm4, %v731_v43, %v732_v44  ;;  %v870_v3 = vmul.f32 %v7592_v18, %v7767_v56  ;;  %v766_v52 = vmul.f32 %v7559_v0, %v7765_v55  ;;  %v575_v44 = vld [vmem:[#allocation2 + $0x80] sm:$0xff] }
 0x189   : > { %v1025_v6 = vadd.f32 %v1003_v35, %v948_v46  ;;  %v830_v53 = vrot.slane %v793_v57, 1  ;;  %v906_v17 = vrot.slane %v869_v58, 2  ;;  %v967_v5 = vmul.f32 %v7564_v1, %v7805_v2 }
 0x18a   : > { %v753_v54 = vadd.f32 %v733_v49, %v675_v48  ;;  %v907_v4 = vrot.slane %v870_v3, 2  ;;  %v968_v61 = vmul.f32 %v7564_v1, %v7807_v51  ;;  %v941_v63 = vmul.f32 %v7552_v59, %v7805_v2 }
 0x18b   : > { %v1102_v62 = vadd.f32 %v1080_v39, %v1025_v6  ;;  %v1044_v12 = vmul.f32 %v7602_v26, %v7805_v2  ;;  %v1045_v8 = vmul.f32 %v7602_v26, %v7807_v51  ;;  %v831_v9 = vsel %vm637_vm3, %v829_v50, %v830_v53 }
 0x18c   : > { %v774_v29 = vadd.f32 %v766_v52, %v753_v54  ;;  %v1004_v10 = vrot.slane %v967_v5, 1  ;;  %v1005_v16 = vrot.slane %v968_v61, 1  ;;  %v908_v13 = vsel %vm715_vm4, %v906_v17, %v907_v4 }
 0x18d   : > { %v1117_v20 = vadd.f32 %v7644_v22, %v1102_v62  ;;  %v1081_v15 = vrot.slane %v1044_v12, 2  ;;  %v1082_v21 = vrot.slane %v1045_v8, 2  ;;  %v590_v24 = vmul.f32 %v7538_v31, %v7765_v55 }
 0x18e   : > { %v851_v23 = vadd.f32 %v831_v9, %v774_v29  ;;  %v617_v27 = vmul.f32 %v7523_v19, %v7765_v55  ;;  %v618_v28 = vmul.f32 %v7523_v19, %v7767_v56  ;;  %v1006_v32 = vsel %vm637_vm3, %v1004_v10, %v1005_v16 }
 0x18f   : > { %v1125_v30 = vmax.f32 %v1117_v20, 0.0  ;;  %v695_v33 = vmul.f32 %v7533_v25, %v7765_v55  ;;  %v696_v34 = vmul.f32 %v7533_v25, %v7767_v56  ;;  %v767_v38 = vmul.f32 %v7559_v0, %v7805_v2 }
 0x190   : > { %v928_v35 = vadd.f32 %v908_v13, %v851_v23  ;;  %v656_v36 = vrot.slane %v617_v27, 1  ;;  %v657_v37 = vrot.slane %v618_v28, 1  ;;  %v794_v42 = vmul.f32 %v7573_v7, %v7805_v2 }
 0x191   : > { %v1133_v39 = vmin.f32 %v1125_v30, 6.0  ;;  %v734_v40 = vrot.slane %v695_v33, 2  ;;  %v735_v41 = vrot.slane %v696_v34, 2  ;;  %v795_v56 = vmul.f32 %v7573_v7, %v7807_v51 }
 0x192   : > { %v949_v43 = vadd.f32 %v941_v63, %v928_v35  ;;  %v658_v55 = vsel %vm637_vm3, %v656_v36, %v657_v37  ;;  %v871_v46 = vmul.f32 %v7592_v18, %v7805_v2  ;;  %v832_v58 = vrot.slane %v794_v42, 1  ;;  %v578_v36 = vld [vmem:[#allocation2 + $0x98] sm:$0x3] }
 0x193   : > { %6914 = vmatprep.mubr.msk.f32.mxu1 %vm528_vm1, %v1133_v39  ;;  %v676_v47 = vadd.f32 %v658_v55, %v590_v24  ;;  %v736_v57 = vsel %vm715_vm4, %v734_v40, %v735_v41  ;;  %v872_v48 = vmul.f32 %v7592_v18, %v7807_v51  ;;  %v1083_v50 = vsel %vm715_vm4, %v1081_v15, %v1082_v21 }
 0x194   : > { %v1026_v49 = vadd.f32 %v1006_v32, %v949_v43  ;;  %v833_v3 = vrot.slane %v795_v56, 1  ;;  %v909_v6 = vrot.slane %v871_v46, 2  ;;  %v969_v17 = vmul.f32 %v7564_v1, %v575_v44 }
 0x195   : > { %v754_v52 = vadd.f32 %v736_v57, %v676_v47  ;;  %v910_v53 = vrot.slane %v872_v48, 2  ;;  %v970_v54 = vmul.f32 %v7564_v1, %v576_v45  ;;  %v1046_v61 = vmul.f32 %v7602_v26, %v575_v44 }
 0x196   : > { %v1103_v4 = vadd.f32 %v1083_v50, %v1026_v49  ;;  %v834_v5 = vsel %vm637_vm3, %v832_v58, %v833_v3  ;;  %v1047_v62 = vmul.f32 %v7602_v26, %v576_v45  ;;  %v942_v12 = vmul.f32 %v7552_v59, %v575_v44 }
 0x197   : > { %v775_v63 = vadd.f32 %v767_v38, %v754_v52  ;;  %v1007_v8 = vrot.slane %v969_v17, 1  ;;  %v1008_v29 = vrot.slane %v970_v54, 1  ;;  %v911_v10 = vsel %vm715_vm4, %v909_v6, %v910_v53 }
 0x198   : > { %v1118_v9 = vadd.f32 %v7644_v22, %v1103_v4  ;;  %v1084_v16 = vrot.slane %v1046_v61, 2  ;;  %v1085_v20 = vrot.slane %v1047_v62, 2  ;;  %v591_v15 = vmul.f32 %v7538_v31, %v7805_v2 }
 0x199   : > { %v852_v13 = vadd.f32 %v834_v5, %v775_v63  ;;  %v619_v21 = vmul.f32 %v7523_v19, %v7805_v2  ;;  %v620_v23 = vmul.f32 %v7523_v19, %v7807_v51  ;;  %v1009_v27 = vsel %vm637_vm3, %v1007_v8, %v1008_v29 }
 0x19a   : > { %v1126_v24 = vmax.f32 %v1118_v9, 0.0  ;;  %v697_v28 = vmul.f32 %v7533_v25, %v7805_v2  ;;  %v698_v30 = vmul.f32 %v7533_v25, %v7807_v51  ;;  %v768_v31 = vmul.f32 %v7559_v0, %v575_v44 }
 0x19b   : > { %v929_v32 = vadd.f32 %v911_v10, %v852_v13  ;;  %v659_v33 = vrot.slane %v619_v21, 1  ;;  %v660_v34 = vrot.slane %v620_v23, 1  ;;  %v796_v19 = vmul.f32 %v7573_v7, %v575_v44 }
 0x19c   : > { %v1134_v35 = vmin.f32 %v1126_v24, 6.0  ;;  %v737_v37 = vrot.slane %v697_v28, 2  ;;  %v738_v38 = vrot.slane %v698_v30, 2  ;;  %v797_v41 = vmul.f32 %v7573_v7, %v576_v45 }
 0x19d   : > { %v950_v39 = vadd.f32 %v942_v12, %v929_v32  ;;  %v661_v40 = vsel %vm637_vm3, %v659_v33, %v660_v34  ;;  %v873_v2 = vmul.f32 %v7592_v18, %v575_v44  ;;  %v835_v42 = vrot.slane %v796_v19, 1 }
 0x19e   : > { %6915 = vmatmul.mubr.msk.f32.gmra.mrb[4].mxu1 %vm528_vm1, %v1134_v35  ;;  %v677_v25 = vadd.f32 %v661_v40, %v591_v15  ;;  %v739_v51 = vsel %vm715_vm4, %v737_v37, %v738_v38  ;;  %v874_v0 = vmul.f32 %v7592_v18, %v576_v45  ;;  %v836_v55 = vrot.slane %v797_v41, 1 }
 0x19f   : > { %v1027_v43 = vadd.f32 %v1009_v27, %v950_v39  ;;  %v912_v56 = vrot.slane %v873_v2, 2  ;;  %v972_v46 = vmul.f32 %v7564_v1, %v578_v36  ;;  %v1086_v47 = vsel %vm715_vm4, %v1084_v16, %v1085_v20 }
 0x1a0   : > { %v755_v57 = vadd.f32 %v739_v51, %v677_v25  ;;  %v913_v58 = vrot.slane %v874_v0, 2  ;;  %v837_v44 = vsel %vm637_vm3, %v835_v42, %v836_v55  ;;  %v1048_v48 = vmul.f32 %v7602_v26, %v7554_v60 }
 0x1a1   : > { %v1104_v7 = vadd.f32 %v1086_v47, %v1027_v43  ;;  %v1049_v49 = vmul.f32 %v7602_v26, %v578_v36  ;;  %v1010_v3 = vrot.slane %v7584_v14, 1  ;;  %v1011_v1 = vrot.slane %v972_v46, 1 }
 0x1a2   : > { %v776_v50 = vadd.f32 %v768_v31, %v755_v57  ;;  %v914_v45 = vsel %vm715_vm4, %v912_v56, %v913_v58  ;;  %v943_v52 = vmul.f32 %v7552_v59, %v7554_v60  ;;  %v1087_v17 = vrot.slane %v1048_v48, 2  ;;  %v7895_v59 = vld [vmem:[%s12043_s6] ss:$0 sm:$0xff]  ;;  %s8133_s6 = sld [smem:[#allocation7 + $0x1a]] }
 0x1a3   : > { %v1119_v18 = vadd.f32 %v7644_v22, %v1104_v7  ;;  %v1088_v54 = vrot.slane %v1049_v49, 2  ;;  %v1012_v61 = vsel %vm637_vm3, %v1010_v3, %v1011_v1 }
 0x1a4   : > { %v853_v6 = vadd.f32 %v837_v44, %v776_v50 }
 0x1a5   : > { %v1127_v53 = vmax.f32 %v1119_v18, 0.0  ;;  %v1089_v62 = vsel %vm715_vm4, %v1087_v17, %v1088_v54 }
 0x1a6   : > { %v930_v4 = vadd.f32 %v914_v45, %v853_v6 }
 0x1a7   : > { %v1135_v5 = vmin.f32 %v1127_v53, 6.0 }
 0x1a8   : > { %v951_v26 = vadd.f32 %v943_v52, %v930_v4  ;;  %12074 = sst [smem:[#allocation51_spill]] %s8133_s6 }
 0x1a9   : > { %6917 = vmatprep.mubr.msk.f32.mxu1 %vm528_vm1, %v1135_v5 }
 0x1aa   : > { %v1028_v63 = vadd.f32 %v1012_v61, %v951_v26 }
 0x1ac   : > { %v1105_v12 = vadd.f32 %v1089_v62, %v1028_v63 }
 0x1ae   : > { %v1120_v14 = vadd.f32 %v7644_v22, %v1105_v12 }
 0x1b0   : > { %v1128_v8 = vmax.f32 %v1120_v14, 0.0 }
 0x1b2   : > { %v1136_v29 = vmin.f32 %v1128_v8, 6.0 }
 0x1b4   : > { %6918 = vmatmul.mubr.msk.f32.gmra.mrb[6].mxu1 %vm528_vm1, %v1136_v29 }
 0x1b5   : > { %6932 = vmatprep.mubr.msk.f32.mxu1 %vm7238_vm13, %v7236_v11 }
 0x247   : > { %v6910_v60 = vpop.f32.mrb[0].mxu1 }
 0x248   : > { %v7898_v9 = vadd.f32 %v6910_v60, %v7895_v59  ;;  %v1238_v10 = vpop.f32.mrb[1].mxu1 }
 0x249   : > { %v7901_v16 = vadd.f32 %v7895_v59, %v1238_v10 }
 0x24a   : > { %12044 = vst [vmem:[#allocation23_spill] sm:$0xff] %v7898_v9  ;;  %v1304_v22 = vsel %vm382_vm0, %v7898_v9, 0.0  ;;  %v7907_v20 = vsel %vm382_vm0, %v7898_v9, -inf }
 0x24b   : > { %12045 = vst [vmem:[#allocation24_spill] sm:$0xff] %v7901_v16  ;;  %1305 = vadd.xlane.f32.xlu1 %v1304_v22  ;;  %v1404_v13 = vrot.slane %v1304_v22, 4  ;;  %1281 = vmax.xlane.f32.xlu0 %v7907_v20  ;;  %v1356_v15 = vrot.slane %v7907_v20, 4  ;;  %v7913_v21 = vsel %vm382_vm0, %v7901_v16, -inf  ;;  %v1301_v23 = vsel %vm382_vm0, %v7901_v16, 0.0 }
 0x24c   : > { %v1350_v24 = vrot.slane %v7913_v21, 4  ;;  %v1341_v27 = vadd.f32 %v1304_v22, %v1301_v23  ;;  %v1398_v28 = vrot.slane %v1301_v23, 4 }
 0x24d   : > { %v1405_v30 = vadd.f32 %v1404_v13, %v1304_v22  ;;  %v1357_v32 = vmax.f32 %v7907_v20, %v1356_v15 }
 0x24e   : > { %v1351_v33 = vmax.f32 %v7913_v21, %v1350_v24  ;;  %v1399_v34 = vadd.f32 %v1398_v28, %v1301_v23 }
 0x24f   : > { %v1406_v31 = vrot.slane %v1405_v30, 2  ;;  %v1358_v35 = vrot.slane %v1357_v32, 2  ;;  %1278 = vmax.xlane.f32.xlu0 %v7913_v21 }
 0x250   : > { %v1352_v36 = vrot.slane %v1351_v33, 2  ;;  %v1400_v37 = vrot.slane %v1399_v34, 2 }
 0x251   : > { %v1407_v38 = vadd.f32 %v1406_v31, %v1405_v30  ;;  %v1359_v19 = vmax.f32 %v1357_v32, %v1358_v35 }
 0x252   : > { %v1353_v39 = vmax.f32 %v1351_v33, %v1352_v36  ;;  %v1401_v40 = vadd.f32 %v1400_v37, %v1399_v34 }
 0x253   : > { %v1408_v41 = vrot.slane %v1407_v38, 1  ;;  %v1360_v2 = vrot.slane %v1359_v19, 1  ;;  %1302 = vadd.xlane.f32.xlu0 %v1301_v23 }
 0x254   : > { %v1354_v25 = vrot.slane %v1353_v39, 1  ;;  %v1402_v51 = vrot.slane %v1401_v40, 1 }
 0x255   : > { %v1409_v42 = vadd.f32 %v1408_v41, %v1407_v38  ;;  %v1361_v0 = vmax.f32 %v1359_v19, %v1360_v2 }
 0x256   : > { %v1355_v43 = vmax.f32 %v1353_v39, %v1354_v25  ;;  %v1403_v55 = vadd.f32 %v1402_v51, %v1401_v40 }
 0x257   : > { %v1447_v56 = vmul.f32 0.125, %v1409_v42 }
 0x258   : > { %v1446_v46 = vmul.f32 0.125, %v1403_v55  ;;  %v4542_v47 = vsel %vm1507_vm5, %v1361_v0, %v1355_v43 }
 0x25a   : > { %v4704_v57 = vsel %vm1507_vm5, %v1447_v56, %v1446_v46 }
 0x25b   : > { %v6913_v58 = vpop.f32.mrb[2].mxu1 }
 0x25c   : > { %v7924_v7 = vadd.f32 %v6913_v58, %v7895_v59  ;;  %v1248_v44 = vpop.f32.mrb[3].mxu1 }
 0x25d   : > { %v7927_v48 = vadd.f32 %v7895_v59, %v1248_v44 }
 0x25e   : > { %12046 = vst [vmem:[#allocation25_spill] sm:$0xff] %v7924_v7  ;;  %v7931_v49 = vsel %vm382_vm0, %v7924_v7, -inf  ;;  %v1310_v50 = vsel %vm382_vm0, %v7924_v7, 0.0 }
 0x25f   : > { %12047 = vst [vmem:[#allocation26_spill] sm:$0xff] %v7927_v48  ;;  %1287 = vmax.xlane.f32.xlu1 %v7931_v49  ;;  %v1368_v18 = vrot.slane %v7931_v49, 4  ;;  %v1416_v45 = vrot.slane %v1310_v50, 4  ;;  %v7939_v3 = vsel %vm382_vm0, %v7927_v48, -inf  ;;  %v1307_v1 = vsel %vm382_vm0, %v7927_v48, 0.0 }
 0x260   : > { %v1362_v6 = vrot.slane %v7939_v3, 4  ;;  %v1410_v52 = vrot.slane %v1307_v1, 4  ;;  %v1342_v53 = vadd.f32 %v1341_v27, %v1307_v1 }
 0x261   : > { %v1369_v17 = vmax.f32 %v7931_v49, %v1368_v18  ;;  %v1417_v54 = vadd.f32 %v1416_v45, %v1310_v50 }
 0x262   : > { %v1363_v4 = vmax.f32 %v7939_v3, %v1362_v6  ;;  %v1411_v5 = vadd.f32 %v1410_v52, %v1307_v1  ;;  %v1343_v61 = vadd.f32 %v1342_v53, %v1310_v50 }
 0x263   : > { %v1370_v26 = vrot.slane %v1369_v17, 2  ;;  %v1418_v62 = vrot.slane %v1417_v54, 2  ;;  %1311 = vadd.xlane.f32.xlu1 %v1310_v50 }
 0x264   : > { %v1364_v63 = vrot.slane %v1363_v4, 2  ;;  %v1412_v12 = vrot.slane %v1411_v5, 2 }
 0x265   : > { %v1371_v14 = vmax.f32 %v1369_v17, %v1370_v26  ;;  %v1419_v8 = vadd.f32 %v1418_v62, %v1417_v54 }
 0x266   : > { %v1365_v29 = vmax.f32 %v1363_v4, %v1364_v63  ;;  %v1413_v60 = vadd.f32 %v1412_v12, %v1411_v5  ;;  %v1454_v4 = vlaneseq }
 0x267   : > { %v1372_v10 = vrot.slane %v1371_v14, 1  ;;  %v1420_v22 = vrot.slane %v1419_v8, 1  ;;  %1284 = vmax.xlane.f32.xlu1 %v7939_v3 }
 0x268   : > { %v1366_v13 = vrot.slane %v1365_v29, 1  ;;  %v1414_v15 = vrot.slane %v1413_v60, 1 }
 0x269   : > { %v1421_v23 = vadd.f32 %v1420_v22, %v1419_v8  ;;  %v1373_v28 = vmax.f32 %v1371_v14, %v1372_v10  ;;  %v7969_v14 = vshrl.u32 %v1454_v4, 7  ;;  %v7971_v8 = vand.u32 127, %v1454_v4 }
 0x26a   : > { %v1367_v24 = vmax.f32 %v1365_v29, %v1366_v13  ;;  %v1415_v27 = vadd.f32 %v1414_v15, %v1413_v60 }
 0x26b   : > { %1308 = vadd.xlane.f32.xlu1 %v1307_v1  ;;  %v1449_v33 = vmul.f32 0.125, %v1421_v23  ;;  %12050 = vst [vmem:[#allocation29_spill] sm:$0xff] %v7969_v14  ;;  %v7975_v10 = vadd.s32 3, %v7969_v14  ;;  %v7237_v23 = vmov 1.0  }
 0x26c   : > { %v1448_v30 = vmul.f32 0.125, %v1415_v27  ;;  %v4543_v32 = vsel %vm1509_vm6, %v1367_v24, %v4542_v47 }
 0x26d   : > { %v4544_v34 = vsel %vm1511_vm7, %v1373_v28, %v4543_v32  ;;  %vm1465_vm10 = vcmp.eq.s32.totalorder %v7971_v8, %v7975_v10 }
 0x26e   : > { %v4705_v31 = vsel %vm1509_vm6, %v1448_v30, %v4704_v57  ;;  %6921 = vmatpush3.msk.msra.mxu0 %vm1465_vm10, %v7237_v23  ;;  %6931 = vmatpush3.msk.msra.mxu1 %vm1465_vm10, %v7237_v23 }
 0x26f   : > { %v4706_v35 = vsel %vm1511_vm7, %v1449_v33, %v4705_v31 }
 0x271   : > { %v6916_v36 = vpop.f32.mrb[4].mxu1 }
 0x272   : > { %v7952_v37 = vadd.f32 %v6916_v36, %v7895_v59  ;;  %v1258_v38 = vpop.f32.mrb[5].mxu1 }
 0x273   : > { %v7955_v19 = vadd.f32 %v7895_v59, %v1258_v38 }
 0x274   : > { %12048 = vst [vmem:[#allocation27_spill] sm:$0xff] %v7952_v37  ;;  %v1292_v39 = vsel %vm382_vm0, %v7952_v37, -inf  ;;  %v1316_v40 = vsel %vm382_vm0, %v7952_v37, 0.0 }
 0x275   : > { %12049 = vst [vmem:[#allocation28_spill] sm:$0xff] %v7955_v19  ;;  %v1335_v41 = vmax.f32 %v7907_v20, %v1292_v39  ;;  %v1380_v2 = vrot.slane %v1292_v39, 4  ;;  %1293 = vmax.xlane.f32.xlu0 %v1292_v39  ;;  %v1289_v25 = vsel %vm382_vm0, %v7955_v19, -inf  ;;  %v1428_v51 = vrot.slane %v1316_v40, 4  ;;  %1317 = vadd.xlane.f32.xlu1 %v1316_v40 }
 0x276   : > { %v1374_v42 = vrot.slane %v1289_v25, 4  ;;  %v1334_v0 = vmax.f32 %v7913_v21, %v1289_v25  ;;  %v1313_v43 = vsel %vm382_vm0, %v7955_v19, 0.0 }
 0x277   : > { %v1381_v55 = vmax.f32 %v1292_v39, %v1380_v2  ;;  %v1429_v56 = vadd.f32 %v1428_v51, %v1316_v40  ;;  %v1422_v46 = vrot.slane %v1313_v43, 4  ;;  %v1344_v47 = vadd.f32 %v1343_v61, %v1313_v43 }
 0x278   : > { %v1375_v57 = vmax.f32 %v1289_v25, %v1374_v42  ;;  %v7967_v58 = vmax.f32 %v1334_v0, %v1335_v41 }
 0x279   : > { %v1382_v20 = vrot.slane %v1381_v55, 2  ;;  %1290 = vmax.xlane.f32.xlu0 %v1289_v25  ;;  %v1430_v44 = vrot.slane %v1429_v56, 2  ;;  %v1423_v50 = vadd.f32 %v1422_v46, %v1313_v43  ;;  %1314 = vadd.xlane.f32.xlu1 %v1313_v43  ;;  %v1345_v18 = vadd.f32 %v1344_v47, %v1316_v40 }
 0x27a   : > { %v1376_v45 = vrot.slane %v1375_v57, 2 }
 0x27b   : > { %v1383_v1 = vmax.f32 %v1381_v55, %v1382_v20  ;;  %v1431_v6 = vadd.f32 %v1430_v44, %v1429_v56  ;;  %v1424_v21 = vrot.slane %v1423_v50, 2 }
 0x27c   : > { %v1377_v52 = vmax.f32 %v1375_v57, %v1376_v45 }
 0x27d   : > { %v1384_v53 = vrot.slane %v1383_v1, 1  ;;  %v1432_v17 = vrot.slane %v1431_v6, 1  ;;  %v1425_v54 = vadd.f32 %v1424_v21, %v1423_v50 }
 0x27e   : > { %v1378_v5 = vrot.slane %v1377_v52, 1 }
 0x27f   : > { %v1426_v61 = vrot.slane %v1425_v54, 1  ;;  %v1433_v62 = vadd.f32 %v1432_v17, %v1431_v6  ;;  %v1385_v63 = vmax.f32 %v1383_v1, %v1384_v53 }
 0x280   : > { %v1379_v26 = vmax.f32 %v1377_v52, %v1378_v5 }
 0x281   : > { %v1427_v12 = vadd.f32 %v1426_v61, %v1425_v54  ;;  %v1451_v13 = vmul.f32 0.125, %v1433_v62 }
 0x282   : > { %v4545_v29 = vsel %vm1513_vm8, %v1379_v26, %v4544_v34 }
 0x283   : > { %v1450_v60 = vmul.f32 0.125, %v1427_v12  ;;  %v4546_v22 = vsel %vm1515_vm9, %v1385_v63, %v4545_v29  ;;  %v7239_v63 = vmov 0.0|0.0  }
 0x284   : > { %7000 = vmatprep.subr.bf16.mxu1 %v7239_v63 }
 0x285   : > { %v4707_v15 = vsel %vm1513_vm8, %v1450_v60, %v4706_v35 }
 0x286   : > { %v4708_v24 = vsel %vm1515_vm9, %v1451_v13, %v4707_v15 }
 0x287   : > { %v6919_v27 = vpop.f32.mrb[6].mxu1 }
 0x288   : > { %v7989_v28 = vadd.f32 %v6919_v27, %v7895_v59  ;;  %v1268_v30 = vpop.f32.mrb[7].mxu1 }
 0x289   : > { %v7992_v32 = vadd.f32 %v7895_v59, %v1268_v30 }
 0x28a   : > { %12051 = vst [vmem:[#allocation30_spill] sm:$0xff] %v7989_v28  ;;  %v1298_v33 = vsel %vm382_vm0, %v7989_v28, -inf  ;;  %v1322_v34 = vsel %vm382_vm0, %v7989_v28, 0.0 }
 0x28b   : > { %12052 = vst [vmem:[#allocation31_spill] sm:$0xff] %v7992_v32  ;;  %v1337_v31 = vmax.f32 %v7931_v49, %v1298_v33  ;;  %v1392_v35 = vrot.slane %v1298_v33, 4  ;;  %1299 = vmax.xlane.f32.xlu0 %v1298_v33  ;;  %v1295_v36 = vsel %vm382_vm0, %v7992_v32, -inf  ;;  %v1440_v38 = vrot.slane %v1322_v34, 4  ;;  %1323 = vadd.xlane.f32.xlu1 %v1322_v34 }
 0x28c   : > { %v1336_v39 = vmax.f32 %v7939_v3, %v1295_v36  ;;  %v1386_v40 = vrot.slane %v1295_v36, 4  ;;  %v1319_v59 = vsel %vm382_vm0, %v7992_v32, 0.0 }
 0x28d   : > { %v1393_v41 = vmax.f32 %v1298_v33, %v1392_v35  ;;  %v1441_v2 = vadd.f32 %v1440_v38, %v1322_v34  ;;  %v1346_v25 = vadd.f32 %v1345_v18, %v1319_v59  ;;  %v1434_v51 = vrot.slane %v1319_v59, 4 }
 0x28e   : > { %v8004_v42 = vmax.f32 %v1336_v39, %v1337_v31  ;;  %v1387_v49 = vmax.f32 %v1295_v36, %v1386_v40  ;;  %v1477_v33 = vsub.s32 %v7971_v8, %v7969_v14 }
 0x28f   : > { %v1394_v0 = vrot.slane %v1393_v41, 2  ;;  %1296 = vmax.xlane.f32.xlu0 %v1295_v36  ;;  %v1442_v43 = vrot.slane %v1441_v2, 2  ;;  %v8006_v55 = vadd.f32 %v1346_v25, %v1322_v34  ;;  %v1435_v56 = vadd.f32 %v1434_v51, %v1319_v59 }
 0x290   : > { %v1388_v46 = vrot.slane %v1387_v49, 2  ;;  %v1340_v3 = vmax.f32 %v7967_v58, %v8004_v42  ;;  %v1459_v58 = vadd.s32 3, %v7971_v8 }
 0x291   : > { %v1395_v47 = vmax.f32 %v1393_v41, %v1394_v0  ;;  %v1443_v57 = vadd.f32 %v1442_v43, %v1441_v2  ;;  %v1436_v20 = vrot.slane %v1435_v56, 2  ;;  %v1456_v43 = vadd.s32 8, %v7969_v14 }
 0x292   : > { %v1389_v44 = vmax.f32 %v1387_v49, %v1388_v46  ;;  %v1349_v10 = vmul.f32 0.125, %v8006_v55  ;;  %vm1460_vm2 = vcmp.eq.s32.totalorder %v7969_v14, %v1459_v58 }
 0x293   : > { %v1396_v50 = vrot.slane %v1395_v47, 1  ;;  %v1444_v18 = vrot.slane %v1443_v57, 1  ;;  %v1437_v45 = vadd.f32 %v1436_v20, %v1435_v56  ;;  %1320 = vadd.xlane.f32.xlu0 %v1319_v59  ;;  %v1462_v42 = vsel %vm1460_vm2, 1.0, %v7236_v11 }
 0x294   : > { %v1390_v1 = vrot.slane %v1389_v44, 1 }
 0x295   : > { %v1438_v6 = vrot.slane %v1437_v45, 1  ;;  %v1445_v52 = vadd.f32 %v1444_v18, %v1443_v57  ;;  %v1397_v17 = vmax.f32 %v1395_v47, %v1396_v50 }
 0x296   : > { %v1391_v21 = vmax.f32 %v1389_v44, %v1390_v1 }
 0x297   : > { %v1439_v53 = vadd.f32 %v1438_v6, %v1437_v45  ;;  %v1453_v61 = vmul.f32 0.125, %v1445_v52  ;;  %v3054_v6 = vadd.s32 3, %v1456_v43 }
 0x298   : > { %v4547_v54 = vsel %vm1517_vm11, %v1391_v21, %v4546_v22 }
 0x299   : > { %v1452_v4 = vmul.f32 0.125, %v1439_v53  ;;  %v8012_v5 = vsel %vm1519_vm12, %v1397_v17, %v4547_v54  ;;  %vm3055_vm15 = vcmp.eq.s32.totalorder %v7971_v8, %v3054_v6  ;;  %v2841_v6 = vstv %s8127_s3  ;;  %s12189_s3 = sld [smem:[#allocation79_spill]] }
 0x29a   : > { %vm8044_vm1 = vmpackc.low %vm3055_vm15, %vm1465_vm10 }
 0x29b   : > { %v4709_v26 = vsel %vm1517_vm11, %v1452_v4, %v4708_v24 }
 0x29c   : > { %v8016_v62 = vsel %vm1519_vm12, %v1453_v61, %v4709_v26 }
 0x2d8   : > { %v1306_v12 = vpop.xlane.xlu1 %1305  ;;  %v1282_v60 = vpop.xlane.xlu0 %1281 }
 0x2d9   : > { %v1482_v36 = vrot.slane %v1282_v60, %v1477_v33  ;;  %v1327_v59 = vmul.f32 0.0625, %v1306_v12 }
 0x2db   : > { %v1690_v57 = vrot.slane %v1327_v59, %v1477_v33 }
 0x2dc   : > { %v1279_v13 = vpop.xlane.xlu0 %1278 }
 0x2dd   : > { %v1478_v34 = vrot.slane %v1279_v13, %v1477_v33 }
 0x2df   : > { %v1508_v41 = vsel %vm1507_vm5, %v1482_v36, %v1478_v34  ;;  %v7240_v36 = vmov 1.0|1.0  }
 0x2e0   : > { %v1303_v23 = vpop.xlane.xlu0 %1302 }
 0x2e1   : > { %v1326_v38 = vmul.f32 0.0625, %v1303_v23 }
 0x2e3   : > { %v1686_v49 = vrot.slane %v1326_v38, %v1477_v33 }
 0x2e5   : > { %v1715_v18 = vsel %vm1507_vm5, %v1690_v57, %v1686_v49  ;;  %vm1461_vm5 = vcmp.eq.s32.totalorder %v1456_v43, %v1459_v58  ;;  %v1910_v49 = vstv %s8103_s20  ;;  %v1926_v43 = vstv %s8105_s16  ;;  %s8219_s20 = sld [smem:[#allocation7 + $0x29]] }
 0x2e6   : > { %v1958_v57 = vstv %s8113_s27  ;;  %s12111_s16 = sld [smem:[#allocation54_spill]]  ;;  %s12116_s27 = sld [smem:[#allocation59_spill]] }
 0x2eb   : > { %12109 = sst [smem:[#allocation85_spill]] %s8219_s20  ;;  %s8233_s20 = sld [smem:[#allocation7 + $0x43]] }
 0x2ec   : > { %v1288_v29 = vpop.xlane.xlu1 %1287 }
 0x2ed   : > { %v1490_v51 = vrot.slane %v1288_v29, %v1477_v33 }
 0x2f0   : > { %v1312_v22 = vpop.xlane.xlu1 %1311 }
 0x2f1   : > { %v1329_v56 = vmul.f32 0.0625, %v1312_v22  ;;  %12117 = sst [smem:[#allocation87_spill]] %s8233_s20  ;;  %s12126_s20 = sld [smem:[#allocation68_spill]] }
 0x2f3   : > { %v1698_v21 = vrot.slane %v1329_v56, %v1477_v33  ;;  %v2711_v56 = vstv %s8107_s19  ;;  %s12113_s19 = sld [smem:[#allocation56_spill]] }
 0x2f4   : > { %v1285_v15 = vpop.xlane.xlu1 %1284 }
 0x2f5   : > { %v1486_v35 = vrot.slane %v1285_v15, %v1477_v33 }
 0x2f7   : > { %v1510_v2 = vsel %vm1509_vm6, %v1486_v35, %v1508_v41 }
 0x2f8   : > { %v1309_v24 = vpop.xlane.xlu1 %1308  ;;  %v1512_v20 = vsel %vm1511_vm7, %v1490_v51, %v1510_v2  ;;  %v1894_v2 = vstv %s8095_s11  ;;  %v1878_v51 = vstv %s8099_s29  ;;  %s8217_s11 = sld [smem:[#allocation7 + $0x27]] }
 0x2f9   : > { %v1328_v39 = vmul.f32 0.0625, %v1309_v24  ;;  %s12108_s29 = sld [smem:[#allocation52_spill]] }
 0x2fb   : > { %v1694_v46 = vrot.slane %v1328_v39, %v1477_v33 }
 0x2fd   : > { %v1716_v52 = vsel %vm1509_vm6, %v1694_v46, %v1715_v18  ;;  %v1942_v46 = vstv %s8109_s24  ;;  %v2022_v18 = vstv %s8121_s0  ;;  %s8227_s24 = sld [smem:[#allocation7 + $0x2d]]  ;;  %s12138_s0 = sld [smem:[#allocation78_spill]]  ;;  %vm2514_vm6 = vcmask 1043456  }
 0x2fe   : > { %v1717_v29 = vsel %vm1511_vm7, %v1698_v21, %v1716_v52  ;;  %v2074_v21 = vstv %s8129_s4  ;;  %v2100_v52 = vstv %s8131_s5  ;;  %s12125_s4 = sld [smem:[#allocation66_spill]]  ;;  %vm2693_vm7 = vcmask 1042432   ;;  %s11987_s5 = smov 124  }
 0x302   : > { %v1294_v27 = vpop.xlane.xlu0 %1293  ;;  %v1318_v30 = vpop.xlane.xlu1 %1317 }
 0x303   : > { %v1498_v45 = vrot.slane %v1294_v27, %v1477_v33  ;;  %v1331_v54 = vmul.f32 0.0625, %v1318_v30  ;;  %12114 = sst [smem:[#allocation86_spill]] %s8227_s24  ;;  %s8241_s24 = sld [smem:[#allocation7 + $0x45]] }
 0x305   : > { %v1706_v23 = vrot.slane %v1331_v54, %v1477_v33 }
 0x306   : > { %v1291_v31 = vpop.xlane.xlu0 %1290  ;;  %v1315_v40 = vpop.xlane.xlu1 %1314 }
 0x307   : > { %v1494_v25 = vrot.slane %v1291_v31, %v1477_v33  ;;  %v1330_v47 = vmul.f32 0.0625, %v1315_v40 }
 0x309   : > { %v1514_v44 = vsel %vm1513_vm8, %v1494_v25, %v1512_v20  ;;  %v1702_v53 = vrot.slane %v1330_v47, %v1477_v33  ;;  %v2636_v25 = vstv %s8097_s23  ;;  %v2737_v47 = vstv %s8111_s26  ;;  %s12112_s23 = sld [smem:[#allocation55_spill]]  ;;  %s12115_s26 = sld [smem:[#allocation57_spill]] }
 0x30a   : > { %v1516_v61 = vsel %vm1515_vm9, %v1498_v45, %v1514_v44  ;;  %v2763_v20 = vstv %s8115_s8  ;;  %v1996_v44 = vstv %s8117_s17  ;;  %v2815_v45 = vstv %s8123_s1  ;;  %s12118_s8 = sld [smem:[#allocation60_spill]]  ;;  %s8275_s1 = sld [smem:[#allocation7 + $0x3b]] }
 0x30b   : > { %v1718_v13 = vsel %vm1513_vm8, %v1702_v53, %v1717_v29  ;;  %s8235_s17 = sld [smem:[#allocation7 + $0x2f]]  ;;  %v2126_v53 = vstv %s8133_s6  ;;  %s8251_s6 = sld [smem:[#allocation7 + $0x33]]  ;;  %v2353_v29 = vstv %s8147_s9  ;;  %vm2335_vm8 = vcmask 1044480  }
 0x30c   : > { %v1719_v30 = vsel %vm1515_vm9, %v1706_v23, %v1718_v13  ;;  %s12134_s9 = sld [smem:[#allocation76_spill]]  ;;  %vm2872_vm9 = vcmask 1041408  }
 0x310   : > { %12139 = sst [smem:[#allocation76_spill]] %s8275_s1  ;;  %s12191_s1 = sld [smem:[#allocation80_spill]] }
 0x311   : > { %12119 = sst [smem:[#allocation88_spill]] %s8235_s17 }
 0x312   : > { %s8249_s17 = sld [smem:[#allocation7 + $0x4b]]  ;;  %12128 = sst [smem:[#allocation90_spill]] %s8251_s6 }
 0x313   : > { %s8265_s6 = sld [smem:[#allocation7 + $0x4f]] }
 0x318   : > { %v1300_v0 = vpop.xlane.xlu0 %1299  ;;  %v1324_v50 = vpop.xlane.xlu1 %1323 }
 0x319   : > { %v1506_v4 = vrot.slane %v1300_v0, %v1477_v33  ;;  %v1333_v26 = vmul.f32 0.0625, %v1324_v50  ;;  %v2662_v0 = vstv %s8101_s25  ;;  %s12110_s25 = sld [smem:[#allocation53_spill]]  ;;  %v2789_v50 = vstv %s8119_s14 }
 0x31a   : > { %s12120_s14 = sld [smem:[#allocation61_spill]] }
 0x31b   : > { %v1714_v24 = vrot.slane %v1333_v26, %v1477_v33  ;;  %v2278_v26 = vstv %s12113_s19  ;;  %s12133_s19 = sld [smem:[#allocation74_spill]] }
 0x31c   : > { %v1297_v1 = vpop.xlane.xlu0 %1296 }
 0x31d   : > { %v1502_v17 = vrot.slane %v1297_v1, %v1477_v33  ;;  %v2048_v1 = vstv %s8125_s2  ;;  %s8243_s2 = sld [smem:[#allocation7 + $0x31]] }
 0x31f   : > { %v1518_v12 = vsel %vm1517_vm11, %v1502_v17, %v1516_v61  ;;  %v2174_v17 = vstv %s12108_s29  ;;  %v2200_v54 = vstv %s12110_s25  ;;  %v2252_v61 = vstv %s12112_s23  ;;  %s12130_s25 = sld [smem:[#allocation72_spill]]  ;;  %s8259_s23 = sld [smem:[#allocation7 + $0x35]] }
 0x320   : > { %v1321_v60 = vpop.xlane.xlu0 %1320  ;;  %v1520_v22 = vsel %vm1519_vm12, %v1506_v4, %v1518_v12  ;;  %v2226_v4 = vstv %s12111_s16  ;;  %v2304_v12 = vstv %s12115_s26  ;;  %v2431_v13 = vstv %s12120_s14  ;;  %s12137_s14 = sld [smem:[#allocation77_spill]]  ;;  %s12149_s26 = sld [smem:[#allocation90_spill]] }
 0x321   : > { %v1332_v15 = vmul.f32 0.0625, %v1321_v60  ;;  %6923 = vmatmul.mubr.msk.f32.vlgmr.msra.gmra.mrb[8].mxu0 %vm1521_vm14, %v1520_v22  ;;  %v2379_v60 = vstv %s12116_s27  ;;  %v2405_v22 = vstv %s12118_s8  ;;  %s8267_s27 = sld [smem:[#allocation7 + $0x37]]  ;;  %s12197_s29 = sld [smem:[#allocation81_spill]] }
 0x322   : > { %6927 = vmatprep.mubr.msk.f32.mxu0 %vm1521_vm14, %v1462_v42  ;;  %s12216_s16 = sld [smem:[#allocation69_spill]] }
 0x323   : > { %v1710_v27 = vrot.slane %v1332_v15, %v1477_v33  ;;  %12123 = sst [smem:[#allocation89_spill]] %s8243_s2  ;;  %s8257_s2 = sld [smem:[#allocation7 + $0x4d]] }
 0x325   : > { %v1720_v34 = vsel %vm1517_vm11, %v1710_v27, %v1719_v30  ;;  %v1886_v30 = vstv %s12125_s4  ;;  %s12148_s4 = sld [smem:[#allocation89_spill]] }
 0x326   : > { %v1721_v35 = vsel %vm1519_vm12, %v1714_v24, %v1720_v34  ;;  %v1902_v34 = vstv %s12126_s20  ;;  %s8282_s20 = sld [smem:[#allocation7 + $0x3f]] }
 0x327   : > { %6933 = vmatmul.mubr.msk.f32.vlgmr.msra.gmra.mrb[8].mxu1 %vm1521_vm14, %v1721_v35  ;;  %12135 = sst [smem:[#allocation74_spill]] %s8267_s27 }
 0x328   : > { %7002 = vmatpush3.bf16.msk.msra.mxu1 %vm8044_vm1, %v7240_v36  ;;  %6944 = vmatprep.mubr.msk.f32.mxu1 %vm7238_vm13, %v7236_v11  ;;  %s8280_s27 = sld [smem:[#allocation7 + $0x3d]] }
 0x329   : > { %7003 = vmatprep.subr.bf16.mxu1 %v7239_v63  ;;  %s12150_s8 = sld [smem:[#allocation74_spill]] }
 0x32b   : > { %6945 = vmatmul.mubr.msk.f32.vlgmr.msra.gmra.mrb[10].mxu1 %vm382_vm0, %v1340_v3  ;;  %v1463_v3 = vsel %vm1461_vm5, 1.0, %v7236_v11 }
 0x32c   : > { %7005 = vmatpush3.bf16.msk.msra.mxu1 %vm8044_vm1, %v7240_v36  ;;  %6956 = vmatprep.mubr.msk.f32.mxu1 %vm7238_vm13, %v7236_v11  ;;  %12142 = sst [smem:[#allocation78_spill]] %s8282_s20  ;;  %s12200_s20 = sld [smem:[#allocation64_spill]] }
 0x32d   : > { %7006 = vmatprep.subr.bf16.mxu1 %v7239_v63 }
 0x32e   : > { %12141 = sst [smem:[#allocation77_spill]] %s8280_s27  ;;  %s7241_s27 = smov 126  }
 0x32f   : > { %6957 = vmatmul.mubr.msk.f32.vlgmr.msra.gmra.mrb[12].mxu1 %vm382_vm0, %v1349_v10  ;;  %v1934_v10 = vstv %s12130_s25  ;;  %s12146_s25 = sld [smem:[#allocation87_spill]] }
 0x330   : > { %7008 = vmatpush3.bf16.msk.msra.mxu1 %vm8044_vm1, %v7240_v36  ;;  %6968 = vmatprep.mubr.msk.f32.mxu1 %vm7238_vm13, %v7236_v11 }
 0x331   : > { %7009 = vmatprep.subr.bf16.mxu1 %v7239_v63 }
 0x333   : > { %6969 = vmatmul.mubr.msk.f32.vlgmr.msra.gmra.mrb[14].mxu1 %vm382_vm0, %v8012_v5 }
 0x334   : > { %7011 = vmatpush3.bf16.msk.msra.mxu1 %vm8044_vm1, %v7240_v36  ;;  %6980 = vmatprep.mubr.msk.f32.mxu1 %vm7238_vm13, %v7236_v11  ;;  %v1918_v36 = vstv %s8171_s13  ;;  %s12145_s13 = sld [smem:[#allocation86_spill]] }
 0x337   : > { %6981 = vmatmul.mubr.msk.f32.vlgmr.msra.gmra.mrb[16].mxu1 %vm382_vm0, %v8016_v62 }
 0x3f4   : > { %v1590_v55 = vpop.f32.mrb[8].mxu0 }
 0x3f5   : > { %v6924_v5 = vpop.f32.mrb[9].mxu0  ;;  %6925 = vmatprep.subr.mxu0 %v1590_v55 }
 0x3f6   : > { %6926 = vmatpush3.msra.mxu0 %v1590_v55  ;;  %v1950_v55 = vstv %s12133_s19  ;;  %v2009_v5 = vstv %s12134_s9  ;;  %s12184_s19 = smov 124   ;;  %s12212_s9 = sld [smem:[#allocation67_spill]] }
 0x3f7   : > { %6928 = vmatmul.mubr.msk.f32.vlgmr.msra.gmra.mrb[10].mxu0 %vm1521_vm14, %v1463_v3 }
 0x3f8   : > { %6937 = vmatprep.mubr.msk.f32.mxu0 %vm1521_vm14, %v1462_v42 }
 0x3fa   : > { %v1790_v62 = vpop.f32.mrb[8].mxu1 }
 0x3fb   : > { %v6934_v63 = vpop.f32.mrb[9].mxu1  ;;  %6935 = vmatprep.subr.mxu0 %v1790_v62 }
 0x3fc   : > { %6936 = vmatpush3.msra.mxu0 %v1790_v62  ;;  %v2035_v63 = vstv %s12137_s14  ;;  %s12186_s14 = smov 123  }
 0x3fd   : > { %6938 = vmatmul.mubr.msk.f32.vlgmr.msra.gmra.mrb[12].mxu0 %vm1521_vm14, %v1463_v3 }
 0x3fe   : > { %v3126_v8 = vpop.f32.mrb[10].mxu1  ;;  %6949 = vmatprep.mubr.msk.f32.mxu0 %vm1521_vm14, %v1462_v42 }
 0x3ff   : > { %v6946_v33 = vpop.f32.mrb[11].mxu1  ;;  %6947 = vmatprep.subr.mxu0 %v3126_v8 }
 0x400   : > { %6948 = vmatpush3.msra.mxu0 %v3126_v8  ;;  %v2061_v8 = vstv %s8189_s28  ;;  %v2087_v33 = vstv %s8191_s7  ;;  %s12190_s7 = sld [smem:[#allocation62_spill]]  ;;  %s12220_s28 = sld [smem:[#allocation85_spill]] }
 0x401   : > { %6950 = vmatmul.mubr.msk.f32.vlgmr.msra.gmra.mrb[14].mxu0 %vm1521_vm14, %v1463_v3 }
 0x402   : > { %v3274_v11 = vpop.f32.mrb[12].mxu1  ;;  %6961 = vmatprep.mubr.msk.f32.mxu0 %vm1521_vm14, %v1462_v42 }
 0x403   : > { %v6958_v38 = vpop.f32.mrb[13].mxu1  ;;  %6959 = vmatprep.subr.mxu0 %v3274_v11 }
 0x404   : > { %6960 = vmatpush3.msra.mxu0 %v3274_v11  ;;  %v2113_v11 = vstv %s12138_s0  ;;  %s12193_s0 = sld [smem:[#allocation63_spill]] }
 0x405   : > { %6962 = vmatmul.mubr.msk.f32.vlgmr.msra.gmra.mrb[16].mxu0 %vm1521_vm14, %v1463_v3 }
 0x406   : > { %v4617_v39 = vpop.f32.mrb[14].mxu1  ;;  %6973 = vmatprep.mubr.msk.f32.mxu0 %vm1521_vm14, %v1462_v42 }
 0x407   : > { %v6970_v40 = vpop.f32.mrb[15].mxu1  ;;  %6971 = vmatprep.subr.mxu0 %v4617_v39 }
 0x408   : > { %6972 = vmatpush3.msra.mxu0 %v4617_v39 }
 0x409   : > { %6974 = vmatmul.mubr.msk.f32.vlgmr.msra.gmra.mrb[18].mxu0 %vm1521_vm14, %v1463_v3 }
 0x40a   : > { %v4779_v59 = vpop.f32.mrb[16].mxu1  ;;  %6985 = vmatprep.mubr.msk.f32.mxu0 %vm1521_vm14, %v1462_v42 }
 0x40b   : > { %v6982_v41 = vpop.f32.mrb[17].mxu1  ;;  %6983 = vmatprep.subr.mxu0 %v4779_v59 }
 0x40c   : > { %6984 = vmatpush3.msra.mxu0 %v4779_v59 }
 0x40d   : > { %6986 = vmatmul.mubr.msk.f32.vlgmr.msra.gmra.mrb[20].mxu0 %vm1521_vm14, %v1463_v3  ;;  %v1966_v3 = vstv %s8183_s21  ;;  %s12209_s21 = sld [smem:[#allocation83_spill]] }
 0x4ca   : > { %v8313_v31 = vpop.f32.mrb[10].mxu0 }
 0x4cb   : > { %12158 = vst [vmem:[#allocation91_spill] sm:$0xff] %v8313_v31  ;;  %v8319_v59 = vpop.f32.mrb[11].mxu0  ;;  %v2638_v42 = vmul.f32 %v8313_v31, %v2636_v25  ;;  %v2664_v62 = vmul.f32 %v8313_v31, %v2662_v0  ;;  %v2713_v35 = vmul.f32 %v8313_v31, %v2711_v56  ;;  %v2739_v23 = vmul.f32 %v8313_v31, %v2737_v47 }
 0x4cc   : > { %12160 = vst [vmem:[#allocation92_spill] sm:$0xff] %v8319_v59  ;;  %v1895_v40 = vmul.f32 %v1894_v2, %v8319_v59  ;;  %v1879_v39 = vmul.f32 %v1878_v51, %v8319_v59  ;;  %v2637_v24 = vmul.f32 %v2636_v25, %v8319_v59  ;;  %v1911_v27 = vmul.f32 %v1910_v49, %v8319_v59 }
 0x4cd   : > { %v2642_v58 = vrot.slane %v2638_v42, 4  ;;  %v2663_v41 = vmul.f32 %v2662_v0, %v8319_v59  ;;  %v2668_v15 = vrot.slane %v2664_v62, 4  ;;  %v1927_v38 = vmul.f32 %v1926_v43, %v8319_v59 }
 0x4ce   : > { %1897 = vrot.lane.b32.xlu1 %v1895_v40, %s7241_s27  ;;  %1881 = vrot.lane.b32.xlu0 %v1879_v39, %s7242_s12  ;;  %v2641_v2 = vrot.slane %v2637_v24, 4  ;;  %v2712_v25 = vmul.f32 %v2711_v56, %v8319_v59  ;;  %v2717_v51 = vrot.slane %v2713_v35, 5  ;;  %v1943_v49 = vmul.f32 %v1942_v46, %v8319_v59 }
 0x4cf   : > { %v2667_v0 = vrot.slane %v2663_v41, 4  ;;  %v2738_v43 = vmul.f32 %v2737_v47, %v8319_v59  ;;  %v2743_v42 = vrot.slane %v2739_v23, 5  ;;  %v8365_v62 = vmul.f32 %v1958_v57, %v8319_v59 }
 0x4d0   : > { %v8367_v39 = vpop.f32.mrb[12].mxu0  ;;  %v2643_v24 = vsel %vm2514_vm6, %v2641_v2, %v2642_v58  ;;  %v2716_v56 = vrot.slane %v2712_v25, 5  ;;  %v2764_v35 = vmul.f32 %v2763_v20, %v8319_v59  ;;  %v2765_v46 = vmul.f32 %v8313_v31, %v2763_v20 }
 0x4d1   : > { %v8376_v40 = vpop.f32.mrb[13].mxu0  ;;  %v2669_v47 = vsel %vm2514_vm6, %v2667_v0, %v2668_v15  ;;  %v2742_v23 = vrot.slane %v2738_v43, 5  ;;  %v1997_v57 = vmul.f32 %v1996_v44, %v8319_v59  ;;  %v1998_v58 = vmul.f32 %v8313_v31, %v1996_v44 }
 0x4d2   : > { %2644 = vrot.lane.b32.xlu1 %v2643_v24, %s11989_s22  ;;  %1913 = vrot.lane.b32.xlu0 %v1911_v27, %s7244_s18  ;;  %v2718_v20 = vsel %vm2693_vm7, %v2716_v56, %v2717_v51  ;;  %v2768_v15 = vrot.slane %v2764_v35, 5  ;;  %v2769_v41 = vrot.slane %v2765_v46, 5  ;;  %v2790_v2 = vmul.f32 %v2789_v50, %v8319_v59 }
 0x4d3   : > { %v2744_v25 = vsel %vm2693_vm7, %v2742_v23, %v2743_v42  ;;  %v2001_v0 = vrot.slane %v1997_v57, 1  ;;  %v2002_v44 = vrot.slane %v1998_v58, 1  ;;  %v2791_v43 = vmul.f32 %v8313_v31, %v2789_v50 }
 0x4d4   : > { %v8396_v24 = vsel %vm2693_vm7, %v2768_v15, %v2769_v41  ;;  %v2794_v27 = vrot.slane %v2790_v2, 5  ;;  %v2023_v51 = vmul.f32 %v2022_v18, %v8319_v59  ;;  %v2024_v56 = vmul.f32 %v8313_v31, %v2022_v18  ;;  %v8404_v35 = vpop.f32.mrb[14].mxu0 }
 0x4d5   : > { %v8407_v42 = vsel %vm637_vm3, %v2001_v0, %v2002_v44  ;;  %v2795_v46 = vrot.slane %v2791_v43, 5  ;;  %v2816_v50 = vmul.f32 %v2815_v45, %v8319_v59  ;;  %v2817_v23 = vmul.f32 %v8313_v31, %v2815_v45  ;;  %v8415_v57 = vpop.f32.mrb[15].mxu0 }
 0x4d6   : > { %2670 = vrot.lane.b32.xlu1 %v2669_v47, %s7245_s15  ;;  %1929 = vrot.lane.b32.xlu0 %v1927_v38, %s11987_s5  ;;  %v2027_v18 = vrot.slane %v2023_v51, 1  ;;  %v2028_v58 = vrot.slane %v2024_v56, 1  ;;  %v2049_v15 = vmul.f32 %v2048_v1, %v8319_v59  ;;  %v2050_v41 = vmul.f32 %v8313_v31, %v2048_v1  ;;  %s12202_s5 = sld [smem:[#allocation82_spill]] }
 0x4d7   : > { %v8426_v45 = vsel %vm2693_vm7, %v2794_v27, %v2795_v46  ;;  %v2820_v2 = vrot.slane %v2816_v50, 5  ;;  %v2821_v0 = vrot.slane %v2817_v23, 5  ;;  %v2842_v47 = vmul.f32 %v2841_v6, %v8319_v59 }
 0x4d8   : > { %v8432_v38 = vsel %vm637_vm3, %v2027_v18, %v2028_v58  ;;  %v2053_v44 = vrot.slane %v2049_v15, 1  ;;  %v2054_v43 = vrot.slane %v2050_v41, 1  ;;  %v2843_v51 = vmul.f32 %v8313_v31, %v2841_v6  ;;  %v8437_v1 = vpop.f32.mrb[16].mxu0 }
 0x4d9   : > { %v8440_v27 = vsel %vm2693_vm7, %v2820_v2, %v2821_v0  ;;  %v2846_v56 = vrot.slane %v2842_v47, 5  ;;  %v2075_v46 = vmul.f32 %v2074_v21, %v8319_v59  ;;  %v2076_v50 = vmul.f32 %v8313_v31, %v2074_v21  ;;  %v8448_v23 = vpop.f32.mrb[17].mxu0 }
 0x4da   : > { %2719 = vrot.lane.b32.xlu1 %v2718_v20, %s7242_s12  ;;  %1945 = vrot.lane.b32.xlu0 %v1943_v49, %s11989_s22  ;;  %v8453_v6 = vsel %vm637_vm3, %v2053_v44, %v2054_v43  ;;  %v2847_v18 = vrot.slane %v2843_v51, 5  ;;  %v2101_v58 = vmul.f32 %v2100_v52, %v8319_v59  ;;  %v2102_v15 = vmul.f32 %v8313_v31, %v2100_v52  ;;  %s12204_s22 = sld [smem:[#allocation65_spill]] }
 0x4db   : > { %v2079_v41 = vrot.slane %v2075_v46, 1  ;;  %v2080_v21 = vrot.slane %v2076_v50, 1  ;;  %v8464_v20 = vmul.f32 %v1886_v30, %v8376_v40  ;;  %v2127_v49 = vmul.f32 %v2126_v53, %v8319_v59 }
 0x4dc   : > { %v8470_v2 = vsel %vm2693_vm7, %v2846_v56, %v2847_v18  ;;  %v2105_v0 = vrot.slane %v2101_v58, 1  ;;  %v2106_v47 = vrot.slane %v2102_v15, 1  ;;  %v2128_v52 = vmul.f32 %v8313_v31, %v2126_v53 }
 0x4dd   : > { %v8476_v44 = vsel %vm637_vm3, %v2079_v41, %v2080_v21  ;;  %v2131_v30 = vrot.slane %v2127_v49, 1  ;;  %v8481_v43 = vmul.f32 %v1902_v34, %v8376_v40  ;;  %v2175_v51 = vmul.f32 %v2174_v17, %v8319_v59 }
 0x4de   : > { %2745 = vrot.lane.b32.xlu1 %v2744_v25, %s7241_s27  ;;  %1961 = vrot.lane.b32.xlu0 %v8365_v62, %s7245_s15  ;;  %v8490_v53 = vsel %vm637_vm3, %v2105_v0, %v2106_v47  ;;  %v2132_v56 = vrot.slane %v2128_v52, 1  ;;  %v2176_v46 = vmul.f32 %v8313_v31, %v2174_v17  ;;  %v8498_v34 = vmul.f32 %v1918_v36, %v8376_v40 }
 0x4df   : > { %v2179_v50 = vrot.slane %v2175_v51, 2  ;;  %v2201_v25 = vmul.f32 %v2200_v54, %v8319_v59  ;;  %v2202_v18 = vmul.f32 %v8313_v31, %v2200_v54  ;;  %v8509_v62 = vmul.f32 %v1934_v10, %v8376_v40 }
 0x4e0   : > { %v8512_v58 = vsel %vm637_vm3, %v2131_v30, %v2132_v56  ;;  %v2180_v17 = vrot.slane %v2176_v46, 2  ;;  %v2227_v36 = vmul.f32 %v2226_v4, %v8319_v59  ;;  %v2228_v15 = vmul.f32 %v8313_v31, %v2226_v4 }
 0x4e1   : > { %v2205_v41 = vrot.slane %v2201_v25, 2  ;;  %v2206_v21 = vrot.slane %v2202_v18, 2  ;;  %v8523_v54 = vmul.f32 %v1950_v55, %v8376_v40  ;;  %v2253_v10 = vmul.f32 %v2252_v61, %v8319_v59 }
 0x4e2   : > { %2771 = vrot.lane.b32.xlu1 %v8396_v24, %s7244_s18  ;;  %2004 = vrot.lane.b32.xlu0 %v8407_v42, %s7242_s12  ;;  %v8533_v4 = vsel %vm715_vm4, %v2179_v50, %v2180_v17  ;;  %v2231_v49 = vrot.slane %v2227_v36, 2  ;;  %v2232_v55 = vrot.slane %v2228_v15, 2  ;;  %v2254_v0 = vmul.f32 %v8313_v31, %v2252_v61 }
 0x4e3   : > { %v8539_v47 = vsel %vm715_vm4, %v2205_v41, %v2206_v21  ;;  %v2257_v52 = vrot.slane %v2253_v10, 2  ;;  %v8544_v24 = vmul.f32 %v1966_v3, %v8376_v40  ;;  %v2279_v42 = vmul.f32 %v2278_v26, %v8319_v59 }
 0x4e4   : > { %v8550_v30 = vsel %vm715_vm4, %v2231_v49, %v2232_v55  ;;  %v2258_v51 = vrot.slane %v2254_v0, 2  ;;  %v2280_v61 = vmul.f32 %v8313_v31, %v2278_v26  ;;  %v2010_v56 = vmul.f32 %v2009_v5, %v8376_v40 }
 0x4e5   : > { %v2283_v46 = vrot.slane %v2279_v42, 2  ;;  %v2011_v3 = vmul.f32 %v8367_v39, %v2009_v5  ;;  %v2305_v50 = vmul.f32 %v2304_v12, %v8319_v59  ;;  %v2306_v25 = vmul.f32 %v8313_v31, %v2304_v12 }
 0x4e6   : > { %2797 = vrot.lane.b32.xlu1 %v8426_v45, %s12184_s19  ;;  %2030 = vrot.lane.b32.xlu0 %v8432_v38, %s7241_s27  ;;  %v8572_v26 = vsel %vm715_vm4, %v2257_v52, %v2258_v51  ;;  %v2284_v18 = vrot.slane %v2280_v61, 2  ;;  %v2014_v17 = vrot.slane %v2010_v56, 1  ;;  %v2036_v5 = vmul.f32 %v2035_v63, %v8376_v40 }
 0x4e7   : > { %v2015_v36 = vrot.slane %v2011_v3, 1  ;;  %v2309_v15 = vrot.slane %v2305_v50, 2  ;;  %v2310_v12 = vrot.slane %v2306_v25, 2  ;;  %v2037_v45 = vmul.f32 %v8367_v39, %v2035_v63 }
 0x4e8   : > { %v8581_v41 = vsel %vm715_vm4, %v2283_v46, %v2284_v18  ;;  %v2040_v38 = vrot.slane %v2036_v5, 1  ;;  %v2354_v21 = vmul.f32 %v2353_v29, %v8319_v59  ;;  %v2355_v10 = vmul.f32 %v8313_v31, %v2353_v29 }
 0x4e9   : > { %v8590_v49 = vsel %vm637_vm3, %v2014_v17, %v2015_v36  ;;  %v8593_v55 = vsel %vm715_vm4, %v2309_v15, %v2310_v12  ;;  %v2041_v63 = vrot.slane %v2037_v45, 1  ;;  %v2062_v0 = vmul.f32 %v2061_v8, %v8376_v40 }
 0x4ea   : > { %2823 = vrot.lane.b32.xlu1 %v8440_v27, %s12186_s14  ;;  %2056 = vrot.lane.b32.xlu0 %v8453_v6, %s7244_s18  ;;  %v2358_v29 = vrot.slane %v2354_v21, 3  ;;  %v2359_v52 = vrot.slane %v2355_v10, 3  ;;  %v2063_v42 = vmul.f32 %v8367_v39, %v2061_v8  ;;  %v2380_v51 = vmul.f32 %v2379_v60, %v8319_v59 }
 0x4eb   : > { %v8609_v61 = vsel %vm637_vm3, %v2040_v38, %v2041_v63  ;;  %v2066_v56 = vrot.slane %v2062_v0, 1  ;;  %v2381_v27 = vmul.f32 %v8313_v31, %v2379_v60  ;;  %v2088_v6 = vmul.f32 %v2087_v33, %v8376_v40 }
 0x4ec   : > { %v8618_v46 = vsel %vm2335_vm8, %v2358_v29, %v2359_v52  ;;  %v2067_v3 = vrot.slane %v2063_v42, 1  ;;  %v2384_v8 = vrot.slane %v2380_v51, 3  ;;  %v2089_v50 = vmul.f32 %v8367_v39, %v2087_v33 }
 0x4ed   : > { %v2385_v25 = vrot.slane %v2381_v27, 3  ;;  %v2092_v18 = vrot.slane %v2088_v6, 1  ;;  %v2406_v17 = vmul.f32 %v2405_v22, %v8319_v59  ;;  %v2407_v60 = vmul.f32 %v8313_v31, %v2405_v22 }
 0x4ee   : > { %2849 = vrot.lane.b32.xlu1 %v8470_v2, %s7245_s15  ;;  %2082 = vrot.lane.b32.xlu0 %v8476_v44, %s12184_s19  ;;  %v8634_v5 = vsel %vm637_vm3, %v2066_v56, %v2067_v3  ;;  %v2093_v33 = vrot.slane %v2089_v50, 1  ;;  %v2114_v36 = vmul.f32 %v2113_v11, %v8376_v40  ;;  %v2115_v15 = vmul.f32 %v8367_v39, %v2113_v11 }
 0x4ef   : > { %v8643_v22 = vsel %vm2335_vm8, %v2384_v8, %v2385_v25  ;;  %v2410_v2 = vrot.slane %v2406_v17, 3  ;;  %v2411_v12 = vrot.slane %v2407_v60, 3  ;;  %v2432_v44 = vmul.f32 %v2431_v13, %v8319_v59 }
 0x4f0   : > { %v8649_v45 = vsel %vm637_vm3, %v2092_v18, %v2093_v33  ;;  %v2118_v38 = vrot.slane %v2114_v36, 1  ;;  %v2119_v21 = vrot.slane %v2115_v15, 1  ;;  %v2433_v11 = vmul.f32 %v8313_v31, %v2431_v13 }
 0x4f1   : > { %v8655_v10 = vsel %vm2335_vm8, %v2410_v2, %v2411_v12  ;;  %v2436_v63 = vrot.slane %v2432_v44, 3  ;;  %v12192_v0 = vstv %s12189_s3  ;;  %v12195_v56 = vstv %s12190_s7  ;;  %s12233_s3 = sld [smem:[#allocation75_spill]]  ;;  %s8969_s7 = sld [smem:[#allocation7 + $0x90]] }
 0x4f2   : > { %v2140_v29 = vmul.f32 %v12192_v0, %v8376_v40  ;;  %v12194_v52 = vmov %v12192_v0  ;;  %2108 = vrot.lane.b32.xlu0 %v8490_v53, %s12186_s14  ;;  %1889 = vrot.lane.b32.xlu1 %v8464_v20, %s7242_s12  ;;  %v8668_v13 = vsel %vm637_vm3, %v2118_v38, %v2119_v21  ;;  %v2437_v51 = vrot.slane %v2433_v11, 3 }
 0x4f3   : > { %v2141_v42 = vmul.f32 %v8367_v39, %v12194_v52  ;;  %v2458_v27 = vmul.f32 %v12195_v56, %v8319_v59  ;;  %v12196_v6 = vmov %v12195_v56  ;;  %v12198_v25 = vstv %s12191_s1  ;;  %s8975_s1 = sld [smem:[#allocation7 + $0xa3]] }
 0x4f4   : > { %v2459_v3 = vmul.f32 %v8313_v31, %v12196_v6  ;;  %v2144_v8 = vrot.slane %v2140_v29, 1  ;;  %v2188_v53 = vmul.f32 %v12198_v25, %v8376_v40  ;;  %v12199_v18 = vmov %v12198_v25 }
 0x4f5   : > { %v2145_v50 = vrot.slane %v2141_v42, 1  ;;  %v2189_v20 = vmul.f32 %v8367_v39, %v12199_v18  ;;  %v8683_v17 = vsel %vm2335_vm8, %v2436_v63, %v2437_v51  ;;  %v2462_v60 = vrot.slane %v2458_v27, 3 }
 0x4f6   : > { %v2463_v33 = vrot.slane %v2459_v3, 3  ;;  %v12201_v36 = vstv %s12193_s0  ;;  %v2192_v12 = vrot.slane %v2188_v53, 2  ;;  %2134 = vrot.lane.b32.xlu0 %v8512_v58, %s7245_s15  ;;  %1905 = vrot.lane.b32.xlu1 %v8481_v43, %s7241_s27  ;;  %v12205_v0 = vstv %s12197_s29  ;;  %s8977_s0 = sld [smem:[#allocation7 + $0x92]] }
 0x4f7   : > { %v2484_v15 = vmul.f32 %v12201_v36, %v8319_v59  ;;  %v8689_v2 = vsel %vm637_vm3, %v2144_v8, %v2145_v50  ;;  %v2193_v44 = vrot.slane %v2189_v20, 2  ;;  %v12203_v38 = vmov %v12201_v36  ;;  %s8983_s29 = sld [smem:[#allocation7 + $0x8a]] }
 0x4f8   : > { %v2485_v21 = vmul.f32 %v8313_v31, %v12203_v38  ;;  %v8699_v11 = vsel %vm2335_vm8, %v2462_v60, %v2463_v33  ;;  %v2214_v29 = vmul.f32 %v12205_v0, %v8376_v40  ;;  %v12206_v52 = vmov %v12205_v0 }
 0x4f9   : > { %v2488_v63 = vrot.slane %v2484_v15, 3  ;;  %v2215_v42 = vmul.f32 %v8367_v39, %v12206_v52  ;;  %v8708_v51 = vsel %vm715_vm4, %v2192_v12, %v2193_v44  ;;  %v12207_v58 = vstv %s12200_s20  ;;  %s8999_s20 = sld [smem:[#allocation7 + $0xa5]] }
 0x4fa   : > { %v2489_v56 = vrot.slane %v2485_v21, 3  ;;  %v2533_v27 = vmul.f32 %v12207_v58, %v8319_v59  ;;  %v12208_v43 = vmov %v12207_v58  ;;  %v2218_v3 = vrot.slane %v2214_v29, 2  ;;  %2182 = vrot.lane.b32.xlu0 %v8533_v4, %s7242_s12  ;;  %1921 = vrot.lane.b32.xlu1 %v8498_v34, %s7244_s18 }
 0x4fb   : > { %v2534_v6 = vmul.f32 %v8313_v31, %v12208_v43  ;;  %v2219_v8 = vrot.slane %v2215_v42, 2  ;;  %v12210_v50 = vstv %s12202_s5  ;;  %v12213_v36 = vstv %s12204_s22  ;;  %s9017_s5 = sld [smem:[#allocation7 + $0x94]] }
 0x4fc   : > { %v2240_v25 = vmul.f32 %v12210_v50, %v8376_v40  ;;  %v12211_v53 = vmov %v12210_v50  ;;  %v8723_v20 = vsel %vm2335_vm8, %v2488_v63, %v2489_v56  ;;  %v2537_v60 = vrot.slane %v2533_v27, 4  ;;  %s12269_s22 = sld [smem:[#allocation73_spill]] }
 0x4fd   : > { %v2241_v18 = vmul.f32 %v8367_v39, %v12211_v53  ;;  %v2538_v33 = vrot.slane %v2534_v6, 4  ;;  %v2559_v15 = vmul.f32 %v12213_v36, %v8319_v59  ;;  %v8733_v12 = vsel %vm715_vm4, %v2218_v3, %v2219_v8 }
 0x4fe   : > { %v2244_v44 = vrot.slane %v2240_v25, 2  ;;  %v12214_v21 = vmov %v12213_v36  ;;  %v12215_v52 = vstv %s12209_s21  ;;  %v12218_v27 = vstv %s12212_s9  ;;  %2208 = vrot.lane.b32.xlu0 %v8539_v47, %s7241_s27  ;;  %1937 = vrot.lane.b32.xlu1 %v8509_v62, %s12184_s19  ;;  %s9039_s21 = sld [smem:[#allocation7 + $0xa7]]  ;;  %s9044_s9 = sld [smem:[#allocation7 + $0x96]] }
 0x4ff   : > { %v2245_v38 = vrot.slane %v2241_v18, 2  ;;  %v2560_v63 = vmul.f32 %v8313_v31, %v12214_v21  ;;  %v8739_v0 = vsel %vm2514_vm6, %v2537_v60, %v2538_v33  ;;  %v2563_v29 = vrot.slane %v2559_v15, 4 }
 0x500   : > { %v2266_v4 = vmul.f32 %v12215_v52, %v8376_v40  ;;  %v12217_v42 = vmov %v12215_v52  ;;  %v2585_v43 = vmul.f32 %v12218_v27, %v8319_v59  ;;  %v12219_v6 = vmov %v12218_v27 }
 0x501   : > { %v2267_v34 = vmul.f32 %v8367_v39, %v12217_v42  ;;  %v8748_v56 = vsel %vm715_vm4, %v2244_v44, %v2245_v38  ;;  %v2564_v58 = vrot.slane %v2560_v63, 4  ;;  %v2586_v3 = vmul.f32 %v8313_v31, %v12219_v6 }
 0x502   : > { %v2270_v8 = vrot.slane %v2266_v4, 2  ;;  %v12221_v25 = vstv %s8217_s11  ;;  %v2589_v36 = vrot.slane %v2585_v43, 4  ;;  %v12223_v44 = vstv %s12216_s16  ;;  %2234 = vrot.lane.b32.xlu0 %v8550_v30, %s7244_s18  ;;  %s12229_s11 = sld [smem:[#allocation88_spill]]  ;;  %1953 = vrot.lane.b32.xlu1 %v8523_v54, %s12186_s14  ;;  %s9061_s16 = sld [smem:[#allocation7 + $0xa9]] }
 0x503   : > { %v2271_v50 = vrot.slane %v2267_v34, 2  ;;  %v2292_v53 = vmul.f32 %v12221_v25, %v8376_v40  ;;  %v12222_v18 = vmov %v12221_v25  ;;  %v8767_v33 = vsel %vm2514_vm6, %v2563_v29, %v2564_v58 }
 0x504   : > { %v2293_v60 = vmul.f32 %v8367_v39, %v12222_v18  ;;  %v2590_v15 = vrot.slane %v2586_v3, 4  ;;  %v2611_v38 = vmul.f32 %v12223_v44, %v8319_v59  ;;  %v12224_v52 = vmov %v12223_v44 }
 0x505   : > { %v8773_v21 = vsel %vm715_vm4, %v2270_v8, %v2271_v50  ;;  %v2296_v63 = vrot.slane %v2292_v53, 2  ;;  %v2612_v4 = vmul.f32 %v8313_v31, %v12224_v52  ;;  %v12225_v42 = vstv %s12220_s28  ;;  %s9071_s28 = sld [smem:[#allocation7 + $0x98]] }
 0x506   : > { %v2297_v47 = vrot.slane %v2293_v60, 2  ;;  %v8779_v62 = vsel %vm2514_vm6, %v2589_v36, %v2590_v15  ;;  %v2615_v29 = vrot.slane %v2611_v38, 4  ;;  %v2318_v34 = vmul.f32 %v12225_v42, %v8376_v40  ;;  %2260 = vrot.lane.b32.xlu0 %v8572_v26, %s12184_s19  ;;  %1969 = vrot.lane.b32.xlu1 %v8544_v24, %s7245_s15 }
 0x507   : > { %v12226_v58 = vmov %v12225_v42  ;;  %v2616_v6 = vrot.slane %v2612_v4, 4  ;;  %v12227_v3 = vstv %s8225_s30  ;;  %v12230_v60 = vstv %s12145_s13  ;;  %s12232_s30 = sld [smem:[#allocation71_spill]] }
 0x508   : > { %v2319_v27 = vmul.f32 %v8367_v39, %v12226_v58  ;;  %v8788_v43 = vsel %vm715_vm4, %v2296_v63, %v2297_v47  ;;  %v2624_v8 = vmul.f32 %v12227_v3, %v8376_v40  ;;  %v12228_v50 = vmov %v12227_v3  ;;  %s8900_s13 = sld [smem:[#allocation7 + $0x82]] }
 0x509   : > { %v2625_v25 = vmul.f32 %v8367_v39, %v12228_v50  ;;  %v2322_v53 = vrot.slane %v2318_v34, 2  ;;  %v2367_v36 = vmul.f32 %v12230_v60, %v8376_v40  ;;  %v12231_v15 = vmov %v12230_v60 }
 0x50a   : > { %v2323_v18 = vrot.slane %v2319_v27, 2  ;;  %v2368_v44 = vmul.f32 %v8367_v39, %v12231_v15  ;;  %v8807_v38 = vsel %vm2514_vm6, %v2615_v29, %v2616_v6  ;;  %v2628_v63 = vrot.slane %v2624_v8, 4  ;;  %2286 = vrot.lane.b32.xlu0 %v8581_v41, %s12186_s14  ;;  %2017 = vrot.lane.b32.xlu1 %v8590_v49, %s7242_s12 }
 0x50b   : > { %v2629_v30 = vrot.slane %v2625_v25, 4  ;;  %v12234_v47 = vstv %s12146_s25  ;;  %v2371_v4 = vrot.slane %v2367_v36, 3  ;;  %v12236_v6 = vstv %s12229_s11  ;;  %s12255_s25 = sld [smem:[#allocation76_spill]]  ;;  %s9073_s11 = sld [smem:[#allocation7 + $0xad]] }
 0x50c   : > { %v2650_v52 = vmul.f32 %v12234_v47, %v8376_v40  ;;  %v8813_v54 = vsel %vm715_vm4, %v2322_v53, %v2323_v18  ;;  %v2372_v42 = vrot.slane %v2368_v44, 3  ;;  %v12235_v34 = vmov %v12234_v47 }
 0x50d   : > { %v2651_v58 = vmul.f32 %v8367_v39, %v12235_v34  ;;  %v8819_v29 = vsel %vm2514_vm6, %v2628_v63, %v2629_v30  ;;  %v2393_v3 = vmul.f32 %v12236_v6, %v8376_v40  ;;  %v12237_v8 = vmov %v12236_v6 }
 0x50e   : > { %v2654_v27 = vrot.slane %v2650_v52, 4  ;;  %v2394_v50 = vmul.f32 %v8367_v39, %v12237_v8  ;;  %v8832_v25 = vsel %vm2335_vm8, %v2371_v4, %v2372_v42  ;;  %v12238_v18 = vstv %s12232_s30  ;;  %2312 = vrot.lane.b32.xlu0 %v8593_v55, %s7245_s15  ;;  %2043 = vrot.lane.b32.xlu1 %v8609_v61, %s7241_s27  ;;  %s9091_s30 = sld [smem:[#allocation7 + $0xf]] }
 0x50f   : > { %v2655_v53 = vrot.slane %v2651_v58, 4  ;;  %v1871_v60 = vmul.f32 %v12238_v18, %v8319_v59  ;;  %v12239_v36 = vstv %s12233_s3  ;;  %v2397_v44 = vrot.slane %v2393_v3, 3  ;;  %s9093_s3 = sld [smem:[#allocation7 + $0x9e]] }
 0x510   : > { %v1875_v15 = vmul.f32 %v12239_v36, %v8376_v40  ;;  %v2398_v63 = vrot.slane %v2394_v50, 3  ;;  %v12240_v30 = vstv %s8241_s24  ;;  %v12242_v42 = vstv %s12148_s4  ;;  %s8892_s4 = sld [smem:[#allocation7 + $0x49]]  ;;  %s12257_s24 = sld [smem:[#allocation77_spill]] }
 0x511   : > { %v2676_v26 = vmul.f32 %v12240_v30, %v8376_v40  ;;  %v12241_v47 = vmov %v12240_v30  ;;  %v8847_v52 = vsel %vm2514_vm6, %v2654_v27, %v2655_v53  ;;  %v2419_v34 = vmul.f32 %v12242_v42, %v8376_v40  ;;  %v8873_v30 = vpop.f32.mrb[18].mxu0 }
 0x512   : > { %v2677_v24 = vmul.f32 %v8367_v39, %v12241_v47  ;;  %v8849_v4 = vadd.f32 %v1875_v15, %v1871_v60  ;;  %v12243_v58 = vmov %v12242_v42  ;;  %v8858_v3 = vsel %vm2335_vm8, %v2397_v44, %v2398_v63  ;;  %2361 = vrot.lane.b32.xlu0 %v8618_v46, %s7242_s12  ;;  %2069 = vrot.lane.b32.xlu1 %v8634_v5, %s7244_s18 }
 0x513   : > { %v2420_v6 = vmul.f32 %v8367_v39, %v12243_v58  ;;  %v2680_v8 = vrot.slane %v2676_v26, 4  ;;  %v12244_v18 = vstv %s8249_s17  ;;  %v2423_v27 = vrot.slane %v2419_v34, 3  ;;  %v8884_v34 = vpop.f32.mrb[19].mxu0  ;;  %s12265_s17 = sld [smem:[#allocation78_spill]] }
 0x514   : > { %v2681_v50 = vrot.slane %v2677_v24, 4  ;;  %v2751_v36 = vmul.f32 %v12244_v18, %v8376_v40  ;;  %v12245_v60 = vmov %v12244_v18  ;;  %v12246_v44 = vstv %s12149_s26  ;;  %s8933_s26 = sld [smem:[#allocation7 + $0x8c]] }
 0x515   : > { %v2424_v53 = vrot.slane %v2420_v6, 3  ;;  %v2752_v15 = vmul.f32 %v8367_v39, %v12245_v60  ;;  %v2445_v63 = vmul.f32 %v12246_v44, %v8376_v40  ;;  %v12247_v41 = vmov %v12246_v44 }
 0x516   : > { %v8876_v26 = vsel %vm2514_vm6, %v2680_v8, %v2681_v50  ;;  %v2755_v47 = vrot.slane %v2751_v36, 5  ;;  %v2446_v24 = vmul.f32 %v8367_v39, %v12247_v41  ;;  %v12248_v49 = vstv %s8257_s2  ;;  %s8915_s2 = sld [smem:[#allocation7 + $0x84]]  ;;  %2387 = vrot.lane.b32.xlu0 %v8643_v22, %s7241_s27  ;;  %2095 = vrot.lane.b32.xlu1 %v8649_v45, %s12184_s19 }
 0x517   : > { %v2777_v42 = vmul.f32 %v12248_v49, %v8376_v40  ;;  %v8887_v58 = vsel %vm2335_vm8, %v2423_v27, %v2424_v53  ;;  %v2756_v6 = vrot.slane %v2752_v15, 5  ;;  %v2449_v18 = vrot.slane %v2445_v63, 3 }
 0x518   : > { %v12249_v60 = vmov %v12248_v49  ;;  %v2450_v50 = vrot.slane %v2446_v24, 3  ;;  %v12250_v44 = vstv %s8259_s23  ;;  %v12252_v15 = vstv %s8265_s6  ;;  %s8923_s23 = sld [smem:[#allocation7 + $0x2a]]  ;;  %s8931_s6 = sld [smem:[#allocation7 + $0x86]] }
 0x519   : > { %v2778_v8 = vmul.f32 %v8367_v39, %v12249_v60  ;;  %v2781_v36 = vrot.slane %v2777_v42, 5  ;;  %v2471_v41 = vmul.f32 %v12250_v44, %v8376_v40  ;;  %v12251_v49 = vmov %v12250_v44 }
 0x51a   : > { %v2472_v28 = vmul.f32 %v8367_v39, %v12251_v49  ;;  %v8907_v27 = vsel %vm2693_vm7, %v2755_v47, %v2756_v6  ;;  %v2803_v63 = vmul.f32 %v12252_v15, %v8376_v40  ;;  %v12253_v24 = vmov %v12252_v15  ;;  %2413 = vrot.lane.b32.xlu0 %v8655_v10, %s7244_s18 }
 0x51b   : > { %v2782_v53 = vrot.slane %v2778_v8, 5  ;;  %v2804_v42 = vmul.f32 %v8367_v39, %v12253_v24  ;;  %v8918_v60 = vsel %vm2335_vm8, %v2449_v18, %v2450_v50  ;;  %v2475_v55 = vrot.slane %v2471_v41, 3  ;;  %2121 = vrot.lane.b32.xlu1 %v8668_v13, %s12186_s14 }
 0x51c   : > { %v2476_v44 = vrot.slane %v2472_v28, 3  ;;  %v12254_v61 = vstv %s12150_s8  ;;  %v2807_v8 = vrot.slane %v2803_v63, 5  ;;  %v12258_v50 = vstv %s8273_s10  ;;  %v8944_v63 = vpop.f32.mrb[20].mxu0  ;;  %s8959_s10 = sld [smem:[#allocation7 + $0x9a]]  ;;  %s8967_s8 = sld [smem:[#allocation7 + $0x88]] }
 0x51d   : > { %v2497_v47 = vmul.f32 %v12254_v61, %v8376_v40  ;;  %v8926_v6 = vsel %vm2693_vm7, %v2781_v36, %v2782_v53  ;;  %v2808_v49 = vrot.slane %v2804_v42, 5  ;;  %v12256_v15 = vmov %v12254_v61  ;;  %12260 = vst [vmem:[#allocation93_spill] sm:$0xff] %v8944_v63  ;;  %v9006_v45 = vpop.f32.mrb[21].mxu0 }
 0x51e   : > { %v2498_v24 = vmul.f32 %v8367_v39, %v12256_v15  ;;  %v8936_v28 = vsel %vm2335_vm8, %v2475_v55, %v2476_v44  ;;  %v2829_v36 = vmul.f32 %v12258_v50, %v8376_v40  ;;  %v12259_v41 = vmov %v12258_v50  ;;  %12268 = vst [vmem:[#allocation94_spill] sm:$0xff] %v9006_v45 }
 0x51f   : > { %v2501_v18 = vrot.slane %v2497_v47, 3  ;;  %v2830_v53 = vmul.f32 %v8367_v39, %v12259_v41  ;;  %v8951_v42 = vsel %vm2693_vm7, %v2807_v8, %v2808_v49  ;;  %v12261_v44 = vstv %s12255_s25  ;;  %2439 = vrot.lane.b32.xlu0 %v8683_v17, %s12184_s19  ;;  %2147 = vrot.lane.b32.xlu1 %v8689_v2, %s7245_s15  ;;  %s9144_s25 = sld [smem:[#allocation7 + $0xa2]] }
 0x520   : > { %v2502_v55 = vrot.slane %v2498_v24, 3  ;;  %v2546_v61 = vmul.f32 %v12261_v44, %v8376_v40  ;;  %v12262_v47 = vmov %v12261_v44  ;;  %v2833_v50 = vrot.slane %v2829_v36, 5 }
 0x521   : > { %v2547_v15 = vmul.f32 %v8367_v39, %v12262_v47  ;;  %v2834_v41 = vrot.slane %v2830_v53, 5  ;;  %v12263_v46 = vstv %s12257_s24  ;;  %v2724_v36 = vstv %s8892_s4  ;;  %s9111_s4 = sld [smem:[#allocation7 + $0xaf]]  ;;  %s9163_s24 = sld [smem:[#allocation7 + $0xa4]] }
 0x522   : > { %v2572_v32 = vmul.f32 %v12263_v46, %v8376_v40  ;;  %v12264_v19 = vmov %v12263_v46  ;;  %v8972_v8 = vsel %vm2335_vm8, %v2501_v18, %v2502_v55  ;;  %v2550_v49 = vrot.slane %v2546_v61, 4 }
 0x523   : > { %v2573_v5 = vmul.f32 %v8367_v39, %v12264_v19  ;;  %v2551_v24 = vrot.slane %v2547_v15, 4  ;;  %v8980_v53 = vsel %vm2693_vm7, %v2833_v50, %v2834_v41  ;;  %v3362_v47 = vstv %s8900_s13  ;;  %2465 = vrot.lane.b32.xlu0 %v8699_v11, %s12186_s14  ;;  %2195 = vrot.lane.b32.xlu1 %v8708_v51, %s7242_s12  ;;  %s9122_s13 = sld [smem:[#allocation7 + $0xa0]] }
 0x524   : > { %v2576_v19 = vrot.slane %v2572_v32, 4  ;;  %v12266_v55 = vstv %s12265_s17  ;;  %v3378_v50 = vstv %s8915_s2  ;;  %v2725_v22 = vmul.f32 %v2724_v36, %v8376_v40  ;;  %s9124_s2 = sld [smem:[#allocation7 + $0xb1]]  ;;  %s9192_s17 = sld [smem:[#allocation7 + $0x104]] }
 0x525   : > { %v2577_v44 = vrot.slane %v2573_v5, 4  ;;  %v8990_v18 = vsel %vm2514_vm6, %v2550_v49, %v2551_v24  ;;  %v2598_v61 = vmul.f32 %v12266_v55, %v8376_v40  ;;  %v12267_v15 = vmov %v12266_v55 }
 0x526   : > { %v2599_v32 = vmul.f32 %v8367_v39, %v12267_v15  ;;  %v2726_v46 = vmul.f32 %v8367_v39, %v2724_v36  ;;  %v3394_v55 = vstv %s8931_s6  ;;  %v3442_v37 = vstv %s8933_s26  ;;  %s9146_s6 = sld [smem:[#allocation7 + $0xb3]]  ;;  %s9165_s26 = sld [smem:[#allocation7 + $0x102]] }
 0x527   : > { %v9002_v41 = vsel %vm2514_vm6, %v2576_v19, %v2577_v44  ;;  %v2602_v49 = vrot.slane %v2598_v61, 4  ;;  %v9012_v15 = vmul.f32 %v3362_v47, %v8415_v57  ;;  %v9015_v19 = vmul.f32 %v3378_v50, %v8415_v57  ;;  %2491 = vrot.lane.b32.xlu0 %v8723_v20, %s7245_s15  ;;  %2221 = vrot.lane.b32.xlu1 %v8733_v12, %s7241_s27 }
 0x528   : > { %v2603_v24 = vrot.slane %v2599_v32, 4  ;;  %v2729_v44 = vrot.slane %v2725_v22, 5  ;;  %v2730_v36 = vrot.slane %v2726_v46, 5  ;;  %v9027_v61 = vmul.f32 %v3394_v55, %v8415_v57 }
 0x529   : > { %v9030_v32 = vmul.f32 %v3442_v37, %v8415_v57  ;;  %v3610_v50 = vstv %s8959_s10  ;;  %v3480_v13 = vstv %s8969_s7  ;;  %v12271_v37 = vstv %s12269_s22  ;;  %s9174_s10 = sld [smem:[#allocation7 + $0xa6]]  ;;  %s9194_s7 = sld [smem:[#allocation7 + $0xa8]] }
 0x52a   : > { %v9024_v47 = vsel %vm2514_vm6, %v2602_v49, %v2603_v24  ;;  %v9034_v22 = vsel %vm2693_vm7, %v2729_v44, %v2730_v36  ;;  %v3611_v10 = vmul.f32 %v3610_v50, %v8415_v57  ;;  %v3612_v5 = vmul.f32 %v8404_v35, %v3610_v50 }
 0x52b   : > { %12270 = vst [vmem:[#allocation95_spill] sm:$0xff] %v9030_v32  ;;  %v3723_v49 = vstv %s8975_s1  ;;  %v3506_v24 = vstv %s8977_s0  ;;  %v9049_v55 = vmul.f32 %v12271_v37, %v8319_v59  ;;  %v3481_v46 = vmul.f32 %v3480_v13, %v8415_v57  ;;  %2540 = vrot.lane.b32.xlu0 %v8739_v0, %s7242_s12  ;;  %2247 = vrot.lane.b32.xlu1 %v8748_v56, %s7244_s18  ;;  %s9206_s1 = sld [smem:[#allocation7 + $0x106]]  ;;  %s9208_s0 = sld [smem:[#allocation7 + $0x1d]] }
 0x52c   : > { %v3615_v48 = vrot.slane %v3611_v10, 1  ;;  %v3616_v44 = vrot.slane %v3612_v5, 1  ;;  %v3482_v50 = vmul.f32 %v8404_v35, %v3480_v13  ;;  %v3724_v7 = vmul.f32 %v3723_v49, %v8448_v23 }
 0x52d   : > { %v3725_v16 = vmul.f32 %v8437_v1, %v3723_v49  ;;  %v3749_v37 = vstv %s8999_s20  ;;  %v3485_v10 = vrot.slane %v3481_v46, 1  ;;  %v3507_v36 = vmul.f32 %v3506_v24, %v8415_v57  ;;  %s9219_s20 = sld [smem:[#allocation7 + $0xac]] }
 0x52e   : > { %v9064_v5 = vsel %vm637_vm3, %v3615_v48, %v3616_v44  ;;  %v3508_v17 = vmul.f32 %v8404_v35, %v3506_v24  ;;  %v3486_v9 = vrot.slane %v3482_v50, 1  ;;  %v3728_v2 = vrot.slane %v3724_v7, 2 }
 0x52f   : > { %v3729_v14 = vrot.slane %v3725_v16, 2  ;;  %v3750_v13 = vmul.f32 %v3749_v37, %v8448_v23  ;;  %v3511_v63 = vrot.slane %v3507_v36, 1  ;;  %v3751_v49 = vmul.f32 %v8437_v1, %v3749_v37  ;;  %2566 = vrot.lane.b32.xlu0 %v8767_v33, %s7241_s27  ;;  %2273 = vrot.lane.b32.xlu1 %v8773_v21, %s12184_s19 }
 0x530   : > { %v3512_v45 = vrot.slane %v3508_v17, 1  ;;  %v3532_v32 = vstv %s9017_s5  ;;  %v9080_v16 = vsel %vm637_vm3, %v3485_v10, %v3486_v9  ;;  %v3775_v11 = vstv %s9039_s21  ;;  %s12275_s5 = sld [smem:[#allocation84_spill]]  ;;  %s9267_s21 = sld [smem:[#allocation7 + $0x10a]] }
 0x531   : > { %v9083_v7 = vsel %vm715_vm4, %v3728_v2, %v3729_v14  ;;  %v3754_v48 = vrot.slane %v3750_v13, 2  ;;  %v3533_v46 = vmul.f32 %v3532_v32, %v8415_v57  ;;  %v3755_v44 = vrot.slane %v3751_v49, 2 }
 0x532   : > { %v9087_v24 = vsel %vm637_vm3, %v3511_v63, %v3512_v45  ;;  %v3534_v36 = vmul.f32 %v8404_v35, %v3532_v32  ;;  %v3776_v14 = vmul.f32 %v3775_v11, %v8448_v23  ;;  %v3777_v51 = vmul.f32 %v8437_v1, %v3775_v11 }
 0x533   : > { %v3537_v9 = vrot.slane %v3533_v46, 1  ;;  %v3558_v50 = vstv %s9044_s9  ;;  %v9099_v37 = vsel %vm715_vm4, %v3754_v48, %v3755_v44  ;;  %v3801_v2 = vstv %s9061_s16  ;;  %2592 = vrot.lane.b32.xlu0 %v8779_v62, %s7244_s18  ;;  %2299 = vrot.lane.b32.xlu1 %v8788_v43, %s12186_s14  ;;  %s9272_s9 = sld [smem:[#allocation7 + $0x10c]]  ;;  %s9274_s16 = sld [smem:[#allocation7 + $0xb2]] }
 0x534   : > { %v3538_v63 = vrot.slane %v3534_v36, 1  ;;  %v3559_v45 = vmul.f32 %v3558_v50, %v8415_v57  ;;  %v3560_v32 = vmul.f32 %v8404_v35, %v3558_v50  ;;  %v3780_v10 = vrot.slane %v3776_v14, 2 }
 0x535   : > { %v3781_v17 = vrot.slane %v3777_v51, 2  ;;  %v12272_v13 = vstv %s12269_s22  ;;  %v3802_v20 = vmul.f32 %v3801_v2, %v8448_v23  ;;  %v3803_v12 = vmul.f32 %v8437_v1, %v3801_v2  ;;  %s9222_s22 = sld [smem:[#allocation7 + $0x108]] }
 0x536   : > { %v1976_v49 = vmul.f32 %v8313_v31, %v12272_v13  ;;  %v9114_v48 = vsel %vm637_vm3, %v3537_v9, %v3538_v63  ;;  %v3563_v46 = vrot.slane %v3559_v45, 1  ;;  %v3564_v44 = vrot.slane %v3560_v32, 1 }
 0x537   : > { %v9118_v36 = vsel %vm715_vm4, %v3780_v10, %v3781_v17  ;;  %v1979_v11 = vrot.slane %v9049_v55, 1  ;;  %v3806_v51 = vrot.slane %v3802_v20, 2  ;;  %v3584_v50 = vstv %s9071_s28  ;;  %2618 = vrot.lane.b32.xlu0 %v8807_v38, %s12184_s19  ;;  %2325 = vrot.lane.b32.xlu1 %v8813_v54, %s7245_s15  ;;  %s9285_s28 = sld [smem:[#allocation7 + $0x110]] }
 0x538   : > { %v1980_v14 = vrot.slane %v1976_v49, 1  ;;  %v9127_v9 = vsel %vm637_vm3, %v3563_v46, %v3564_v44  ;;  %v3849_v63 = vstv %s9073_s11  ;;  %v3807_v55 = vrot.slane %v3803_v12, 2  ;;  %s9296_s11 = sld [smem:[#allocation7 + $0x112]] }
 0x539   : > { %v3585_v32 = vmul.f32 %v3584_v50, %v8415_v57  ;;  %v3586_v10 = vmul.f32 %v8404_v35, %v3584_v50  ;;  %v3850_v17 = vmul.f32 %v3849_v63, %v8448_v23  ;;  %v3851_v2 = vmul.f32 %v8437_v1, %v3849_v63 }
 0x53a   : > { %v9136_v45 = vsel %vm637_vm3, %v1979_v11, %v1980_v14  ;;  %v1985_v13 = vstv %s9091_s30  ;;  %v3658_v49 = vstv %s9093_s3  ;;  %v9149_v0 = vsel %vm715_vm4, %v3806_v51, %v3807_v55  ;;  %s9324_s30 = sld [smem:[#allocation7 + $0x83]]  ;;  %s9335_s3 = sld [smem:[#allocation7 + $0x114]] }
 0x53b   : > { %v3589_v56 = vrot.slane %v3585_v32, 1  ;;  %v3590_v46 = vrot.slane %v3586_v10, 1  ;;  %v1986_v44 = vmul.f32 %v1985_v13, %v8376_v40  ;;  %v3854_v20 = vrot.slane %v3850_v17, 3  ;;  %2631 = vrot.lane.b32.xlu0 %v8819_v29, %s12184_s19  ;;  %2374 = vrot.lane.b32.xlu1 %v8832_v25, %s7242_s12 }
 0x53c   : > { %v3855_v12 = vrot.slane %v3851_v2, 3  ;;  %v1987_v11 = vmul.f32 %v8367_v39, %v1985_v13  ;;  %v3659_v14 = vmul.f32 %v3658_v49, %v8415_v57  ;;  %v3660_v63 = vmul.f32 %v8404_v35, %v3658_v49 }
 0x53d   : > { %v9159_v51 = vsel %vm637_vm3, %v3589_v56, %v3590_v46  ;;  %v1990_v50 = vrot.slane %v1986_v44, 1  ;;  %v3875_v55 = vstv %s9111_s4  ;;  %v3684_v13 = vstv %s9122_s13  ;;  %s9337_s4 = sld [smem:[#allocation7 + $0x2b]]  ;;  %s9349_s13 = sld [smem:[#allocation7 + $0x38]] }
 0x53e   : > { %v9168_v32 = vsel %vm2335_vm8, %v3854_v20, %v3855_v12  ;;  %v1991_v10 = vrot.slane %v1987_v11, 1  ;;  %v3663_v17 = vrot.slane %v3659_v14, 2  ;;  %v3876_v33 = vmul.f32 %v3875_v55, %v8448_v23 }
 0x53f   : > { %v3664_v2 = vrot.slane %v3660_v63, 2  ;;  %v3877_v21 = vmul.f32 %v8437_v1, %v3875_v55  ;;  %v3901_v56 = vstv %s9124_s2  ;;  %v3685_v44 = vmul.f32 %v3684_v13, %v8415_v57  ;;  %2657 = vrot.lane.b32.xlu0 %v8847_v52, %s12186_s14  ;;  %2400 = vrot.lane.b32.xlu1 %v8858_v3, %s7241_s27  ;;  %s9356_s2 = sld [smem:[#allocation7 + $0x85]] }
 0x540   : > { %v9177_v49 = vsel %vm637_vm3, %v1990_v50, %v1991_v10  ;;  %v3880_v46 = vrot.slane %v3876_v33, 3  ;;  %v3686_v20 = vmul.f32 %v8404_v35, %v3684_v13  ;;  %v3902_v14 = vmul.f32 %v3901_v56, %v8448_v23  ;;  %v1882_v3 = vpop.permute.xlu0 %1881 }
 0x541   : > { %v9186_v12 = vsel %vm715_vm4, %v3663_v17, %v3664_v2  ;;  %v3881_v11 = vrot.slane %v3877_v21, 3  ;;  %v3903_v50 = vmul.f32 %v8437_v1, %v3901_v56  ;;  %v3689_v63 = vrot.slane %v3685_v44, 2 }
 0x542   : > { %v3690_v55 = vrot.slane %v3686_v20, 2  ;;  %v3710_v10 = vstv %s9144_s25  ;;  %v3927_v33 = vstv %s9146_s6  ;;  %v3906_v43 = vrot.slane %v3902_v14, 3  ;;  %s9366_s25 = sld [smem:[#allocation7 + $0x116]]  ;;  %s9374_s6 = sld [smem:[#allocation7 + $0x87]] }
 0x543   : > { %v9197_v62 = vsel %vm2335_vm8, %v3880_v46, %v3881_v11  ;;  %v3907_v17 = vrot.slane %v3903_v50, 3  ;;  %v3711_v2 = vmul.f32 %v3710_v10, %v8415_v57  ;;  %v3712_v13 = vmul.f32 %v8404_v35, %v3710_v10  ;;  %2683 = vrot.lane.b32.xlu0 %v8876_v26, %s7245_s15  ;;  %2426 = vrot.lane.b32.xlu1 %v8887_v58, %s7244_s18 }
 0x544   : > { %v9201_v21 = vsel %vm715_vm4, %v3689_v63, %v3690_v55  ;;  %v3928_v56 = vmul.f32 %v3927_v33, %v8448_v23  ;;  %v3929_v44 = vmul.f32 %v8437_v1, %v3927_v33  ;;  %v3736_v11 = vstv %s9163_s24  ;;  %s9385_s24 = sld [smem:[#allocation7 + $0x89]] }
 0x545   : > { %12273 = vst [vmem:[#allocation96_spill] sm:$0xff] %v9201_v21  ;;  %v9215_v46 = vsel %vm2335_vm8, %v3906_v43, %v3907_v17  ;;  %v3715_v20 = vrot.slane %v3711_v2, 2  ;;  %v4867_v14 = vstv %s9165_s26  ;;  %v3716_v50 = vrot.slane %v3712_v13, 2  ;;  %s9387_s26 = sld [smem:[#allocation7 + $0x118]] }
 0x546   : > { %12274 = vst [vmem:[#allocation97_spill] sm:$0xff] %v9215_v46  ;;  %v3932_v63 = vrot.slane %v3928_v56, 3  ;;  %v3933_v55 = vrot.slane %v3929_v44, 3  ;;  %v3737_v10 = vmul.f32 %v3736_v11, %v8415_v57  ;;  %v12276_v38 = vstv %s8967_s8  ;;  %s9243_s8 = sld [smem:[#allocation7 + $0xae]] }
 0x547   : > { %v9227_v33 = vmul.f32 %v12276_v38, %v8415_v57  ;;  %v12277_v54 = vstv %s8983_s29  ;;  %v3738_v17 = vmul.f32 %v8404_v35, %v3736_v11  ;;  %v3762_v2 = vstv %s9174_s10  ;;  %s9261_s29 = sld [smem:[#allocation7 + $0xb0]]  ;;  %2758 = vrot.lane.b32.xlu0 %v8907_v27, %s7241_s27  ;;  %2452 = vrot.lane.b32.xlu1 %v8918_v60, %s12184_s19  ;;  %s9399_s10 = sld [smem:[#allocation7 + $0x8b]] }
 0x548   : > { %v9232_v43 = vmul.f32 %v12277_v54, %v8415_v57  ;;  %v9237_v13 = vsel %vm715_vm4, %v3715_v20, %v3716_v50  ;;  %v9240_v56 = vsel %vm2335_vm8, %v3932_v63, %v3933_v55  ;;  %v3741_v44 = vrot.slane %v3737_v10, 2 }
 0x549   : > { %12278 = vst [vmem:[#allocation98_spill] sm:$0xff] %v9237_v13  ;;  %12279 = vst [vmem:[#allocation99_spill] sm:$0xff] %v9240_v56  ;;  %v3763_v38 = vmul.f32 %v3762_v2, %v8415_v57  ;;  %v3742_v11 = vrot.slane %v3738_v17, 2  ;;  %v9250_v54 = vmul.f32 %v4867_v14, %v8884_v34  ;;  %v3764_v20 = vmul.f32 %v8404_v35, %v3762_v2 }
 0x54a   : > { %v12281_v50 = vstv %s12275_s5  ;;  %v4883_v10 = vstv %s9192_s17  ;;  %v3788_v29 = vstv %s9194_s7  ;;  %v2163_v46 = vstv %s9208_s0  ;;  %s9407_s17 = sld [smem:[#allocation7 + $0x11a]]  ;;  %s9409_s7 = sld [smem:[#allocation7 + $0x11e]] }
 0x54b   : > { %12280 = vst [vmem:[#allocation100_spill] sm:$0xff] %v9250_v54  ;;  %v2153_v63 = vmul.f32 %v12281_v50, %v8319_v59  ;;  %v3767_v55 = vrot.slane %v3763_v38, 2  ;;  %v12282_v56 = vmov %v12281_v50  ;;  %v9264_v25 = vsel %vm715_vm4, %v3741_v44, %v3742_v11  ;;  %2784 = vrot.lane.b32.xlu0 %v8926_v6, %s7244_s18  ;;  %2478 = vrot.lane.b32.xlu1 %v8936_v28, %s12186_s14  ;;  %s9439_s0 = sld [smem:[#allocation7 + $0x120]]  ;;  %s9473_s5 = sld [smem:[#allocation7 + $0x39]] }
 0x54c   : > { %v2154_v13 = vmul.f32 %v8313_v31, %v12282_v56  ;;  %12283 = vst [vmem:[#allocation101_spill] sm:$0xff] %v9264_v25  ;;  %v3768_v17 = vrot.slane %v3764_v20, 2  ;;  %v3789_v54 = vmul.f32 %v3788_v29, %v8415_v57  ;;  %v3790_v38 = vmul.f32 %v8404_v35, %v3788_v29  ;;  %v9292_v25 = vpop.permute.xlu1 %1897 }
 0x54d   : > { %v2157_v14 = vrot.slane %v2153_v63, 2  ;;  %v4899_v50 = vstv %s9206_s1  ;;  %v2165_v11 = vmul.f32 %v8367_v39, %v2163_v46  ;;  %v3836_v29 = vstv %s9219_s20  ;;  %s9424_s1 = sld [smem:[#allocation7 + $0x91]]  ;;  %s9461_s20 = sld [smem:[#allocation7 + $0x93]] }
 0x54e   : > { %v2158_v2 = vrot.slane %v2154_v13, 2  ;;  %v9281_v56 = vsel %vm715_vm4, %v3767_v55, %v3768_v17  ;;  %v3793_v44 = vrot.slane %v3789_v54, 2  ;;  %v2164_v13 = vmul.f32 %v2163_v46, %v8376_v40 }
 0x54f   : > { %v3794_v63 = vrot.slane %v3790_v38, 2  ;;  %v4915_v52 = vstv %s9222_s22  ;;  %v2169_v55 = vrot.slane %v2165_v11, 2  ;;  %v3837_v54 = vmul.f32 %v3836_v29, %v8415_v57  ;;  %2810 = vrot.lane.b32.xlu0 %v8951_v42, %s12184_s19  ;;  %2504 = vrot.lane.b32.xlu1 %v8972_v8, %s7245_s15  ;;  %s9479_s22 = sld [smem:[#allocation7 + $0x122]] }
 0x550   : > { %v9288_v20 = vsel %vm715_vm4, %v2157_v14, %v2158_v2  ;;  %v2168_v21 = vrot.slane %v2164_v13, 2  ;;  %v3838_v17 = vmul.f32 %v8404_v35, %v3836_v29  ;;  %v9299_v46 = vmul.f32 %v4883_v10, %v8884_v34  ;;  %v9326_v58 = vpop.permute.xlu1 %2644 }
 0x551   : > { %12284 = vst [vmem:[#allocation102_spill] sm:$0xff] %v9288_v20  ;;  %v9302_v14 = vsel %vm715_vm4, %v3793_v44, %v3794_v63  ;;  %v9305_v2 = vmul.f32 %v4899_v50, %v8884_v34  ;;  %v3862_v38 = vstv %s9243_s8  ;;  %v3841_v11 = vrot.slane %v3837_v54, 3  ;;  %12288 = vst [vmem:[#allocation106_spill] sm:$0xff] %v9326_v58  ;;  %s9481_s8 = sld [smem:[#allocation7 + $0x95]] }
 0x552   : > { %v9313_v13 = vsel %vm715_vm4, %v2168_v21, %v2169_v55  ;;  %v3842_v10 = vrot.slane %v3838_v17, 3  ;;  %v3863_v29 = vmul.f32 %v3862_v38, %v8415_v57  ;;  %v9317_v44 = vadd.f32 %v1882_v3, %v8849_v4  ;;  %v9328_v21 = vpop.permute.xlu0 %1913 }
 0x553   : > { %12285 = vst [vmem:[#allocation103_spill] sm:$0xff] %v9305_v2  ;;  %12286 = vst [vmem:[#allocation104_spill] sm:$0xff] %v9313_v13  ;;  %v9320_v50 = vmul.f32 %v4915_v52, %v8884_v34  ;;  %v3864_v26 = vmul.f32 %v8404_v35, %v3862_v38  ;;  %v3888_v63 = vstv %s9261_s29  ;;  %v4931_v4 = vstv %s9267_s21  ;;  %2836 = vrot.lane.b32.xlu0 %v8980_v53, %s12186_s14  ;;  %s9502_s29 = sld [smem:[#allocation7 + $0x124]]  ;;  %s9516_s21 = sld [smem:[#allocation7 + $0x80]] }
 0x554   : > { %v9331_v55 = vsel %vm2335_vm8, %v3841_v11, %v3842_v10  ;;  %v3867_v54 = vrot.slane %v3863_v29, 3  ;;  %v3889_v3 = vmul.f32 %v3888_v63, %v8415_v57  ;;  %v3890_v17 = vmul.f32 %v8404_v35, %v3888_v63  ;;  %v9358_v60 = vpop.permute.xlu1 %2670  ;;  %2553 = vrot.lane.b32.xlu1 %v8990_v18, %s7242_s12 }
 0x555   : > { %12287 = vst [vmem:[#allocation105_spill] sm:$0xff] %v9320_v50  ;;  %12289 = vst [vmem:[#allocation107_spill] sm:$0xff] %v9331_v55  ;;  %v3868_v52 = vrot.slane %v3864_v26, 3  ;;  %v4947_v38 = vstv %s9272_s9  ;;  %v3914_v13 = vstv %s9274_s16  ;;  %v4985_v58 = vstv %s9285_s28  ;;  %s9522_s9 = sld [smem:[#allocation7 + $0x81]]  ;;  %s9533_s16 = sld [smem:[#allocation7 + $0x46]] }
 0x556   : > { %v3893_v11 = vrot.slane %v3889_v3, 3  ;;  %v3915_v10 = vmul.f32 %v3914_v13, %v8415_v57  ;;  %v3916_v29 = vmul.f32 %v8404_v35, %v3914_v13  ;;  %v3894_v63 = vrot.slane %v3890_v17, 3  ;;  %12290 = vst [vmem:[#allocation108_spill] sm:$0xff] %v9358_v60  ;;  %v9360_v3 = vpop.permute.xlu0 %1929  ;;  %s9541_s28 = sld [smem:[#allocation7 + $0x97]] }
 0x557   : > { %v9352_v26 = vsel %vm2335_vm8, %v3867_v54, %v3868_v52  ;;  %v4986_v20 = vmul.f32 %v4985_v58, %v8884_v34  ;;  %v4987_v27 = vmul.f32 %v8873_v30, %v4985_v58  ;;  %v9363_v50 = vmul.f32 %v4931_v4, %v8884_v34  ;;  %3365 = vrot.lane.b32.xlu0 %v9012_v15, %s7242_s12 }
 0x558   : > { %v3919_v13 = vrot.slane %v3915_v10, 3  ;;  %v3920_v55 = vrot.slane %v3916_v29, 3  ;;  %v5011_v2 = vstv %s9296_s11  ;;  %v9369_v54 = vsel %vm2335_vm8, %v3893_v11, %v3894_v63  ;;  %2579 = vrot.lane.b32.xlu1 %v9002_v41, %s7241_s27  ;;  %s9543_s11 = sld [smem:[#allocation7 + $0xb5]] }
 0x559   : > { %v9372_v58 = vmul.f32 %v4947_v38, %v8884_v34  ;;  %v4990_v52 = vrot.slane %v4986_v20, 1  ;;  %v4991_v17 = vrot.slane %v4987_v27, 1  ;;  %v5012_v11 = vmul.f32 %v5011_v2, %v8884_v34 }
 0x55a   : > { %v9381_v4 = vsel %vm2335_vm8, %v3919_v13, %v3920_v55  ;;  %v5013_v38 = vmul.f32 %v8873_v30, %v5011_v2  ;;  %v3370_v6 = vstv %s9324_s30  ;;  %v12294_v10 = vstv %s8923_s23  ;;  %v9401_v55 = vpop.permute.xlu1 %2719  ;;  %v9403_v27 = vpop.permute.xlu0 %1945  ;;  %s9422_s23 = sld [smem:[#allocation7 + $0x8d]]  ;;  %s9553_s30 = sld [smem:[#allocation7 + $0x47]] }
 0x55b   : > { %12291 = vst [vmem:[#allocation109_spill] sm:$0xff] %v9372_v58  ;;  %12292 = vst [vmem:[#allocation110_spill] sm:$0xff] %v9381_v4  ;;  %v9390_v20 = vsel %vm637_vm3, %v4990_v52, %v4991_v17  ;;  %v2331_v29 = vmul.f32 %v12294_v10, %v8319_v59  ;;  %v12295_v28 = vmov %v12294_v10  ;;  %v5016_v2 = vrot.slane %v5012_v11, 1  ;;  %3381 = vrot.lane.b32.xlu0 %v9015_v19, %s7241_s27 }
 0x55c   : > { %12293 = vst [vmem:[#allocation111_spill] sm:$0xff] %v9390_v20  ;;  %v2332_v63 = vmul.f32 %v8313_v31, %v12295_v28  ;;  %12296 = vst [vmem:[#allocation112_spill] sm:$0xff] %v9401_v55  ;;  %v5017_v13 = vrot.slane %v5013_v38, 1  ;;  %v5037_v60 = vstv %s9335_s3  ;;  %v2342_v4 = vstv %s9337_s4  ;;  %2605 = vrot.lane.b32.xlu1 %v9024_v47, %s7244_s18  ;;  %s9592_s3 = sld [smem:[#allocation7 + $0x99]]  ;;  %s9594_s4 = sld [smem:[#allocation7 + $0xb7]] }
 0x55d   : > { %v2336_v52 = vrot.slane %v2331_v29, 3  ;;  %v5038_v10 = vmul.f32 %v5037_v60, %v8884_v34  ;;  %v5039_v28 = vmul.f32 %v8873_v30, %v5037_v60  ;;  %v2343_v38 = vmul.f32 %v2342_v4, %v8376_v40 }
 0x55e   : > { %v2337_v17 = vrot.slane %v2332_v63, 3  ;;  %v9418_v11 = vsel %vm637_vm3, %v5016_v2, %v5017_v13  ;;  %v2344_v55 = vmul.f32 %v8367_v39, %v2342_v4  ;;  %v3386_v42 = vstv %s9356_s2  ;;  %v9431_v20 = vpop.permute.xlu1 %2745  ;;  %v9433_v2 = vpop.permute.xlu0 %1961  ;;  %s9619_s2 = sld [smem:[#allocation7 + $0x57]] }
 0x55f   : > { %12297 = vst [vmem:[#allocation113_spill] sm:$0xff] %v9418_v11  ;;  %v5042_v63 = vrot.slane %v5038_v10, 1  ;;  %v5043_v8 = vrot.slane %v5039_v28, 1  ;;  %12299 = vst [vmem:[#allocation115_spill] sm:$0xff] %v9431_v20  ;;  %v9436_v4 = vmul.f32 %v3370_v6, %v8448_v23  ;;  %v2347_v13 = vrot.slane %v2343_v38, 3  ;;  %3397 = vrot.lane.b32.xlu0 %v9027_v61, %s7244_s18 }
 0x560   : > { %v9428_v29 = vsel %vm2335_vm8, %v2336_v52, %v2337_v17  ;;  %v2348_v11 = vrot.slane %v2344_v55, 3  ;;  %v5063_v58 = vstv %s9366_s25  ;;  %v9452_v6 = vmul.f32 %v3386_v42, %v8448_v23  ;;  %2732 = vrot.lane.b32.xlu1 %v9034_v22, %s7242_s12  ;;  %s9621_s25 = sld [smem:[#allocation7 + $0x58]] }
 0x561   : > { %12298 = vst [vmem:[#allocation114_spill] sm:$0xff] %v9428_v29  ;;  %v9442_v52 = vsel %vm637_vm3, %v5042_v63, %v5043_v8  ;;  %v5064_v10 = vmul.f32 %v5063_v58, %v8884_v34  ;;  %v5065_v28 = vmul.f32 %v8873_v30, %v5063_v58  ;;  %v5089_v63 = vstv %s9387_s26  ;;  %s9628_s26 = sld [smem:[#allocation7 + $0x5a]] }
 0x562   : > { %12300 = vst [vmem:[#allocation116_spill] sm:$0xff] %v9442_v52  ;;  %v9455_v55 = vsel %vm2335_vm8, %v2347_v13, %v2348_v11  ;;  %v5090_v58 = vmul.f32 %v5089_v63, %v8884_v34  ;;  %v5091_v60 = vmul.f32 %v8873_v30, %v5089_v63  ;;  %v9463_v53 = vpop.permute.xlu1 %2771  ;;  %v9465_v18 = vpop.permute.xlu0 %2004  ;;  %v5115_v20 = vstv %s9407_s17  ;;  %s9648_s17 = sld [smem:[#allocation7 + $0x5c]] }
 0x563   : > { %12301 = vst [vmem:[#allocation117_spill] sm:$0xff] %v9455_v55  ;;  %v5068_v8 = vrot.slane %v5064_v10, 1  ;;  %v5069_v17 = vrot.slane %v5065_v28, 1  ;;  %12302 = vst [vmem:[#allocation118_spill] sm:$0xff] %v9463_v53  ;;  %v5163_v11 = vstv %s9409_s7  ;;  %v12303_v13 = vstv %s9349_s13  ;;  %3413 = vrot.lane.b32.xlu0 %v9227_v33, %s12184_s19  ;;  %s9659_s7 = sld [smem:[#allocation7 + $0x53]] }
 0x564   : > { %v2510_v38 = vmul.f32 %v12303_v13, %v8319_v59  ;;  %v5094_v28 = vrot.slane %v5090_v58, 1  ;;  %v5095_v63 = vrot.slane %v5091_v60, 1  ;;  %v5116_v55 = vmul.f32 %v5115_v20, %v8884_v34 }
 0x565   : > { %v9476_v10 = vsel %vm637_vm3, %v5068_v8, %v5069_v17  ;;  %v5117_v13 = vmul.f32 %v8873_v30, %v5115_v20  ;;  %v5164_v17 = vmul.f32 %v5163_v11, %v8884_v34  ;;  %v3493_v8 = vstv %s9424_s1  ;;  %s9661_s1 = sld [smem:[#allocation7 + $0x5e]] }
 0x566   : > { %12304 = vst [vmem:[#allocation119_spill] sm:$0xff] %v9476_v10  ;;  %v9492_v60 = vsel %vm637_vm3, %v5094_v28, %v5095_v63  ;;  %v5120_v58 = vrot.slane %v5116_v55, 1  ;;  %v5165_v53 = vmul.f32 %v8873_v30, %v5163_v11  ;;  %v3494_v29 = vmul.f32 %v3493_v8, %v8448_v23  ;;  %v9496_v10 = vpop.permute.xlu1 %2797  ;;  %v9498_v41 = vpop.permute.xlu0 %2030 }
 0x567   : > { %12305 = vst [vmem:[#allocation120_spill] sm:$0xff] %v9492_v60  ;;  %12306 = vst [vmem:[#allocation121_spill] sm:$0xff] %v9496_v10  ;;  %v5121_v15 = vrot.slane %v5117_v13, 1  ;;  %v5168_v52 = vrot.slane %v5164_v17, 2  ;;  %v3495_v20 = vmul.f32 %v8437_v1, %v3493_v8  ;;  %v5189_v42 = vstv %s9439_s0  ;;  %3429 = vrot.lane.b32.xlu0 %v9232_v43, %s12186_s14  ;;  %s9682_s0 = sld [smem:[#allocation7 + $0x59]] }
 0x568   : > { %v5169_v28 = vrot.slane %v5165_v53, 2  ;;  %v3498_v63 = vrot.slane %v3494_v29, 1  ;;  %v5190_v55 = vmul.f32 %v5189_v42, %v8884_v34  ;;  %v5191_v11 = vmul.f32 %v8873_v30, %v5189_v42 }
 0x569   : > { %v9511_v13 = vsel %vm637_vm3, %v5120_v58, %v5121_v15  ;;  %v3499_v17 = vrot.slane %v3495_v20, 1  ;;  %v12307_v8 = vstv %s9349_s13  ;;  %v2515_v53 = vrot.slane %v2510_v38, 4  ;;  %s9608_s13 = sld [smem:[#allocation7 + $0x56]] }
 0x56a   : > { %v2511_v10 = vmul.f32 %v8313_v31, %v12307_v8  ;;  %v9519_v29 = vsel %vm715_vm4, %v5168_v52, %v5169_v28  ;;  %v5194_v47 = vrot.slane %v5190_v55, 2  ;;  %v5195_v42 = vrot.slane %v5191_v11, 2  ;;  %v9524_v19 = vpop.permute.xlu1 %2823  ;;  %v9526_v58 = vpop.permute.xlu0 %2056 }
 0x56b   : > { %12308 = vst [vmem:[#allocation122_spill] sm:$0xff] %v9519_v29  ;;  %v3519_v60 = vstv %s9461_s20  ;;  %12309 = vst [vmem:[#allocation123_spill] sm:$0xff] %v9524_v19  ;;  %v9529_v15 = vsel %vm637_vm3, %v3498_v63, %v3499_v17  ;;  %v5215_v28 = vstv %s9479_s22  ;;  %v2521_v55 = vstv %s9473_s5  ;;  %3488 = vrot.lane.b32.xlu0 %v9080_v16, %s7242_s12  ;;  %s9684_s20 = sld [smem:[#allocation7 + $0x60]]  ;;  %s9709_s5 = sld [smem:[#allocation7 + $0x5b]] }
 0x56c   : > { %12310 = vst [vmem:[#allocation124_spill] sm:$0xff] %v9529_v15  ;;  %v2516_v38 = vrot.slane %v2511_v10, 4  ;;  %v3520_v20 = vmul.f32 %v3519_v60, %v8448_v23  ;;  %v3521_v8 = vmul.f32 %v8437_v1, %v3519_v60  ;;  %v9536_v52 = vsel %vm715_vm4, %v5194_v47, %v5195_v42  ;;  %s9719_s22 = sld [smem:[#allocation7 + $0xb4]] }
 0x56d   : > { %12311 = vst [vmem:[#allocation125_spill] sm:$0xff] %v9536_v52  ;;  %v3545_v11 = vstv %s9481_s8  ;;  %v5216_v17 = vmul.f32 %v5215_v28, %v8884_v34  ;;  %v5217_v47 = vmul.f32 %v8873_v30, %v5215_v28  ;;  %v2522_v42 = vmul.f32 %v2521_v55, %v8376_v40  ;;  %s9722_s8 = sld [smem:[#allocation7 + $0x9b]] }
 0x56e   : > { %v9550_v10 = vsel %vm2514_vm6, %v2515_v53, %v2516_v38  ;;  %v3524_v60 = vrot.slane %v3520_v20, 1  ;;  %v3525_v63 = vrot.slane %v3521_v8, 1  ;;  %v2523_v19 = vmul.f32 %v8367_v39, %v2521_v55  ;;  %v9559_v52 = vpop.permute.xlu1 %2849  ;;  %v9561_v61 = vpop.permute.xlu0 %2082  ;;  %v12315_v55 = vld [vmem:[#allocation95_spill] sm:$0xff] }
 0x56f   : > { %12312 = vst [vmem:[#allocation126_spill] sm:$0xff] %v9550_v10  ;;  %v3546_v22 = vmul.f32 %v3545_v11, %v8448_v23  ;;  %12313 = vst [vmem:[#allocation127_spill] sm:$0xff] %v9559_v52  ;;  %v5220_v38 = vrot.slane %v5216_v17, 2  ;;  %v3547_v20 = vmul.f32 %v8437_v1, %v3545_v11  ;;  %v5241_v8 = vstv %s9502_s29  ;;  %3445 = vrot.lane.b32.xlu1 %v12315_v55, %s7245_s15  ;;  %s9724_s29 = sld [smem:[#allocation7 + $0x9f]] }
 0x570   : > { %v9564_v53 = vsel %vm637_vm3, %v3524_v60, %v3525_v63  ;;  %v5221_v28 = vrot.slane %v5217_v47, 2  ;;  %v2526_v10 = vrot.slane %v2522_v42, 4  ;;  %v2527_v15 = vrot.slane %v2523_v19, 4  ;;  %3514 = vrot.lane.b32.xlu0 %v9087_v24, %s7241_s27 }
 0x571   : > { %12314 = vst [vmem:[#allocation128_spill] sm:$0xff] %v9564_v53  ;;  %v3550_v29 = vrot.slane %v3546_v22, 1  ;;  %v3551_v52 = vrot.slane %v3547_v20, 1  ;;  %v5242_v60 = vmul.f32 %v5241_v8, %v8884_v34  ;;  %v5243_v63 = vmul.f32 %v8873_v30, %v5241_v8 }
 0x572   : > { %v3354_v17 = vstv %s9516_s21  ;;  %v9576_v11 = vsel %vm715_vm4, %v5220_v38, %v5221_v28  ;;  %v9579_v19 = vsel %vm2514_vm6, %v2526_v10, %v2527_v15  ;;  %v3358_v47 = vstv %s9522_s9  ;;  %v1890_v22 = vpop.permute.xlu1 %1889  ;;  %v9583_v33 = vpop.permute.xlu0 %2108  ;;  %s9732_s21 = sld [smem:[#allocation7 + $0xa1]]  ;;  %s9734_s9 = sld [smem:[#allocation7 + $0x126]] }
 0x573   : > { %12316 = vst [vmem:[#allocation95_spill] sm:$0xff] %v9576_v11  ;;  %12317 = vst [vmem:[#allocation129_spill] sm:$0xff] %v9579_v19  ;;  %v3355_v42 = vmul.f32 %v3354_v17, %v8415_v57  ;;  %v9586_v20 = vsel %vm637_vm3, %v3550_v29, %v3551_v52  ;;  %v5246_v55 = vrot.slane %v5242_v60, 2  ;;  %v5247_v8 = vrot.slane %v5243_v63, 2  ;;  %3618 = vrot.lane.b32.xlu1 %v9064_v5, %s7245_s15 }
 0x574   : > { %v3359_v53 = vmul.f32 %v3358_v47, %v8448_v23  ;;  %v1892_v38 = vadd.f32 %v1890_v22, %v9317_v44  ;;  %v3571_v28 = vstv %s9541_s28  ;;  %v3953_v11 = vstv %s9543_s11  ;;  %3540 = vrot.lane.b32.xlu0 %v9114_v48, %s7244_s18  ;;  %s9814_s28 = sld [smem:[#allocation7 + $0x12e]]  ;;  %s9829_s11 = sld [smem:[#allocation7 + $0x130]] }
 0x575   : > { %v2688_v15 = vstv %s9533_s16  ;;  %v9602_v29 = vsel %vm715_vm4, %v5246_v55, %v5247_v8  ;;  %v3572_v44 = vmul.f32 %v3571_v28, %v8448_v23  ;;  %v2700_v10 = vstv %s9553_s30  ;;  %s9760_s16 = sld [smem:[#allocation7 + $0xb6]]  ;;  %s9838_s30 = sld [smem:[#allocation7 + $0x132]] }
 0x576   : > { %v9604_v52 = vadd.f32 %v3359_v53, %v3355_v42  ;;  %v1900_v60 = vadd.f32 %v9292_v25, %v1892_v38  ;;  %v3573_v63 = vmul.f32 %v8437_v1, %v3571_v28  ;;  %v3954_v17 = vmul.f32 %v3953_v11, %v8448_v23  ;;  %v1906_v47 = vpop.permute.xlu1 %1905  ;;  %v9614_v43 = vpop.permute.xlu0 %2134 }
 0x577   : > { %v3955_v5 = vmul.f32 %v8437_v1, %v3953_v11  ;;  %v3576_v22 = vrot.slane %v3572_v44, 1  ;;  %v2689_v53 = vmul.f32 %v2688_v15, %v8319_v59  ;;  %v2690_v42 = vmul.f32 %v8313_v31, %v2688_v15  ;;  %3731 = vrot.lane.b32.xlu1 %v9083_v7, %s7244_s18 }
 0x578   : > { %12318 = vst [vmem:[#allocation130_spill] sm:$0xff] %v9604_v52  ;;  %v2701_v55 = vmul.f32 %v2700_v10, %v8376_v40  ;;  %v1908_v25 = vadd.f32 %v1906_v47, %v1900_v60  ;;  %v3577_v8 = vrot.slane %v3573_v63, 1  ;;  %v3958_v38 = vrot.slane %v3954_v17, 3  ;;  %3566 = vrot.lane.b32.xlu0 %v9127_v9, %s12184_s19 }
 0x579   : > { %v3959_v28 = vrot.slane %v3955_v5, 3  ;;  %v2694_v11 = vrot.slane %v2689_v53, 5  ;;  %v2695_v15 = vrot.slane %v2690_v42, 5  ;;  %v2702_v44 = vmul.f32 %v8367_v39, %v2700_v10 }
 0x57a   : > { %v2705_v52 = vrot.slane %v2701_v55, 5  ;;  %v1916_v60 = vadd.f32 %v9328_v21, %v1908_v25  ;;  %v9632_v63 = vsel %vm637_vm3, %v3576_v22, %v3577_v8  ;;  %v3597_v5 = vstv %s9592_s3  ;;  %v1922_v16 = vpop.permute.xlu1 %1921  ;;  %v9638_v47 = vpop.permute.xlu0 %2182  ;;  %s9851_s3 = sld [smem:[#allocation7 + $0x109]] }
 0x57b   : > { %v9635_v17 = vsel %vm2335_vm8, %v3958_v38, %v3959_v28  ;;  %v3598_v7 = vmul.f32 %v3597_v5, %v8448_v23  ;;  %v3599_v10 = vmul.f32 %v8437_v1, %v3597_v5  ;;  %v3979_v53 = vstv %s9594_s4  ;;  %3757 = vrot.lane.b32.xlu1 %v9099_v37, %s12184_s19  ;;  %s9859_s4 = sld [smem:[#allocation7 + $0xbb]] }
 0x57c   : > { %v9644_v42 = vsel %vm2693_vm7, %v2694_v11, %v2695_v15  ;;  %v1924_v21 = vadd.f32 %v1922_v16, %v1916_v60  ;;  %v3980_v22 = vmul.f32 %v3979_v53, %v8448_v23  ;;  %v3981_v55 = vmul.f32 %v8437_v1, %v3979_v53  ;;  %3592 = vrot.lane.b32.xlu0 %v9159_v51, %s12186_s14 }
 0x57d   : > { %12319 = vst [vmem:[#allocation131_spill] sm:$0xff] %v9644_v42  ;;  %v2706_v25 = vrot.slane %v2702_v44, 5  ;;  %v3602_v8 = vrot.slane %v3598_v7, 1  ;;  %v3603_v38 = vrot.slane %v3599_v10, 1  ;;  %v2890_v28 = vstv %s9608_s13  ;;  %s9878_s13 = sld [smem:[#allocation7 + $0x134]] }
 0x57e   : > { %v1932_v11 = vadd.f32 %v9360_v3, %v1924_v21  ;;  %v3984_v15 = vrot.slane %v3980_v22, 3  ;;  %v3985_v60 = vrot.slane %v3981_v55, 3  ;;  %v1938_v24 = vpop.permute.xlu1 %1937  ;;  %v9663_v37 = vpop.permute.xlu0 %2208  ;;  %v2891_v16 = vmul.f32 %v2890_v28, %v8319_v59 }
 0x57f   : > { %v9657_v5 = vsel %vm2693_vm7, %v2705_v52, %v2706_v25  ;;  %v9666_v44 = vsel %vm637_vm3, %v3602_v8, %v3603_v38  ;;  %v2892_v3 = vmul.f32 %v8313_v31, %v2890_v28  ;;  %v2903_v7 = vstv %s9619_s2  ;;  %3783 = vrot.lane.b32.xlu1 %v9118_v36, %s12186_s14  ;;  %s9880_s2 = sld [smem:[#allocation7 + $0x136]] }
 0x580   : > { %12320 = vst [vmem:[#allocation132_spill] sm:$0xff] %v9657_v5  ;;  %v1940_v10 = vadd.f32 %v1938_v24, %v1932_v11  ;;  %v9672_v52 = vsel %vm2335_vm8, %v3984_v15, %v3985_v60  ;;  %v2904_v53 = vmul.f32 %v2903_v7, %v8376_v40  ;;  %v2905_v21 = vmul.f32 %v8367_v39, %v2903_v7 }
 0x581   : > { %v2895_v22 = vrot.slane %v2891_v16, 6  ;;  %v2896_v55 = vrot.slane %v2892_v3, 6  ;;  %v2916_v25 = vstv %s9621_s25  ;;  %v2942_v8 = vstv %s9628_s26  ;;  %3666 = vrot.lane.b32.xlu0 %v9186_v12, %s7242_s12  ;;  %s9898_s25 = sld [smem:[#allocation7 + $0xbd]]  ;;  %s9913_s26 = sld [smem:[#allocation7 + $0x100]] }
 0x582   : > { %v1948_v38 = vadd.f32 %v9403_v27, %v1940_v10  ;;  %v2908_v28 = vrot.slane %v2904_v53, 6  ;;  %v2909_v11 = vrot.slane %v2905_v21, 6  ;;  %v2917_v15 = vmul.f32 %v2916_v25, %v8319_v59  ;;  %v1954_v60 = vpop.permute.xlu1 %1953  ;;  %v9688_v48 = vpop.permute.xlu0 %2234 }
 0x583   : > { %v9691_v36 = vsel %vm2872_vm9, %v2895_v22, %v2896_v55  ;;  %v2918_v24 = vmul.f32 %v8313_v31, %v2916_v25  ;;  %v2943_v16 = vmul.f32 %v2942_v8, %v8319_v59  ;;  %v2944_v3 = vmul.f32 %v8313_v31, %v2942_v8  ;;  %3809 = vrot.lane.b32.xlu1 %v9149_v0, %s7245_s15 }
 0x584   : > { %12321 = vst [vmem:[#allocation133_spill] sm:$0xff] %v9691_v36  ;;  %v1956_v7 = vadd.f32 %v1954_v60, %v1948_v38  ;;  %v9697_v27 = vsel %vm2872_vm9, %v2908_v28, %v2909_v11  ;;  %v2921_v10 = vrot.slane %v2917_v15, 6  ;;  %v2968_v53 = vstv %s9648_s17  ;;  %v12338_v36 = vld [vmem:[#allocation99_spill] sm:$0xff]  ;;  %s9915_s17 = sld [smem:[#allocation7 + $0x101]] }
 0x585   : > { %12322 = vst [vmem:[#allocation134_spill] sm:$0xff] %v9697_v27  ;;  %v2922_v21 = vrot.slane %v2918_v24, 6  ;;  %v2947_v22 = vrot.slane %v2943_v16, 6  ;;  %v2948_v55 = vrot.slane %v2944_v3, 6  ;;  %v2969_v25 = vmul.f32 %v2968_v53, %v8319_v59  ;;  %v12337_v27 = vld [vmem:[#allocation98_spill] sm:$0xff] }
 0x586   : > { %v1964_v5 = vadd.f32 %v9433_v2, %v1956_v7  ;;  %v2970_v8 = vmul.f32 %v8313_v31, %v2968_v53  ;;  %v2854_v38 = vstv %s9659_s7  ;;  %v2994_v28 = vstv %s9661_s1  ;;  %v1970_v11 = vpop.permute.xlu1 %1969  ;;  %v9711_v15 = vpop.permute.xlu0 %2260  ;;  %s9934_s7 = sld [smem:[#allocation7 + $0x10b]] }
 0x587   : > { %v9714_v9 = vsel %vm2872_vm9, %v2921_v10, %v2922_v21  ;;  %v9717_v0 = vsel %vm2872_vm9, %v2947_v22, %v2948_v55  ;;  %v2973_v60 = vrot.slane %v2969_v25, 6  ;;  %v2855_v2 = vmul.f32 %v2854_v38, %v8376_v40  ;;  %3857 = vrot.lane.b32.xlu1 %v9168_v32, %s7242_s12  ;;  %s9938_s1 = sld [smem:[#allocation7 + $0x113]] }
 0x588   : > { %12323 = vst [vmem:[#allocation135_spill] sm:$0xff] %v9714_v9  ;;  %12324 = vst [vmem:[#allocation136_spill] sm:$0xff] %v9717_v0  ;;  %v1972_v24 = vadd.f32 %v1970_v11, %v1964_v5  ;;  %v2974_v16 = vrot.slane %v2970_v8, 6  ;;  %v2856_v3 = vmul.f32 %v8367_v39, %v2854_v38  ;;  %v2995_v7 = vmul.f32 %v2994_v28, %v8319_v59 }
 0x589   : > { %v2859_v5 = vrot.slane %v2855_v2, 5  ;;  %v2996_v10 = vmul.f32 %v8313_v31, %v2994_v28  ;;  %v2929_v53 = vstv %s9682_s0  ;;  %v12326_v32 = vstv %s9374_s6  ;;  %s9778_s6 = sld [smem:[#allocation7 + $0x105]] }
 0x58a   : > { %v1983_v22 = vadd.f32 %v9136_v45, %v1972_v24  ;;  %v9741_v55 = vsel %vm2872_vm9, %v2973_v60, %v2974_v16  ;;  %v2860_v51 = vrot.slane %v2856_v3, 5  ;;  %v2999_v25 = vrot.slane %v2995_v7, 6  ;;  %v2018_v8 = vpop.permute.xlu1 %2017  ;;  %v9743_v38 = vpop.permute.xlu0 %2286  ;;  %s9950_s0 = sld [smem:[#allocation7 + $0x115]] }
 0x58b   : > { %12325 = vst [vmem:[#allocation137_spill] sm:$0xff] %v9741_v55  ;;  %v9748_v11 = vmul.f32 %v12326_v32, %v8448_v23  ;;  %v12327_v2 = vstv %s9385_s24  ;;  %v12328_v21 = vstv %s9399_s10  ;;  %v3000_v60 = vrot.slane %v2996_v10, 6  ;;  %3883 = vrot.lane.b32.xlu1 %v9197_v62, %s7241_s27  ;;  %s9780_s24 = sld [smem:[#allocation7 + $0x128]]  ;;  %s9803_s10 = sld [smem:[#allocation7 + $0x12c]] }
 0x58c   : > { %v9753_v28 = vmul.f32 %v12327_v2, %v8448_v23  ;;  %v9758_v45 = vmul.f32 %v12328_v21, %v8448_v23  ;;  %v1994_v24 = vadd.f32 %v9177_v49, %v1983_v22  ;;  %v12329_v16 = vstv %s9422_s23  ;;  %s9807_s23 = sld [smem:[#allocation7 + $0x107]] }
 0x58d   : > { %v9766_v3 = vmul.f32 %v12329_v16, %v8448_v23  ;;  %v9769_v7 = vsel %vm2693_vm7, %v2859_v5, %v2860_v51  ;;  %v9772_v32 = vmul.f32 %v2929_v53, %v8376_v40  ;;  %v9783_v49 = vsel %vm2872_vm9, %v2999_v25, %v3000_v60  ;;  %v12334_v51 = vld [vmem:[#allocation97_spill] sm:$0xff] }
 0x58e   : > { %12330 = vst [vmem:[#allocation138_spill] sm:$0xff] %v9769_v7  ;;  %12331 = vst [vmem:[#allocation139_spill] sm:$0xff] %v9783_v49  ;;  %v9786_v5 = vmul.f32 %v8367_v39, %v2929_v53  ;;  %v12332_v10 = vstv %s9684_s20  ;;  %v2007_v12 = vadd.f32 %v9465_v18, %v1994_v24  ;;  %v3623_v62 = vstv %s9722_s8  ;;  %v2044_v2 = vpop.permute.xlu1 %2043  ;;  %v9797_v16 = vpop.permute.xlu0 %2312  ;;  %v12333_v24 = vld [vmem:[#allocation96_spill] sm:$0xff]  ;;  %s9991_s8 = sld [smem:[#allocation7 + $0x13a]] }
 0x58f   : > { %v9791_v21 = vmul.f32 %v12332_v10, %v8319_v59  ;;  %v3671_v22 = vstv %s9724_s29  ;;  %v3624_v25 = vmul.f32 %v3623_v62, %v8448_v23  ;;  %v3625_v60 = vmul.f32 %v8437_v1, %v3623_v62  ;;  %3692 = vrot.lane.b32.xlu0 %v12333_v24, %s7241_s27  ;;  %3909 = vrot.lane.b32.xlu1 %v12334_v51, %s7244_s18  ;;  %s10008_s29 = sld [smem:[#allocation7 + $0x11b]] }
 0x590   : > { %v3672_v53 = vmul.f32 %v3671_v22, %v8448_v23  ;;  %v3673_v49 = vmul.f32 %v8437_v1, %v3671_v22  ;;  %v2020_v10 = vadd.f32 %v2018_v8, %v2007_v12  ;;  %v3697_v7 = vstv %s9732_s21  ;;  %s10010_s21 = sld [smem:[#allocation7 + $0x13c]] }
 0x591   : > { %v5267_v55 = vstv %s9734_s9  ;;  %v3628_v62 = vrot.slane %v3624_v25, 1  ;;  %v3629_v59 = vrot.slane %v3625_v60, 1  ;;  %v3698_v12 = vmul.f32 %v3697_v7, %v8448_v23  ;;  %s10023_s9 = sld [smem:[#allocation7 + $0xbf]] }
 0x592   : > { %v3676_v0 = vrot.slane %v3672_v53, 2  ;;  %v3677_v42 = vrot.slane %v3673_v49, 2  ;;  %v2033_v8 = vadd.f32 %v9498_v41, %v2020_v10  ;;  %v3699_v22 = vmul.f32 %v8437_v1, %v3697_v7  ;;  %v2070_v24 = vpop.permute.xlu1 %2069  ;;  %v9820_v9 = vpop.permute.xlu0 %2361 }
 0x593   : > { %v5268_v18 = vmul.f32 %v5267_v55, %v8884_v34  ;;  %v9823_v51 = vsel %vm637_vm3, %v3628_v62, %v3629_v59  ;;  %v5269_v41 = vmul.f32 %v8873_v30, %v5267_v55  ;;  %v3702_v60 = vrot.slane %v3698_v12, 2  ;;  %3718 = vrot.lane.b32.xlu0 %v12337_v27, %s7244_s18  ;;  %3935 = vrot.lane.b32.xlu1 %v12338_v36, %s12184_s19 }
 0x594   : > { %12335 = vst [vmem:[#allocation96_spill] sm:$0xff] %v9823_v51  ;;  %v9826_v49 = vsel %vm715_vm4, %v3676_v0, %v3677_v42  ;;  %v2046_v7 = vadd.f32 %v2044_v2, %v2033_v8  ;;  %v3703_v53 = vrot.slane %v3699_v22, 2  ;;  %v4891_v42 = vstv %s9778_s6  ;;  %s10038_s6 = sld [smem:[#allocation7 + $0xba]] }
 0x595   : > { %12336 = vst [vmem:[#allocation97_spill] sm:$0xff] %v9826_v49  ;;  %v5272_v10 = vrot.slane %v5268_v18, 2  ;;  %v5273_v59 = vrot.slane %v5269_v41, 2  ;;  %v5293_v0 = vstv %s9780_s24  ;;  %v12339_v55 = vstv %s9684_s20  ;;  %s9952_s20 = sld [smem:[#allocation7 + $0x117]]  ;;  %s10062_s24 = sld [smem:[#allocation7 + $0xc1]] }
 0x596   : > { %v9843_v62 = vmul.f32 %v8313_v31, %v12339_v55  ;;  %v2059_v2 = vadd.f32 %v9526_v58, %v2046_v7  ;;  %v9847_v18 = vsel %vm715_vm4, %v3702_v60, %v3703_v53  ;;  %v5294_v27 = vmul.f32 %v5293_v0, %v8884_v34  ;;  %v2096_v36 = vpop.permute.xlu1 %2095  ;;  %v9853_v12 = vpop.permute.xlu0 %2387  ;;  %v12343_v31 = vld [vmem:[#allocation101_spill] sm:$0xff] }
 0x597   : > { %12340 = vst [vmem:[#allocation98_spill] sm:$0xff] %v9847_v18  ;;  %v5295_v8 = vmul.f32 %v8873_v30, %v5293_v0  ;;  %v9856_v22 = vsel %vm715_vm4, %v5272_v10, %v5273_v59  ;;  %v5341_v41 = vstv %s9803_s10  ;;  %v12342_v58 = vstv %s9719_s22  ;;  %3744 = vrot.lane.b32.xlu0 %v12343_v31, %s12184_s19  ;;  %v12344_v10 = vld [vmem:[#allocation100_spill] sm:$0xff]  ;;  %v12345_v59 = vld [vmem:[#allocation94_spill] sm:$0xff]  ;;  %s10084_s10 = sld [smem:[#allocation7 + $0x13e]] }
 0x598   : > { %12341 = vst [vmem:[#allocation99_spill] sm:$0xff] %v9856_v22  ;;  %v9864_v7 = vmul.f32 %v12342_v58, %v8415_v57  ;;  %v2072_v53 = vadd.f32 %v2070_v24, %v2059_v2  ;;  %v5298_v0 = vrot.slane %v5294_v27, 2  ;;  %v5342_v25 = vmul.f32 %v5341_v41, %v8884_v34  ;;  %4870 = vrot.lane.b32.xlu1 %v12344_v10, %s7242_s12 }
 0x599   : > { %v5299_v55 = vrot.slane %v5295_v8, 2  ;;  %v9873_v22 = vmul.f32 %v4891_v42, %v12345_v59  ;;  %v4907_v58 = vstv %s9807_s23  ;;  %v5343_v18 = vmul.f32 %v8873_v30, %v5341_v41  ;;  %s10096_s23 = sld [smem:[#allocation7 + $0x121]] }
 0x59a   : > { %v5367_v60 = vstv %s9814_s28  ;;  %v2085_v24 = vadd.f32 %v9561_v61, %v2072_v53  ;;  %v5346_v2 = vrot.slane %v5342_v25, 3  ;;  %v2122_v8 = vpop.permute.xlu1 %2121  ;;  %v9887_v42 = vpop.permute.xlu0 %2413  ;;  %v12348_v49 = vstv %s9719_s22  ;;  %s9981_s22 = sld [smem:[#allocation7 + $0x119]]  ;;  %s10098_s28 = sld [smem:[#allocation7 + $0xbc]] }
 0x59b   : > { %12346 = vst [vmem:[#allocation101_spill] sm:$0xff] %v9873_v22  ;;  %v9884_v31 = vsel %vm715_vm4, %v5298_v0, %v5299_v55  ;;  %v5368_v27 = vmul.f32 %v5367_v60, %v8884_v34  ;;  %v5347_v10 = vrot.slane %v5343_v18, 3  ;;  %v5369_v41 = vmul.f32 %v8873_v30, %v5367_v60  ;;  %3770 = vrot.lane.b32.xlu0 %v9281_v56, %s12186_s14 }
 0x59c   : > { %12347 = vst [vmem:[#allocation100_spill] sm:$0xff] %v9884_v31  ;;  %v5393_v22 = vstv %s9829_s11  ;;  %v9894_v51 = vmul.f32 %v8404_v35, %v12348_v49  ;;  %v2098_v61 = vadd.f32 %v2096_v36, %v2085_v24  ;;  %4886 = vrot.lane.b32.xlu1 %v9299_v46, %s7241_s27  ;;  %v9905_v18 = vmul.f32 %v4907_v58, %v12345_v59  ;;  %v12358_v31 = vld [vmem:[#allocation102_spill] sm:$0xff]  ;;  %s10115_s11 = sld [smem:[#allocation7 + $0x123]] }
 0x59d   : > { %v5372_v53 = vrot.slane %v5368_v27, 3  ;;  %v5394_v0 = vmul.f32 %v5393_v22, %v8884_v34  ;;  %v5395_v25 = vmul.f32 %v8873_v30, %v5393_v22  ;;  %v9908_v49 = vsel %vm2335_vm8, %v5346_v2, %v5347_v10 }
 0x59e   : > { %12349 = vst [vmem:[#allocation94_spill] sm:$0xff] %v9905_v18  ;;  %12350 = vst [vmem:[#allocation140_spill] sm:$0xff] %v9908_v49  ;;  %v5373_v36 = vrot.slane %v5369_v41, 3  ;;  %v5419_v60 = vstv %s9838_s30  ;;  %v2111_v55 = vadd.f32 %v9583_v33, %v2098_v61  ;;  %v4923_v22 = vstv %s9851_s3  ;;  %v2148_v56 = vpop.permute.xlu1 %2147  ;;  %v9917_v46 = vpop.permute.xlu0 %2439  ;;  %v12353_v49 = vld [vmem:[#allocation103_spill] sm:$0xff]  ;;  %s10143_s30 = sld [smem:[#allocation7 + $0x8e]]  ;;  %s10162_s3 = sld [smem:[#allocation7 + $0x8f]] }
 0x59f   : > { %v5398_v24 = vrot.slane %v5394_v0, 3  ;;  %v5399_v27 = vrot.slane %v5395_v25, 3  ;;  %v5420_v2 = vmul.f32 %v5419_v60, %v8884_v34  ;;  %v5421_v10 = vmul.f32 %v8873_v30, %v5419_v60  ;;  %3796 = vrot.lane.b32.xlu0 %v9302_v14, %s7245_s15 }
 0x5a0   : > { %v9920_v58 = vsel %vm2335_vm8, %v5372_v53, %v5373_v36  ;;  %v4027_v33 = vstv %s9859_s4  ;;  %v2124_v41 = vadd.f32 %v2122_v8, %v2111_v55  ;;  %4902 = vrot.lane.b32.xlu1 %v12353_v49, %s7244_s18  ;;  %v5445_v60 = vstv %s9878_s13  ;;  %s10166_s4 = sld [smem:[#allocation7 + $0x125]]  ;;  %s10181_s13 = sld [smem:[#allocation7 + $0x140]] }
 0x5a1   : > { %12351 = vst [vmem:[#allocation141_spill] sm:$0xff] %v9920_v58  ;;  %v9926_v61 = vsel %vm2335_vm8, %v5398_v24, %v5399_v27  ;;  %v4028_v0 = vmul.f32 %v4027_v33, %v8448_v23  ;;  %v4029_v25 = vmul.f32 %v8437_v1, %v4027_v33  ;;  %v5424_v53 = vrot.slane %v5420_v2, 3 }
 0x5a2   : > { %12352 = vst [vmem:[#allocation142_spill] sm:$0xff] %v9926_v61  ;;  %v5425_v36 = vrot.slane %v5421_v10, 3  ;;  %v5471_v58 = vstv %s9880_s2  ;;  %v2137_v8 = vadd.f32 %v9614_v43, %v2124_v41  ;;  %v5446_v27 = vmul.f32 %v5445_v60, %v8884_v34  ;;  %v2196_v33 = vpop.permute.xlu1 %2195  ;;  %v9942_v14 = vpop.permute.xlu0 %2465  ;;  %s10192_s2 = sld [smem:[#allocation7 + $0x127]] }
 0x5a3   : > { %v4032_v55 = vrot.slane %v4028_v0, 4  ;;  %v4033_v24 = vrot.slane %v4029_v25, 4  ;;  %v5447_v2 = vmul.f32 %v8873_v30, %v5445_v60  ;;  %v5472_v10 = vmul.f32 %v5471_v58, %v8884_v34 }
 0x5a4   : > { %v9945_v49 = vsel %vm2335_vm8, %v5424_v53, %v5425_v36  ;;  %v5473_v61 = vmul.f32 %v8873_v30, %v5471_v58  ;;  %v2150_v43 = vadd.f32 %v2148_v56, %v2137_v8  ;;  %v5450_v0 = vrot.slane %v5446_v27, 3  ;;  %v12356_v53 = vld [vmem:[#allocation107_spill] sm:$0xff]  ;;  %v12357_v36 = vld [vmem:[#allocation105_spill] sm:$0xff] }
 0x5a5   : > { %12354 = vst [vmem:[#allocation103_spill] sm:$0xff] %v9945_v49  ;;  %v9955_v41 = vsel %vm2514_vm6, %v4032_v55, %v4033_v24  ;;  %v4053_v25 = vstv %s9898_s25  ;;  %3844 = vrot.lane.b32.xlu0 %v12356_v53, %s7242_s12  ;;  %4918 = vrot.lane.b32.xlu1 %v12357_v36, %s12184_s19  ;;  %v5451_v60 = vrot.slane %v5447_v2, 3  ;;  %v5476_v49 = vrot.slane %v5472_v10, 3  ;;  %v12360_v36 = vld [vmem:[#allocation104_spill] sm:$0xff]  ;;  %s10228_s25 = sld [smem:[#allocation7 + $0x129]] }
 0x5a6   : > { %12355 = vst [vmem:[#allocation143_spill] sm:$0xff] %v9955_v41  ;;  %v5477_v58 = vrot.slane %v5473_v61, 3  ;;  %v4054_v18 = vmul.f32 %v4053_v25, %v8448_v23  ;;  %v2161_v19 = vadd.f32 %v12358_v31, %v2150_v43  ;;  %v4055_v56 = vmul.f32 %v8437_v1, %v4053_v25  ;;  %v2222_v24 = vpop.permute.xlu1 %2221  ;;  %v9967_v27 = vpop.permute.xlu0 %2491 }
 0x5a7   : > { %v4859_v8 = vstv %s9913_s26  ;;  %v4863_v55 = vstv %s9915_s17  ;;  %v9970_v53 = vsel %vm2335_vm8, %v5450_v0, %v5451_v60  ;;  %v9978_v43 = vmul.f32 %v4923_v22, %v12345_v59  ;;  %s10238_s26 = sld [smem:[#allocation7 + $0x11f]]  ;;  %s10250_s17 = sld [smem:[#allocation7 + $0x5d]] }
 0x5a8   : > { %v9973_v2 = vsel %vm2335_vm8, %v5476_v49, %v5477_v58  ;;  %v4058_v61 = vrot.slane %v4054_v18, 4  ;;  %v4860_v10 = vmul.f32 %v4859_v8, %v8884_v34  ;;  %v2172_v31 = vadd.f32 %v12360_v36, %v2161_v19 }
 0x5a9   : > { %12359 = vst [vmem:[#allocation107_spill] sm:$0xff] %v9973_v2  ;;  %v4059_v25 = vrot.slane %v4055_v56, 4  ;;  %v4864_v41 = vmul.f32 %v4863_v55, %v12345_v59  ;;  %3870 = vrot.lane.b32.xlu0 %v9352_v26, %s7241_s27  ;;  %4934 = vrot.lane.b32.xlu1 %v9363_v50, %s12186_s14  ;;  %v5024_v49 = vstv %s9938_s1  ;;  %v3945_v19 = vrot.slane %v9864_v7, 3  ;;  %v12363_v50 = vld [vmem:[#allocation93_spill] sm:$0xff]  ;;  %s10271_s1 = sld [smem:[#allocation7 + $0x10d]] }
 0x5aa   : > { %v3946_v22 = vrot.slane %v9894_v51, 3  ;;  %v2185_v0 = vadd.f32 %v9638_v47, %v2172_v31  ;;  %v5025_v26 = vmul.f32 %v5024_v49, %v12345_v59  ;;  %v2248_v56 = vpop.permute.xlu1 %2247  ;;  %v10000_v8 = vpop.permute.xlu0 %2540  ;;  %v5026_v55 = vmul.f32 %v12363_v50, %v5024_v49  ;;  %v12365_v31 = vld [vmem:[#allocation109_spill] sm:$0xff] }
 0x5ab   : > { %v9995_v60 = vsel %vm2514_vm6, %v4058_v61, %v4059_v25  ;;  %v9997_v58 = vadd.f32 %v4864_v41, %v4860_v10  ;;  %v5050_v51 = vstv %s9950_s0  ;;  %v5076_v36 = vstv %s9952_s20  ;;  %s10286_s0 = sld [smem:[#allocation7 + $0xc5]]  ;;  %s10288_s20 = sld [smem:[#allocation7 + $0x142]] }
 0x5ac   : > { %12361 = vst [vmem:[#allocation105_spill] sm:$0xff] %v9995_v60  ;;  %v10004_v7 = vsel %vm2335_vm8, %v3945_v19, %v3946_v22  ;;  %v2198_v47 = vadd.f32 %v2196_v33, %v2185_v0  ;;  %v5029_v41 = vrot.slane %v5025_v26, 1  ;;  %v5051_v61 = vmul.f32 %v5050_v51, %v12345_v59 }
 0x5ad   : > { %12362 = vst [vmem:[#allocation102_spill] sm:$0xff] %v9997_v58  ;;  %12364 = vst [vmem:[#allocation104_spill] sm:$0xff] %v10004_v7  ;;  %v5052_v10 = vmul.f32 %v12363_v50, %v5050_v51  ;;  %3896 = vrot.lane.b32.xlu0 %v9369_v54, %s7244_s18  ;;  %4950 = vrot.lane.b32.xlu1 %v12365_v31, %s7245_s15  ;;  %v5030_v25 = vrot.slane %v5026_v55, 1  ;;  %v5077_v49 = vmul.f32 %v5076_v36, %v12345_v59 }
 0x5ae   : > { %v5078_v19 = vmul.f32 %v12363_v50, %v5076_v36  ;;  %v12366_v22 = vstv %s9760_s16  ;;  %v2211_v0 = vadd.f32 %v9663_v37, %v2198_v47  ;;  %v5055_v26 = vrot.slane %v5051_v61, 1  ;;  %v2274_v58 = vpop.permute.xlu1 %2273  ;;  %v10029_v31 = vpop.permute.xlu0 %2566  ;;  %s10040_s16 = sld [smem:[#allocation7 + $0x111]] }
 0x5af   : > { %v3967_v33 = vmul.f32 %v12366_v22, %v8415_v57  ;;  %v5056_v51 = vrot.slane %v5052_v10, 1  ;;  %v12367_v18 = vmov %v12366_v22  ;;  %v10032_v55 = vsel %vm637_vm3, %v5029_v41, %v5030_v25  ;;  %v12369_v41 = vld [vmem:[#allocation111_spill] sm:$0xff] }
 0x5b0   : > { %v3968_v54 = vmul.f32 %v8404_v35, %v12367_v18  ;;  %v5081_v36 = vrot.slane %v5077_v49, 1  ;;  %v5082_v7 = vrot.slane %v5078_v19, 1  ;;  %v2224_v22 = vadd.f32 %v2222_v24, %v2211_v0  ;;  %v12368_v18 = vld [vmem:[#allocation110_spill] sm:$0xff] }
 0x5b1   : > { %v3971_v60 = vrot.slane %v3967_v33, 3  ;;  %v10035_v2 = vsel %vm637_vm3, %v5055_v26, %v5056_v51  ;;  %v5102_v47 = vstv %s9981_s22  ;;  %3922 = vrot.lane.b32.xlu0 %v12368_v18, %s12184_s19  ;;  %4993 = vrot.lane.b32.xlu1 %v12369_v41, %s7242_s12  ;;  %v5519_v25 = vstv %s9991_s8  ;;  %s10300_s22 = sld [smem:[#allocation7 + $0xc8]] }
 0x5b2   : > { %v3972_v37 = vrot.slane %v3968_v54, 3  ;;  %v10047_v61 = vsel %vm637_vm3, %v5081_v36, %v5082_v7  ;;  %v5103_v24 = vmul.f32 %v5102_v47, %v12345_v59  ;;  %v5104_v10 = vmul.f32 %v12363_v50, %v5102_v47  ;;  %v2300_v26 = vpop.permute.xlu1 %2299  ;;  %v10058_v51 = vpop.permute.xlu0 %2592  ;;  %s10317_s8 = sld [smem:[#allocation7 + $0xc0]] }
 0x5b3   : > { %12370 = vst [vmem:[#allocation93_spill] sm:$0xff] %v10047_v61  ;;  %v2237_v49 = vadd.f32 %v9688_v48, %v2224_v22  ;;  %v5520_v33 = vmul.f32 %v5519_v25, %v8884_v34  ;;  %v5521_v0 = vmul.f32 %v8873_v30, %v5519_v25  ;;  %v5128_v36 = vstv %s10008_s29  ;;  %v12372_v22 = vld [vmem:[#allocation113_spill] sm:$0xff]  ;;  %s10319_s29 = sld [smem:[#allocation7 + $0x9c]] }
 0x5b4   : > { %v10054_v19 = vsel %vm2335_vm8, %v3971_v60, %v3972_v37  ;;  %v5107_v7 = vrot.slane %v5103_v24, 1  ;;  %v5108_v54 = vrot.slane %v5104_v10, 1  ;;  %v5545_v18 = vstv %s10010_s21  ;;  %s10331_s21 = sld [smem:[#allocation7 + $0x9d]] }
 0x5b5   : > { %12371 = vst [vmem:[#allocation109_spill] sm:$0xff] %v10054_v19  ;;  %v2250_v47 = vadd.f32 %v2248_v56, %v2237_v49  ;;  %v5524_v41 = vrot.slane %v5520_v33, 4  ;;  %v5525_v48 = vrot.slane %v5521_v0, 4  ;;  %v5129_v60 = vmul.f32 %v5128_v36, %v12345_v59  ;;  %3373 = vrot.lane.b32.xlu0 %v9436_v4, %s7242_s12  ;;  %5019 = vrot.lane.b32.xlu1 %v12372_v22, %s7241_s27 }
 0x5b6   : > { %v10070_v37 = vsel %vm637_vm3, %v5107_v7, %v5108_v54  ;;  %v5130_v24 = vmul.f32 %v12363_v50, %v5128_v36  ;;  %v5546_v10 = vmul.f32 %v5545_v18, %v8884_v34  ;;  %v4079_v56 = vstv %s10023_s9  ;;  %v2326_v0 = vpop.permute.xlu1 %2325  ;;  %v10080_v22 = vpop.permute.xlu0 %2618  ;;  %s10340_s9 = sld [smem:[#allocation7 + $0xc9]] }
 0x5b7   : > { %12373 = vst [vmem:[#allocation110_spill] sm:$0xff] %v10070_v37  ;;  %v2263_v25 = vadd.f32 %v9711_v15, %v2250_v47  ;;  %v10077_v49 = vsel %vm2514_vm6, %v5524_v41, %v5525_v48  ;;  %v5133_v33 = vrot.slane %v5129_v60, 1  ;;  %v5547_v4 = vmul.f32 %v8873_v30, %v5545_v18  ;;  %v12374_v18 = vld [vmem:[#allocation116_spill] sm:$0xff] }
 0x5b8   : > { %v5134_v7 = vrot.slane %v5130_v24, 1  ;;  %v5550_v54 = vrot.slane %v5546_v10, 4  ;;  %v4080_v36 = vmul.f32 %v4079_v56, %v8448_v23  ;;  %v4081_v37 = vmul.f32 %v8437_v1, %v4079_v56 }
 0x5b9   : > { %v2276_v19 = vadd.f32 %v2274_v58, %v2263_v25  ;;  %v5551_v61 = vrot.slane %v5547_v4, 4  ;;  %v4014_v15 = vstv %s10038_s6  ;;  %v4998_v47 = vstv %s10040_s16  ;;  %3389 = vrot.lane.b32.xlu0 %v9452_v6, %s7241_s27  ;;  %5045 = vrot.lane.b32.xlu1 %v12374_v18, %s7244_s18  ;;  %s10360_s6 = sld [smem:[#allocation7 + $0x5f]]  ;;  %s10374_s16 = sld [smem:[#allocation7 + $0xca]] }
 0x5ba   : > { %v10093_v41 = vsel %vm637_vm3, %v5133_v33, %v5134_v7  ;;  %v4084_v48 = vrot.slane %v4080_v36, 4  ;;  %v4085_v60 = vrot.slane %v4081_v37, 4  ;;  %v4015_v24 = vmul.f32 %v4014_v15, %v8415_v57  ;;  %v10106_v25 = vpop.permute.xlu1 %2374  ;;  %v10108_v33 = vpop.permute.xlu0 %2631 }
 0x5bb   : > { %v2289_v58 = vadd.f32 %v9743_v38, %v2276_v19  ;;  %v10102_v10 = vsel %vm2514_vm6, %v5550_v54, %v5551_v61  ;;  %v4016_v6 = vmul.f32 %v8404_v35, %v4014_v15  ;;  %v4999_v56 = vmul.f32 %v4998_v47, %v12345_v59  ;;  %v12375_v15 = vld [vmem:[#allocation119_spill] sm:$0xff] }
 0x5bc   : > { %v10111_v37 = vsel %vm2514_vm6, %v4084_v48, %v4085_v60  ;;  %v4019_v4 = vrot.slane %v4015_v24, 4  ;;  %v5000_v7 = vmul.f32 %v12363_v50, %v4998_v47  ;;  %v4105_v36 = vstv %s10062_s24  ;;  %s10388_s24 = sld [smem:[#allocation7 + $0x144]] }
 0x5bd   : > { %v2302_v38 = vadd.f32 %v2300_v26, %v2289_v58  ;;  %v4020_v61 = vrot.slane %v4016_v6, 4  ;;  %v5003_v19 = vrot.slane %v4999_v56, 1  ;;  %v4106_v54 = vmul.f32 %v4105_v36, %v8448_v23  ;;  %3405 = vrot.lane.b32.xlu0 %v9748_v11, %s7244_s18  ;;  %5071 = vrot.lane.b32.xlu1 %v12375_v15, %s12184_s19 }
 0x5be   : > { %v5004_v18 = vrot.slane %v5000_v7, 1  ;;  %v4107_v48 = vmul.f32 %v8437_v1, %v4105_v36  ;;  %v2935_v47 = vrot.slane %v9786_v5, 6  ;;  %v3025_v60 = vrot.slane %v9791_v21, 6  ;;  %v10130_v11 = vpop.permute.xlu1 %2400  ;;  %v10132_v56 = vpop.permute.xlu0 %2657 }
 0x5bf   : > { %v2315_v26 = vadd.f32 %v9797_v16, %v2302_v38  ;;  %v10127_v24 = vsel %vm2514_vm6, %v4019_v4, %v4020_v61  ;;  %v4110_v58 = vrot.slane %v4106_v54, 4  ;;  %v3026_v6 = vrot.slane %v9843_v62, 6 }
 0x5c0   : > { %v10135_v7 = vsel %vm637_vm3, %v5003_v19, %v5004_v18  ;;  %v4111_v5 = vrot.slane %v4107_v48, 4  ;;  %v12376_v21 = vrot.slane %v9772_v32, 6  ;;  %v5571_v4 = vstv %s10084_s10  ;;  %v12378_v19 = vld [vmem:[#allocation120_spill] sm:$0xff]  ;;  %v12380_v48 = vld [vmem:[#allocation114_spill] sm:$0xff]  ;;  %s10399_s10 = sld [smem:[#allocation7 + $0xaa]] }
 0x5c1   : > { %v2328_v36 = vadd.f32 %v2326_v0, %v2315_v26  ;;  %v10146_v62 = vsel %vm2872_vm9, %v3025_v60, %v3026_v6  ;;  %v5572_v38 = vmul.f32 %v5571_v4, %v8884_v34  ;;  %v5573_v61 = vmul.f32 %v8873_v30, %v5571_v4  ;;  %3421 = vrot.lane.b32.xlu0 %v9753_v28, %s12184_s19 }
 0x5c2   : > { %v10140_v16 = vsel %vm2872_vm9, %v12376_v21, %v2935_v47  ;;  %12377 = vst [vmem:[#allocation111_spill] sm:$0xff] %v10146_v62  ;;  %5097 = vrot.lane.b32.xlu1 %v12378_v19, %s12186_s14  ;;  %v10155_v32 = vsel %vm2514_vm6, %v4110_v58, %v4111_v5  ;;  %v5202_v54 = vstv %s10096_s23  ;;  %v4040_v15 = vstv %s10098_s28  ;;  %v10168_v6 = vpop.permute.xlu1 %2426  ;;  %v10170_v21 = vpop.permute.xlu0 %2683  ;;  %s10402_s23 = sld [smem:[#allocation7 + $0xcb]]  ;;  %s10420_s28 = sld [smem:[#allocation7 + $0xc2]] }
 0x5c3   : > { %v12379_v0 = vstv %s9709_s5  ;;  %v2340_v47 = vadd.f32 %v12380_v48, %v2328_v36  ;;  %v5576_v60 = vrot.slane %v5572_v38, 4  ;;  %v5577_v26 = vrot.slane %v5573_v61, 4 }
 0x5c4   : > { %v2956_v18 = vmul.f32 %v12379_v0, %v8376_v40  ;;  %v5203_v28 = vmul.f32 %v5202_v54, %v12345_v59  ;;  %v5204_v58 = vmul.f32 %v12363_v50, %v5202_v54  ;;  %v4041_v5 = vmul.f32 %v4040_v15, %v8415_v57  ;;  %v12381_v0 = vld [vmem:[#allocation117_spill] sm:$0xff] }
 0x5c5   : > { %v4042_v4 = vmul.f32 %v8404_v35, %v4040_v15  ;;  %v5228_v19 = vstv %s10115_s11  ;;  %v2351_v36 = vadd.f32 %v12381_v0, %v2340_v47  ;;  %v10178_v38 = vsel %vm2514_vm6, %v5576_v60, %v5577_v26  ;;  %3437 = vrot.lane.b32.xlu0 %v9758_v45, %s12186_s14  ;;  %s10426_s11 = sld [smem:[#allocation7 + $0xcc]] }
 0x5c6   : > { %12382 = vst [vmem:[#allocation113_spill] sm:$0xff] %v10178_v38  ;;  %v5207_v61 = vrot.slane %v5203_v28, 2  ;;  %v5229_v48 = vmul.f32 %v5228_v19, %v12345_v59  ;;  %5123 = vrot.lane.b32.xlu1 %v9511_v13, %s7245_s15  ;;  %v5208_v54 = vrot.slane %v5204_v58, 2  ;;  %v4045_v15 = vrot.slane %v4041_v5, 4  ;;  %v10194_v45 = vpop.permute.xlu1 %2452  ;;  %v10196_v13 = vpop.permute.xlu0 %2758 }
 0x5c7   : > { %v4046_v62 = vrot.slane %v4042_v4, 4  ;;  %v5230_v47 = vmul.f32 %v12363_v50, %v5228_v19  ;;  %v2364_v60 = vadd.f32 %v9820_v9, %v2351_v36  ;;  %v12383_v28 = vstv %s9709_s5  ;;  %s10205_s5 = sld [smem:[#allocation7 + $0xbe]] }
 0x5c8   : > { %v5233_v26 = vrot.slane %v5229_v48, 2  ;;  %v2957_v0 = vmul.f32 %v8367_v39, %v12383_v28  ;;  %v2960_v38 = vrot.slane %v2956_v18, 6  ;;  %v10199_v58 = vsel %vm715_vm4, %v5207_v61, %v5208_v54  ;;  %v12385_v61 = vld [vmem:[#allocation122_spill] sm:$0xff] }
 0x5c9   : > { %v10202_v5 = vsel %vm2514_vm6, %v4045_v15, %v4046_v62  ;;  %v5234_v9 = vrot.slane %v5230_v47, 2  ;;  %v3458_v4 = vstv %s10143_s30  ;;  %v2377_v18 = vadd.f32 %v10106_v25, %v2364_v60  ;;  %3453 = vrot.lane.b32.xlu0 %v9766_v3, %s7245_s15  ;;  %s10446_s30 = sld [smem:[#allocation7 + $0xcd]] }
 0x5ca   : > { %12384 = vst [vmem:[#allocation116_spill] sm:$0xff] %v10202_v5  ;;  %v2961_v19 = vrot.slane %v2957_v0, 6  ;;  %v3459_v36 = vmul.f32 %v3458_v4, %v8415_v57  ;;  %v3460_v48 = vmul.f32 %v8404_v35, %v3458_v4  ;;  %5171 = vrot.lane.b32.xlu1 %v12385_v61, %s7242_s12  ;;  %v12386_v62 = vstv %s9934_s7  ;;  %v10230_v4 = vpop.permute.xlu1 %2478  ;;  %v10232_v61 = vpop.permute.xlu0 %2784  ;;  %s10256_s7 = sld [smem:[#allocation7 + $0xc3]]  ;;  %v12394_v5 = vld [vmem:[#allocation128_spill] sm:$0xff] }
 0x5cb   : > { %v10217_v54 = vmul.f32 %v12386_v62, %v12345_v59  ;;  %v10220_v15 = vsel %vm715_vm4, %v5233_v26, %v5234_v9  ;;  %v3469_v47 = vstv %s10162_s3  ;;  %v5254_v25 = vstv %s10166_s4  ;;  %12389 = vst [vmem:[#allocation114_spill] sm:$0xff] %v10232_v61  ;;  %s10460_s3 = sld [smem:[#allocation7 + $0x61]]  ;;  %s10474_s4 = sld [smem:[#allocation7 + $0xc4]] }
 0x5cc   : > { %12387 = vst [vmem:[#allocation119_spill] sm:$0xff] %v10220_v15  ;;  %v2390_v60 = vadd.f32 %v9853_v12, %v2377_v18  ;;  %v10226_v28 = vsel %vm2872_vm9, %v2960_v38, %v2961_v19  ;;  %v3463_v3 = vrot.slane %v3459_v36, 1  ;;  %v3464_v0 = vrot.slane %v3460_v48, 1  ;;  %v12391_v36 = vld [vmem:[#allocation124_spill] sm:$0xff]  ;;  %v12392_v48 = vld [vmem:[#allocation125_spill] sm:$0xff] }
 0x5cd   : > { %12388 = vst [vmem:[#allocation120_spill] sm:$0xff] %v10226_v28  ;;  %v3470_v26 = vmul.f32 %v3469_v47, %v8448_v23  ;;  %v3471_v9 = vmul.f32 %v8437_v1, %v3469_v47  ;;  %v5255_v62 = vmul.f32 %v5254_v25, %v12345_v59  ;;  %v5256_v15 = vmul.f32 %v12363_v50, %v5254_v25 }
 0x5ce   : > { %v2403_v12 = vadd.f32 %v10130_v11, %v2390_v60  ;;  %v10242_v38 = vsel %vm637_vm3, %v3463_v3, %v3464_v0  ;;  %v5597_v18 = vstv %s10181_s13  ;;  %v5280_v19 = vstv %s10192_s2  ;;  %3501 = vrot.lane.b32.xlu0 %v12391_v36, %s7242_s12  ;;  %5197 = vrot.lane.b32.xlu1 %v12392_v48, %s7241_s27  ;;  %v10258_v36 = vpop.permute.xlu1 %2504  ;;  %v10260_v48 = vpop.permute.xlu0 %2810  ;;  %s10485_s13 = sld [smem:[#allocation7 + $0xce]]  ;;  %s10488_s2 = sld [smem:[#allocation7 + $0xcf]] }
 0x5cf   : > { %12390 = vst [vmem:[#allocation117_spill] sm:$0xff] %v10242_v38  ;;  %v3474_v47 = vrot.slane %v3470_v26, 1  ;;  %v3475_v61 = vrot.slane %v3471_v9, 1  ;;  %v5259_v28 = vrot.slane %v5255_v62, 2  ;;  %v5260_v25 = vrot.slane %v5256_v15, 2  ;;  %12393 = vst [vmem:[#allocation122_spill] sm:$0xff] %v10260_v48 }
 0x5d0   : > { %v2416_v11 = vadd.f32 %v9887_v42, %v2403_v12  ;;  %v5598_v60 = vmul.f32 %v5597_v18, %v8884_v34  ;;  %v5599_v3 = vmul.f32 %v8873_v30, %v5597_v18  ;;  %v5281_v0 = vmul.f32 %v5280_v19, %v12345_v59  ;;  %v12395_v48 = vld [vmem:[#allocation95_spill] sm:$0xff] }
 0x5d1   : > { %v10263_v26 = vsel %vm637_vm3, %v3474_v47, %v3475_v61  ;;  %v10266_v15 = vsel %vm715_vm4, %v5259_v28, %v5260_v25  ;;  %v5282_v42 = vmul.f32 %v12363_v50, %v5280_v19  ;;  %v4066_v9 = vstv %s10205_s5  ;;  %s10499_s5 = sld [smem:[#allocation7 + $0x103]] }
 0x5d2   : > { %v2429_v62 = vadd.f32 %v10168_v6, %v2416_v11  ;;  %v5602_v12 = vrot.slane %v5598_v60, 4  ;;  %v5603_v18 = vrot.slane %v5599_v3, 4  ;;  %v5285_v38 = vrot.slane %v5281_v0, 2  ;;  %3527 = vrot.lane.b32.xlu0 %v12394_v5, %s7241_s27  ;;  %5223 = vrot.lane.b32.xlu1 %v12395_v48, %s7244_s18  ;;  %v10290_v5 = vpop.permute.xlu1 %2553  ;;  %v10292_v3 = vpop.permute.xlu0 %2836 }
 0x5d3   : > { %v5286_v61 = vrot.slane %v5282_v42, 2  ;;  %v4067_v28 = vmul.f32 %v4066_v9, %v8415_v57  ;;  %v4068_v19 = vmul.f32 %v8404_v35, %v4066_v9  ;;  %v5306_v47 = vstv %s10228_s25  ;;  %12396 = vst [vmem:[#allocation124_spill] sm:$0xff] %v10292_v3  ;;  %s10528_s25 = sld [smem:[#allocation7 + $0xab]] }
 0x5d4   : > { %v2442_v6 = vadd.f32 %v9917_v46, %v2429_v62  ;;  %v10282_v25 = vsel %vm2514_vm6, %v5602_v12, %v5603_v18  ;;  %v5307_v11 = vmul.f32 %v5306_v47, %v12345_v59  ;;  %v5308_v60 = vmul.f32 %v12363_v50, %v5306_v47 }
 0x5d5   : > { %v10295_v0 = vsel %vm715_vm4, %v5285_v38, %v5286_v61  ;;  %v4071_v46 = vrot.slane %v4067_v28, 4  ;;  %v4072_v48 = vrot.slane %v4068_v19, 4  ;;  %v5176_v42 = vstv %s10238_s26  ;;  %s10530_s26 = sld [smem:[#allocation7 + $0x54]] }
 0x5d6   : > { %v2455_v9 = vadd.f32 %v10194_v45, %v2442_v6  ;;  %v5311_v62 = vrot.slane %v5307_v11, 2  ;;  %v5312_v12 = vrot.slane %v5308_v60, 2  ;;  %v5177_v18 = vmul.f32 %v5176_v42, %v12345_v59  ;;  %3553 = vrot.lane.b32.xlu0 %v9586_v20, %s7244_s18  ;;  %5249 = vrot.lane.b32.xlu1 %v9602_v29, %s12184_s19  ;;  %v10321_v29 = vpop.permute.xlu1 %2579  ;;  %v10323_v11 = vpop.permute.xlu0 %3365 }
 0x5d7   : > { %v10307_v38 = vsel %vm2514_vm6, %v4071_v46, %v4072_v48  ;;  %v5178_v61 = vmul.f32 %v12363_v50, %v5176_v42  ;;  %v4131_v28 = vstv %s10256_s7  ;;  %v2981_v45 = vstv %s10250_s17  ;;  %s10541_s17 = sld [smem:[#allocation7 + $0x12d]]  ;;  %s10546_s7 = sld [smem:[#allocation7 + $0x12f]] }
 0x5d8   : > { %v2468_v19 = vadd.f32 %v9942_v14, %v2455_v9  ;;  %v10314_v47 = vsel %vm715_vm4, %v5311_v62, %v5312_v12  ;;  %v5181_v6 = vrot.slane %v5177_v18, 2  ;;  %v4132_v20 = vmul.f32 %v4131_v28, %v8448_v23 }
 0x5d9   : > { %v5182_v60 = vrot.slane %v5178_v61, 2  ;;  %v4133_v46 = vmul.f32 %v8437_v1, %v4131_v28  ;;  %v2982_v48 = vmul.f32 %v2981_v45, %v8376_v40  ;;  %v2983_v14 = vmul.f32 %v8367_v39, %v2981_v45 }
 0x5da   : > { %v2481_v42 = vadd.f32 %v10230_v4, %v2468_v19  ;;  %v4136_v62 = vrot.slane %v4132_v20, 4  ;;  %v4157_v12 = vstv %s10286_s0  ;;  %3579 = vrot.lane.b32.xlu0 %v9632_v63, %s12184_s19  ;;  %3961 = vrot.lane.b32.xlu1 %v9635_v17, %s12186_s14  ;;  %v5623_v9 = vstv %s10288_s20  ;;  %v10346_v63 = vpop.permute.xlu1 %2605  ;;  %v10348_v3 = vpop.permute.xlu0 %3381  ;;  %s10557_s0 = sld [smem:[#allocation7 + $0x131]]  ;;  %s10559_s20 = sld [smem:[#allocation7 + $0x148]] }
 0x5db   : > { %v10338_v18 = vsel %vm715_vm4, %v5181_v6, %v5182_v60  ;;  %v4137_v61 = vrot.slane %v4133_v46, 4  ;;  %v2986_v28 = vrot.slane %v2982_v48, 6  ;;  %v2987_v45 = vrot.slane %v2983_v14, 6 }
 0x5dc   : > { %12397 = vst [vmem:[#allocation125_spill] sm:$0xff] %v10338_v18  ;;  %v2494_v4 = vadd.f32 %v9967_v27, %v2481_v42  ;;  %v4158_v19 = vmul.f32 %v4157_v12, %v8448_v23  ;;  %v4159_v20 = vmul.f32 %v8437_v1, %v4157_v12  ;;  %v5624_v60 = vmul.f32 %v5623_v9, %v8884_v34 }
 0x5dd   : > { %v10351_v17 = vsel %vm2514_vm6, %v4136_v62, %v4137_v61  ;;  %v10354_v6 = vsel %vm2872_vm9, %v2986_v28, %v2987_v45  ;;  %v5625_v27 = vmul.f32 %v8873_v30, %v5623_v9  ;;  %v4192_v42 = vstv %s10300_s22  ;;  %v12400_v9 = vld [vmem:[#allocation126_spill] sm:$0xff]  ;;  %s10572_s22 = sld [smem:[#allocation7 + $0x133]] }
 0x5de   : > { %12398 = vst [vmem:[#allocation128_spill] sm:$0xff] %v10351_v17  ;;  %12399 = vst [vmem:[#allocation95_spill] sm:$0xff] %v10354_v6  ;;  %v2507_v46 = vadd.f32 %v10258_v36, %v2494_v4  ;;  %v4162_v48 = vrot.slane %v4158_v19, 4  ;;  %v4163_v14 = vrot.slane %v4159_v20, 4  ;;  %3605 = vrot.lane.b32.xlu0 %v9666_v44, %s12186_s14  ;;  %3987 = vrot.lane.b32.xlu1 %v9672_v52, %s7245_s15  ;;  %v5628_v62 = vrot.slane %v5624_v60, 4  ;;  %v10376_v44 = vpop.permute.xlu1 %2732  ;;  %v10378_v52 = vpop.permute.xlu0 %3397  ;;  %v12404_v6 = vld [vmem:[#allocation96_spill] sm:$0xff] }
 0x5df   : > { %v5629_v12 = vrot.slane %v5625_v27, 4  ;;  %v4193_v61 = vmul.f32 %v4192_v42, %v8415_v57  ;;  %v4194_v28 = vmul.f32 %v8404_v35, %v4192_v42  ;;  %v4092_v4 = vstv %s10317_s8  ;;  %v12403_v42 = vld [vmem:[#allocation129_spill] sm:$0xff]  ;;  %s10588_s8 = sld [smem:[#allocation7 + $0x14a]] }
 0x5e0   : > { %v2519_v45 = vadd.f32 %v12400_v9, %v2507_v46  ;;  %v10370_v36 = vsel %vm2514_vm6, %v4162_v48, %v4163_v14  ;;  %v3636_v19 = vstv %s10319_s29  ;;  %v4093_v46 = vmul.f32 %v4092_v4, %v8415_v57  ;;  %s10612_s29 = sld [smem:[#allocation7 + $0x14c]] }
 0x5e1   : > { %12401 = vst [vmem:[#allocation126_spill] sm:$0xff] %v10370_v36  ;;  %v10381_v20 = vsel %vm2514_vm6, %v5628_v62, %v5629_v12  ;;  %v4197_v60 = vrot.slane %v4193_v61, 5  ;;  %v4198_v27 = vrot.slane %v4194_v28, 5  ;;  %v4094_v14 = vmul.f32 %v8404_v35, %v4092_v4  ;;  %v12405_v62 = vld [vmem:[#allocation133_spill] sm:$0xff] }
 0x5e2   : > { %12402 = vst [vmem:[#allocation144_spill] sm:$0xff] %v10381_v20  ;;  %v2530_v48 = vadd.f32 %v12403_v42, %v2519_v45  ;;  %v3637_v9 = vmul.f32 %v3636_v19, %v8415_v57  ;;  %v3638_v36 = vmul.f32 %v8404_v35, %v3636_v19  ;;  %3631 = vrot.lane.b32.xlu0 %v12404_v6, %s7245_s15  ;;  %v4097_v61 = vrot.slane %v4093_v46, 4  ;;  %v10404_v6 = vpop.permute.xlu1 %3445  ;;  %v10406_v17 = vpop.permute.xlu0 %3413 }
 0x5e3   : > { %2898 = vrot.lane.b32.xlu1 %v12405_v62, %s7242_s12  ;;  %v10395_v12 = vsel %vm2693_vm7, %v4197_v60, %v4198_v27  ;;  %v3647_v28 = vstv %s10331_s21  ;;  %v4205_v45 = vstv %s10340_s9  ;;  %v4098_v19 = vrot.slane %v4094_v14, 4  ;;  %s10623_s21 = sld [smem:[#allocation7 + $0x137]]  ;;  %s10645_s9 = sld [smem:[#allocation7 + $0x14e]] }
 0x5e4   : > { %12406 = vst [vmem:[#allocation129_spill] sm:$0xff] %v10395_v12  ;;  %v2543_v4 = vadd.f32 %v10000_v8, %v2530_v48  ;;  %v3641_v42 = vrot.slane %v3637_v9, 2  ;;  %v3642_v20 = vrot.slane %v3638_v36, 2  ;;  %v3648_v60 = vmul.f32 %v3647_v28, %v8448_v23  ;;  %v12409_v9 = vld [vmem:[#allocation97_spill] sm:$0xff] }
 0x5e5   : > { %v3649_v27 = vmul.f32 %v8437_v1, %v3647_v28  ;;  %v4206_v46 = vmul.f32 %v4205_v45, %v8448_v23  ;;  %v4207_v62 = vmul.f32 %v8437_v1, %v4205_v45  ;;  %v10414_v48 = vsel %vm2514_vm6, %v4097_v61, %v4098_v19  ;;  %v12410_v28 = vld [vmem:[#allocation134_spill] sm:$0xff] }
 0x5e6   : > { %v2556_v8 = vadd.f32 %v10290_v5, %v2543_v4  ;;  %12407 = vst [vmem:[#allocation96_spill] sm:$0xff] %v10414_v48  ;;  %v10417_v36 = vsel %vm715_vm4, %v3641_v42, %v3642_v20  ;;  %v3007_v14 = vstv %s10360_s6  ;;  %3679 = vrot.lane.b32.xlu0 %v12409_v9, %s7242_s12  ;;  %v3652_v12 = vrot.slane %v3648_v60, 2  ;;  %v10432_v42 = vpop.permute.xlu1 %3618  ;;  %v10434_v9 = vpop.permute.xlu0 %3429  ;;  %s10647_s6 = sld [smem:[#allocation7 + $0x13b]] }
 0x5e7   : > { %12408 = vst [vmem:[#allocation133_spill] sm:$0xff] %v10417_v36  ;;  %2911 = vrot.lane.b32.xlu1 %v12410_v28, %s7242_s12  ;;  %v3653_v45 = vrot.slane %v3649_v27, 2  ;;  %v4210_v18 = vrot.slane %v4206_v46, 5  ;;  %v4211_v5 = vrot.slane %v4207_v62, 5  ;;  %v3008_v20 = vmul.f32 %v3007_v14, %v8376_v40  ;;  %12411 = vst [vmem:[#allocation97_spill] sm:$0xff] %v10432_v42  ;;  %v12414_v36 = vld [vmem:[#allocation98_spill] sm:$0xff] }
 0x5e8   : > { %v2569_v61 = vadd.f32 %v10029_v31, %v2556_v8  ;;  %v3009_v4 = vmul.f32 %v8367_v39, %v3007_v14  ;;  %v4218_v19 = vstv %s10374_s16  ;;  %v5649_v14 = vstv %s10388_s24  ;;  %v12419_v42 = vld [vmem:[#allocation99_spill] sm:$0xff]  ;;  %s10670_s16 = sld [smem:[#allocation7 + $0x150]]  ;;  %s10688_s24 = sld [smem:[#allocation7 + $0x152]] }
 0x5e9   : > { %v10437_v28 = vsel %vm715_vm4, %v3652_v12, %v3653_v45  ;;  %v10440_v60 = vsel %vm2693_vm7, %v4210_v18, %v4211_v5  ;;  %v4219_v27 = vmul.f32 %v4218_v19, %v8415_v57  ;;  %v4220_v31 = vmul.f32 %v8404_v35, %v4218_v19  ;;  %v12415_v12 = vld [vmem:[#allocation135_spill] sm:$0xff] }
 0x5ea   : > { %12412 = vst [vmem:[#allocation134_spill] sm:$0xff] %v10437_v28  ;;  %12413 = vst [vmem:[#allocation145_spill] sm:$0xff] %v10440_v60  ;;  %v2582_v46 = vadd.f32 %v10321_v29, %v2569_v61  ;;  %v3012_v62 = vrot.slane %v3008_v20, 6  ;;  %v3013_v8 = vrot.slane %v3009_v4, 6  ;;  %3705 = vrot.lane.b32.xlu0 %v12414_v36, %s7241_s27  ;;  %v5650_v5 = vmul.f32 %v5649_v14, %v8884_v34  ;;  %v10462_v36 = vpop.permute.xlu0 %3488  ;;  %v10464_v4 = vpop.permute.xlu1 %3731 }
 0x5eb   : > { %2924 = vrot.lane.b32.xlu1 %v12415_v12, %s7241_s27  ;;  %v4223_v18 = vrot.slane %v4219_v27, 5  ;;  %v4224_v45 = vrot.slane %v4220_v31, 5  ;;  %v5651_v28 = vmul.f32 %v8873_v30, %v5649_v14  ;;  %v3814_v61 = vstv %s10399_s10  ;;  %12417 = vst [vmem:[#allocation135_spill] sm:$0xff] %v10464_v4  ;;  %s10723_s10 = sld [smem:[#allocation7 + $0x55]] }
 0x5ec   : > { %v2595_v19 = vadd.f32 %v10058_v51, %v2582_v46  ;;  %v10456_v29 = vsel %vm2872_vm9, %v3012_v62, %v3013_v8  ;;  %v4231_v20 = vstv %s10402_s23  ;;  %v5654_v31 = vrot.slane %v5650_v5, 4  ;;  %s10729_s23 = sld [smem:[#allocation7 + $0x13d]] }
 0x5ed   : > { %12416 = vst [vmem:[#allocation98_spill] sm:$0xff] %v10456_v29  ;;  %v10467_v27 = vsel %vm2693_vm7, %v4223_v18, %v4224_v45  ;;  %v5655_v14 = vrot.slane %v5651_v28, 4  ;;  %v3815_v51 = vmul.f32 %v3814_v61, %v8415_v57  ;;  %v3816_v62 = vmul.f32 %v8404_v35, %v3814_v61  ;;  %v12420_v18 = vld [vmem:[#allocation101_spill] sm:$0xff] }
 0x5ee   : > { %12418 = vst [vmem:[#allocation146_spill] sm:$0xff] %v10467_v27  ;;  %v2608_v46 = vadd.f32 %v10346_v63, %v2595_v19  ;;  %v4232_v8 = vmul.f32 %v4231_v20, %v8448_v23  ;;  %v4233_v12 = vmul.f32 %v8437_v1, %v4231_v20  ;;  %5275 = vrot.lane.b32.xlu0 %v12419_v42, %s12186_s14  ;;  %v4118_v5 = vstv %s10420_s28  ;;  %v10490_v42 = vpop.permute.xlu0 %3514  ;;  %v10492_v27 = vpop.permute.xlu1 %3757  ;;  %s10731_s28 = sld [smem:[#allocation7 + $0x13f]] }
 0x5ef   : > { %4894 = vrot.lane.b32.xlu1 %v12420_v18, %s7241_s27  ;;  %v10481_v28 = vsel %vm2514_vm6, %v5654_v31, %v5655_v14  ;;  %v3819_v45 = vrot.slane %v3815_v51, 3  ;;  %v4244_v63 = vstv %s10426_s11  ;;  %v3820_v61 = vrot.slane %v3816_v62, 3  ;;  %12422 = vst [vmem:[#allocation101_spill] sm:$0xff] %v10492_v27  ;;  %s10751_s11 = sld [smem:[#allocation7 + $0xd2]] }
 0x5f0   : > { %12421 = vst [vmem:[#allocation99_spill] sm:$0xff] %v10481_v28  ;;  %v2621_v19 = vadd.f32 %v10080_v22, %v2608_v46  ;;  %v4236_v20 = vrot.slane %v4232_v8, 5  ;;  %v4237_v4 = vrot.slane %v4233_v12, 5  ;;  %v4119_v31 = vmul.f32 %v4118_v5, %v8415_v57  ;;  %v12425_v12 = vld [vmem:[#allocation100_spill] sm:$0xff] }
 0x5f1   : > { %v4120_v14 = vmul.f32 %v8404_v35, %v4118_v5  ;;  %v4245_v51 = vmul.f32 %v4244_v63, %v8415_v57  ;;  %v4246_v18 = vmul.f32 %v8404_v35, %v4244_v63  ;;  %v10502_v46 = vsel %vm2335_vm8, %v3819_v45, %v3820_v61  ;;  %v12426_v5 = vld [vmem:[#allocation94_spill] sm:$0xff] }
 0x5f2   : > { %v2634_v22 = vadd.f32 %v10108_v33, %v2621_v19  ;;  %12423 = vst [vmem:[#allocation147_spill] sm:$0xff] %v10502_v46  ;;  %v10505_v62 = vsel %vm2693_vm7, %v4236_v20, %v4237_v4  ;;  %v4257_v8 = vstv %s10446_s30  ;;  %5301 = vrot.lane.b32.xlu0 %v12425_v12, %s7245_s15  ;;  %v4123_v27 = vrot.slane %v4119_v31, 4  ;;  %v12427_v33 = vld [vmem:[#allocation106_spill] sm:$0xff]  ;;  %v10516_v20 = vpop.permute.xlu0 %3540  ;;  %v10518_v46 = vpop.permute.xlu1 %3783  ;;  %s10769_s30 = sld [smem:[#allocation7 + $0x141]] }
 0x5f3   : > { %12424 = vst [vmem:[#allocation148_spill] sm:$0xff] %v10505_v62  ;;  %4910 = vrot.lane.b32.xlu1 %v12426_v5, %s7244_s18  ;;  %v4124_v28 = vrot.slane %v4120_v14, 4  ;;  %v4249_v63 = vrot.slane %v4245_v51, 5  ;;  %v4250_v29 = vrot.slane %v4246_v18, 5  ;;  %v4258_v45 = vmul.f32 %v4257_v8, %v8448_v23  ;;  %12428 = vst [vmem:[#allocation100_spill] sm:$0xff] %v10518_v46 }
 0x5f4   : > { %v2647_v19 = vadd.f32 %v12427_v33, %v2634_v22  ;;  %v4259_v61 = vmul.f32 %v8437_v1, %v4257_v8  ;;  %v3033_v4 = vstv %s10460_s3  ;;  %v4144_v5 = vstv %s10474_s4  ;;  %s10771_s3 = sld [smem:[#allocation7 + $0x156]]  ;;  %s10784_s4 = sld [smem:[#allocation7 + $0x143]] }
 0x5f5   : > { %v10521_v12 = vsel %vm2514_vm6, %v4123_v27, %v4124_v28  ;;  %v10524_v31 = vsel %vm2693_vm7, %v4249_v63, %v4250_v29  ;;  %v3034_v14 = vmul.f32 %v3033_v4, %v8376_v40  ;;  %v3035_v51 = vmul.f32 %v8367_v39, %v3033_v4  ;;  %v12431_v27 = vld [vmem:[#allocation140_spill] sm:$0xff] }
 0x5f6   : > { %12429 = vst [vmem:[#allocation94_spill] sm:$0xff] %v10521_v12  ;;  %12430 = vst [vmem:[#allocation106_spill] sm:$0xff] %v10524_v31  ;;  %v2660_v18 = vadd.f32 %v10132_v56, %v2647_v19  ;;  %v4262_v22 = vrot.slane %v4258_v45, 5  ;;  %v4263_v8 = vrot.slane %v4259_v61, 5  ;;  %5349 = vrot.lane.b32.xlu0 %v12431_v27, %s7242_s12  ;;  %v4145_v63 = vmul.f32 %v4144_v5, %v8415_v57  ;;  %v12432_v4 = vld [vmem:[#allocation108_spill] sm:$0xff]  ;;  %v10550_v61 = vpop.permute.xlu0 %3566 }
 0x5f7   : > { %4926 = vrot.lane.b32.xlu1 %v9978_v43, %s12184_s19  ;;  %v3038_v29 = vrot.slane %v3034_v14, 6  ;;  %v3039_v28 = vrot.slane %v3035_v51, 6  ;;  %v4146_v33 = vmul.f32 %v8404_v35, %v4144_v5  ;;  %v4270_v19 = vstv %s10485_s13  ;;  %v10552_v43 = vpop.permute.xlu1 %3809  ;;  %s10792_s13 = sld [smem:[#allocation7 + $0x158]] }
 0x5f8   : > { %v2673_v46 = vadd.f32 %v12432_v4, %v2660_v18  ;;  %v10544_v56 = vsel %vm2693_vm7, %v4262_v22, %v4263_v8  ;;  %v4283_v45 = vstv %s10488_s2  ;;  %12434 = vst [vmem:[#allocation108_spill] sm:$0xff] %v10552_v43  ;;  %v4149_v51 = vrot.slane %v4145_v63, 4  ;;  %v12436_v4 = vld [vmem:[#allocation141_spill] sm:$0xff]  ;;  %s10794_s2 = sld [smem:[#allocation7 + $0x145]] }
 0x5f9   : > { %12433 = vst [vmem:[#allocation140_spill] sm:$0xff] %v10544_v56  ;;  %v10555_v14 = vsel %vm2872_vm9, %v3038_v29, %v3039_v28  ;;  %v4150_v5 = vrot.slane %v4146_v33, 4  ;;  %v4271_v18 = vmul.f32 %v4270_v19, %v8415_v57  ;;  %v4875_v8 = vstv %s10499_s5  ;;  %s10831_s5 = sld [smem:[#allocation7 + $0x15a]] }
 0x5fa   : > { %12435 = vst [vmem:[#allocation149_spill] sm:$0xff] %v10555_v14  ;;  %v2686_v22 = vadd.f32 %v10170_v21, %v2673_v46  ;;  %v4272_v27 = vmul.f32 %v8404_v35, %v4270_v19  ;;  %5375 = vrot.lane.b32.xlu0 %v12436_v4, %s7241_s27  ;;  %v12438_v21 = vld [vmem:[#allocation131_spill] sm:$0xff]  ;;  %v12439_v63 = vstv %s10271_s1  ;;  %v10579_v43 = vmul.f32 %v4283_v45, %v8448_v23  ;;  %v10581_v4 = vpop.permute.xlu0 %3592  ;;  %s10610_s1 = sld [smem:[#allocation7 + $0x135]] }
 0x5fb   : > { %4942 = vrot.lane.b32.xlu1 %v10217_v54, %s12186_s14  ;;  %v10570_v29 = vsel %vm2514_vm6, %v4149_v51, %v4150_v5  ;;  %v4275_v28 = vrot.slane %v4271_v18, 5  ;;  %v4956_v33 = vmul.f32 %v12439_v63, %v12345_v59  ;;  %12440 = vst [vmem:[#allocation131_spill] sm:$0xff] %v10581_v4  ;;  %v10583_v54 = vpop.permute.xlu1 %3857  ;;  %v10586_v51 = vmul.f32 %v4875_v8, %v12345_v59 }
 0x5fc   : > { %12437 = vst [vmem:[#allocation141_spill] sm:$0xff] %v10570_v29  ;;  %v2698_v46 = vadd.f32 %v12438_v21, %v2686_v22  ;;  %v4276_v19 = vrot.slane %v4272_v27, 5  ;;  %12441 = vst [vmem:[#allocation150_spill] sm:$0xff] %v10583_v54  ;;  %v10591_v5 = vmul.f32 %v8437_v1, %v4283_v45  ;;  %v3825_v18 = vstv %s10528_s25  ;;  %v12442_v21 = vld [vmem:[#allocation132_spill] sm:$0xff]  ;;  %v12444_v54 = vld [vmem:[#allocation142_spill] sm:$0xff]  ;;  %s10833_s25 = sld [smem:[#allocation7 + $0xb8]] }
 0x5fd   : > { %v5354_v63 = vstv %s10541_s17  ;;  %v5380_v29 = vstv %s10546_s7  ;;  %v5406_v56 = vstv %s10557_s0  ;;  %v5697_v12 = vstv %s10559_s20  ;;  %s10854_s17 = sld [smem:[#allocation7 + $0xd0]]  ;;  %s10863_s7 = sld [smem:[#allocation7 + $0x15c]] }
 0x5fe   : > { %v10596_v27 = vadd.f32 %v12442_v21, %v2698_v46  ;;  %v10601_v14 = vsel %vm2693_vm7, %v4275_v28, %v4276_v19  ;;  %5401 = vrot.lane.b32.xlu0 %v12444_v54, %s7244_s18  ;;  %v5355_v8 = vmul.f32 %v5354_v63, %v12345_v59  ;;  %v5356_v45 = vmul.f32 %v12363_v50, %v5354_v63  ;;  %v10618_v54 = vpop.permute.xlu0 %3666  ;;  %s10881_s0 = sld [smem:[#allocation7 + $0x10e]]  ;;  %s10897_s20 = sld [smem:[#allocation7 + $0x10f]] }
 0x5ff   : > { %12443 = vst [vmem:[#allocation132_spill] sm:$0xff] %v10601_v14  ;;  %4958 = vrot.lane.b32.xlu1 %v4956_v33, %s7245_s15  ;;  %v5381_v22 = vmul.f32 %v5380_v29, %v12345_v59  ;;  %v5382_v28 = vmul.f32 %v12363_v50, %v5380_v29  ;;  %v5407_v46 = vmul.f32 %v5406_v56, %v12345_v59  ;;  %12445 = vst [vmem:[#allocation142_spill] sm:$0xff] %v10618_v54  ;;  %v10620_v21 = vpop.permute.xlu1 %3883  ;;  %v12448_v33 = vld [vmem:[#allocation143_spill] sm:$0xff] }
 0x600   : > { %v5408_v19 = vmul.f32 %v12363_v50, %v5406_v56  ;;  %12446 = vst [vmem:[#allocation151_spill] sm:$0xff] %v10620_v21  ;;  %v5359_v63 = vrot.slane %v5355_v8, 3  ;;  %v5360_v14 = vrot.slane %v5356_v45, 3  ;;  %v10626_v29 = vmul.f32 %v3825_v18, %v8448_v23  ;;  %v12447_v56 = vld [vmem:[#allocation103_spill] sm:$0xff] }
 0x601   : > { %v5385_v31 = vrot.slane %v5381_v22, 3  ;;  %v5386_v62 = vrot.slane %v5382_v28, 3  ;;  %v5411_v60 = vrot.slane %v5407_v46, 3  ;;  %v5698_v22 = vmul.f32 %v5697_v12, %v8884_v34 }
 0x602   : > { %v5412_v4 = vrot.slane %v5408_v19, 3  ;;  %5427 = vrot.lane.b32.xlu0 %v12447_v56, %s12184_s19  ;;  %v10633_v8 = vsel %vm2335_vm8, %v5359_v63, %v5360_v14  ;;  %v5699_v45 = vmul.f32 %v8873_v30, %v5697_v12  ;;  %v5432_v28 = vstv %s10572_s22  ;;  %s10899_s22 = sld [smem:[#allocation7 + $0xd6]] }
 0x603   : > { %4035 = vrot.lane.b32.xlu1 %v12448_v33, %s7242_s12  ;;  %12449 = vst [vmem:[#allocation103_spill] sm:$0xff] %v10633_v8  ;;  %v10639_v46 = vsel %vm2335_vm8, %v5385_v31, %v5386_v62  ;;  %v5433_v56 = vmul.f32 %v5432_v28, %v12345_v59  ;;  %v4289_v14 = vrot.slane %v10591_v5, 5  ;;  %v10650_v33 = vpop.permute.xlu0 %3692  ;;  %v10652_v12 = vpop.permute.xlu1 %3909  ;;  %v5702_v63 = vrot.slane %v5698_v22, 5  ;;  %v12454_v5 = vld [vmem:[#allocation136_spill] sm:$0xff] }
 0x604   : > { %12450 = vst [vmem:[#allocation143_spill] sm:$0xff] %v10639_v46  ;;  %v10642_v19 = vsel %vm2335_vm8, %v5411_v60, %v5412_v4  ;;  %12452 = vst [vmem:[#allocation153_spill] sm:$0xff] %v10650_v33  ;;  %v5703_v62 = vrot.slane %v5699_v45, 5  ;;  %v5434_v31 = vmul.f32 %v12363_v50, %v5432_v28  ;;  %v5723_v60 = vstv %s10588_s8  ;;  %v12456_v33 = vld [vmem:[#allocation92_spill] sm:$0xff]  ;;  %s10919_s8 = sld [smem:[#allocation7 + $0xd8]] }
 0x605   : > { %12451 = vst [vmem:[#allocation152_spill] sm:$0xff] %v10642_v19  ;;  %12453 = vst [vmem:[#allocation154_spill] sm:$0xff] %v10652_v12  ;;  %v5437_v4 = vrot.slane %v5433_v56, 3  ;;  %v5724_v21 = vmul.f32 %v5723_v60, %v8884_v34  ;;  %v5725_v19 = vmul.f32 %v8873_v30, %v5723_v60  ;;  %v10659_v46 = vmul.f32 %v8437_v1, %v3825_v18 }
 0x606   : > { %5453 = vrot.lane.b32.xlu0 %v9970_v53, %s12186_s14  ;;  %v10666_v22 = vsel %vm2693_vm7, %v5702_v63, %v5703_v62  ;;  %v5438_v45 = vrot.slane %v5434_v31, 3  ;;  %v5458_v28 = vstv %s10610_s1  ;;  %v5749_v56 = vstv %s10612_s29  ;;  %s10921_s1 = sld [smem:[#allocation7 + $0xda]]  ;;  %s10940_s29 = sld [smem:[#allocation7 + $0x149]] }
 0x607   : > { %2950 = vrot.lane.b32.xlu1 %v12454_v5, %s7244_s18  ;;  %12455 = vst [vmem:[#allocation136_spill] sm:$0xff] %v10666_v22  ;;  %v5728_v60 = vrot.slane %v5724_v21, 5  ;;  %v5729_v12 = vrot.slane %v5725_v19, 5  ;;  %v5459_v18 = vmul.f32 %v5458_v28, %v12345_v59  ;;  %v12457_v8 = vstv %s10530_s26  ;;  %v10678_v54 = vpop.permute.xlu0 %3718  ;;  %v10680_v5 = vpop.permute.xlu1 %3935 }
 0x608   : > { %v10676_v53 = vmul.f32 %v12457_v8, %v12456_v33  ;;  %12458 = vst [vmem:[#allocation92_spill] sm:$0xff] %v10678_v54  ;;  %12459 = vst [vmem:[#allocation155_spill] sm:$0xff] %v10680_v5  ;;  %v10683_v63 = vsel %vm2335_vm8, %v5437_v4, %v5438_v45  ;;  %v5460_v62 = vmul.f32 %v12363_v50, %v5458_v28  ;;  %v5484_v31 = vstv %s10623_s21  ;;  %v12463_v5 = vld [vmem:[#allocation91_spill] sm:$0xff]  ;;  %v12465_v45 = vld [vmem:[#allocation105_spill] sm:$0xff]  ;;  %s10942_s21 = sld [smem:[#allocation7 + $0x14b]] }
 0x609   : > { %12460 = vst [vmem:[#allocation156_spill] sm:$0xff] %v10683_v63  ;;  %v5750_v21 = vmul.f32 %v5749_v56, %v8884_v34  ;;  %v5751_v19 = vmul.f32 %v8873_v30, %v5749_v56  ;;  %v10691_v8 = vsel %vm2693_vm7, %v5728_v60, %v5729_v12  ;;  %v5463_v33 = vrot.slane %v5459_v18, 3  ;;  %v12464_v4 = vld [vmem:[#allocation107_spill] sm:$0xff] }
 0x60a   : > { %12461 = vst [vmem:[#allocation157_spill] sm:$0xff] %v10691_v8  ;;  %v12462_v22 = vstv %s10530_s26  ;;  %5479 = vrot.lane.b32.xlu0 %v12464_v4, %s7245_s15  ;;  %v5464_v28 = vrot.slane %v5460_v62, 3  ;;  %v5485_v48 = vmul.f32 %v5484_v31, %v12345_v59  ;;  %v5486_v12 = vmul.f32 %v12363_v50, %v5484_v31  ;;  %s10849_s26 = sld [smem:[#allocation7 + $0xb9]] }
 0x60b   : > { %v10697_v54 = vmul.f32 %v12463_v5, %v12462_v22  ;;  %4061 = vrot.lane.b32.xlu1 %v12465_v45, %s7241_s27  ;;  %v5754_v63 = vrot.slane %v5750_v21, 5  ;;  %v5755_v56 = vrot.slane %v5751_v19, 5  ;;  %v5775_v60 = vstv %s10645_s9  ;;  %v10712_v5 = vpop.permute.xlu0 %3744  ;;  %v10714_v4 = vpop.permute.xlu1 %4870  ;;  %s10949_s9 = sld [smem:[#allocation7 + $0xd1]] }
 0x60c   : > { %v5532_v18 = vstv %s10647_s6  ;;  %v12466_v8 = vrot.slane %v10579_v43, 5  ;;  %12468 = vst [vmem:[#allocation107_spill] sm:$0xff] %v10714_v4  ;;  %v10717_v62 = vsel %vm2335_vm8, %v5463_v33, %v5464_v28  ;;  %v5489_v19 = vrot.slane %v5485_v48, 3  ;;  %v12470_v43 = vld [vmem:[#allocation112_spill] sm:$0xff]  ;;  %s10954_s6 = sld [smem:[#allocation7 + $0x14d]] }
 0x60d   : > { %v10720_v21 = vsel %vm2693_vm7, %v5754_v63, %v5755_v56  ;;  %v5776_v31 = vmul.f32 %v5775_v60, %v8884_v34  ;;  %v5777_v45 = vmul.f32 %v8873_v30, %v5775_v60  ;;  %v12471_v63 = vld [vmem:[#allocation137_spill] sm:$0xff]  ;;  %v5534_v33 = vmul.f32 %v12363_v50, %v5532_v18 }
 0x60e   : > { %v10710_v22 = vsel %vm2693_vm7, %v12466_v8, %v4289_v14  ;;  %12469 = vst [vmem:[#allocation105_spill] sm:$0xff] %v10720_v21  ;;  %v2722_v14 = vadd.f32 %v12470_v43, %v10596_v27  ;;  %v5490_v8 = vrot.slane %v5486_v12, 3  ;;  %4878 = vrot.lane.b32.xlu0 %v10586_v51, %s7242_s12  ;;  %v5801_v27 = vstv %s10670_s16  ;;  %s10967_s16 = sld [smem:[#allocation7 + $0xd3]] }
 0x60f   : > { %12467 = vst [vmem:[#allocation91_spill] sm:$0xff] %v10710_v22  ;;  %v5533_v22 = vmul.f32 %v5532_v18, %v12345_v59  ;;  %2976 = vrot.lane.b32.xlu1 %v12471_v63, %s12184_s19  ;;  %v5780_v48 = vrot.slane %v5776_v31, 5  ;;  %v3830_v28 = vrot.slane %v10626_v29, 3  ;;  %v5781_v12 = vrot.slane %v5777_v45, 5  ;;  %v10744_v4 = vpop.permute.xlu0 %3770  ;;  %v10746_v21 = vpop.permute.xlu1 %4886 }
 0x610   : > { %v10741_v56 = vsel %vm2335_vm8, %v5489_v19, %v5490_v8  ;;  %v5802_v43 = vmul.f32 %v5801_v27, %v8884_v34  ;;  %v5538_v63 = vrot.slane %v5534_v33, 4  ;;  %v5803_v51 = vmul.f32 %v8873_v30, %v5801_v27  ;;  %v12472_v33 = vld [vmem:[#allocation104_spill] sm:$0xff] }
 0x611   : > { %v5537_v60 = vrot.slane %v5533_v22, 4  ;;  %v3831_v18 = vrot.slane %v10659_v46, 3  ;;  %v5827_v31 = vstv %s10688_s24  ;;  %v10754_v29 = vsel %vm2693_vm7, %v5780_v48, %v5781_v12  ;;  %s10986_s24 = sld [smem:[#allocation7 + $0x14f]] }
 0x612   : > { %v5806_v19 = vrot.slane %v5802_v43, 5  ;;  %v5828_v22 = vmul.f32 %v5827_v31, %v8884_v34  ;;  %v5829_v8 = vmul.f32 %v8873_v30, %v5827_v31  ;;  %v2735_v45 = vadd.f32 %v10376_v44, %v2722_v14  ;;  %3948 = vrot.lane.b32.xlu0 %v12472_v33, %s12186_s14  ;;  %v12476_v33 = vld [vmem:[#allocation138_spill] sm:$0xff] }
 0x613   : > { %5032 = vrot.lane.b32.xlu1 %v10032_v55, %s7241_s27  ;;  %v10764_v46 = vsel %vm2514_vm6, %v5537_v60, %v5538_v63  ;;  %v5807_v27 = vrot.slane %v5803_v51, 5  ;;  %v10767_v48 = vsel %vm2335_vm8, %v3830_v28, %v3831_v18  ;;  %v5558_v44 = vstv %s10729_s23  ;;  %v10775_v43 = vpop.permute.xlu0 %3796  ;;  %v10777_v31 = vpop.permute.xlu1 %4902  ;;  %s11009_s23 = sld [smem:[#allocation7 + $0xd7]] }
 0x614   : > { %v5832_v14 = vrot.slane %v5828_v22, 5  ;;  %v5833_v12 = vrot.slane %v5829_v8, 5  ;;  %v2873_v55 = vrot.slane %v10676_v53, 6  ;;  %12473 = vst [vmem:[#allocation112_spill] sm:$0xff] %v10777_v31  ;;  %v5559_v28 = vmul.f32 %v5558_v44, %v12345_v59  ;;  %v12475_v8 = vld [vmem:[#allocation115_spill] sm:$0xff] }
 0x615   : > { %v10780_v60 = vsel %vm2693_vm7, %v5806_v19, %v5807_v27  ;;  %v5560_v63 = vmul.f32 %v12363_v50, %v5558_v44  ;;  %v2874_v18 = vrot.slane %v10697_v54, 6  ;;  %v2879_v22 = vstv %s10723_s10  ;;  %s10999_s10 = sld [smem:[#allocation7 + $0x151]] }
 0x616   : > { %v10787_v51 = vsel %vm2693_vm7, %v5832_v14, %v5833_v12  ;;  %v5584_v53 = vstv %s10731_s28  ;;  %v2748_v19 = vadd.f32 %v12475_v8, %v2735_v45  ;;  %2862 = vrot.lane.b32.xlu0 %v12476_v33, %s7245_s15  ;;  %v5563_v27 = vrot.slane %v5559_v28, 4  ;;  %v12478_v8 = vld [vmem:[#allocation130_spill] sm:$0xff]  ;;  %s11022_s28 = sld [smem:[#allocation7 + $0x153]] }
 0x617   : > { %12474 = vst [vmem:[#allocation137_spill] sm:$0xff] %v10787_v51  ;;  %5058 = vrot.lane.b32.xlu1 %v10035_v2, %s7244_s18  ;;  %v5564_v44 = vrot.slane %v5560_v63, 4  ;;  %v2880_v14 = vmul.f32 %v2879_v22, %v8376_v40  ;;  %v10803_v54 = vsel %vm2872_vm9, %v2873_v55, %v2874_v18  ;;  %v2881_v12 = vmul.f32 %v8367_v39, %v2879_v22  ;;  %v10812_v33 = vpop.permute.xlu0 %3844  ;;  %v10814_v28 = vpop.permute.xlu1 %4918 }
 0x618   : > { %12477 = vst [vmem:[#allocation104_spill] sm:$0xff] %v10803_v54  ;;  %v5585_v31 = vmul.f32 %v5584_v53, %v12345_v59  ;;  %v5586_v45 = vmul.f32 %v12363_v50, %v5584_v53  ;;  %v10810_v2 = vadd.f32 %v10323_v11, %v12478_v8  ;;  %12479 = vst [vmem:[#allocation115_spill] sm:$0xff] %v10814_v28  ;;  %v4322_v63 = vstv %s10751_s11  ;;  %v12481_v11 = vld [vmem:[#allocation93_spill] sm:$0xff]  ;;  %s11040_s11 = sld [smem:[#allocation7 + $0x15e]] }
 0x619   : > { %v10817_v40 = vsel %vm2514_vm6, %v5563_v27, %v5564_v44  ;;  %v2884_v55 = vrot.slane %v2880_v14, 6  ;;  %v2885_v39 = vrot.slane %v2881_v12, 6  ;;  %v4323_v54 = vmul.f32 %v4322_v63, %v8415_v57  ;;  %v12482_v8 = vld [vmem:[#allocation109_spill] sm:$0xff] }
 0x61a   : > { %12480 = vst [vmem:[#allocation138_spill] sm:$0xff] %v10817_v40  ;;  %v5589_v18 = vrot.slane %v5585_v31, 4  ;;  %v5590_v22 = vrot.slane %v5586_v45, 4  ;;  %v10822_v53 = vadd.f32 %v10196_v13, %v2748_v19  ;;  %3974 = vrot.lane.b32.xlu0 %v12482_v8, %s7245_s15  ;;  %v4324_v28 = vmul.f32 %v8404_v35, %v4322_v63 }
 0x61b   : > { %5084 = vrot.lane.b32.xlu1 %v12481_v11, %s12184_s19  ;;  %v5610_v27 = vstv %s10769_s30  ;;  %v5875_v44 = vstv %s10771_s3  ;;  %v10836_v13 = vsel %vm2872_vm9, %v2884_v55, %v2885_v39  ;;  %v4327_v19 = vrot.slane %v4323_v54, 5  ;;  %v10842_v12 = vpop.permute.xlu0 %3870  ;;  %v10844_v45 = vpop.permute.xlu1 %4934  ;;  %v12486_v54 = vld [vmem:[#allocation110_spill] sm:$0xff]  ;;  %s11055_s30 = sld [smem:[#allocation7 + $0xd9]]  ;;  %s11057_s3 = sld [smem:[#allocation7 + $0x160]] }
 0x61c   : > { %12483 = vst [vmem:[#allocation130_spill] sm:$0xff] %v10836_v13  ;;  %v10839_v31 = vsel %vm2514_vm6, %v5589_v18, %v5590_v22  ;;  %v5611_v14 = vmul.f32 %v5610_v27, %v12345_v59  ;;  %12485 = vst [vmem:[#allocation109_spill] sm:$0xff] %v10844_v45  ;;  %v4328_v63 = vrot.slane %v4324_v28, 5  ;;  %v5612_v11 = vmul.f32 %v12363_v50, %v5610_v27 }
 0x61d   : > { %12484 = vst [vmem:[#allocation93_spill] sm:$0xff] %v10839_v31  ;;  %v5876_v8 = vmul.f32 %v5875_v44, %v8884_v34  ;;  %v5877_v51 = vmul.f32 %v8873_v30, %v5875_v44  ;;  %v5636_v39 = vstv %s10784_s4  ;;  %v5901_v18 = vstv %s10792_s13  ;;  %s11076_s4 = sld [smem:[#allocation7 + $0x11c]]  ;;  %s11078_s13 = sld [smem:[#allocation7 + $0x11d]] }
 0x61e   : > { %v5615_v55 = vrot.slane %v5611_v14, 4  ;;  %v5662_v22 = vstv %s10794_s2  ;;  %5527 = vrot.lane.b32.xlu0 %v10077_v49, %s7242_s12  ;;  %v10861_v28 = vsel %vm2693_vm7, %v4327_v19, %v4328_v63  ;;  %v5616_v27 = vrot.slane %v5612_v11, 4  ;;  %s11114_s2 = sld [smem:[#allocation7 + $0xdb]] }
 0x61f   : > { %5110 = vrot.lane.b32.xlu1 %v12486_v54, %s12186_s14  ;;  %12487 = vst [vmem:[#allocation110_spill] sm:$0xff] %v10861_v28  ;;  %v5880_v45 = vrot.slane %v5876_v8, 6  ;;  %v5881_v44 = vrot.slane %v5877_v51, 6  ;;  %v5637_v14 = vmul.f32 %v5636_v39, %v12345_v59  ;;  %v5638_v13 = vmul.f32 %v12363_v50, %v5636_v39  ;;  %v10869_v54 = vpop.permute.xlu0 %3896  ;;  %v10871_v49 = vpop.permute.xlu1 %4950 }
 0x620   : > { %v5902_v31 = vmul.f32 %v5901_v18, %v8884_v34  ;;  %v5903_v40 = vmul.f32 %v8873_v30, %v5901_v18  ;;  %12488 = vst [vmem:[#allocation158_spill] sm:$0xff] %v10871_v49  ;;  %v10874_v19 = vsel %vm2514_vm6, %v5615_v55, %v5616_v27  ;;  %v5663_v63 = vmul.f32 %v5662_v22, %v12345_v59 }
 0x621   : > { %v10877_v51 = vsel %vm2872_vm9, %v5880_v45, %v5881_v44  ;;  %v5664_v11 = vmul.f32 %v12363_v50, %v5662_v22  ;;  %v5641_v8 = vrot.slane %v5637_v14, 4  ;;  %v5642_v39 = vrot.slane %v5638_v13, 4 }
 0x622   : > { %v5906_v28 = vrot.slane %v5902_v31, 6  ;;  %v5907_v18 = vrot.slane %v5903_v40, 6  ;;  %5553 = vrot.lane.b32.xlu0 %v10102_v10, %s7241_s27  ;;  %v5667_v55 = vrot.slane %v5663_v63, 4  ;;  %v5927_v27 = vstv %s10831_s5  ;;  %s11131_s5 = sld [smem:[#allocation7 + $0x157]] }
 0x623   : > { %5136 = vrot.lane.b32.xlu1 %v10093_v41, %s7245_s15  ;;  %v5668_v45 = vrot.slane %v5664_v11, 4  ;;  %v3992_v44 = vstv %s10833_s25  ;;  %v10890_v49 = vsel %vm2514_vm6, %v5641_v8, %v5642_v39  ;;  %v5928_v40 = vmul.f32 %v5927_v27, %v8884_v34  ;;  %v10901_v41 = vpop.permute.xlu0 %3922  ;;  %v10903_v10 = vpop.permute.xlu1 %4993  ;;  %s11133_s25 = sld [smem:[#allocation7 + $0x159]] }
 0x624   : > { %v10893_v13 = vsel %vm2872_vm9, %v5906_v28, %v5907_v18  ;;  %v5929_v31 = vmul.f32 %v8873_v30, %v5927_v27  ;;  %12490 = vst [vmem:[#allocation160_spill] sm:$0xff] %v10903_v10  ;;  %v3993_v28 = vmul.f32 %v3992_v44, %v8415_v57  ;;  %v3994_v14 = vmul.f32 %v8404_v35, %v3992_v44 }
 0x625   : > { %12489 = vst [vmem:[#allocation159_spill] sm:$0xff] %v10893_v13  ;;  %v10906_v22 = vsel %vm2514_vm6, %v5667_v55, %v5668_v45  ;;  %v4003_v63 = vstv %s10849_s26  ;;  %v5932_v11 = vrot.slane %v5928_v40, 6  ;;  %v4296_v45 = vstv %s10854_s17  ;;  %s11139_s26 = sld [smem:[#allocation7 + $0x15b]]  ;;  %s11157_s17 = sld [smem:[#allocation7 + $0x15d]] }
 0x626   : > { %12491 = vst [vmem:[#allocation161_spill] sm:$0xff] %v10906_v22  ;;  %v5933_v8 = vrot.slane %v5929_v31, 6  ;;  %v4004_v39 = vmul.f32 %v4003_v63, %v8448_v23  ;;  %v4005_v18 = vmul.f32 %v8437_v1, %v4003_v63  ;;  %4022 = vrot.lane.b32.xlu0 %v10127_v24, %s7242_s12  ;;  %v3997_v27 = vrot.slane %v3993_v28, 4 }
 0x627   : > { %4087 = vrot.lane.b32.xlu1 %v10111_v37, %s7244_s18  ;;  %v3998_v55 = vrot.slane %v3994_v14, 4  ;;  %v5953_v10 = vstv %s10863_s7  ;;  %v4297_v63 = vmul.f32 %v4296_v45, %v8415_v57  ;;  %v3374_v37 = vpop.permute.xlu0 %3373  ;;  %v10927_v22 = vpop.permute.xlu1 %5019  ;;  %v4298_v28 = vmul.f32 %v8404_v35, %v4296_v45  ;;  %s11164_s7 = sld [smem:[#allocation7 + $0xdc]] }
 0x628   : > { %v10924_v44 = vsel %vm2872_vm9, %v5932_v11, %v5933_v8  ;;  %v4008_v40 = vrot.slane %v4004_v39, 4  ;;  %v4009_v31 = vrot.slane %v4005_v18, 4  ;;  %12493 = vst [vmem:[#allocation163_spill] sm:$0xff] %v10927_v22  ;;  %v5954_v14 = vmul.f32 %v5953_v10, %v8884_v34 }
 0x629   : > { %12492 = vst [vmem:[#allocation162_spill] sm:$0xff] %v10924_v44  ;;  %v10930_v24 = vsel %vm2514_vm6, %v3997_v27, %v3998_v55  ;;  %v5955_v13 = vmul.f32 %v8873_v30, %v5953_v10  ;;  %v3376_v11 = vadd.f32 %v3374_v37, %v10810_v2  ;;  %v4301_v39 = vrot.slane %v4297_v63, 5  ;;  %v12494_v27 = vld [vmem:[#allocation139_spill] sm:$0xff] }
 0x62a   : > { %v10937_v8 = vsel %vm2514_vm6, %v4008_v40, %v4009_v31  ;;  %v4963_v18 = vstv %s10881_s0  ;;  %5006 = vrot.lane.b32.xlu0 %v10135_v7, %s7242_s12  ;;  %v4302_v10 = vrot.slane %v4298_v28, 5  ;;  %v5958_v55 = vrot.slane %v5954_v14, 6  ;;  %s11180_s0 = sld [smem:[#allocation7 + $0x15f]] }
 0x62b   : > { %3002 = vrot.lane.b32.xlu1 %v12494_v27, %s12186_s14  ;;  %v5959_v45 = vrot.slane %v5955_v13, 6  ;;  %v4964_v2 = vmul.f32 %v4963_v18, %v8884_v34  ;;  %v3384_v40 = vadd.f32 %v10348_v3, %v3376_v11  ;;  %v4965_v31 = vmul.f32 %v8873_v30, %v4963_v18  ;;  %v3390_v27 = vpop.permute.xlu0 %3389  ;;  %v10957_v22 = vpop.permute.xlu1 %5045 }
 0x62c   : > { %v4974_v63 = vstv %s10897_s20  ;;  %v4370_v37 = vstv %s10899_s22  ;;  %12495 = vst [vmem:[#allocation139_spill] sm:$0xff] %v10957_v22  ;;  %v10960_v7 = vsel %vm2693_vm7, %v4301_v39, %v4302_v10  ;;  %s11187_s20 = sld [smem:[#allocation7 + $0xdd]]  ;;  %s11194_s22 = sld [smem:[#allocation7 + $0x161]] }
 0x62d   : > { %12496 = vst [vmem:[#allocation164_spill] sm:$0xff] %v10960_v7  ;;  %v10963_v13 = vsel %vm2872_vm9, %v5958_v55, %v5959_v45  ;;  %v4968_v28 = vrot.slane %v4964_v2, 1  ;;  %v4975_v3 = vmul.f32 %v4974_v63, %v12345_v59  ;;  %v3392_v14 = vadd.f32 %v3390_v27, %v3384_v40 }
 0x62e   : > { %12497 = vst [vmem:[#allocation165_spill] sm:$0xff] %v10963_v13  ;;  %v4969_v11 = vrot.slane %v4965_v31, 1  ;;  %v4976_v18 = vmul.f32 %v12363_v50, %v4974_v63  ;;  %v10970_v44 = vmul.f32 %v4370_v37, %v8415_v57  ;;  %2937 = vrot.lane.b32.xlu0 %v10140_v16, %s7241_s27  ;;  %v10977_v10 = vmul.f32 %v8404_v35, %v4370_v37 }
 0x62f   : > { %4113 = vrot.lane.b32.xlu1 %v10155_v32, %s12184_s19  ;;  %v4979_v39 = vrot.slane %v4975_v3, 1  ;;  %v3400_v2 = vadd.f32 %v10378_v52, %v3392_v14  ;;  %v5710_v63 = vstv %s10940_s29  ;;  %v3406_v32 = vpop.permute.xlu0 %3405  ;;  %v10988_v27 = vpop.permute.xlu1 %5071  ;;  %v5736_v37 = vstv %s10942_s21  ;;  %s11232_s29 = sld [smem:[#allocation7 + $0xdf]]  ;;  %s11245_s21 = sld [smem:[#allocation7 + $0x12a]] }
 0x630   : > { %v10983_v40 = vsel %vm637_vm3, %v4968_v28, %v4969_v11  ;;  %v4980_v31 = vrot.slane %v4976_v18, 1  ;;  %12498 = vst [vmem:[#allocation166_spill] sm:$0xff] %v10988_v27  ;;  %v5711_v16 = vmul.f32 %v5710_v63, %v12345_v59  ;;  %v5712_v3 = vmul.f32 %v12363_v50, %v5710_v63  ;;  %v12500_v11 = vld [vmem:[#allocation111_spill] sm:$0xff]  ;;  %v12501_v18 = vld [vmem:[#allocation113_spill] sm:$0xff] }
 0x631   : > { %v4309_v55 = vstv %s10949_s9  ;;  %v3408_v45 = vadd.f32 %v3406_v32, %v3400_v2  ;;  %v5737_v28 = vmul.f32 %v5736_v37, %v12345_v59  ;;  %v5738_v14 = vmul.f32 %v12363_v50, %v5736_v37  ;;  %s11257_s9 = sld [smem:[#allocation7 + $0x12b]] }
 0x632   : > { %v10995_v52 = vsel %vm637_vm3, %v4979_v39, %v4980_v31  ;;  %5579 = vrot.lane.b32.xlu0 %v12501_v18, %s7244_s18  ;;  %v5715_v63 = vrot.slane %v5711_v16, 5  ;;  %v5716_v27 = vrot.slane %v5712_v3, 5  ;;  %v4310_v22 = vmul.f32 %v4309_v55, %v8448_v23 }
 0x633   : > { %12499 = vst [vmem:[#allocation167_spill] sm:$0xff] %v10995_v52  ;;  %3028 = vrot.lane.b32.xlu1 %v12500_v11, %s7245_s15  ;;  %v4311_v39 = vmul.f32 %v8437_v1, %v4309_v55  ;;  %v3416_v2 = vadd.f32 %v10406_v17, %v3408_v45  ;;  %v5741_v31 = vrot.slane %v5737_v28, 5  ;;  %v5742_v32 = vrot.slane %v5738_v14, 5  ;;  %v3422_v13 = vpop.permute.xlu0 %3421 }
 0x634   : > { %v5762_v37 = vstv %s10954_s6  ;;  %v11011_v7 = vpop.permute.xlu1 %5097  ;;  %v11014_v11 = vsel %vm2693_vm7, %v5715_v63, %v5716_v27  ;;  %v4314_v16 = vrot.slane %v4310_v22, 5  ;;  %v4335_v45 = vstv %s10967_s16  ;;  %v12503_v27 = vld [vmem:[#allocation116_spill] sm:$0xff]  ;;  %s11268_s6 = sld [smem:[#allocation7 + $0xe1]]  ;;  %s11284_s16 = sld [smem:[#allocation7 + $0xc6]] }
 0x635   : > { %12502 = vst [vmem:[#allocation111_spill] sm:$0xff] %v11011_v7  ;;  %v4315_v3 = vrot.slane %v4311_v39, 5  ;;  %v5763_v18 = vmul.f32 %v5762_v37, %v12345_v59  ;;  %v3424_v52 = vadd.f32 %v3422_v13, %v3416_v2  ;;  %v11018_v55 = vsel %vm2693_vm7, %v5741_v31, %v5742_v32 }
 0x636   : > { %v5764_v17 = vmul.f32 %v12363_v50, %v5762_v37  ;;  %4048 = vrot.lane.b32.xlu0 %v12503_v27, %s7241_s27  ;;  %v4336_v13 = vmul.f32 %v4335_v45, %v8448_v23  ;;  %v4337_v14 = vmul.f32 %v8437_v1, %v4335_v45  ;;  %v5788_v2 = vstv %s10986_s24  ;;  %s11286_s24 = sld [smem:[#allocation7 + $0xc7]] }
 0x637   : > { %5210 = vrot.lane.b32.xlu1 %v10199_v58, %s7241_s27  ;;  %v11029_v22 = vsel %vm2693_vm7, %v4314_v16, %v4315_v3  ;;  %v5767_v28 = vrot.slane %v5763_v18, 5  ;;  %v3432_v63 = vadd.f32 %v10434_v9, %v3424_v52  ;;  %v4375_v31 = vrot.slane %v10970_v44, 6  ;;  %v3438_v32 = vpop.permute.xlu0 %3437  ;;  %v12505_v44 = vld [vmem:[#allocation119_spill] sm:$0xff] }
 0x638   : > { %v5768_v39 = vrot.slane %v5764_v17, 5  ;;  %v11036_v58 = vpop.permute.xlu1 %5123  ;;  %v4340_v37 = vrot.slane %v4336_v13, 5  ;;  %v4341_v27 = vrot.slane %v4337_v14, 5  ;;  %v5789_v16 = vmul.f32 %v5788_v2, %v12345_v59  ;;  %v12506_v17 = vld [vmem:[#allocation120_spill] sm:$0xff] }
 0x639   : > { %12504 = vst [vmem:[#allocation113_spill] sm:$0xff] %v11036_v58  ;;  %v5790_v3 = vmul.f32 %v12363_v50, %v5788_v2  ;;  %v3440_v18 = vadd.f32 %v3438_v32, %v3432_v63  ;;  %v4376_v9 = vrot.slane %v10977_v10, 6  ;;  %v5814_v52 = vstv %s10999_s10  ;;  %s11302_s10 = sld [smem:[#allocation7 + $0x138]] }
 0x63a   : > { %v11043_v45 = vsel %vm2693_vm7, %v5767_v28, %v5768_v39  ;;  %2963 = vrot.lane.b32.xlu0 %v12506_v17, %s7244_s18  ;;  %v11052_v13 = vsel %vm2693_vm7, %v4340_v37, %v4341_v27  ;;  %v5793_v14 = vrot.slane %v5789_v16, 5  ;;  %v5815_v63 = vmul.f32 %v5814_v52, %v12345_v59 }
 0x63b   : > { %5236 = vrot.lane.b32.xlu1 %v12505_v44, %s7244_s18  ;;  %v5794_v2 = vrot.slane %v5790_v3, 5  ;;  %v3448_v10 = vadd.f32 %v10404_v6, %v3440_v18  ;;  %v11061_v28 = vsel %vm2872_vm9, %v4375_v31, %v4376_v9  ;;  %v5816_v39 = vmul.f32 %v12363_v50, %v5814_v52  ;;  %v3454_v37 = vpop.permute.xlu0 %3453 }
 0x63c   : > { %v4383_v32 = vstv %s11009_s23  ;;  %v11065_v27 = vpop.permute.xlu1 %5171  ;;  %v5819_v3 = vrot.slane %v5815_v63, 5  ;;  %v5840_v18 = vstv %s11022_s28  ;;  %v12508_v31 = vstv %s10919_s8  ;;  %s11209_s8 = sld [smem:[#allocation7 + $0xde]]  ;;  %s11333_s28 = sld [smem:[#allocation7 + $0xd4]] }
 0x63d   : > { %12507 = vst [vmem:[#allocation116_spill] sm:$0xff] %v11065_v27  ;;  %v11068_v16 = vsel %vm2693_vm7, %v5793_v14, %v5794_v2  ;;  %v4384_v44 = vmul.f32 %v4383_v32, %v8448_v23  ;;  %v4385_v17 = vmul.f32 %v8437_v1, %v4383_v32  ;;  %v3456_v58 = vadd.f32 %v3454_v37, %v3448_v10  ;;  %v12509_v10 = vld [vmem:[#allocation117_spill] sm:$0xff]  ;;  %s11313_s23 = sld [smem:[#allocation7 + $0x146]] }
 0x63e   : > { %v5820_v6 = vrot.slane %v5816_v39, 5  ;;  %v4397_v9 = vmul.f32 %v12508_v31, %v8415_v57  ;;  %5605 = vrot.lane.b32.xlu0 %v10282_v25, %s12184_s19  ;;  %v5841_v2 = vmul.f32 %v5840_v18, %v12345_v59  ;;  %v5842_v63 = vmul.f32 %v12363_v50, %v5840_v18 }
 0x63f   : > { %5262 = vrot.lane.b32.xlu1 %v10266_v15, %s12184_s19  ;;  %v4388_v52 = vrot.slane %v4384_v44, 6  ;;  %v4389_v14 = vrot.slane %v4385_v17, 6  ;;  %v3467_v39 = vadd.f32 %v12509_v10, %v3456_v58  ;;  %v12510_v37 = vmov %v12508_v31 }
 0x640   : > { %v11088_v32 = vsel %vm2693_vm7, %v5819_v3, %v5820_v6  ;;  %v4398_v31 = vmul.f32 %v8404_v35, %v12510_v37  ;;  %v4401_v15 = vrot.slane %v4397_v9, 6  ;;  %v3502_v27 = vpop.permute.xlu0 %3501  ;;  %v11093_v25 = vpop.permute.xlu1 %5197  ;;  %v5845_v17 = vrot.slane %v5841_v2, 5 }
 0x641   : > { %12511 = vst [vmem:[#allocation119_spill] sm:$0xff] %v11093_v25  ;;  %v11096_v44 = vsel %vm2872_vm9, %v4388_v52, %v4389_v14  ;;  %v5846_v18 = vrot.slane %v5842_v63, 5  ;;  %v5979_v7 = vstv %s11040_s11  ;;  %v3478_v58 = vadd.f32 %v10263_v26, %v3467_v39  ;;  %s11335_s11 = sld [smem:[#allocation7 + $0xd5]] }
 0x642   : > { %v4402_v3 = vrot.slane %v4398_v31, 6  ;;  %v5980_v6 = vmul.f32 %v5979_v7, %v8884_v34  ;;  %v5981_v10 = vmul.f32 %v8873_v30, %v5979_v7  ;;  %4074 = vrot.lane.b32.xlu0 %v10307_v38, %s7244_s18  ;;  %v4409_v52 = vstv %s11055_s30  ;;  %s11355_s30 = sld [smem:[#allocation7 + $0x154]] }
 0x643   : > { %5288 = vrot.lane.b32.xlu1 %v10295_v0, %s12186_s14  ;;  %v11107_v9 = vsel %vm2693_vm7, %v5845_v17, %v5846_v18  ;;  %v6005_v14 = vstv %s11057_s3  ;;  %v12513_v2 = vstv %s10921_s1  ;;  %v3491_v7 = vadd.f32 %v10462_v36, %v3478_v58  ;;  %v12515_v58 = vld [vmem:[#allocation125_spill] sm:$0xff]  ;;  %s6776_s3 = sld [smem:[#allocation7 + $0x139]] }
 0x644   : > { %12512 = vst [vmem:[#allocation120_spill] sm:$0xff] %v11107_v9  ;;  %v4423_v26 = vmul.f32 %v12513_v2, %v8415_v57  ;;  %v11118_v63 = vsel %vm2872_vm9, %v4401_v15, %v4402_v3  ;;  %v5984_v0 = vrot.slane %v5980_v6, 6  ;;  %v5985_v39 = vrot.slane %v5981_v10, 6  ;;  %v3528_v38 = vpop.permute.xlu0 %3527  ;;  %v11120_v37 = vpop.permute.xlu1 %5223 }
 0x645   : > { %12514 = vst [vmem:[#allocation117_spill] sm:$0xff] %v11120_v37  ;;  %v4410_v31 = vmul.f32 %v4409_v52, %v8448_v23  ;;  %v4411_v17 = vmul.f32 %v8437_v1, %v4409_v52  ;;  %v6006_v18 = vmul.f32 %v6005_v14, %v8884_v34  ;;  %v6007_v2 = vmul.f32 %v8873_v30, %v6005_v14 }
 0x646   : > { %v3504_v25 = vadd.f32 %v3502_v27, %v3491_v7  ;;  %v11127_v9 = vsel %vm2872_vm9, %v5984_v0, %v5985_v39  ;;  %v5141_v36 = vstv %s11076_s4  ;;  %v5152_v15 = vstv %s11078_s13  ;;  %5184 = vrot.lane.b32.xlu0 %v12515_v58, %s7242_s12  ;;  %s6790_s4 = sld [smem:[#allocation7 + $0x147]]  ;;  %s6804_s13 = sld [smem:[#allocation7 + $0x155]] }
 0x647   : > { %5314 = vrot.lane.b32.xlu1 %v10314_v47, %s7245_s15  ;;  %v4414_v3 = vrot.slane %v4410_v31, 6  ;;  %v4415_v6 = vrot.slane %v4411_v17, 6  ;;  %v6010_v10 = vrot.slane %v6006_v18, 6  ;;  %v6011_v27 = vrot.slane %v6007_v2, 6 }
 0x648   : > { %v3517_v52 = vadd.f32 %v10490_v42, %v3504_v25  ;;  %v5142_v14 = vmul.f32 %v5141_v36, %v8884_v34  ;;  %v5143_v7 = vmul.f32 %v8873_v30, %v5141_v36  ;;  %v5153_v0 = vmul.f32 %v5152_v15, %v12345_v59  ;;  %v3554_v39 = vpop.permute.xlu0 %3553  ;;  %v11145_v47 = vpop.permute.xlu1 %5249 }
 0x649   : > { %12516 = vst [vmem:[#allocation125_spill] sm:$0xff] %v11145_v47  ;;  %v11148_v58 = vsel %vm2872_vm9, %v4414_v3, %v4415_v6  ;;  %v11151_v31 = vsel %vm2872_vm9, %v6010_v10, %v6011_v27  ;;  %v5154_v17 = vmul.f32 %v12363_v50, %v5152_v15  ;;  %v12519_v18 = vstv %s10921_s1  ;;  %v12520_v47 = vld [vmem:[#allocation128_spill] sm:$0xff]  ;;  %v12521_v3 = vld [vmem:[#allocation95_spill] sm:$0xff]  ;;  %s11211_s1 = sld [smem:[#allocation7 + $0xe0]] }
 0x64a   : > { %12517 = vst [vmem:[#allocation168_spill] sm:$0xff] %v11148_v58  ;;  %12518 = vst [vmem:[#allocation169_spill] sm:$0xff] %v11151_v31  ;;  %v4424_v42 = vmul.f32 %v8404_v35, %v12519_v18  ;;  %v3530_v25 = vadd.f32 %v3528_v38, %v3517_v52  ;;  %v5146_v2 = vrot.slane %v5142_v14, 2  ;;  %v5147_v36 = vrot.slane %v5143_v7, 2  ;;  %2989 = vrot.lane.b32.xlu0 %v12521_v3, %s12184_s19  ;;  %v12526_v3 = vld [vmem:[#allocation144_spill] sm:$0xff] }
 0x64b   : > { %v5157_v37 = vrot.slane %v5153_v0, 2  ;;  %4139 = vrot.lane.b32.xlu1 %v12520_v47, %s12186_s14  ;;  %v5158_v6 = vrot.slane %v5154_v17, 2  ;;  %v4427_v10 = vrot.slane %v4423_v26, 6  ;;  %v4435_v27 = vstv %s11114_s2 }
 0x64c   : > { %v4428_v15 = vrot.slane %v4424_v42, 6  ;;  %v3543_v18 = vadd.f32 %v10516_v20, %v3530_v25  ;;  %v11168_v38 = vsel %vm715_vm4, %v5146_v2, %v5147_v36  ;;  %v5888_v52 = vstv %s11131_s5  ;;  %v3580_v7 = vpop.permute.xlu0 %3579  ;;  %v11172_v0 = vpop.permute.xlu1 %3961 }
 0x64d   : > { %12522 = vst [vmem:[#allocation128_spill] sm:$0xff] %v11168_v38  ;;  %v5914_v14 = vstv %s11133_s25  ;;  %v11175_v47 = vsel %vm715_vm4, %v5157_v37, %v5158_v6  ;;  %v5889_v26 = vmul.f32 %v5888_v52, %v12345_v59  ;;  %v5890_v17 = vmul.f32 %v12363_v50, %v5888_v52  ;;  %v12525_v37 = vld [vmem:[#allocation126_spill] sm:$0xff] }
 0x64e   : > { %12523 = vst [vmem:[#allocation95_spill] sm:$0xff] %v11175_v47  ;;  %v5915_v42 = vmul.f32 %v5914_v14, %v12345_v59  ;;  %v3556_v20 = vadd.f32 %v3554_v39, %v3543_v18  ;;  %v5916_v25 = vmul.f32 %v12363_v50, %v5914_v14  ;;  %v11184_v2 = vsel %vm2872_vm9, %v4427_v10, %v4428_v15 }
 0x64f   : > { %12524 = vst [vmem:[#allocation170_spill] sm:$0xff] %v11184_v2  ;;  %v5940_v36 = vstv %s11139_s26  ;;  %4165 = vrot.lane.b32.xlu1 %v12525_v37, %s7245_s15  ;;  %5631 = vrot.lane.b32.xlu0 %v12526_v3, %s12186_s14  ;;  %v5893_v6 = vrot.slane %v5889_v26, 6  ;;  %v5894_v52 = vrot.slane %v5890_v17, 6  ;;  %v4436_v14 = vmul.f32 %v4435_v27, %v8448_v23 }
 0x650   : > { %v5919_v31 = vrot.slane %v5915_v42, 6  ;;  %v5941_v39 = vmul.f32 %v5940_v36, %v12345_v59  ;;  %v3569_v10 = vadd.f32 %v10550_v61, %v3556_v20  ;;  %v5920_v15 = vrot.slane %v5916_v25, 6  ;;  %v3606_v2 = vpop.permute.xlu0 %3605  ;;  %v11199_v37 = vpop.permute.xlu1 %3987  ;;  %v12529_v25 = vld [vmem:[#allocation129_spill] sm:$0xff] }
 0x651   : > { %v5942_v18 = vmul.f32 %v12363_v50, %v5940_v36  ;;  %v11202_v3 = vsel %vm2872_vm9, %v5893_v6, %v5894_v52  ;;  %v4437_v17 = vmul.f32 %v8437_v1, %v4435_v27  ;;  %v5966_v42 = vstv %s11157_s17  ;;  %v12530_v36 = vld [vmem:[#allocation96_spill] sm:$0xff]  ;;  %v12531_v52 = vld [vmem:[#allocation131_spill] sm:$0xff] }
 0x652   : > { %12527 = vst [vmem:[#allocation126_spill] sm:$0xff] %v11202_v3  ;;  %v5945_v26 = vrot.slane %v5941_v39, 6  ;;  %v3582_v58 = vadd.f32 %v3580_v7, %v3569_v10  ;;  %v11207_v47 = vsel %vm2872_vm9, %v5919_v31, %v5920_v15  ;;  %v4440_v20 = vrot.slane %v4436_v14, 6 }
 0x653   : > { %12528 = vst [vmem:[#allocation144_spill] sm:$0xff] %v11207_v47  ;;  %v5946_v61 = vrot.slane %v5942_v18, 6  ;;  %4200 = vrot.lane.b32.xlu1 %v12529_v25, %s7242_s12  ;;  %4100 = vrot.lane.b32.xlu0 %v12530_v36, %s12184_s19  ;;  %v4441_v6 = vrot.slane %v4437_v17, 6  ;;  %v5967_v27 = vmul.f32 %v5966_v42, %v12345_v59  ;;  %v5968_v7 = vmul.f32 %v12363_v50, %v5966_v42 }
 0x654   : > { %v4448_v31 = vstv %s11164_s7  ;;  %v3595_v39 = vadd.f32 %v12531_v52, %v3582_v58  ;;  %v3632_v14 = vpop.permute.xlu0 %3631  ;;  %v5992_v47 = vstv %s11180_s0 }
 0x655   : > { %v11222_v10 = vsel %vm2872_vm9, %v5945_v26, %v5946_v61  ;;  %v4449_v15 = vmul.f32 %v4448_v31, %v8415_v57  ;;  %v4450_v18 = vmul.f32 %v8404_v35, %v4448_v31  ;;  %v11226_v25 = vpop.permute.xlu1 %2898  ;;  %v11229_v17 = vsel %vm2872_vm9, %v4440_v20, %v4441_v6  ;;  %v12535_v31 = vld [vmem:[#allocation145_spill] sm:$0xff] }
 0x656   : > { %12532 = vst [vmem:[#allocation129_spill] sm:$0xff] %v11222_v10  ;;  %12533 = vst [vmem:[#allocation96_spill] sm:$0xff] %v11226_v25  ;;  %v5971_v36 = vrot.slane %v5967_v27, 6  ;;  %v5972_v42 = vrot.slane %v5968_v7, 6  ;;  %v3608_v58 = vadd.f32 %v3606_v2, %v3595_v39  ;;  %v5993_v52 = vmul.f32 %v5992_v47, %v12345_v59  ;;  %v12536_v10 = vld [vmem:[#allocation98_spill] sm:$0xff]  ;;  %v12538_v2 = vld [vmem:[#allocation97_spill] sm:$0xff] }
 0x657   : > { %12534 = vst [vmem:[#allocation131_spill] sm:$0xff] %v11229_v17  ;;  %v4453_v26 = vrot.slane %v4449_v15, 6  ;;  %v4454_v61 = vrot.slane %v4450_v18, 6  ;;  %4213 = vrot.lane.b32.xlu1 %v12535_v31, %s7242_s12  ;;  %3015 = vrot.lane.b32.xlu0 %v12536_v10, %s12186_s14  ;;  %v5994_v20 = vmul.f32 %v12363_v50, %v5992_v47  ;;  %v4461_v6 = vstv %s11187_s20 }
 0x658   : > { %v11240_v3 = vsel %vm2872_vm9, %v5971_v36, %v5972_v42  ;;  %v6018_v27 = vstv %s11194_s22  ;;  %v3621_v7 = vadd.f32 %v12538_v2, %v3608_v58  ;;  %v5997_v15 = vrot.slane %v5993_v52, 6  ;;  %v3680_v10 = vpop.permute.xlu0 %3679  ;;  %v12542_v52 = vld [vmem:[#allocation99_spill] sm:$0xff] }
 0x659   : > { %12537 = vst [vmem:[#allocation145_spill] sm:$0xff] %v11240_v3  ;;  %v11249_v39 = vsel %vm2872_vm9, %v4453_v26, %v4454_v61  ;;  %v4462_v18 = vmul.f32 %v4461_v6, %v8448_v23  ;;  %v11252_v31 = vpop.permute.xlu1 %2911  ;;  %v5998_v36 = vrot.slane %v5994_v20, 6  ;;  %v4463_v47 = vmul.f32 %v8437_v1, %v4461_v6  ;;  %v12541_v61 = vld [vmem:[#allocation146_spill] sm:$0xff] }
 0x65a   : > { %12539 = vst [vmem:[#allocation98_spill] sm:$0xff] %v11249_v39  ;;  %12540 = vst [vmem:[#allocation97_spill] sm:$0xff] %v11252_v31  ;;  %v6019_v42 = vmul.f32 %v6018_v27, %v12345_v59  ;;  %v6020_v3 = vmul.f32 %v12363_v50, %v6018_v27  ;;  %v3634_v17 = vadd.f32 %v3632_v14, %v3621_v7  ;;  %v4474_v2 = vstv %s11209_s8  ;;  %v12544_v27 = vld [vmem:[#allocation133_spill] sm:$0xff] }
 0x65b   : > { %v4466_v58 = vrot.slane %v4462_v18, 6  ;;  %v4500_v26 = vstv %s11211_s1  ;;  %4226 = vrot.lane.b32.xlu1 %v12541_v61, %s7241_s27  ;;  %5657 = vrot.lane.b32.xlu0 %v12542_v52, %s7245_s15  ;;  %v11266_v20 = vsel %vm2872_vm9, %v5997_v15, %v5998_v36  ;;  %v4467_v6 = vrot.slane %v4463_v47, 6  ;;  %s12661_s1 = sld [smem:[#allocation22_spill]] }
 0x65c   : > { %12543 = vst [vmem:[#allocation146_spill] sm:$0xff] %v11266_v20  ;;  %v6023_v39 = vrot.slane %v6019_v42, 6  ;;  %v6024_v31 = vrot.slane %v6020_v3, 6  ;;  %v3645_v14 = vadd.f32 %v12544_v27, %v3634_v17  ;;  %v4475_v7 = vmul.f32 %v4474_v2, %v8415_v57  ;;  %v3706_v25 = vpop.permute.xlu0 %3705  ;;  %v12548_v17 = vld [vmem:[#allocation134_spill] sm:$0xff]  ;;  %v12549_v20 = vld [vmem:[#allocation148_spill] sm:$0xff] }
 0x65d   : > { %v4476_v18 = vmul.f32 %v8404_v35, %v4474_v2  ;;  %v4501_v61 = vmul.f32 %v4500_v26, %v8415_v57  ;;  %v11274_v38 = vpop.permute.xlu1 %2924  ;;  %v11277_v15 = vsel %vm2872_vm9, %v4466_v58, %v4467_v6  ;;  %v4502_v3 = vmul.f32 %v8404_v35, %v4500_v26  ;;  %v12550_v58 = vld [vmem:[#allocation94_spill] sm:$0xff] }
 0x65e   : > { %12545 = vst [vmem:[#allocation99_spill] sm:$0xff] %v11274_v38  ;;  %12546 = vst [vmem:[#allocation133_spill] sm:$0xff] %v11277_v15  ;;  %v11280_v36 = vsel %vm2872_vm9, %v6023_v39, %v6024_v31  ;;  %v4487_v47 = vstv %s11232_s29  ;;  %v3656_v42 = vadd.f32 %v12548_v17, %v3645_v14  ;;  %v4479_v2 = vrot.slane %v4475_v7, 6  ;;  %s12662_s29 = sld [smem:[#allocation16_spill]] }
 0x65f   : > { %12547 = vst [vmem:[#allocation171_spill] sm:$0xff] %v11280_v36  ;;  %v4480_v52 = vrot.slane %v4476_v18, 6  ;;  %v4505_v27 = vrot.slane %v4501_v61, 6  ;;  %4239 = vrot.lane.b32.xlu1 %v12549_v20, %s7241_s27  ;;  %4126 = vrot.lane.b32.xlu0 %v12550_v58, %s12186_s14  ;;  %v4506_v39 = vrot.slane %v4502_v3, 6  ;;  %v4488_v31 = vmul.f32 %v4487_v47, %v8448_v23  ;;  %v12551_v36 = vld [vmem:[#allocation142_spill] sm:$0xff] }
 0x660   : > { %v4489_v26 = vmul.f32 %v8437_v1, %v4487_v47  ;;  %v5319_v6 = vstv %s11245_s21  ;;  %v3669_v15 = vadd.f32 %v12551_v36, %v3656_v42  ;;  %v11304_v20 = vpop.permute.xlu0 %5275  ;;  %v5330_v36 = vstv %s11257_s9  ;;  %s12663_s21 = sld [smem:[#allocation21_spill]] }
 0x661   : > { %v11298_v14 = vsel %vm2872_vm9, %v4479_v2, %v4480_v52  ;;  %v5320_v7 = vmul.f32 %v5319_v6, %v8884_v34  ;;  %v5321_v18 = vmul.f32 %v8873_v30, %v5319_v6  ;;  %12553 = vst [vmem:[#allocation148_spill] sm:$0xff] %v11304_v20  ;;  %v11306_v61 = vpop.permute.xlu1 %4894  ;;  %v11309_v3 = vsel %vm2872_vm9, %v4505_v27, %v4506_v39  ;;  %v12555_v6 = vld [vmem:[#allocation118_spill] sm:$0xff]  ;;  %v12557_v27 = vld [vmem:[#allocation103_spill] sm:$0xff] }
 0x662   : > { %12552 = vst [vmem:[#allocation134_spill] sm:$0xff] %v11298_v14  ;;  %12554 = vst [vmem:[#allocation94_spill] sm:$0xff] %v11309_v3  ;;  %v4492_v47 = vrot.slane %v4488_v31, 6  ;;  %v4493_v17 = vrot.slane %v4489_v26, 6  ;;  %v3682_v42 = vadd.f32 %v3680_v10, %v3669_v15  ;;  %v5331_v58 = vmul.f32 %v5330_v36, %v12345_v59  ;;  %v12556_v20 = vld [vmem:[#allocation106_spill] sm:$0xff]  ;;  %v12559_v31 = vld [vmem:[#allocation153_spill] sm:$0xff] }
 0x663   : > { %v5324_v2 = vrot.slane %v5320_v7, 3  ;;  %v5325_v52 = vrot.slane %v5321_v18, 3  ;;  %v11317_v14 = vadd.f32 %v12555_v6, %v10822_v53  ;;  %4252 = vrot.lane.b32.xlu1 %v12556_v20, %s7244_s18  ;;  %5362 = vrot.lane.b32.xlu0 %v12557_v27, %s7242_s12  ;;  %v5332_v15 = vmul.f32 %v12363_v50, %v5330_v36 }
 0x664   : > { %v11324_v10 = vsel %vm2872_vm9, %v4492_v47, %v4493_v17  ;;  %v4513_v39 = vstv %s11268_s6  ;;  %v3695_v26 = vadd.f32 %v12559_v31, %v3682_v42  ;;  %v5335_v53 = vrot.slane %v5331_v58, 3  ;;  %v11337_v20 = vpop.permute.xlu0 %5301  ;;  %v12562_v31 = vld [vmem:[#allocation140_spill] sm:$0xff]  ;;  %s6827_s9 = sshll.u32 %s12662_s29, 10 }
 0x665   : > { %12558 = vst [vmem:[#allocation142_spill] sm:$0xff] %v11324_v10  ;;  %v11330_v7 = vsel %vm2335_vm8, %v5324_v2, %v5325_v52  ;;  %v4514_v18 = vmul.f32 %v4513_v39, %v8448_v23  ;;  %12561 = vst [vmem:[#allocation106_spill] sm:$0xff] %v11337_v20  ;;  %v11339_v6 = vpop.permute.xlu1 %4910  ;;  %v5336_v47 = vrot.slane %v5332_v15, 3  ;;  %v4515_v17 = vmul.f32 %v8437_v1, %v4513_v39  ;;  %v12563_v10 = vld [vmem:[#allocation149_spill] sm:$0xff] }
 0x666   : > { %12560 = vst [vmem:[#allocation118_spill] sm:$0xff] %v11330_v7  ;;  %v4170_v36 = vstv %s11284_s16  ;;  %v4181_v42 = vstv %s11286_s24  ;;  %v3708_v27 = vadd.f32 %v3706_v25, %v3695_v26  ;;  %v12565_v26 = vld [vmem:[#allocation92_spill] sm:$0xff]  ;;  %v5497_v20 = vstv %s11302_s10  ;;  %s12664_s6 = sshll.u32 %s12663_s21, 6 }
 0x667   : > { %v4518_v2 = vrot.slane %v4514_v18, 6  ;;  %v4171_v52 = vmul.f32 %v4170_v36, %v8415_v57  ;;  %v4172_v58 = vmul.f32 %v8404_v35, %v4170_v36  ;;  %4265 = vrot.lane.b32.xlu1 %v12562_v31, %s7244_s18  ;;  %3041 = vrot.lane.b32.xlu0 %v12563_v10, %s7245_s15  ;;  %v11351_v7 = vsel %vm2335_vm8, %v5335_v53, %v5336_v47  ;;  %s364_s16 = scalar_lea.vmem [#allocation8], %s12664_s6 }
 0x668   : > { %12564 = vst [vmem:[#allocation103_spill] sm:$0xff] %v11351_v7  ;;  %v4519_v15 = vrot.slane %v4515_v17, 6  ;;  %v4182_v39 = vmul.f32 %v4181_v42, %v8448_v23  ;;  %v4183_v25 = vmul.f32 %v8437_v1, %v4181_v42  ;;  %v3721_v18 = vadd.f32 %v12565_v26, %v3708_v27  ;;  %v11359_v31 = vpop.permute.xlu0 %5349  ;;  %v12567_v42 = vld [vmem:[#allocation135_spill] sm:$0xff]  ;;  %s6368_s24 = sshll.u32 %s364_s16, 4  ;;  %s11819_s24 = int_to_ptr.vmem [resolvable:$true] %s6368_s24 }
 0x669   : > { %v4175_v36 = vrot.slane %v4171_v52, 5  ;;  %v4176_v3 = vrot.slane %v4172_v58, 5  ;;  %v11361_v38 = vpop.permute.xlu1 %4926  ;;  %v5498_v17 = vmul.f32 %v5497_v20, %v8884_v34  ;;  %v5499_v52 = vmul.f32 %v8873_v30, %v5497_v20  ;;  %v12569_v26 = vld [vmem:[#allocation143_spill] sm:$0xff] }
 0x66a   : > { %v11364_v10 = vsel %vm2872_vm9, %v4518_v2, %v4519_v15  ;;  %v4186_v53 = vrot.slane %v4182_v39, 5  ;;  %v4187_v47 = vrot.slane %v4183_v25, 5  ;;  %v3734_v7 = vadd.f32 %v12567_v42, %v3721_v18  ;;  %v12570_v2 = vld [vmem:[#allocation141_spill] sm:$0xff] }
 0x66b   : > { %12566 = vst [vmem:[#allocation153_spill] sm:$0xff] %v11364_v10  ;;  %v11369_v27 = vsel %vm2693_vm7, %v4175_v36, %v4176_v3  ;;  %v5675_v58 = vstv %s11313_s23  ;;  %5388 = vrot.lane.b32.xlu1 %v12569_v26, %s7241_s27  ;;  %4152 = vrot.lane.b32.xlu0 %v12570_v2, %s7245_s15  ;;  %v5502_v39 = vrot.slane %v5498_v17, 4  ;;  %v5503_v36 = vrot.slane %v5499_v52, 4  ;;  %v12573_v17 = vld [vmem:[#allocation101_spill] sm:$0xff]  ;;  %v12574_v52 = vld [vmem:[#allocation152_spill] sm:$0xff] }
 0x66c   : > { %12568 = vst [vmem:[#allocation140_spill] sm:$0xff] %v11369_v27  ;;  %v11378_v15 = vsel %vm2693_vm7, %v4186_v53, %v4187_v47  ;;  %v5676_v25 = vmul.f32 %v5675_v58, %v8884_v34  ;;  %v5677_v18 = vmul.f32 %v8873_v30, %v5675_v58  ;;  %v3747_v3 = vadd.f32 %v10712_v5, %v3734_v7  ;;  %v11385_v27 = vpop.permute.xlu0 %5375 }
 0x66d   : > { %12571 = vst [vmem:[#allocation149_spill] sm:$0xff] %v11378_v15  ;;  %v4348_v42 = vstv %s11333_s28  ;;  %v4359_v20 = vstv %s11335_s11  ;;  %12572 = vst [vmem:[#allocation92_spill] sm:$0xff] %v11385_v27  ;;  %v11387_v26 = vpop.permute.xlu1 %4942  ;;  %v11393_v58 = vsel %vm2514_vm6, %v5502_v39, %v5503_v36  ;;  %v12575_v27 = vld [vmem:[#allocation136_spill] sm:$0xff]  ;;  %s12665_s28 = sld [smem:[#allocation181_spill]] }
 0x66e   : > { %v5680_v10 = vrot.slane %v5676_v25, 5  ;;  %v5681_v2 = vrot.slane %v5677_v18, 5  ;;  %v4349_v53 = vmul.f32 %v4348_v42, %v8415_v57  ;;  %v4350_v47 = vmul.f32 %v8404_v35, %v4348_v42 }
 0x66f   : > { %v3760_v15 = vadd.f32 %v12573_v17, %v3747_v3  ;;  %v4360_v5 = vmul.f32 %v4359_v20, %v8448_v23  ;;  %v4361_v7 = vmul.f32 %v8437_v1, %v4359_v20  ;;  %5414 = vrot.lane.b32.xlu1 %v12574_v52, %s7244_s18  ;;  %5705 = vrot.lane.b32.xlu0 %v12575_v27, %s7242_s12  ;;  %v5853_v18 = vstv %s11355_s30  ;;  %v12579_v17 = vld [vmem:[#allocation114_spill] sm:$0xff]  ;;  %s12666_s30 = sld [smem:[#allocation19_spill]] }
 0x670   : > { %v11402_v25 = vsel %vm2693_vm7, %v5680_v10, %v5681_v2  ;;  %v4353_v57 = vrot.slane %v4349_v53, 6  ;;  %v4354_v35 = vrot.slane %v4350_v47, 6  ;;  %v5854_v23 = vmul.f32 %v5853_v18, %v8884_v34  ;;  %v11407_v42 = vpop.permute.xlu0 %5401  ;;  %v12576_v10 = vld [vmem:[#allocation100_spill] sm:$0xff]  ;;  %v12578_v34 = vld [vmem:[#allocation157_spill] sm:$0xff] }
 0x671   : > { %v3773_v3 = vadd.f32 %v10744_v4, %v3760_v15  ;;  %v4364_v39 = vrot.slane %v4360_v5, 6  ;;  %v4365_v36 = vrot.slane %v4361_v7, 6  ;;  %v11409_v1 = vpop.permute.xlu1 %4958  ;;  %v5855_v27 = vmul.f32 %v8873_v30, %v5853_v18  ;;  %v12577_v15 = vld [vmem:[#allocation156_spill] sm:$0xff] }
 0x672   : > { %v11412_v20 = vsel %vm2872_vm9, %v4353_v57, %v4354_v35  ;;  %v5858_v4 = vrot.slane %v5854_v23, 6  ;;  %v2787_v5 = vadd.f32 %v12579_v17, %v11317_v14  ;;  %v12580_v35 = vld [vmem:[#allocation108_spill] sm:$0xff]  ;;  %v12583_v14 = vld [vmem:[#allocation121_spill] sm:$0xff]  ;;  %v12584_v17 = vld [vmem:[#allocation122_spill] sm:$0xff] }
 0x673   : > { %v3786_v2 = vadd.f32 %v12576_v10, %v3773_v3  ;;  %v11417_v53 = vsel %vm2872_vm9, %v4364_v39, %v4365_v36  ;;  %5440 = vrot.lane.b32.xlu1 %v12577_v15, %s12184_s19  ;;  %5731 = vrot.lane.b32.xlu0 %v12578_v34, %s7241_s27  ;;  %v5859_v47 = vrot.slane %v5855_v27, 6  ;;  %v12581_v3 = vld [vmem:[#allocation105_spill] sm:$0xff]  ;;  %v12582_v39 = vld [vmem:[#allocation147_spill] sm:$0xff]  ;;  %s11817_s11 = scalar_lea.hbm %s12665_s28, %s6827_s9 }
 0x674   : > { %v11426_v30 = vpop.permute.xlu0 %5427  ;;  %v2800_v23 = vadd.f32 %v12583_v14, %v2787_v5  ;;  %v12589_v14 = vld [vmem:[#allocation123_spill] sm:$0xff] }
 0x675   : > { %v3799_v7 = vadd.f32 %v10775_v43, %v3786_v2  ;;  %v11428_v52 = vpop.permute.xlu1 %4035  ;;  %v11431_v57 = vsel %vm2872_vm9, %v5858_v4, %v5859_v47  ;;  %v5508_v43 = vstv %s6776_s3  ;;  %s6355_s3 = scalar_lea.sflag [#allocation5], %s12663_s21  ;;  %p12667_p12 = scmp.ne.s32.totalorder %s12666_s30, 0 }
 0x676   : > { %v5509_v2 = vmul.f32 %v5508_v43, %v12345_v59  ;;  %v5510_v4 = vmul.f32 %v12363_v50, %v5508_v43  ;;  %v2813_v5 = vadd.f32 %v12584_v17, %v2800_v23  ;;  %v12592_v17 = vld [vmem:[#allocation124_spill] sm:$0xff] }
 0x677   : > { %v3812_v18 = vadd.f32 %v12580_v35, %v3799_v7  ;;  %5466 = vrot.lane.b32.xlu1 %v10717_v62, %s12186_s14  ;;  %5757 = vrot.lane.b32.xlu0 %v12581_v3, %s7244_s18 }
 0x678   : > { %v11440_v27 = vpop.permute.xlu0 %5453  ;;  %v5513_v62 = vrot.slane %v5509_v2, 4  ;;  %v5514_v34 = vrot.slane %v5510_v4, 4  ;;  %v2826_v23 = vadd.f32 %v12589_v14, %v2813_v5 }
 0x679   : > { %v3823_v36 = vadd.f32 %v12582_v39, %v3812_v18  ;;  %v11442_v10 = vpop.permute.xlu1 %2950  ;;  %v12588_v39 = vld [vmem:[#allocation107_spill] sm:$0xff] }
 0x67a   : > { %v11458_v18 = vsel %vm2514_vm6, %v5513_v62, %v5514_v34  ;;  %v12591_v34 = vld [vmem:[#allocation91_spill] sm:$0xff] }
 0x67b   : > { %v3834_v15 = vadd.f32 %v10767_v48, %v3823_v36  ;;  %5492 = vrot.lane.b32.xlu1 %v10741_v56, %s7245_s15  ;;  %5783 = vrot.lane.b32.xlu0 %v10754_v29, %s12184_s19  ;;  %v12585_v48 = vld [vmem:[#allocation150_spill] sm:$0xff]  ;;  %v12586_v56 = vld [vmem:[#allocation132_spill] sm:$0xff] }
 0x67c   : > { %v11453_v7 = vpop.permute.xlu0 %5479  ;;  %v12587_v29 = vld [vmem:[#allocation102_spill] sm:$0xff] }
 0x67d   : > { %v3847_v47 = vadd.f32 %v10812_v33, %v3834_v15  ;;  %v11455_v35 = vpop.permute.xlu1 %4061  ;;  %v4873_v33 = vadd.f32 %v12588_v39, %v12587_v29  ;;  %v12590_v15 = vld [vmem:[#allocation151_spill] sm:$0xff]  ;;  %v12594_v39 = vld [vmem:[#allocation138_spill] sm:$0xff] }
 0x67f   : > { %v3860_v3 = vadd.f32 %v12585_v48, %v3847_v47  ;;  %4278 = vrot.lane.b32.xlu1 %v12586_v56, %s12184_s19  ;;  %5540 = vrot.lane.b32.xlu0 %v10764_v46, %s7242_s12  ;;  %v12593_v56 = vld [vmem:[#allocation154_spill] sm:$0xff] }
 0x680   : > { %v4879_v2 = vpop.permute.xlu0 %4878 }
 0x681   : > { %v3873_v36 = vadd.f32 %v10842_v12, %v3860_v3  ;;  %v11469_v43 = vpop.permute.xlu1 %2976  ;;  %v4881_v4 = vadd.f32 %v4879_v2, %v4873_v33  ;;  %v2839_v12 = vadd.f32 %v12592_v17, %v2826_v23  ;;  %v12595_v33 = vld [vmem:[#allocation137_spill] sm:$0xff] }
 0x683   : > { %v3886_v62 = vadd.f32 %v12590_v15, %v3873_v36  ;;  %4291 = vrot.lane.b32.xlu1 %v12591_v34, %s12184_s19  ;;  %5809 = vrot.lane.b32.xlu0 %v10780_v60, %s12186_s14  ;;  %v4889_v46 = vadd.f32 %v10746_v21, %v4881_v4  ;;  %v12596_v60 = vld [vmem:[#allocation112_spill] sm:$0xff]  ;;  %v12599_v34 = vld [vmem:[#allocation93_spill] sm:$0xff] }
 0x684   : > { %v3949_v5 = vpop.permute.xlu0 %3948 }
 0x685   : > { %v3899_v47 = vadd.f32 %v10869_v54, %v3886_v62  ;;  %v11479_v48 = vpop.permute.xlu1 %5032  ;;  %v4897_v3 = vadd.f32 %v11306_v61, %v4889_v46  ;;  %v12597_v54 = vld [vmem:[#allocation127_spill] sm:$0xff]  ;;  %v12600_v46 = vld [vmem:[#allocation110_spill] sm:$0xff] }
 0x686   : > { %v2852_v14 = vadd.f32 %v12597_v54, %v2839_v12  ;;  %v12598_v61 = vld [vmem:[#allocation155_spill] sm:$0xff] }
 0x687   : > { %v3912_v29 = vadd.f32 %v12593_v56, %v3899_v47  ;;  %5566 = vrot.lane.b32.xlu1 %v12594_v39, %s7241_s27  ;;  %5835 = vrot.lane.b32.xlu0 %v12595_v33, %s7245_s15  ;;  %v4905_v36 = vadd.f32 %v12596_v60, %v4897_v3  ;;  %v12601_v47 = vld [vmem:[#allocation115_spill] sm:$0xff]  ;;  %v12603_v33 = vld [vmem:[#allocation130_spill] sm:$0xff] }
 0x688   : > { %v2863_v2 = vpop.permute.xlu0 %2862 }
 0x689   : > { %v3925_v21 = vadd.f32 %v10901_v41, %v3912_v29  ;;  %v11490_v23 = vpop.permute.xlu1 %5058  ;;  %v4913_v4 = vadd.f32 %v11339_v6, %v4905_v36  ;;  %v2865_v62 = vadd.f32 %v2863_v2, %v2852_v14  ;;  %v12602_v41 = vld [vmem:[#allocation104_spill] sm:$0xff] }
 0x68b   : > { %v3938_v15 = vadd.f32 %v12598_v61, %v3925_v21  ;;  %5592 = vrot.lane.b32.xlu1 %v12599_v34, %s7244_s18  ;;  %4330 = vrot.lane.b32.xlu0 %v12600_v46, %s7245_s15  ;;  %v4921_v17 = vadd.f32 %v12601_v47, %v4913_v4  ;;  %v2877_v56 = vadd.f32 %v12602_v41, %v2865_v62  ;;  %v12606_v4 = vld [vmem:[#allocation158_spill] sm:$0xff]  ;;  %v5686_v61 = vstv %s6790_s4  ;;  %s7160_s4 = scalar_lea.vmem %s11819_s24, 1024 }
 0x68c   : > { %v3975_v29 = vpop.permute.xlu0 %3974  ;;  %v5687_v34 = vmul.f32 %v5686_v61, %v12345_v59  ;;  %v12608_v47 = vld [vmem:[#allocation162_spill] sm:$0xff]  ;;  %p7161_p5 = scmp.ne.s32.totalorder %s11819_s24, %s7160_s4 }
 0x68d   : > { %v3951_v3 = vadd.f32 %v3949_v5, %v3938_v15  ;;  %v5085_v12 = vpop.permute.xlu1 %5084  ;;  %v4929_v39 = vadd.f32 %v11361_v38, %v4921_v17  ;;  %v11502_v6 = vadd.f32 %v12603_v33, %v2877_v56  ;;  %v12604_v5 = vld [vmem:[#allocation109_spill] sm:$0xff]  ;;  %v12609_v33 = vld [vmem:[#allocation167_spill] sm:$0xff] }
 0x68e   : > { %p7162_p8 = pnand %p7161_p5, %p12667_p12 }
 0x68f   : > { %v3964_v60 = vadd.f32 %v11172_v0, %v3951_v3  ;;  %5618 = vrot.lane.b32.xlu1 %v10874_v19, %s12184_s19  ;;  %5883 = vrot.lane.b32.xlu0 %v10877_v51, %s7242_s12  ;;  %v4937_v21 = vadd.f32 %v12604_v5, %v4929_v39  ;;  %v12605_v0 = vld [vmem:[#allocation159_spill] sm:$0xff] }
 0x690   : > { %v11510_v14 = vpop.permute.xlu0 %5527  ;;  %p7163_p9 = pneg %p7162_p8 }
 0x691   : > { %v3977_v36 = vadd.f32 %v3975_v29, %v3964_v60  ;;  %v5111_v54 = vpop.permute.xlu1 %5110  ;;  %v4945_v2 = vadd.f32 %v11387_v26, %v4937_v21  ;;  %v12611_v60 = vld [vmem:[#allocation165_spill] sm:$0xff] }
 0x693   : > { %v3990_v38 = vadd.f32 %v11199_v37, %v3977_v36  ;;  %5644 = vrot.lane.b32.xlu1 %v10890_v49, %s12186_s14  ;;  %5909 = vrot.lane.b32.xlu0 %v12605_v0, %s7241_s27  ;;  %v4953_v51 = vadd.f32 %v12606_v4, %v4945_v2  ;;  %v5688_v37 = vmul.f32 %v12363_v50, %v5686_v61  ;;  %v12607_v49 = vld [vmem:[#allocation161_spill] sm:$0xff]  ;;  %v12612_v36 = vld [vmem:[#allocation160_spill] sm:$0xff]  ;;  %v12613_v2 = vld [vmem:[#allocation163_spill] sm:$0xff] }
 0x694   : > { %v11520_v62 = vpop.permute.xlu0 %5553  ;;  %v12614_v61 = vld [vmem:[#allocation139_spill] sm:$0xff] }
 0x695   : > { %v4001_v19 = vadd.f32 %v10930_v24, %v3990_v38  ;;  %v5137_v15 = vpop.permute.xlu1 %5136  ;;  %v4961_v46 = vadd.f32 %v11409_v1, %v4953_v51  ;;  %v5691_v24 = vrot.slane %v5687_v34, 5  ;;  %v5692_v17 = vrot.slane %v5688_v37, 5  ;;  %v12610_v1 = vld [vmem:[#allocation164_spill] sm:$0xff] }
 0x697   : > { %v4012_v26 = vadd.f32 %v10937_v8, %v4001_v19  ;;  %5670 = vrot.lane.b32.xlu1 %v12607_v49, %s7245_s15  ;;  %5935 = vrot.lane.b32.xlu0 %v12608_v47, %s7244_s18  ;;  %v4972_v3 = vadd.f32 %v10983_v40, %v4961_v46  ;;  %v11532_v29 = vsel %vm2693_vm7, %v5691_v24, %v5692_v17  ;;  %v5864_v24 = vstv %s6804_s13  ;;  %s7248_s13 = smov [#allocation8]  }
 0x698   : > { %v4023_v56 = vpop.permute.xlu0 %4022 }
 0x699   : > { %v4088_v41 = vpop.permute.xlu1 %4087  ;;  %v4025_v39 = vadd.f32 %v4023_v56, %v4012_v26  ;;  %v4983_v8 = vadd.f32 %v12609_v33, %v4972_v3 }
 0x69b   : > { %4304 = vrot.lane.b32.xlu1 %v12610_v1, %s12186_s14  ;;  %5961 = vrot.lane.b32.xlu0 %v12611_v60, %s12184_s19  ;;  %v4996_v5 = vadd.f32 %v12612_v36, %v4983_v8  ;;  %v4038_v26 = vadd.f32 %v11428_v52, %v4025_v39 }
 0x69c   : > { %v5007_v38 = vpop.permute.xlu0 %5006 }
 0x69d   : > { %v11540_v21 = vpop.permute.xlu1 %3002  ;;  %v5009_v40 = vadd.f32 %v5007_v38, %v4996_v5 }
 0x69f   : > { %5718 = vrot.lane.b32.xlu1 %v11014_v11, %s7242_s12  ;;  %5744 = vrot.lane.b32.xlu0 %v11018_v55, %s7241_s27  ;;  %v5022_v0 = vadd.f32 %v12613_v2, %v5009_v40  ;;  %v12620_v40 = vld [vmem:[#allocation95_spill] sm:$0xff] }
 0x6a0   : > { %v11549_v4 = vpop.permute.xlu0 %2937 }
 0x6a1   : > { %v11547_v19 = vpop.permute.xlu1 %4113  ;;  %v5035_v51 = vadd.f32 %v11479_v48, %v5022_v0  ;;  %v12615_v48 = vld [vmem:[#allocation166_spill] sm:$0xff]  ;;  %v12621_v0 = vld [vmem:[#allocation168_spill] sm:$0xff] }
 0x6a3   : > { %4317 = vrot.lane.b32.xlu1 %v11029_v22, %s12186_s14  ;;  %5770 = vrot.lane.b32.xlu0 %v11043_v45, %s7244_s18  ;;  %v5048_v34 = vadd.f32 %v12614_v61, %v5035_v51  ;;  %v12624_v61 = vld [vmem:[#allocation116_spill] sm:$0xff] }
 0x6a4   : > { %v11559_v55 = vpop.permute.xlu0 %5579 }
 0x6a5   : > { %v11557_v11 = vpop.permute.xlu1 %3028  ;;  %v5061_v37 = vadd.f32 %v11490_v23, %v5048_v34  ;;  %v5866_v23 = vmul.f32 %v12363_v50, %v5864_v24 }
 0x6a7   : > { %4343 = vrot.lane.b32.xlu1 %v11052_v13, %s7245_s15  ;;  %5796 = vrot.lane.b32.xlu0 %v11068_v16, %s12184_s19  ;;  %v5074_v22 = vadd.f32 %v12615_v48, %v5061_v37  ;;  %v5865_v13 = vmul.f32 %v5864_v24, %v12345_v59  ;;  %v12616_v16 = vld [vmem:[#allocation111_spill] sm:$0xff]  ;;  %v5870_v39 = vrot.slane %v5866_v23, 6 }
 0x6a8   : > { %v4049_v46 = vpop.permute.xlu0 %4048 }
 0x6a9   : > { %v5211_v45 = vpop.permute.xlu1 %5210  ;;  %v5087_v49 = vadd.f32 %v5085_v12, %v5074_v22  ;;  %v4051_v47 = vadd.f32 %v4049_v46, %v4038_v26  ;;  %v5869_v52 = vrot.slane %v5865_v13, 6  ;;  %v12617_v12 = vld [vmem:[#allocation120_spill] sm:$0xff]  ;;  %v12625_v22 = vld [vmem:[#allocation126_spill] sm:$0xff]  ;;  %v12627_v46 = vld [vmem:[#allocation97_spill] sm:$0xff] }
 0x6aa   : > { %v12626_v26 = vld [vmem:[#allocation144_spill] sm:$0xff] }
 0x6ab   : > { %4378 = vrot.lane.b32.xlu1 %v11061_v28, %s7242_s12  ;;  %5822 = vrot.lane.b32.xlu0 %v11088_v32, %s12186_s14  ;;  %v5100_v17 = vadd.f32 %v12616_v16, %v5087_v49  ;;  %v11580_v28 = vsel %vm2872_vm9, %v5869_v52, %v5870_v39  ;;  %v12618_v32 = vld [vmem:[#allocation113_spill] sm:$0xff] }
 0x6ac   : > { %v2964_v56 = vpop.permute.xlu0 %2963  ;;  %v12632_v39 = vld [vmem:[#allocation117_spill] sm:$0xff] }
 0x6ad   : > { %v5237_v3 = vpop.permute.xlu1 %5236  ;;  %v5113_v33 = vadd.f32 %v5111_v54, %v5100_v17  ;;  %v12619_v54 = vld [vmem:[#allocation128_spill] sm:$0xff]  ;;  %v12631_v17 = vld [vmem:[#allocation99_spill] sm:$0xff] }
 0x6af   : > { %4391 = vrot.lane.b32.xlu1 %v11096_v44, %s7242_s12  ;;  %5848 = vrot.lane.b32.xlu0 %v12617_v12, %s7245_s15  ;;  %v5126_v59 = vadd.f32 %v12618_v32, %v5113_v33  ;;  %v4064_v44 = vadd.f32 %v11455_v35, %v4051_v47  ;;  %v12628_v47 = vld [vmem:[#allocation119_spill] sm:$0xff] }
 0x6b0   : > { %v11583_v50 = vpop.permute.xlu0 %5605 }
 0x6b1   : > { %v5263_v8 = vpop.permute.xlu1 %5262  ;;  %v5139_v1 = vadd.f32 %v5137_v15, %v5126_v59  ;;  %v12622_v15 = vld [vmem:[#allocation169_spill] sm:$0xff] }
 0x6b3   : > { %4404 = vrot.lane.b32.xlu1 %v11118_v63, %s7241_s27  ;;  %5987 = vrot.lane.b32.xlu0 %v11127_v9, %s12186_s14  ;;  %v5150_v60 = vadd.f32 %v12619_v54, %v5139_v1  ;;  %v12623_v63 = vld [vmem:[#allocation96_spill] sm:$0xff]  ;;  %v12635_v54 = vld [vmem:[#allocation125_spill] sm:$0xff] }
 0x6b4   : > { %v4075_v5 = vpop.permute.xlu0 %4074  ;;  %v2901_v51 = vadd.f32 %v12623_v63, %v11502_v6  ;;  %v12629_v6 = vld [vmem:[#allocation170_spill] sm:$0xff] }
 0x6b5   : > { %v5289_v36 = vpop.permute.xlu1 %5288  ;;  %v4077_v38 = vadd.f32 %v4075_v5, %v4064_v44  ;;  %v5161_v2 = vadd.f32 %v12620_v40, %v5150_v60  ;;  %v12633_v44 = vld [vmem:[#allocation131_spill] sm:$0xff] }
 0x6b6   : > { %v2914_v49 = vadd.f32 %v12627_v46, %v2901_v51  ;;  %v12638_v51 = vld [vmem:[#allocation148_spill] sm:$0xff] }
 0x6b7   : > { %4417 = vrot.lane.b32.xlu1 %v12621_v0, %s7241_s27  ;;  %6013 = vrot.lane.b32.xlu0 %v12622_v15, %s7245_s15  ;;  %v5174_v9 = vadd.f32 %v12624_v61, %v5161_v2  ;;  %v4090_v34 = vadd.f32 %v4088_v41, %v4077_v38  ;;  %v12630_v41 = vld [vmem:[#allocation129_spill] sm:$0xff]  ;;  %v12636_v15 = vld [vmem:[#allocation98_spill] sm:$0xff] }
 0x6b8   : > { %v5185_v37 = vpop.permute.xlu0 %5184  ;;  %v2927_v52 = vadd.f32 %v12631_v17, %v2914_v49 }
 0x6b9   : > { %v5315_v35 = vpop.permute.xlu1 %5314  ;;  %v5187_v48 = vadd.f32 %v5185_v37, %v5174_v9 }
 0x6ba   : > { %v2940_v59 = vadd.f32 %v11549_v4, %v2927_v52  ;;  %v12637_v4 = vld [vmem:[#allocation146_spill] sm:$0xff]  ;;  %v12645_v52 = vld [vmem:[#allocation103_spill] sm:$0xff] }
 0x6bb   : > { %5896 = vrot.lane.b32.xlu1 %v12625_v22, %s7242_s12  ;;  %5922 = vrot.lane.b32.xlu0 %v12626_v26, %s7241_s27  ;;  %v5200_v24 = vadd.f32 %v12628_v47, %v5187_v48  ;;  %v12639_v22 = vld [vmem:[#allocation133_spill] sm:$0xff]  ;;  %v12642_v47 = vld [vmem:[#allocation134_spill] sm:$0xff]  ;;  %s6597_s27 = sld [smem:[#allocation7 + $0x62]] }
 0x6bc   : > { %v2990_v23 = vpop.permute.xlu0 %2989  ;;  %v2953_v40 = vadd.f32 %v11442_v10, %v2940_v59  ;;  %v12640_v10 = vld [vmem:[#allocation171_spill] sm:$0xff]  ;;  %s6817_s12 = sld [smem:[#allocation7 + $0x162]] }
 0x6bd   : > { %v4140_v13 = vpop.permute.xlu1 %4139  ;;  %v5213_v16 = vadd.f32 %v5211_v45, %v5200_v24  ;;  %v12634_v45 = vld [vmem:[#allocation145_spill] sm:$0xff]  ;;  %v12644_v24 = vld [vmem:[#allocation118_spill] sm:$0xff] }
 0x6bf   : > { %4430 = vrot.lane.b32.xlu1 %v12629_v6, %s7244_s18  ;;  %5948 = vrot.lane.b32.xlu0 %v12630_v41, %s7244_s18  ;;  %v5226_v33 = vadd.f32 %v12632_v39, %v5213_v16 }
 0x6c1   : > { %v4166_v12 = vpop.permute.xlu1 %4165  ;;  %v11611_v32 = vpop.permute.xlu0 %5631  ;;  %v5239_v1 = vadd.f32 %v5237_v3, %v5226_v33  ;;  %v2966_v3 = vadd.f32 %v2964_v56, %v2953_v40  ;;  %v12646_v33 = vld [vmem:[#allocation142_spill] sm:$0xff] }
 0x6c3   : > { %4443 = vrot.lane.b32.xlu1 %v12633_v44, %s7244_s18  ;;  %5974 = vrot.lane.b32.xlu0 %v12634_v45, %s12184_s19  ;;  %v5252_v60 = vadd.f32 %v12635_v54, %v5239_v1  ;;  %v12647_v45 = vld [vmem:[#allocation153_spill] sm:$0xff]  ;;  %s6707_s18 = sld [smem:[#allocation7 + $0xe2]] }
 0x6c5   : > { %v4201_v5 = vpop.permute.xlu1 %4200  ;;  %v4101_v38 = vpop.permute.xlu0 %4100  ;;  %v5265_v2 = vadd.f32 %v5263_v8, %v5252_v60  ;;  %v2979_v8 = vadd.f32 %v11469_v43, %v2966_v3 }
 0x6c6   : > { %v4103_v0 = vadd.f32 %v4101_v38, %v4090_v34  ;;  %v12641_v34 = vld [vmem:[#allocation106_spill] sm:$0xff] }
 0x6c7   : > { %4456 = vrot.lane.b32.xlu1 %v12636_v15, %s12184_s19  ;;  %6000 = vrot.lane.b32.xlu0 %v12637_v4, %s12186_s14  ;;  %v5278_v61 = vadd.f32 %v12638_v51, %v5265_v2  ;;  %v2992_v56 = vadd.f32 %v2990_v23, %v2979_v8  ;;  %v12648_v15 = vld [vmem:[#allocation92_spill] sm:$0xff] }
 0x6c8   : > { %v4116_v63 = vadd.f32 %v11547_v19, %v4103_v0 }
 0x6c9   : > { %v4214_v9 = vpop.permute.xlu1 %4213  ;;  %v3016_v37 = vpop.permute.xlu0 %3015  ;;  %v5291_v48 = vadd.f32 %v5289_v36, %v5278_v61  ;;  %v12643_v36 = vld [vmem:[#allocation94_spill] sm:$0xff]  ;;  %v3005_v43 = vadd.f32 %v11540_v21, %v2992_v56  ;;  %v3046_v21 = vstv %s6597_s27  ;;  %s7164_s27 = sshll.u32 %s7248_s13, 4  ;;  %s7165_s27 = int_to_ptr.vmem [resolvable:$false] %s7164_s27 }
 0x6ca   : > { %p7167_p10 = scmp.lt.s32.totalorder %s11819_s24, %s7165_s27 }
 0x6cb   : > { %4469 = vrot.lane.b32.xlu1 %v12639_v22, %s12184_s19  ;;  %6026 = vrot.lane.b32.xlu0 %v12640_v10, %s7245_s15  ;;  %v5304_v26 = vadd.f32 %v12641_v34, %v5291_v48  ;;  %v12650_v34 = vld [vmem:[#allocation149_spill] sm:$0xff] }
 0x6cd   : > { %v4227_v46 = vpop.permute.xlu1 %4226  ;;  %v11632_v49 = vpop.permute.xlu0 %5657  ;;  %v5317_v19 = vadd.f32 %v5315_v35, %v5304_v26  ;;  %v3018_v35 = vadd.f32 %v3016_v37, %v3005_v43 }
 0x6cf   : > { %4482 = vrot.lane.b32.xlu1 %v12642_v47, %s12186_s14  ;;  %4508 = vrot.lane.b32.xlu0 %v12643_v36, %s7245_s15  ;;  %v5328_v16 = vadd.f32 %v12644_v24, %v5317_v19  ;;  %v3031_v60 = vadd.f32 %v11557_v11, %v3018_v35  ;;  %v12649_v11 = vld [vmem:[#allocation140_spill] sm:$0xff] }
 0x6d1   : > { %v4240_v6 = vpop.permute.xlu1 %4239  ;;  %v4127_v41 = vpop.permute.xlu0 %4126  ;;  %v5339_v39 = vadd.f32 %v12645_v52, %v5328_v16 }
 0x6d2   : > { %v4129_v17 = vadd.f32 %v4127_v41, %v4116_v63 }
 0x6d3   : > { %4495 = vrot.lane.b32.xlu1 %v12646_v33, %s12186_s14  ;;  %v5352_v23 = vadd.f32 %v11359_v31, %v5339_v39  ;;  %s12660_s14 = sld [smem:[#allocation179_spill]] }
 0x6d4   : > { %v4142_v59 = vadd.f32 %v4140_v13, %v4129_v17 }
 0x6d5   : > { %v4253_v1 = vpop.permute.xlu1 %4252  ;;  %v5363_v44 = vpop.permute.xlu0 %5362 }
 0x6d6   : > { %v5365_v54 = vadd.f32 %v5363_v44, %v5352_v23 }
 0x6d7   : > { %4521 = vrot.lane.b32.xlu1 %v12647_v45, %s7245_s15 }
 0x6d8   : > { %v5378_v4 = vadd.f32 %v12648_v15, %v5365_v54 }
 0x6d9   : > { %v4266_v38 = vpop.permute.xlu1 %4265  ;;  %v3042_v40 = vpop.permute.xlu0 %3041 }
 0x6da   : > { %v3044_v2 = vadd.f32 %v3042_v40, %v3031_v60 }
 0x6dc   : > { %v3047_v0 = vadd.f32 %v3046_v21, %v3044_v2 }
 0x6dd   : > { %v5389_v3 = vpop.permute.xlu1 %5388  ;;  %v4153_v63 = vpop.permute.xlu0 %4152 }
 0x6de   : > { %v6598_v51 = vmul.f32 -1.442695, %v3047_v0  ;;  %v5391_v31 = vadd.f32 %v5389_v3, %v5378_v4  ;;  %v4155_v13 = vadd.f32 %v4153_v63, %v4142_v59 }
 0x6e0   : > { %7085 = vpow2.f32 %v6598_v51  ;;  %v4168_v61 = vadd.f32 %v4166_v12, %v4155_v13  ;;  %v5404_v37 = vadd.f32 %v11407_v42, %v5391_v31 }
 0x6e1   : > { %v5415_v48 = vpop.permute.xlu1 %5414  ;;  %v11649_v22 = vpop.permute.xlu0 %5705 }
 0x6e2   : > { %v4179_v10 = vadd.f32 %v12649_v11, %v4168_v61  ;;  %v5417_v8 = vadd.f32 %v5415_v48, %v5404_v37 }
 0x6e4   : > { %v4190_v26 = vadd.f32 %v12650_v34, %v4179_v10  ;;  %v5430_v56 = vadd.f32 %v11426_v30, %v5417_v8 }
 0x6e5   : > { %v5441_v19 = vpop.permute.xlu1 %5440  ;;  %v11654_v47 = vpop.permute.xlu0 %5731 }
 0x6e6   : > { %v4203_v36 = vadd.f32 %v4201_v5, %v4190_v26  ;;  %v5443_v24 = vadd.f32 %v5441_v19, %v5430_v56 }
 0x6e8   : > { %v5456_v16 = vadd.f32 %v11440_v27, %v5443_v24  ;;  %v4216_v12 = vadd.f32 %v4214_v9, %v4203_v36 }
 0x6e9   : > { %v5467_v41 = vpop.permute.xlu1 %5466  ;;  %v11657_v42 = vpop.permute.xlu0 %5757 }
 0x6ea   : > { %v7086_v43 = vpop.eup %7085  ;;  %v5469_v17 = vadd.f32 %v5467_v41, %v5456_v16  ;;  %v4229_v52 = vadd.f32 %v4227_v46, %v4216_v12  ;;  %v12651_v46 = vld [vmem:[#allocation29_spill] sm:$0xff] }
 0x6eb   : > { %v3051_v39 = vadd.f32 1.0, %v7086_v43  ;;  %v6048_v21 = vsub.s32 1, %v12651_v46  ;;  %v6076_v63 = vsub.s32 5, %v12651_v46  ;;  %v6069_v61 = vsub.s32 4, %v12651_v46 }
 0x6ec   : > { %v5482_v33 = vadd.f32 %v11453_v7, %v5469_v17  ;;  %v4242_v35 = vadd.f32 %v4240_v6, %v4229_v52  ;;  %v11667_v7 = vsub.s32 0, %v12651_v46  ;;  %v6090_v11 = vsub.s32 7, %v12651_v46 }
 0x6ed   : > { %7087 = vrcp.f32 %v3051_v39  ;;  %v5493_v30 = vpop.permute.xlu1 %5492  ;;  %v11660_v23 = vpop.permute.xlu0 %5783  ;;  %v6083_v26 = vsub.s32 6, %v12651_v46 }
 0x6ee   : > { %v5495_v59 = vadd.f32 %v5493_v30, %v5482_v33  ;;  %v4255_v5 = vadd.f32 %v4253_v1, %v4242_v35  ;;  %v6062_v1 = vsub.s32 3, %v12651_v46 }
 0x6f0   : > { %v5506_v44 = vadd.f32 %v11393_v58, %v5495_v59  ;;  %v4268_v27 = vadd.f32 %v4266_v38, %v4255_v5 }
 0x6f1   : > { %v4279_v9 = vpop.permute.xlu1 %4278  ;;  %v5541_v45 = vpop.permute.xlu0 %5540 }
 0x6f2   : > { %v5517_v54 = vadd.f32 %v11458_v18, %v5506_v44  ;;  %v6055_v18 = vsub.s32 2, %v12651_v46  ;;  %v4281_v5 = vadd.f32 %v4279_v9, %v4268_v27 }
 0x6f4   : > { %v5530_v60 = vadd.f32 %v11510_v14, %v5517_v54 }
 0x6f5   : > { %v4292_v6 = vpop.permute.xlu1 %4291  ;;  %v11669_v40 = vpop.permute.xlu0 %5809 }
 0x6f6   : > { %v5543_v2 = vadd.f32 %v5541_v45, %v5530_v60  ;;  %v4294_v54 = vadd.f32 %v4292_v6, %v4281_v5 }
 0x6f7   : > { %v7088_v0 = vpop.eup %7087 }
 0x6f8   : > { %v5556_v58 = vadd.f32 %v11520_v62, %v5543_v2  ;;  %v6049_v38 = vrot.slane %v7088_v0, %v6048_v21  ;;  %v6042_v15 = vrot.slane %v7088_v0, %v11667_v7  ;;  %v6063_v31 = vrot.slane %v7088_v0, %v6062_v1 }
 0x6f9   : > { %v5567_v14 = vpop.permute.xlu1 %5566  ;;  %v11675_v4 = vpop.permute.xlu0 %5835  ;;  %v6056_v13 = vrot.slane %v7088_v0, %v6055_v18  ;;  %v6077_v8 = vrot.slane %v7088_v0, %v6076_v63  ;;  %v6070_v34 = vrot.slane %v7088_v0, %v6069_v61  ;;  %v6091_v24 = vrot.slane %v7088_v0, %v6090_v11 }
 0x6fa   : > { %v5569_v3 = vadd.f32 %v5567_v14, %v5556_v58  ;;  %6051 = vbcast.lane.b32.xlu1 %v6049_v38, 256  ;;  %6044 = vbcast.lane.b32.xlu0 %v6042_v15, 256  ;;  %v6084_v16 = vrot.slane %v7088_v0, %v6083_v26 }
 0x6fc   : > { %v5582_v51 = vadd.f32 %v11559_v55, %v5569_v3 }
 0x6fd   : > { %v5593_v62 = vpop.permute.xlu1 %5592  ;;  %v4331_v37 = vpop.permute.xlu0 %4330 }
 0x6fe   : > { %v5595_v48 = vadd.f32 %v5593_v62, %v5582_v51  ;;  %6065 = vbcast.lane.b32.xlu1 %v6063_v31, 256  ;;  %6058 = vbcast.lane.b32.xlu0 %v6056_v13, 256 }
 0x700   : > { %v5608_v10 = vadd.f32 %v11583_v50, %v5595_v48 }
 0x701   : > { %v5619_v56 = vpop.permute.xlu1 %5618  ;;  %v5884_v19 = vpop.permute.xlu0 %5883 }
 0x702   : > { %v5621_v55 = vadd.f32 %v5619_v56, %v5608_v10  ;;  %6079 = vbcast.lane.b32.xlu1 %v6077_v8, 256  ;;  %6072 = vbcast.lane.b32.xlu0 %v6070_v34, 256 }
 0x704   : > { %v5634_v36 = vadd.f32 %v11611_v32, %v5621_v55 }
 0x705   : > { %v5645_v12 = vpop.permute.xlu1 %5644  ;;  %v5910_v41 = vpop.permute.xlu0 %5909 }
 0x706   : > { %v5647_v43 = vadd.f32 %v5645_v12, %v5634_v36  ;;  %6093 = vbcast.lane.b32.xlu1 %v6091_v24, 256  ;;  %6086 = vbcast.lane.b32.xlu0 %v6084_v16, 256 }
 0x708   : > { %v5660_v50 = vadd.f32 %v11632_v49, %v5647_v43 }
 0x709   : > { %v5671_v17 = vpop.permute.xlu1 %5670  ;;  %v5936_v52 = vpop.permute.xlu0 %5935 }
 0x70a   : > { %v5673_v39 = vadd.f32 %v5671_v17, %v5660_v50 }
 0x70c   : > { %v5684_v33 = vadd.f32 %v11402_v25, %v5673_v39 }
 0x70d   : > { %v4305_v35 = vpop.permute.xlu1 %4304  ;;  %v5962_v30 = vpop.permute.xlu0 %5961 }
 0x70e   : > { %v5695_v59 = vadd.f32 %v11532_v29, %v5684_v33  ;;  %v4307_v21 = vadd.f32 %v4305_v35, %v4294_v54 }
 0x710   : > { %v5708_v32 = vadd.f32 %v11649_v22, %v5695_v59 }
 0x711   : > { %v5719_v44 = vpop.permute.xlu1 %5718  ;;  %v5745_v45 = vpop.permute.xlu0 %5744 }
 0x712   : > { %v5721_v60 = vadd.f32 %v5719_v44, %v5708_v32 }
 0x714   : > { %v5734_v2 = vadd.f32 %v11654_v47, %v5721_v60 }
 0x715   : > { %v4318_v49 = vpop.permute.xlu1 %4317  ;;  %v5771_v0 = vpop.permute.xlu0 %5770 }
 0x716   : > { %v5747_v1 = vadd.f32 %v5745_v45, %v5734_v2  ;;  %v4320_v58 = vadd.f32 %v4318_v49, %v4307_v21  ;;  %v6031_v45 = vstv %s6817_s12  ;;  %s7166_s12 = scalar_lea.vmem %s7165_s27, 2048 }
 0x717   : > { %p7168_p1 = scmp.lt.s32.totalorder %s7166_s12, %s7160_s4 }
 0x718   : > { %v5760_v25 = vadd.f32 %v11657_v42, %v5747_v1  ;;  %v4333_v38 = vadd.f32 %v4331_v37, %v4320_v58 }
 0x719   : > { %v4344_v15 = vpop.permute.xlu1 %4343  ;;  %v5797_v18 = vpop.permute.xlu0 %5796  ;;  %p7169_p4 = por %p7168_p1, %p7167_p10 }
 0x71a   : > { %v5773_v29 = vadd.f32 %v5771_v0, %v5760_v25  ;;  %v4346_v27 = vadd.f32 %v4344_v15, %v4333_v38  ;;  %v4526_v38 = vstv %s6707_s18 }
 0x71b   : > { %p7170_p11 = pnand %p7169_p4, %p7163_p9 }
 0x71c   : > { %v4357_v22 = vadd.f32 %v11412_v20, %v4346_v27  ;;  %v5786_v9 = vadd.f32 %v11660_v23, %v5773_v29 }
 0x71d   : > { %v4379_v6 = vpop.permute.xlu1 %4378  ;;  %v5823_v14 = vpop.permute.xlu0 %5822 }
 0x71e   : > { %v5799_v3 = vadd.f32 %v5797_v18, %v5786_v9  ;;  %v4368_v47 = vadd.f32 %v11417_v53, %v4357_v22 }
 0x720   : > { %v5812_v63 = vadd.f32 %v11669_v40, %v5799_v3  ;;  %v4381_v55 = vadd.f32 %v4379_v6, %v4368_v47  ;;  %v7247_v6 = vmov 1966171168  }
 0x721   : > { %v4392_v51 = vpop.permute.xlu1 %4391  ;;  %v5849_v31 = vpop.permute.xlu0 %5848 }
 0x722   : > { %v5825_v13 = vadd.f32 %v5823_v14, %v5812_v63  ;;  %v4394_v12 = vadd.f32 %v4392_v51, %v4381_v55  ;;  %v6106_v14 = vunpack.c.l.s4 %v7247_v6 }
 0x724   : > { %v5838_v42 = vadd.f32 %v11675_v4, %v5825_v13  ;;  %v6107_v3 = vunpack.c.0.s8 %v6106_v14 }
 0x725   : > { %v4405_v61 = vpop.permute.xlu1 %4404  ;;  %v5988_v62 = vpop.permute.xlu0 %5987 }
 0x726   : > { %v5851_v37 = vadd.f32 %v5849_v31, %v5838_v42  ;;  %v4407_v50 = vadd.f32 %v4405_v61, %v4394_v12  ;;  %v6110_v63 = vsub.s32 %v6107_v3, %v12651_v46 }
 0x728   : > { %v5862_v48 = vadd.f32 %v11431_v57, %v5851_v37 }
 0x729   : > { %v4418_v20 = vpop.permute.xlu1 %4417  ;;  %v6014_v11 = vpop.permute.xlu0 %6013 }
 0x72a   : > { %v5873_v23 = vadd.f32 %v11580_v28, %v5862_v48  ;;  %v4420_v39 = vadd.f32 %v4418_v20, %v4407_v50 }
 0x72c   : > { %v5886_v10 = vadd.f32 %v5884_v19, %v5873_v23 }
 0x72d   : > { %v5897_v8 = vpop.permute.xlu1 %5896  ;;  %v5923_v34 = vpop.permute.xlu0 %5922 }
 0x72e   : > { %v5899_v53 = vadd.f32 %v5897_v8, %v5886_v10 }
 0x730   : > { %v5912_v26 = vadd.f32 %v5910_v41, %v5899_v53 }
 0x731   : > { %v4431_v40 = vpop.permute.xlu1 %4430  ;;  %v5949_v56 = vpop.permute.xlu0 %5948 }
 0x732   : > { %v5925_v36 = vadd.f32 %v5923_v34, %v5912_v26  ;;  %v4433_v33 = vadd.f32 %v4431_v40, %v4420_v39 }
 0x734   : > { %v5938_v24 = vadd.f32 %v5936_v52, %v5925_v36 }
 0x735   : > { %v4444_v4 = vpop.permute.xlu1 %4443  ;;  %v5975_v16 = vpop.permute.xlu0 %5974 }
 0x736   : > { %v5951_v43 = vadd.f32 %v5949_v56, %v5938_v24  ;;  %v4446_v41 = vadd.f32 %v4444_v4, %v4433_v33  ;;  %v12653_v33 = vld [vmem:[#allocation24_spill] sm:$0xff] }
 0x738   : > { %v5964_v57 = vadd.f32 %v5962_v30, %v5951_v43 }
 0x739   : > { %v4457_v17 = vpop.permute.xlu1 %4456  ;;  %v6001_v19 = vpop.permute.xlu0 %6000 }
 0x73a   : > { %v5977_v28 = vadd.f32 %v5975_v16, %v5964_v57  ;;  %v4459_v32 = vadd.f32 %v4457_v17, %v4446_v41 }
 0x73c   : > { %v5990_v35 = vadd.f32 %v5988_v62, %v5977_v28  ;;  %v12652_v28 = vld [vmem:[#allocation23_spill] sm:$0xff] }
 0x73d   : > { %v4470_v59 = vpop.permute.xlu1 %4469  ;;  %v6027_v52 = vpop.permute.xlu0 %6026 }
 0x73e   : > { %v6003_v5 = vadd.f32 %v6001_v19, %v5990_v35  ;;  %v4472_v60 = vadd.f32 %v4470_v59, %v4459_v32 }
 0x740   : > { %v6016_v44 = vadd.f32 %v6014_v11, %v6003_v5 }
 0x741   : > { %v4483_v54 = vpop.permute.xlu1 %4482  ;;  %v4509_v58 = vpop.permute.xlu0 %4508 }
 0x742   : > { %v6029_v21 = vadd.f32 %v6027_v52, %v6016_v44  ;;  %v4485_v30 = vadd.f32 %v4483_v54, %v4472_v60 }
 0x744   : > { %v6032_v2 = vadd.f32 %v6031_v45, %v6029_v21 }
 0x745   : > { %v4496_v49 = vpop.permute.xlu1 %4495 }
 0x746   : > { %v6818_v0 = vmul.f32 -1.442695, %v6032_v2  ;;  %v4498_v1 = vadd.f32 %v4496_v49, %v4485_v30 }
 0x748   : > { %7089 = vpow2.f32 %v6818_v0  ;;  %v4511_v25 = vadd.f32 %v4509_v58, %v4498_v1  ;;  %v12654_v1 = vld [vmem:[#allocation25_spill] sm:$0xff] }
 0x749   : > { %v4522_v15 = vpop.permute.xlu1 %4521 }
 0x74a   : > { %v4524_v18 = vadd.f32 %v4522_v15, %v4511_v25  ;;  %v12655_v25 = vld [vmem:[#allocation26_spill] sm:$0xff] }
 0x74c   : > { %v4527_v29 = vadd.f32 %v4526_v38, %v4524_v18 }
 0x74e   : > { %v6708_v27 = vmul.f32 -1.442695, %v4527_v29 }
 0x750   : > { %7091 = vpow2.f32 %v6708_v27 }
 0x752   : > { %v7090_v22 = vpop.eup %7089 }
 0x753   : > { %v6036_v9 = vadd.f32 1.0, %v7090_v22 }
 0x755   : > { %7093 = vrcp.f32 %v6036_v9 }
 0x75a   : > { %v7092_v47 = vpop.eup %7091 }
 0x75b   : > { %v4531_v51 = vadd.f32 1.0, %v7092_v47 }
 0x75d   : > { %7095 = vrcp.f32 %v4531_v51 }
 0x75f   : > { %v7094_v31 = vpop.eup %7093 }
 0x760   : > { %v6111_v13 = vrot.slane %v7094_v31, %v6110_v63  ;;  %v6104_v61 = vcombine.high %v7094_v31, %v7094_v31 }
 0x762   : > { %v6119_v42 = vcombine.high %v6111_v13, %v6111_v13  ;;  %v6127_v37 = vrot.slane %v6111_v13, %v6110_v63  ;;  %v6118_v48 = vrot.slane %v6104_v61, %v6110_v63 }
 0x764   : > { %v6141_v62 = vrot.slane %v6119_v42, %v6110_v63  ;;  %v6149_v8 = vcombine.high %v6127_v37, %v6127_v37  ;;  %v6120_v34 = vcombine.high %v6118_v48, %v6118_v48  ;;  %v6156_v46 = vrot.slane %v6127_v37, %v11667_v7 }
 0x765   : > { %v6134_v43 = vrot.slane %v6118_v48, %v6110_v63  ;;  %v12657_v48 = vld [vmem:[#allocation28_spill] sm:$0xff] }
 0x766   : > { %v6151_v10 = vcombine.high %v6141_v62, %v6141_v62  ;;  %v6160_v26 = vrot.slane %v6141_v62, %v11667_v7  ;;  %v6164_v16 = vrot.slane %v6149_v8, %v11667_v7  ;;  %v6148_v12 = vrot.slane %v6120_v34, %v6110_v63  ;;  %v12656_v62 = vld [vmem:[#allocation27_spill] sm:$0xff] }
 0x767   : > { %v7096_v20 = vpop.eup %7095  ;;  %v6150_v45 = vcombine.high %v6134_v43, %v6134_v43  ;;  %v6172_v0 = vrot.slane %v6134_v43, %v11667_v7 }
 0x768   : > { %v6168_v24 = vrot.slane %v6151_v10, %v11667_v7  ;;  %v6152_v44 = vcombine.high %v6148_v12, %v6148_v12  ;;  %v6176_v30 = vrot.slane %v6148_v12, %v11667_v7 }
 0x769   : > { %v6180_v9 = vrot.slane %v6150_v45, %v11667_v7 }
 0x76a   : > { %v6184_v3 = vrot.slane %v6152_v44, %v11667_v7 }
 0x76c   : > { %v6052_v11 = vpop.permute.xlu1 %6051  ;;  %v6045_v23 = vpop.permute.xlu0 %6044 }
 0x76d   : > { %v6096_v53 = vadd.f32 %v7096_v20, %v6052_v11  ;;  %v6095_v40 = vadd.f32 %v7096_v20, %v6045_v23 }
 0x76f   : > { %v6194_v56 = vadd.f32 %v6160_v26, %v6096_v53  ;;  %v6193_v55 = vadd.f32 %v6156_v46, %v6095_v40  ;;  %v12658_v53 = vld [vmem:[#allocation31_spill] sm:$0xff]  ;;  %v12659_v46 = vld [vmem:[#allocation30_spill] sm:$0xff] }
 0x770   : > { %v6066_v36 = vpop.permute.xlu1 %6065  ;;  %v6059_v4 = vpop.permute.xlu0 %6058 }
 0x771   : > { %v6202_v50 = vmul.f32 0.33333334, %v6194_v56  ;;  %v6201_v57 = vmul.f32 0.33333334, %v6193_v55  ;;  %v6098_v17 = vadd.f32 %v7096_v20, %v6066_v36  ;;  %v6097_v39 = vadd.f32 %v7096_v20, %v6059_v4 }
 0x773   : > { %v11703_v19 = vmul.f32 %v6202_v50, %v12652_v28  ;;  %v11706_v35 = vmul.f32 %v6201_v57, %v12653_v33  ;;  %v6196_v59 = vadd.f32 %v6168_v24, %v6098_v17  ;;  %v6195_v41 = vadd.f32 %v6164_v16, %v6097_v39 }
 0x774   : > { %v6080_v5 = vpop.permute.xlu1 %6079  ;;  %v6073_v32 = vpop.permute.xlu0 %6072 }
 0x775   : > { %v6218_v52 = vsel %vm382_vm0, %v11703_v19, 0.0  ;;  %v6217_v54 = vsel %vm382_vm0, %v11706_v35, 0.0  ;;  %v6204_v60 = vmul.f32 0.33333334, %v6196_v59  ;;  %v6203_v21 = vmul.f32 0.33333334, %v6195_v41 }
 0x776   : > { %v6100_v2 = vadd.f32 %v7096_v20, %v6080_v5  ;;  %v6099_v49 = vadd.f32 %v7096_v20, %v6073_v32  ;;  %v6219_v15 = vadd.f32 %v6218_v52, %v6217_v54 }
 0x777   : > { %v11715_v58 = vmul.f32 %v6204_v60, %v12654_v1  ;;  %v11718_v38 = vmul.f32 %v6203_v21, %v12655_v25 }
 0x778   : > { %v6198_v18 = vadd.f32 %v6176_v30, %v6100_v2  ;;  %v6197_v29 = vadd.f32 %v6172_v0, %v6099_v49  ;;  %v6094_v27 = vpop.permute.xlu1 %6093  ;;  %v6087_v22 = vpop.permute.xlu0 %6086 }
 0x779   : > { %v6220_v6 = vsel %vm382_vm0, %v11718_v38, 0.0  ;;  %v6102_v14 = vadd.f32 %v7096_v20, %v6094_v27  ;;  %v6101_v47 = vadd.f32 %v7096_v20, %v6087_v22  ;;  %v6222_v13 = vsel %vm382_vm0, %v11715_v58, 0.0 }
 0x77a   : > { %v6221_v63 = vadd.f32 %v6220_v6, %v6219_v15  ;;  %v6206_v51 = vmul.f32 0.33333334, %v6198_v18  ;;  %v6205_v31 = vmul.f32 0.33333334, %v6197_v29 }
 0x77b   : > { %v6200_v42 = vadd.f32 %v6184_v3, %v6102_v14  ;;  %v6199_v61 = vadd.f32 %v6180_v9, %v6101_v47 }
 0x77c   : > { %v11727_v37 = vmul.f32 %v6206_v51, %v12656_v62  ;;  %v11730_v11 = vmul.f32 %v6205_v31, %v12657_v48  ;;  %v6223_v23 = vadd.f32 %v6222_v13, %v6221_v63 }
 0x77d   : > { %v6208_v10 = vmul.f32 0.33333334, %v6200_v42  ;;  %v6207_v8 = vmul.f32 0.33333334, %v6199_v61 }
 0x77e   : > { %v6224_v20 = vsel %vm382_vm0, %v11730_v11, 0.0  ;;  %v6226_v40 = vsel %vm382_vm0, %v11727_v37, 0.0 }
 0x77f   : > { %v6225_v34 = vadd.f32 %v6224_v20, %v6223_v23  ;;  %v11735_v26 = vmul.f32 %v6207_v8, %v12658_v53  ;;  %v11740_v56 = vmul.f32 %v6208_v10, %v12659_v46  ;;  %v6288_v53 = vld [vmem:[%s12660_s14 + $0x1] sm:$0x1]  ;;  %v6299_v46 = vld [vmem:[%s12660_s14 + $0x3] sm:$0x1] }
 0x781   : > { %v6227_v55 = vadd.f32 %v6226_v40, %v6225_v34  ;;  %v6228_v36 = vsel %vm382_vm0, %v11735_v26, 0.0  ;;  %v6230_v4 = vsel %vm382_vm0, %v11740_v56, 0.0  ;;  %v6286_v34 = vld [vmem:[%s12660_s14] sm:$0x1] }
 0x783   : > { %v6229_v24 = vadd.f32 %v6228_v36, %v6227_v55  ;;  %v6301_v55 = vld [vmem:[%s12660_s14 + $0x4] sm:$0x1] }
 0x785   : > { %v6231_v16 = vadd.f32 %v6230_v4, %v6229_v24 }
 0x787   : > { %v6232_v12 = vrot.slane %v6231_v16, 4 }
 0x789   : > { %v6233_v43 = vadd.f32 %v6232_v12, %v6231_v16 }
 0x78b   : > { %v6234_v50 = vrot.slane %v6233_v43, 2 }
 0x78d   : > { %v6235_v57 = vadd.f32 %v6234_v50, %v6233_v43 }
 0x78f   : > { %v6236_v17 = vrot.slane %v6235_v57, 1 }
 0x791   : > { %v6237_v39 = vadd.f32 %v6236_v17, %v6235_v57  ;;  %v6291_v57 = vld [vmem:[%s12660_s14 + $0x2] sm:$0x1]  ;;  %v6304_v17 = vld [vmem:[%s12660_s14 + $0x5] sm:$0x1] }
 0x793   : > { %v11746_v28 = vmul.f32 0.015625, %v6237_v39 }
 0x795   : > { %v6240_v33 = vsub.f32 %v11706_v35, %v11746_v28  ;;  %v6241_v59 = vsub.f32 %v11703_v19, %v11746_v28  ;;  %v6242_v41 = vsub.f32 %v11718_v38, %v11746_v28  ;;  %v6243_v5 = vsub.f32 %v11715_v58, %v11746_v28 }
 0x796   : > { %v6244_v32 = vsub.f32 %v11730_v11, %v11746_v28  ;;  %v6245_v54 = vsub.f32 %v11727_v37, %v11746_v28  ;;  %v6246_v49 = vsub.f32 %v11735_v26, %v11746_v28  ;;  %v6247_v15 = vsub.f32 %v11740_v56, %v11746_v28 }
 0x797   : > { %v6248_v44 = vmul.f32 %v6240_v33, %v6240_v33  ;;  %v6249_v45 = vmul.f32 %v6241_v59, %v6241_v59  ;;  %v6250_v52 = vmul.f32 %v6242_v41, %v6242_v41  ;;  %v6251_v60 = vmul.f32 %v6243_v5, %v6243_v5 }
 0x798   : > { %v6252_v0 = vmul.f32 %v6244_v32, %v6244_v32  ;;  %v6253_v18 = vmul.f32 %v6245_v54, %v6245_v54  ;;  %v6254_v22 = vmul.f32 %v6246_v49, %v6246_v49  ;;  %v6255_v14 = vmul.f32 %v6247_v15, %v6247_v15 }
 0x799   : > { %v6256_v21 = vsel %vm382_vm0, %v6248_v44, 0.0  ;;  %v6257_v2 = vsel %vm382_vm0, %v6249_v45, 0.0  ;;  %v6259_v1 = vsel %vm382_vm0, %v6250_v52, 0.0  ;;  %v6261_v29 = vsel %vm382_vm0, %v6251_v60, 0.0 }
 0x79a   : > { %v6258_v30 = vadd.f32 %v6257_v2, %v6256_v21  ;;  %v6263_v9 = vsel %vm382_vm0, %v6252_v0, 0.0  ;;  %v6265_v3 = vsel %vm382_vm0, %v6253_v18, 0.0  ;;  %v6267_v63 = vsel %vm382_vm0, %v6254_v22, 0.0  ;;  %v7107_v22 = vld [vmem:[%s12661_s1 + $0x30] sm:$0xff] }
 0x79b   : > { %v6269_v31 = vsel %vm382_vm0, %v6255_v14, 0.0  ;;  %v6287_v16 = vmul.f32 %v6286_v34, %v11746_v28  ;;  %v6300_v43 = vmul.f32 %v6299_v46, %v11746_v28 }
 0x79c   : > { %v6260_v25 = vadd.f32 %v6259_v1, %v6258_v30 }
 0x79e   : > { %v6262_v27 = vadd.f32 %v6261_v29, %v6260_v25 }
 0x7a0   : > { %v6264_v6 = vadd.f32 %v6263_v9, %v6262_v27  ;;  %v7108_v9 = vld [vmem:[%s12661_s1] sm:$0xff] }
 0x7a2   : > { %v6266_v47 = vadd.f32 %v6265_v3, %v6264_v6  ;;  %v7112_v3 = vld [vmem:[%s12661_s1 + $0x20] sm:$0xff] }
 0x7a4   : > { %v6268_v51 = vadd.f32 %v6267_v63, %v6266_v47  ;;  %v7113_v63 = vld [vmem:[%s12661_s1 + $0x28] sm:$0xff] }
 0x7a6   : > { %v6270_v13 = vadd.f32 %v6269_v31, %v6268_v51 }
 0x7a8   : > { %v6271_v42 = vrot.slane %v6270_v13, 4 }
 0x7aa   : > { %v6272_v61 = vadd.f32 %v6271_v42, %v6270_v13 }
 0x7ac   : > { %v6273_v62 = vrot.slane %v6272_v61, 2 }
 0x7ae   : > { %v6274_v48 = vadd.f32 %v6273_v62, %v6272_v61 }
 0x7b0   : > { %v6275_v23 = vrot.slane %v6274_v48, 1 }
 0x7b2   : > { %v6276_v10 = vadd.f32 %v6275_v23, %v6274_v48 }
 0x7b4   : > { %v6278_v8 = vmul.f32 0.015873017, %v6276_v10 }
 0x7b6   : > { %7097 = vrsqrt.f32 %v6278_v8  ;;  %vm6281_vm3 = vcmp.eq.f32.partialorder %v6278_v8, inf  ;;  %v6284_v36 = vand.u32 2147483648, %v6278_v8  ;;  %vm6283_vm4 = vcmp.eq.f32.partialorder %v6278_v8, 0.0 }
 0x7c0   : > { %v7098_v20 = vpop.eup %7097 }
 0x7c1   : > { %v6280_v40 = vmul.f32 %v7098_v20, %v6278_v8 }
 0x7c3   : > { %v6282_v24 = vsel %vm6281_vm3, %v6278_v8, %v6280_v40 }
 0x7c4   : > { %v6285_v4 = vsel %vm6283_vm4, %v6284_v36, %v6282_v24 }
 0x7c5   : > { %v6289_v12 = vmul.f32 %v6288_v53, %v6285_v4  ;;  %v6302_v50 = vmul.f32 %v6301_v55, %v6285_v4 }
 0x7c7   : > { %v6290_v39 = vadd.f32 %v6289_v12, %v6287_v16  ;;  %v6303_v33 = vadd.f32 %v6302_v50, %v6300_v43 }
 0x7c9   : > { %v6292_v59 = vadd.f32 %v6291_v57, %v6290_v39  ;;  %v6305_v41 = vadd.f32 %v6304_v17, %v6303_v33 }
 0x7cb   : > { %v6819_v5 = vmul.f32 -1.442695, %v6292_v59  ;;  %v6820_v32 = vmul.f32 -1.442695, %v6305_v41 }
 0x7cd   : > { %7099 = vpow2.f32 %v6819_v5 }
 0x7ce   : > { %7101 = vpow2.f32 %v6820_v32 }
 0x7d7   : > { %v7100_v44 = vpop.eup %7099 }
 0x7d8   : > { %v7102_v45 = vpop.eup %7101  ;;  %v6296_v52 = vadd.f32 1.0, %v7100_v44 }
 0x7d9   : > { %v6309_v54 = vadd.f32 1.0, %v7102_v45 }
 0x7da   : > { %7103 = vrcp.f32 %v6296_v52 }
 0x7db   : > { %7105 = vrcp.f32 %v6309_v54 }
 0x7e4   : > { %v7104_v60 = vpop.eup %7103 }
 0x7e5   : > { %v7106_v21 = vpop.eup %7105  ;;  %v6315_v2 = vrot.slane %v7104_v60, %v11667_v7 }
 0x7e6   : > { %v6332_v30 = vsub.f32 %v7106_v21, %v7104_v60 }
 0x7e7   : > { %v6322_v49 = vmul.f32 %v6315_v2, %v11735_v26  ;;  %v6316_v0 = vmul.f32 %v6315_v2, %v11706_v35  ;;  %v6317_v1 = vmul.f32 %v6315_v2, %v11703_v19  ;;  %v6318_v25 = vmul.f32 %v6315_v2, %v11718_v38  ;;  %v7109_v38 = vld [vmem:[%s12661_s1 + $0x8] sm:$0xff] }
 0x7e8   : > { %v6333_v15 = vmul.f32 %v6332_v30, %v11746_v28  ;;  %v6319_v18 = vmul.f32 %v6315_v2, %v11715_v58  ;;  %v6320_v29 = vmul.f32 %v6315_v2, %v11730_v11  ;;  %v6321_v27 = vmul.f32 %v6315_v2, %v11727_v37  ;;  %v7110_v11 = vld [vmem:[%s12661_s1 + $0x10] sm:$0xff]  ;;  %v7111_v37 = vld [vmem:[%s12661_s1 + $0x18] sm:$0xff] }
 0x7e9   : > { %v6330_v26 = vadd.f32 %v7107_v22, %v6322_v49  ;;  %v6323_v35 = vmul.f32 %v6315_v2, %v11740_v56  ;;  %v6324_v19 = vadd.f32 %v7108_v9, %v6316_v0  ;;  %v6325_v6 = vadd.f32 %v7109_v38, %v6317_v1  ;;  %v7114_v56 = vld [vmem:[%s12661_s1 + $0x38] sm:$0xff] }
 0x7ea   : > { %v6337_v58 = vrot.slane %v6333_v15, %v11667_v7  ;;  %v6326_v28 = vadd.f32 %v7110_v11, %v6318_v25  ;;  %v6327_v14 = vadd.f32 %v7111_v37, %v6319_v18  ;;  %v6328_v47 = vadd.f32 %v7112_v3, %v6320_v29 }
 0x7eb   : > { %v6329_v51 = vadd.f32 %v7113_v63, %v6321_v27  ;;  %v6331_v31 = vadd.f32 %v7114_v56, %v6323_v35 }
 0x7ec   : > { %v6344_v13 = vadd.f32 %v6337_v58, %v6330_v26  ;;  %v6338_v42 = vadd.f32 %v6337_v58, %v6324_v19  ;;  %v6339_v61 = vadd.f32 %v6337_v58, %v6325_v6  ;;  %v6340_v62 = vadd.f32 %v6337_v58, %v6326_v28 }
 0x7ed   : > { %v6341_v7 = vadd.f32 %v6337_v58, %v6327_v14  ;;  %v6342_v48 = vadd.f32 %v6337_v58, %v6328_v47  ;;  %v6343_v23 = vadd.f32 %v6337_v58, %v6329_v51  ;;  %v6345_v10 = vadd.f32 %v6337_v58, %v6331_v31 }
 0x7ee   : > { %6352 = vst.msk [vmem:[%s364_s16 + $0x30] sm:$0xff] %vm382_vm0, %v6344_v13  ;;  %6346 = vst.msk [vmem:[%s364_s16] sm:$0xff] %vm382_vm0, %v6338_v42 }
 0x7ef   : > { %6347 = vst.msk [vmem:[%s364_s16 + $0x8] sm:$0xff] %vm382_vm0, %v6339_v61  ;;  %6348 = vst.msk [vmem:[%s364_s16 + $0x10] sm:$0xff] %vm382_vm0, %v6340_v62 }
 0x7f0   : > { %6349 = vst.msk [vmem:[%s364_s16 + $0x18] sm:$0xff] %vm382_vm0, %v6341_v7  ;;  %6350 = vst.msk [vmem:[%s364_s16 + $0x20] sm:$0xff] %vm382_vm0, %v6342_v48 }
 0x7f1   : > { %6351 = vst.msk [vmem:[%s364_s16 + $0x28] sm:$0xff] %vm382_vm0, %v6343_v23  ;;  %6353 = vst.msk [vmem:[%s364_s16 + $0x38] sm:$0xff] %vm382_vm0, %v6345_v10 }
 0x7f2   : > { %7173 = shalt.err (!%p7170_p11)
}
 0x7f3   : > { %s7174_s18 = scalar_lea.hbm %s11817_s11, 1024  ;;  %s7178_s2 = scalar_lea.hbm %s12665_s28, 2048 }
 0x7f4   : > { %p7175_p0 = scmp.ne.s32.totalorder %s11817_s11, %s7174_s18  ;;  %p7179_p6 = scmp.lt.u32.totalorder %s11817_s11, %s12665_s28 }
 0x7f5   : > { %p7180_p3 = scmp.lt.u32.totalorder %s7178_s2, %s7174_s18  ;;  %p7182_p5 = scmp.lt.u32.totalorder %s7174_s18, %s11817_s11 }
 0x7f6   : > { %p7176_p2 = pnand %p7175_p0, %p12667_p12 }
 0x7f7   : > { %p7181_p13 = por %p7180_p3, %p7179_p6 }
 0x7f8   : > { %p7177_p7 = pneg %p7176_p2 }
 0x7f9   : > { %p7183_p8 = por %p7182_p5, %p7181_p13 }
 0x7fb   : > { %p7184_p9 = pnand %p7183_p8, %p7177_p7 }
 0x7fd   : > { %7187 = shalt.err (!%p7184_p9)
}
 0x7fe   : > { %s7249_s26 = smov 128   ;;  %s7250_s17 = smov 8  }
 0x7ff   : > { %7018 = dma.vmem_to_hbm [thread:$0]  (%p12667_p12), %s11819_s24, 1024, %s11817_s11, %s6355_s3, %s7249_s26, %s7249_s26, %s7250_s17  }
 0x800 PF: > { %s12668_s7 = sld [smem:[#allocation12_spill]]  ;;  %s12669_s0 = sld [smem:[#allocation20_spill]] }
 0x801   : > { %s12670_s20 = sld [smem:[#allocation15_spill]] }
 0x806   : > { %s6383_s22 = sand.u32 1, %s12668_s7   ;;  %p12671_p10 = scmp.ne.s32.totalorder %s12669_s0, 0 }
 0x807   : > { %p12672_p1 = scmp.ge.s32.totalorder %s12670_s20, 2  ;;  %s6384_s8 = scalar_lea.sflag [#allocation5], %s6383_s22 }
 0x809   : > { %p7029_p4 = pnand %p12672_p1, %p12671_p10 }
 0x80b   : > { %7213 = dma.done.wait (!%p7029_p4), %s6384_s8, 1024  }
 0x80c   : > { %7215 = vsyncadd (!%p7029_p4), %s6384_s8, 4294966272  ;;  %s12673_s12 = sld [smem:[#allocation17_spill]]  ;;  %s12674_s30 = sld [smem:[#allocation13_spill]] }
 0x80d   : > { %s12675_s10 = sld [smem:[#allocation14_spill]]  ;;  %s12676_s11 = sld [smem:[#allocation18_spill]] }
 0x812   : > { %p23_p11 = scmp.ge.s32.totalorder %s12673_s12, 4  }
 0x814   :  { %25 = sbr.rel (!%p23_p11) target bundleno = 17 (0x11), region = 107 }
 0x81b   :  { %6389 = vsyncpa [#allocation4], 1 }
 0x81c   :  { %6391 = vsyncpa [#allocation4 + $0x1], 1 }
 0x81d   :  { %6392 = vsyncpa [#allocation5], 1 }
 0x81e   :  { %6394 = vsyncpa [#allocation5 + $0x1], 1 }
 0x81f   :  { %6395 = vsyncpa [#allocation6], 1 }
 0x820   :  { %6397 = vsyncpa [#allocation6 + $0x1], 1 }

</bundles_post_ra>
